<compile_context>
chip_gen: v5e
topology: v5e:2x2
jax: 0.10.0
libtpu: 0.0.40
codegen_flags: <defaults>
</compile_context>

<pallas_src>
import functools

import jax
import jax.numpy as jnp
from jax.experimental import pallas as pl
from jax.experimental.pallas import tpu as pltpu

EPS = 1e-5
LANE = 128


def _round_up(x, m):
    return ((x + m - 1) // m) * m


def _pick_row_tile(H, W, target_rows=128):
    """Largest divisor TH of H with TH*W <= target_rows (keeps the f32
    accumulator around 16 vregs)."""
    th = 1
    for cand in range(1, H + 1):
        if H % cand == 0 and cand * W <= target_rows:
            th = cand
    return th


def basic_block_kernel(xpad_ref, w1_ref, w2_ref,
                       sc1_ref, sh1_ref, sc2_ref, sh2_ref,
                       out_ref, h1pad_ref, *, row_tile):
    # Grid iterates over the batch dim (squeezed out of the refs).
    #   xpad_ref : (H+2, W+2, Cp)  bf16  spatially zero-padded, channel-padded input
    #   w1_ref   : (9, Cp, Cp)     bf16  conv1 taps, tap t = ky*3 + kx
    #   w2_ref   : (9, Cp, Cp)     bf16  conv2 taps
    #   sc*/sh*  : (1, Cp)         f32   folded BatchNorm scale / shift
    #   out_ref  : (H, W, Cp)      f32
    #   h1pad_ref: (H+2, W+2, Cp)  bf16  VMEM scratch: padded conv1 activation
    Hp, Wp, Cp = xpad_ref.shape
    H, W = Hp - 2, Wp - 2
    TH = row_tile
    M = TH * W

    # Zero only the 1-pixel border of the scratch (the interior is fully
    # overwritten below).  Done every grid step: the batch axis is "parallel",
    # so a program_id==0 init would be unsafe under megacore sharding.
    zrow = jnp.zeros((1, Wp, Cp), h1pad_ref.dtype)
    zcol = jnp.zeros((H, 1, Cp), h1pad_ref.dtype)
    h1pad_ref[0:1, :, :] = zrow
    h1pad_ref[Hp - 1:Hp, :, :] = zrow
    h1pad_ref[1:H + 1, 0:1, :] = zcol
    h1pad_ref[1:H + 1, Wp - 1:Wp, :] = zcol

    sc1 = sc1_ref[...]
    sh1 = sh1_ref[...]
    sc2 = sc2_ref[...]
    sh2 = sh2_ref[...]

    # ---- phase 1: conv1 (3x3, pad 1) + bn1 + relu, one row-tile at a time --
    for h0 in range(0, H, TH):
        acc = jnp.zeros((M, Cp), jnp.float32)
        for t in range(9):
            ky, kx = t // 3, t % 3
            win = xpad_ref[h0 + ky:h0 + ky + TH, kx:kx + W, :].reshape(M, Cp)
            acc = acc + jnp.dot(win, w1_ref[t],
                                preferred_element_type=jnp.float32)
        h1 = jnp.maximum(acc * sc1 + sh1, 0.0)                    # f32 math
        h1pad_ref[h0 + 1:h0 + 1 + TH, 1:W + 1, :] = (
            h1.reshape(TH, W, Cp).astype(h1pad_ref.dtype))        # bf16 store

    # ---- phase 2: conv2 (3x3, pad 1) + bn2 + residual + relu ---------------
    for h0 in range(0, H, TH):
        acc = jnp.zeros((M, Cp), jnp.float32)
        for t in range(9):
            ky, kx = t // 3, t % 3
            win = h1pad_ref[h0 + ky:h0 + ky + TH, kx:kx + W, :].reshape(M, Cp)
            acc = acc + jnp.dot(win, w2_ref[t],
                                preferred_element_type=jnp.float32)
        residual = xpad_ref[h0 + 1:h0 + 1 + TH, 1:W + 1, :].reshape(M, Cp)
        o = acc * sc2 + sh2 + residual.astype(jnp.float32)
        out_ref[h0:h0 + TH, :, :] = (
            jnp.maximum(o, 0.0).reshape(TH, W, Cp).astype(out_ref.dtype))


def _fold_bn(gamma, beta, mean, var, c_pad, eps=EPS):
    scale = gamma * jax.lax.rsqrt(var + eps)
    shift = beta - mean * scale
    pad = c_pad - scale.shape[0]
    scale = jnp.pad(scale, (0, pad)).reshape(1, c_pad).astype(jnp.float32)
    shift = jnp.pad(shift, (0, pad)).reshape(1, c_pad).astype(jnp.float32)
    return scale, shift


def _torch_conv_to_taps(w, c_pad):
    # torch conv weight (Cout, Cin, 3, 3) -> (9, Cp, Cp) bf16, tap t = ky*3+kx
    co, ci = int(w.shape[0]), int(w.shape[1])
    taps = jnp.transpose(w, (2, 3, 1, 0)).reshape(9, ci, co)
    taps = jnp.pad(taps, ((0, 0), (0, c_pad - ci), (0, c_pad - co)))
    return taps.astype(jnp.bfloat16)


def basic_block_forward(x_nchw, params):
    x = jnp.transpose(x_nchw, (0, 2, 3, 1)).astype(jnp.float32)   # NCHW -> NHWC
    N, H, W, Cin = x.shape
    Cmid = int(params["w1"].shape[0])
    Cout = int(params["w2"].shape[0])
    assert Cin == Cout, "downsample=None requires inplanes == planes, stride == 1"

    Cp = _round_up(max(Cin, Cmid, Cout), LANE)   # lane-dense channel padding
    Hp, Wp = H + 2, W + 2
    TH = _pick_row_tile(H, W)

    # spatial 1-pixel zero border + channel padding, cast to bf16 (MXU input)
    xpad = jnp.pad(x, ((0, 0), (1, 1), (1, 1), (0, Cp - Cin))).astype(jnp.bfloat16)

    w1 = _torch_conv_to_taps(params["w1"], Cp)
    w2 = _torch_conv_to_taps(params["w2"], Cp)
    sc1, sh1 = _fold_bn(params["bn1_gamma"], params["bn1_beta"],
                        params["bn1_mean"], params["bn1_var"], Cp)
    sc2, sh2 = _fold_bn(params["bn2_gamma"], params["bn2_beta"],
                        params["bn2_mean"], params["bn2_var"], Cp)

    kernel = functools.partial(basic_block_kernel, row_tile=TH)

    out_nhwc = pl.pallas_call(
        kernel,
        out_shape=jax.ShapeDtypeStruct((N, H, W, Cp), jnp.float32),
        grid=(N,),
        in_specs=[
            pl.BlockSpec((None, Hp, Wp, Cp), lambda n: (n, 0, 0, 0)),
            pl.BlockSpec((9, Cp, Cp), lambda n: (0, 0, 0)),
            pl.BlockSpec((9, Cp, Cp), lambda n: (0, 0, 0)),
            pl.BlockSpec((1, Cp), lambda n: (0, 0)),
            pl.BlockSpec((1, Cp), lambda n: (0, 0)),
            pl.BlockSpec((1, Cp), lambda n: (0, 0)),
            pl.BlockSpec((1, Cp), lambda n: (0, 0)),
        ],
        out_specs=pl.BlockSpec((None, H, W, Cp), lambda n: (n, 0, 0, 0)),
        scratch_shapes=[pltpu.VMEM((Hp, Wp, Cp), jnp.bfloat16)],
        # Batch items are independent -> let v7x shard them across its 2 TCs.
        # Default scoped VMEM (16/32 MiB) is ample at these block sizes.
        compiler_params=pltpu.CompilerParams(dimension_semantics=("parallel",)),
    )(xpad, w1, w2, sc1, sh1, sc2, sh2)

    out_nhwc = out_nhwc[..., :Cout]                               # drop channel pad
    return jnp.transpose(out_nhwc, (0, 3, 1, 2))                  # NHWC -> NCHW


def reference_forward(x_nchw, params):
    # Pure-JAX reference (lax.conv, f32 HIGHEST) with the same folded-BN params.
    x = jnp.transpose(x_nchw, (0, 2, 3, 1)).astype(jnp.float32)
    Cin = x.shape[-1]

    def conv3x3(h, w_torch):
        w = jnp.transpose(w_torch, (2, 3, 1, 0))                  # HWIO
        return jax.lax.conv_general_dilated(
            h, w, window_strides=(1, 1), padding="SAME",
            dimension_numbers=("NHWC", "HWIO", "NHWC"),
            precision=jax.lax.Precision.HIGHEST)

    def fold(g, b, m, v):
        s = g / jnp.sqrt(v + EPS)
        return s.reshape(1, -1), (b - m * s).reshape(1, -1)

    sc1, sh1 = fold(params["bn1_gamma"], params["bn1_beta"],
                    params["bn1_mean"], params["bn1_var"])
    sc2, sh2 = fold(params["bn2_gamma"], params["bn2_beta"],
                    params["bn2_mean"], params["bn2_var"])
    h = jnp.maximum(conv3x3(x, params["w1"]) * sc1 + sh1, 0.0)
    h = conv3x3(h, params["w2"]) * sc2 + sh2 + x
    h = jnp.maximum(h, 0.0)
    return jnp.transpose(h, (0, 3, 1, 2))


def make_params(key, inplanes, planes):
    ks = jax.random.split(key, 10)
    p = {
        "w1": 0.1 * jax.random.normal(ks[0], (planes, inplanes, 3, 3), jnp.float32),
        "w2": 0.1 * jax.random.normal(ks[1], (planes, planes, 3, 3), jnp.float32),
    }
    for i, name in enumerate(["bn1", "bn2"]):
        p[name + "_gamma"] = 1.0 + 0.1 * jax.random.normal(ks[2 + 4 * i], (planes,), jnp.float32)
        p[name + "_beta"] = 0.1 * jax.random.normal(ks[3 + 4 * i], (planes,), jnp.float32)
        p[name + "_mean"] = 0.1 * jax.random.normal(ks[4 + 4 * i], (planes,), jnp.float32)
        p[name + "_var"] = 0.5 + 0.5 * jnp.abs(jax.random.normal(ks[5 + 4 * i], (planes,), jnp.float32))
    return p


if __name__ == "__main__":
    key = jax.random.PRNGKey(0)
    kx, kp = jax.random.split(key)

    N, C, H, W = 2, 8, 16, 16          # inplanes = planes = 8, stride = 1
    x = jax.random.normal(kx, (N, C, H, W), jnp.float32)
    params = make_params(kp, C, C)

    fwd = jax.jit(basic_block_forward)
    out = jax.block_until_ready(fwd(x, params))
    ref = reference_forward(x, params)

    assert out.shape == (N, C, H, W), out.shape
    max_err = float(jnp.max(jnp.abs(out - ref)))
    # bf16 MXU inputs with f32 accumulation: expect ~1e-2 worst-case deviation
    # from the f32/HIGHEST reference at these magnitudes.
    assert jnp.allclose(out, ref, atol=2e-2, rtol=2e-2), f"max abs err {max_err}"
    print("KERNEL_OK")
</pallas_src>

<mosaic_0001>
module attributes {stable_mosaic.version = 11 : i64} {
  func.func @basic_block_kernel(%arg0: i32, %arg1: memref<1x18x18x128xbf16, #tpu.memory_space<vmem>>, %arg2: memref<9x128x128xbf16, #tpu.memory_space<vmem>>, %arg3: memref<9x128x128xbf16, #tpu.memory_space<vmem>>, %arg4: memref<1x128xf32, #tpu.memory_space<vmem>>, %arg5: memref<1x128xf32, #tpu.memory_space<vmem>>, %arg6: memref<1x128xf32, #tpu.memory_space<vmem>>, %arg7: memref<1x128xf32, #tpu.memory_space<vmem>>, %arg8: memref<1x16x16x128xf32, #tpu.memory_space<vmem>>, %arg9: memref<18x18x128xbf16, #tpu.memory_space<vmem>>) attributes {dimension_semantics = [#tpu.dimension_semantics<parallel>], iteration_bounds = array<i64: 2>, scalar_prefetch = 0 : i64, scratch_operands = 1 : i64, tpu.core_type = #tpu.core_type<tc>, window_params = [{transform_indices = @transform_0, window_bounds = array<i64: 1, 18, 18, 128>}, {pipeline_mode = #tpu.pipeline_mode<synchronous>, transform_indices = @transform_1, window_bounds = array<i64: 9, 128, 128>}, {pipeline_mode = #tpu.pipeline_mode<synchronous>, transform_indices = @transform_2, window_bounds = array<i64: 9, 128, 128>}, {pipeline_mode = #tpu.pipeline_mode<synchronous>, transform_indices = @transform_3, window_bounds = array<i64: 1, 128>}, {pipeline_mode = #tpu.pipeline_mode<synchronous>, transform_indices = @transform_4, window_bounds = array<i64: 1, 128>}, {pipeline_mode = #tpu.pipeline_mode<synchronous>, transform_indices = @transform_5, window_bounds = array<i64: 1, 128>}, {pipeline_mode = #tpu.pipeline_mode<synchronous>, transform_indices = @transform_6, window_bounds = array<i64: 1, 128>}, {transform_indices = @transform_7, window_bounds = array<i64: 1, 16, 16, 128>}]} {
    %cst = arith.constant 0.000000e+00 : bf16
    %0 = vector.broadcast %cst : bf16 to vector<1x18x128xbf16>
    %cst_0 = arith.constant 0.000000e+00 : bf16
    %1 = vector.broadcast %cst_0 : bf16 to vector<16x1x128xbf16>
    %c0 = arith.constant 0 : index
    %c0_1 = arith.constant 0 : index
    %c0_2 = arith.constant 0 : index
    %2 = vector.load %arg9[%c0, %c0_1, %c0_2] : memref<18x18x128xbf16, #tpu.memory_space<vmem>>, vector<1x18x128xbf16>
    tpu.vector_store %arg9[%c0, %c0_1, %c0_2], %0 {strides = array<i32>} : memref<18x18x128xbf16, #tpu.memory_space<vmem>>, vector<1x18x128xbf16>,
    %c17 = arith.constant 17 : index
    %c0_3 = arith.constant 0 : index
    %c0_4 = arith.constant 0 : index
    %3 = vector.load %arg9[%c17, %c0_3, %c0_4] : memref<18x18x128xbf16, #tpu.memory_space<vmem>>, vector<1x18x128xbf16>
    tpu.vector_store %arg9[%c17, %c0_3, %c0_4], %0 {strides = array<i32>} : memref<18x18x128xbf16, #tpu.memory_space<vmem>>, vector<1x18x128xbf16>,
    %c1 = arith.constant 1 : index
    %c0_5 = arith.constant 0 : index
    %c0_6 = arith.constant 0 : index
    %4 = vector.load %arg9[%c1, %c0_5, %c0_6] : memref<18x18x128xbf16, #tpu.memory_space<vmem>>, vector<16x1x128xbf16>
    tpu.vector_store %arg9[%c1, %c0_5, %c0_6], %1 {strides = array<i32>} : memref<18x18x128xbf16, #tpu.memory_space<vmem>>, vector<16x1x128xbf16>,
    %c1_7 = arith.constant 1 : index
    %c17_8 = arith.constant 17 : index
    %c0_9 = arith.constant 0 : index
    %5 = vector.load %arg9[%c1_7, %c17_8, %c0_9] : memref<18x18x128xbf16, #tpu.memory_space<vmem>>, vector<16x1x128xbf16>
    tpu.vector_store %arg9[%c1_7, %c17_8, %c0_9], %1 {strides = array<i32>} : memref<18x18x128xbf16, #tpu.memory_space<vmem>>, vector<16x1x128xbf16>,
    %c0_10 = arith.constant 0 : index
    %c0_11 = arith.constant 0 : index
    %6 = vector.load %arg4[%c0_10, %c0_11] : memref<1x128xf32, #tpu.memory_space<vmem>>, vector<1x128xf32>
    %c0_12 = arith.constant 0 : index
    %c0_13 = arith.constant 0 : index
    %7 = vector.load %arg5[%c0_12, %c0_13] : memref<1x128xf32, #tpu.memory_space<vmem>>, vector<1x128xf32>
    %c0_14 = arith.constant 0 : index
    %c0_15 = arith.constant 0 : index
    %8 = vector.load %arg6[%c0_14, %c0_15] : memref<1x128xf32, #tpu.memory_space<vmem>>, vector<1x128xf32>
    %c0_16 = arith.constant 0 : index
    %c0_17 = arith.constant 0 : index
    %9 = vector.load %arg7[%c0_16, %c0_17] : memref<1x128xf32, #tpu.memory_space<vmem>>, vector<1x128xf32>
    %cst_18 = arith.constant 0.000000e+00 : f32
    %10 = vector.broadcast %cst_18 : f32 to vector<128x128xf32>
    %c0_19 = arith.constant 0 : index
    %c0_20 = arith.constant 0 : index
    %c0_21 = arith.constant 0 : index
    %c0_22 = arith.constant 0 : index
    %11 = vector.load %arg1[%c0_19, %c0_20, %c0_21, %c0_22] : memref<1x18x18x128xbf16, #tpu.memory_space<vmem>>, vector<1x8x16x128xbf16>
    %12 = vector.shape_cast %11 : vector<1x8x16x128xbf16> to vector<8x16x128xbf16>
    %13 = vector.shape_cast %12 : vector<8x16x128xbf16> to vector<128x128xbf16>
    %c0_23 = arith.constant 0 : index
    %c0_24 = arith.constant 0 : index
    %c0_25 = arith.constant 0 : index
    %14 = vector.load %arg2[%c0_23, %c0_24, %c0_25] : memref<9x128x128xbf16, #tpu.memory_space<vmem>>, vector<1x128x128xbf16>
    %15 = vector.shape_cast %14 : vector<1x128x128xbf16> to vector<128x128xbf16>
    %cst_26 = arith.constant dense<0.000000e+00> : vector<128x128xf32>
    %16 = tpu.matmul %13, %15, %cst_26 {dimension_numbers = #tpu.dot_dimension_numbers<[1], [0], [0], [1], [0, 0, 1, 1], [], []>} : vector<128x128xbf16>, vector<128x128xbf16>, vector<128x128xf32> -> vector<128x128xf32>
    %17 = arith.addf %10, %16 : vector<128x128xf32>
    %c0_27 = arith.constant 0 : index
    %c0_28 = arith.constant 0 : index
    %c1_29 = arith.constant 1 : index
    %c0_30 = arith.constant 0 : index
    %18 = vector.load %arg1[%c0_27, %c0_28, %c1_29, %c0_30] : memref<1x18x18x128xbf16, #tpu.memory_space<vmem>>, vector<1x8x16x128xbf16>
    %19 = vector.shape_cast %18 : vector<1x8x16x128xbf16> to vector<8x16x128xbf16>
    %20 = vector.shape_cast %19 : vector<8x16x128xbf16> to vector<128x128xbf16>
    %c1_31 = arith.constant 1 : index
    %c0_32 = arith.constant 0 : index
    %c0_33 = arith.constant 0 : index
    %21 = vector.load %arg2[%c1_31, %c0_32, %c0_33] : memref<9x128x128xbf16, #tpu.memory_space<vmem>>, vector<1x128x128xbf16>
    %22 = vector.shape_cast %21 : vector<1x128x128xbf16> to vector<128x128xbf16>
    %cst_34 = arith.constant dense<0.000000e+00> : vector<128x128xf32>
    %23 = tpu.matmul %20, %22, %cst_34 {dimension_numbers = #tpu.dot_dimension_numbers<[1], [0], [0], [1], [0, 0, 1, 1], [], []>} : vector<128x128xbf16>, vector<128x128xbf16>, vector<128x128xf32> -> vector<128x128xf32>
    %24 = arith.addf %17, %23 : vector<128x128xf32>
    %c0_35 = arith.constant 0 : index
    %c0_36 = arith.constant 0 : index
    %c2 = arith.constant 2 : index
    %c0_37 = arith.constant 0 : index
    %25 = vector.load %arg1[%c0_35, %c0_36, %c2, %c0_37] : memref<1x18x18x128xbf16, #tpu.memory_space<vmem>>, vector<1x8x16x128xbf16>
    %26 = vector.shape_cast %25 : vector<1x8x16x128xbf16> to vector<8x16x128xbf16>
    %27 = vector.shape_cast %26 : vector<8x16x128xbf16> to vector<128x128xbf16>
    %c2_38 = arith.constant 2 : index
    %c0_39 = arith.constant 0 : index
    %c0_40 = arith.constant 0 : index
    %28 = vector.load %arg2[%c2_38, %c0_39, %c0_40] : memref<9x128x128xbf16, #tpu.memory_space<vmem>>, vector<1x128x128xbf16>
    %29 = vector.shape_cast %28 : vector<1x128x128xbf16> to vector<128x128xbf16>
    %cst_41 = arith.constant dense<0.000000e+00> : vector<128x128xf32>
    %30 = tpu.matmul %27, %29, %cst_41 {dimension_numbers = #tpu.dot_dimension_numbers<[1], [0], [0], [1], [0, 0, 1, 1], [], []>} : vector<128x128xbf16>, vector<128x128xbf16>, vector<128x128xf32> -> vector<128x128xf32>
    %31 = arith.addf %24, %30 : vector<128x128xf32>
    %c0_42 = arith.constant 0 : index
    %c1_43 = arith.constant 1 : index
    %c0_44 = arith.constant 0 : index
    %c0_45 = arith.constant 0 : index
    %32 = vector.load %arg1[%c0_42, %c1_43, %c0_44, %c0_45] : memref<1x18x18x128xbf16, #tpu.memory_space<vmem>>, vector<1x8x16x128xbf16>
    %33 = vector.shape_cast %32 : vector<1x8x16x128xbf16> to vector<8x16x128xbf16>
    %34 = vector.shape_cast %33 : vector<8x16x128xbf16> to vector<128x128xbf16>
    %c3 = arith.constant 3 : index
    %c0_46 = arith.constant 0 : index
    %c0_47 = arith.constant 0 : index
    %35 = vector.load %arg2[%c3, %c0_46, %c0_47] : memref<9x128x128xbf16, #tpu.memory_space<vmem>>, vector<1x128x128xbf16>
    %36 = vector.shape_cast %35 : vector<1x128x128xbf16> to vector<128x128xbf16>
    %cst_48 = arith.constant dense<0.000000e+00> : vector<128x128xf32>
    %37 = tpu.matmul %34, %36, %cst_48 {dimension_numbers = #tpu.dot_dimension_numbers<[1], [0], [0], [1], [0, 0, 1, 1], [], []>} : vector<128x128xbf16>, vector<128x128xbf16>, vector<128x128xf32> -> vector<128x128xf32>
    %38 = arith.addf %31, %37 : vector<128x128xf32>
    %c0_49 = arith.constant 0 : index
    %c1_50 = arith.constant 1 : index
    %c1_51 = arith.constant 1 : index
    %c0_52 = arith.constant 0 : index
    %39 = vector.load %arg1[%c0_49, %c1_50, %c1_51, %c0_52] : memref<1x18x18x128xbf16, #tpu.memory_space<vmem>>, vector<1x8x16x128xbf16>
    %40 = vector.shape_cast %39 : vector<1x8x16x128xbf16> to vector<8x16x128xbf16>
    %41 = vector.shape_cast %40 : vector<8x16x128xbf16> to vector<128x128xbf16>
    %c4 = arith.constant 4 : index
    %c0_53 = arith.constant 0 : index
    %c0_54 = arith.constant 0 : index
    %42 = vector.load %arg2[%c4, %c0_53, %c0_54] : memref<9x128x128xbf16, #tpu.memory_space<vmem>>, vector<1x128x128xbf16>
    %43 = vector.shape_cast %42 : vector<1x128x128xbf16> to vector<128x128xbf16>
    %cst_55 = arith.constant dense<0.000000e+00> : vector<128x128xf32>
    %44 = tpu.matmul %41, %43, %cst_55 {dimension_numbers = #tpu.dot_dimension_numbers<[1], [0], [0], [1], [0, 0, 1, 1], [], []>} : vector<128x128xbf16>, vector<128x128xbf16>, vector<128x128xf32> -> vector<128x128xf32>
    %45 = arith.addf %38, %44 : vector<128x128xf32>
    %c0_56 = arith.constant 0 : index
    %c1_57 = arith.constant 1 : index
    %c2_58 = arith.constant 2 : index
    %c0_59 = arith.constant 0 : index
    %46 = vector.load %arg1[%c0_56, %c1_57, %c2_58, %c0_59] : memref<1x18x18x128xbf16, #tpu.memory_space<vmem>>, vector<1x8x16x128xbf16>
    %47 = vector.shape_cast %46 : vector<1x8x16x128xbf16> to vector<8x16x128xbf16>
    %48 = vector.shape_cast %47 : vector<8x16x128xbf16> to vector<128x128xbf16>
    %c5 = arith.constant 5 : index
    %c0_60 = arith.constant 0 : index
    %c0_61 = arith.constant 0 : index
    %49 = vector.load %arg2[%c5, %c0_60, %c0_61] : memref<9x128x128xbf16, #tpu.memory_space<vmem>>, vector<1x128x128xbf16>
    %50 = vector.shape_cast %49 : vector<1x128x128xbf16> to vector<128x128xbf16>
    %cst_62 = arith.constant dense<0.000000e+00> : vector<128x128xf32>
    %51 = tpu.matmul %48, %50, %cst_62 {dimension_numbers = #tpu.dot_dimension_numbers<[1], [0], [0], [1], [0, 0, 1, 1], [], []>} : vector<128x128xbf16>, vector<128x128xbf16>, vector<128x128xf32> -> vector<128x128xf32>
    %52 = arith.addf %45, %51 : vector<128x128xf32>
    %c0_63 = arith.constant 0 : index
    %c2_64 = arith.constant 2 : index
    %c0_65 = arith.constant 0 : index
    %c0_66 = arith.constant 0 : index
    %53 = vector.load %arg1[%c0_63, %c2_64, %c0_65, %c0_66] : memref<1x18x18x128xbf16, #tpu.memory_space<vmem>>, vector<1x8x16x128xbf16>
    %54 = vector.shape_cast %53 : vector<1x8x16x128xbf16> to vector<8x16x128xbf16>
    %55 = vector.shape_cast %54 : vector<8x16x128xbf16> to vector<128x128xbf16>
    %c6 = arith.constant 6 : index
    %c0_67 = arith.constant 0 : index
    %c0_68 = arith.constant 0 : index
    %56 = vector.load %arg2[%c6, %c0_67, %c0_68] : memref<9x128x128xbf16, #tpu.memory_space<vmem>>, vector<1x128x128xbf16>
    %57 = vector.shape_cast %56 : vector<1x128x128xbf16> to vector<128x128xbf16>
    %cst_69 = arith.constant dense<0.000000e+00> : vector<128x128xf32>
    %58 = tpu.matmul %55, %57, %cst_69 {dimension_numbers = #tpu.dot_dimension_numbers<[1], [0], [0], [1], [0, 0, 1, 1], [], []>} : vector<128x128xbf16>, vector<128x128xbf16>, vector<128x128xf32> -> vector<128x128xf32>
    %59 = arith.addf %52, %58 : vector<128x128xf32>
    %c0_70 = arith.constant 0 : index
    %c2_71 = arith.constant 2 : index
    %c1_72 = arith.constant 1 : index
    %c0_73 = arith.constant 0 : index
    %60 = vector.load %arg1[%c0_70, %c2_71, %c1_72, %c0_73] : memref<1x18x18x128xbf16, #tpu.memory_space<vmem>>, vector<1x8x16x128xbf16>
    %61 = vector.shape_cast %60 : vector<1x8x16x128xbf16> to vector<8x16x128xbf16>
    %62 = vector.shape_cast %61 : vector<8x16x128xbf16> to vector<128x128xbf16>
    %c7 = arith.constant 7 : index
    %c0_74 = arith.constant 0 : index
    %c0_75 = arith.constant 0 : index
    %63 = vector.load %arg2[%c7, %c0_74, %c0_75] : memref<9x128x128xbf16, #tpu.memory_space<vmem>>, vector<1x128x128xbf16>
    %64 = vector.shape_cast %63 : vector<1x128x128xbf16> to vector<128x128xbf16>
    %cst_76 = arith.constant dense<0.000000e+00> : vector<128x128xf32>
    %65 = tpu.matmul %62, %64, %cst_76 {dimension_numbers = #tpu.dot_dimension_numbers<[1], [0], [0], [1], [0, 0, 1, 1], [], []>} : vector<128x128xbf16>, vector<128x128xbf16>, vector<128x128xf32> -> vector<128x128xf32>
    %66 = arith.addf %59, %65 : vector<128x128xf32>
    %c0_77 = arith.constant 0 : index
    %c2_78 = arith.constant 2 : index
    %c2_79 = arith.constant 2 : index
    %c0_80 = arith.constant 0 : index
    %67 = vector.load %arg1[%c0_77, %c2_78, %c2_79, %c0_80] : memref<1x18x18x128xbf16, #tpu.memory_space<vmem>>, vector<1x8x16x128xbf16>
    %68 = vector.shape_cast %67 : vector<1x8x16x128xbf16> to vector<8x16x128xbf16>
    %69 = vector.shape_cast %68 : vector<8x16x128xbf16> to vector<128x128xbf16>
    %c8 = arith.constant 8 : index
    %c0_81 = arith.constant 0 : index
    %c0_82 = arith.constant 0 : index
    %70 = vector.load %arg2[%c8, %c0_81, %c0_82] : memref<9x128x128xbf16, #tpu.memory_space<vmem>>, vector<1x128x128xbf16>
    %71 = vector.shape_cast %70 : vector<1x128x128xbf16> to vector<128x128xbf16>
    %cst_83 = arith.constant dense<0.000000e+00> : vector<128x128xf32>
    %72 = tpu.matmul %69, %71, %cst_83 {dimension_numbers = #tpu.dot_dimension_numbers<[1], [0], [0], [1], [0, 0, 1, 1], [], []>} : vector<128x128xbf16>, vector<128x128xbf16>, vector<128x128xf32> -> vector<128x128xf32>
    %73 = arith.addf %66, %72 : vector<128x128xf32>
    %74 = vector.broadcast %6 : vector<1x128xf32> to vector<128x128xf32>
    %75 = arith.mulf %73, %74 : vector<128x128xf32>
    %76 = vector.broadcast %7 : vector<1x128xf32> to vector<128x128xf32>
    %77 = arith.addf %75, %76 : vector<128x128xf32>
    %cst_84 = arith.constant 0.000000e+00 : f32
    %78 = vector.broadcast %cst_84 : f32 to vector<128x128xf32>
    %79 = arith.maximumf %77, %78 : vector<128x128xf32>
    %80 = vector.shape_cast %79 : vector<128x128xf32> to vector<8x16x128xf32>
    %81 = arith.truncf %80 : vector<8x16x128xf32> to vector<8x16x128xbf16>
    %c1_85 = arith.constant 1 : index
    %c1_86 = arith.constant 1 : index
    %c0_87 = arith.constant 0 : index
    %82 = vector.load %arg9[%c1_85, %c1_86, %c0_87] : memref<18x18x128xbf16, #tpu.memory_space<vmem>>, vector<8x16x128xbf16>
    tpu.vector_store %arg9[%c1_85, %c1_86, %c0_87], %81 {strides = array<i32>} : memref<18x18x128xbf16, #tpu.memory_space<vmem>>, vector<8x16x128xbf16>,
    %cst_88 = arith.constant 0.000000e+00 : f32
    %83 = vector.broadcast %cst_88 : f32 to vector<128x128xf32>
    %c0_89 = arith.constant 0 : index
    %c8_90 = arith.constant 8 : index
    %c0_91 = arith.constant 0 : index
    %c0_92 = arith.constant 0 : index
    %84 = vector.load %arg1[%c0_89, %c8_90, %c0_91, %c0_92] : memref<1x18x18x128xbf16, #tpu.memory_space<vmem>>, vector<1x8x16x128xbf16>
    %85 = vector.shape_cast %84 : vector<1x8x16x128xbf16> to vector<8x16x128xbf16>
    %86 = vector.shape_cast %85 : vector<8x16x128xbf16> to vector<128x128xbf16>
    %c0_93 = arith.constant 0 : index
    %c0_94 = arith.constant 0 : index
    %c0_95 = arith.constant 0 : index
    %87 = vector.load %arg2[%c0_93, %c0_94, %c0_95] : memref<9x128x128xbf16, #tpu.memory_space<vmem>>, vector<1x128x128xbf16>
    %88 = vector.shape_cast %87 : vector<1x128x128xbf16> to vector<128x128xbf16>
    %cst_96 = arith.constant dense<0.000000e+00> : vector<128x128xf32>
    %89 = tpu.matmul %86, %88, %cst_96 {dimension_numbers = #tpu.dot_dimension_numbers<[1], [0], [0], [1], [0, 0, 1, 1], [], []>} : vector<128x128xbf16>, vector<128x128xbf16>, vector<128x128xf32> -> vector<128x128xf32>
    %90 = arith.addf %83, %89 : vector<128x128xf32>
    %c0_97 = arith.constant 0 : index
    %c8_98 = arith.constant 8 : index
    %c1_99 = arith.constant 1 : index
    %c0_100 = arith.constant 0 : index
    %91 = vector.load %arg1[%c0_97, %c8_98, %c1_99, %c0_100] : memref<1x18x18x128xbf16, #tpu.memory_space<vmem>>, vector<1x8x16x128xbf16>
    %92 = vector.shape_cast %91 : vector<1x8x16x128xbf16> to vector<8x16x128xbf16>
    %93 = vector.shape_cast %92 : vector<8x16x128xbf16> to vector<128x128xbf16>
    %c1_101 = arith.constant 1 : index
    %c0_102 = arith.constant 0 : index
    %c0_103 = arith.constant 0 : index
    %94 = vector.load %arg2[%c1_101, %c0_102, %c0_103] : memref<9x128x128xbf16, #tpu.memory_space<vmem>>, vector<1x128x128xbf16>
    %95 = vector.shape_cast %94 : vector<1x128x128xbf16> to vector<128x128xbf16>
    %cst_104 = arith.constant dense<0.000000e+00> : vector<128x128xf32>
    %96 = tpu.matmul %93, %95, %cst_104 {dimension_numbers = #tpu.dot_dimension_numbers<[1], [0], [0], [1], [0, 0, 1, 1], [], []>} : vector<128x128xbf16>, vector<128x128xbf16>, vector<128x128xf32> -> vector<128x128xf32>
    %97 = arith.addf %90, %96 : vector<128x128xf32>
    %c0_105 = arith.constant 0 : index
    %c8_106 = arith.constant 8 : index
    %c2_107 = arith.constant 2 : index
    %c0_108 = arith.constant 0 : index
    %98 = vector.load %arg1[%c0_105, %c8_106, %c2_107, %c0_108] : memref<1x18x18x128xbf16, #tpu.memory_space<vmem>>, vector<1x8x16x128xbf16>
    %99 = vector.shape_cast %98 : vector<1x8x16x128xbf16> to vector<8x16x128xbf16>
    %100 = vector.shape_cast %99 : vector<8x16x128xbf16> to vector<128x128xbf16>
    %c2_109 = arith.constant 2 : index
    %c0_110 = arith.constant 0 : index
    %c0_111 = arith.constant 0 : index
    %101 = vector.load %arg2[%c2_109, %c0_110, %c0_111] : memref<9x128x128xbf16, #tpu.memory_space<vmem>>, vector<1x128x128xbf16>
    %102 = vector.shape_cast %101 : vector<1x128x128xbf16> to vector<128x128xbf16>
    %cst_112 = arith.constant dense<0.000000e+00> : vector<128x128xf32>
    %103 = tpu.matmul %100, %102, %cst_112 {dimension_numbers = #tpu.dot_dimension_numbers<[1], [0], [0], [1], [0, 0, 1, 1], [], []>} : vector<128x128xbf16>, vector<128x128xbf16>, vector<128x128xf32> -> vector<128x128xf32>
    %104 = arith.addf %97, %103 : vector<128x128xf32>
    %c0_113 = arith.constant 0 : index
    %c9 = arith.constant 9 : index
    %c0_114 = arith.constant 0 : index
    %c0_115 = arith.constant 0 : index
    %105 = vector.load %arg1[%c0_113, %c9, %c0_114, %c0_115] : memref<1x18x18x128xbf16, #tpu.memory_space<vmem>>, vector<1x8x16x128xbf16>
    %106 = vector.shape_cast %105 : vector<1x8x16x128xbf16> to vector<8x16x128xbf16>
    %107 = vector.shape_cast %106 : vector<8x16x128xbf16> to vector<128x128xbf16>
    %c3_116 = arith.constant 3 : index
    %c0_117 = arith.constant 0 : index
    %c0_118 = arith.constant 0 : index
    %108 = vector.load %arg2[%c3_116, %c0_117, %c0_118] : memref<9x128x128xbf16, #tpu.memory_space<vmem>>, vector<1x128x128xbf16>
    %109 = vector.shape_cast %108 : vector<1x128x128xbf16> to vector<128x128xbf16>
    %cst_119 = arith.constant dense<0.000000e+00> : vector<128x128xf32>
    %110 = tpu.matmul %107, %109, %cst_119 {dimension_numbers = #tpu.dot_dimension_numbers<[1], [0], [0], [1], [0, 0, 1, 1], [], []>} : vector<128x128xbf16>, vector<128x128xbf16>, vector<128x128xf32> -> vector<128x128xf32>
    %111 = arith.addf %104, %110 : vector<128x128xf32>
    %c0_120 = arith.constant 0 : index
    %c9_121 = arith.constant 9 : index
    %c1_122 = arith.constant 1 : index
    %c0_123 = arith.constant 0 : index
    %112 = vector.load %arg1[%c0_120, %c9_121, %c1_122, %c0_123] : memref<1x18x18x128xbf16, #tpu.memory_space<vmem>>, vector<1x8x16x128xbf16>
    %113 = vector.shape_cast %112 : vector<1x8x16x128xbf16> to vector<8x16x128xbf16>
    %114 = vector.shape_cast %113 : vector<8x16x128xbf16> to vector<128x128xbf16>
    %c4_124 = arith.constant 4 : index
    %c0_125 = arith.constant 0 : index
    %c0_126 = arith.constant 0 : index
    %115 = vector.load %arg2[%c4_124, %c0_125, %c0_126] : memref<9x128x128xbf16, #tpu.memory_space<vmem>>, vector<1x128x128xbf16>
    %116 = vector.shape_cast %115 : vector<1x128x128xbf16> to vector<128x128xbf16>
    %cst_127 = arith.constant dense<0.000000e+00> : vector<128x128xf32>
    %117 = tpu.matmul %114, %116, %cst_127 {dimension_numbers = #tpu.dot_dimension_numbers<[1], [0], [0], [1], [0, 0, 1, 1], [], []>} : vector<128x128xbf16>, vector<128x128xbf16>, vector<128x128xf32> -> vector<128x128xf32>
    %118 = arith.addf %111, %117 : vector<128x128xf32>
    %c0_128 = arith.constant 0 : index
    %c9_129 = arith.constant 9 : index
    %c2_130 = arith.constant 2 : index
    %c0_131 = arith.constant 0 : index
    %119 = vector.load %arg1[%c0_128, %c9_129, %c2_130, %c0_131] : memref<1x18x18x128xbf16, #tpu.memory_space<vmem>>, vector<1x8x16x128xbf16>
    %120 = vector.shape_cast %119 : vector<1x8x16x128xbf16> to vector<8x16x128xbf16>
    %121 = vector.shape_cast %120 : vector<8x16x128xbf16> to vector<128x128xbf16>
    %c5_132 = arith.constant 5 : index
    %c0_133 = arith.constant 0 : index
    %c0_134 = arith.constant 0 : index
    %122 = vector.load %arg2[%c5_132, %c0_133, %c0_134] : memref<9x128x128xbf16, #tpu.memory_space<vmem>>, vector<1x128x128xbf16>
    %123 = vector.shape_cast %122 : vector<1x128x128xbf16> to vector<128x128xbf16>
    %cst_135 = arith.constant dense<0.000000e+00> : vector<128x128xf32>
    %124 = tpu.matmul %121, %123, %cst_135 {dimension_numbers = #tpu.dot_dimension_numbers<[1], [0], [0], [1], [0, 0, 1, 1], [], []>} : vector<128x128xbf16>, vector<128x128xbf16>, vector<128x128xf32> -> vector<128x128xf32>
    %125 = arith.addf %118, %124 : vector<128x128xf32>
    %c0_136 = arith.constant 0 : index
    %c10 = arith.constant 10 : index
    %c0_137 = arith.constant 0 : index
    %c0_138 = arith.constant 0 : index
    %126 = vector.load %arg1[%c0_136, %c10, %c0_137, %c0_138] : memref<1x18x18x128xbf16, #tpu.memory_space<vmem>>, vector<1x8x16x128xbf16>
    %127 = vector.shape_cast %126 : vector<1x8x16x128xbf16> to vector<8x16x128xbf16>
    %128 = vector.shape_cast %127 : vector<8x16x128xbf16> to vector<128x128xbf16>
    %c6_139 = arith.constant 6 : index
    %c0_140 = arith.constant 0 : index
    %c0_141 = arith.constant 0 : index
    %129 = vector.load %arg2[%c6_139, %c0_140, %c0_141] : memref<9x128x128xbf16, #tpu.memory_space<vmem>>, vector<1x128x128xbf16>
    %130 = vector.shape_cast %129 : vector<1x128x128xbf16> to vector<128x128xbf16>
    %cst_142 = arith.constant dense<0.000000e+00> : vector<128x128xf32>
    %131 = tpu.matmul %128, %130, %cst_142 {dimension_numbers = #tpu.dot_dimension_numbers<[1], [0], [0], [1], [0, 0, 1, 1], [], []>} : vector<128x128xbf16>, vector<128x128xbf16>, vector<128x128xf32> -> vector<128x128xf32>
    %132 = arith.addf %125, %131 : vector<128x128xf32>
    %c0_143 = arith.constant 0 : index
    %c10_144 = arith.constant 10 : index
    %c1_145 = arith.constant 1 : index
    %c0_146 = arith.constant 0 : index
    %133 = vector.load %arg1[%c0_143, %c10_144, %c1_145, %c0_146] : memref<1x18x18x128xbf16, #tpu.memory_space<vmem>>, vector<1x8x16x128xbf16>
    %134 = vector.shape_cast %133 : vector<1x8x16x128xbf16> to vector<8x16x128xbf16>
    %135 = vector.shape_cast %134 : vector<8x16x128xbf16> to vector<128x128xbf16>
    %c7_147 = arith.constant 7 : index
    %c0_148 = arith.constant 0 : index
    %c0_149 = arith.constant 0 : index
    %136 = vector.load %arg2[%c7_147, %c0_148, %c0_149] : memref<9x128x128xbf16, #tpu.memory_space<vmem>>, vector<1x128x128xbf16>
    %137 = vector.shape_cast %136 : vector<1x128x128xbf16> to vector<128x128xbf16>
    %cst_150 = arith.constant dense<0.000000e+00> : vector<128x128xf32>
    %138 = tpu.matmul %135, %137, %cst_150 {dimension_numbers = #tpu.dot_dimension_numbers<[1], [0], [0], [1], [0, 0, 1, 1], [], []>} : vector<128x128xbf16>, vector<128x128xbf16>, vector<128x128xf32> -> vector<128x128xf32>
    %139 = arith.addf %132, %138 : vector<128x128xf32>
    %c0_151 = arith.constant 0 : index
    %c10_152 = arith.constant 10 : index
    %c2_153 = arith.constant 2 : index
    %c0_154 = arith.constant 0 : index
    %140 = vector.load %arg1[%c0_151, %c10_152, %c2_153, %c0_154] : memref<1x18x18x128xbf16, #tpu.memory_space<vmem>>, vector<1x8x16x128xbf16>
    %141 = vector.shape_cast %140 : vector<1x8x16x128xbf16> to vector<8x16x128xbf16>
    %142 = vector.shape_cast %141 : vector<8x16x128xbf16> to vector<128x128xbf16>
    %c8_155 = arith.constant 8 : index
    %c0_156 = arith.constant 0 : index
    %c0_157 = arith.constant 0 : index
    %143 = vector.load %arg2[%c8_155, %c0_156, %c0_157] : memref<9x128x128xbf16, #tpu.memory_space<vmem>>, vector<1x128x128xbf16>
    %144 = vector.shape_cast %143 : vector<1x128x128xbf16> to vector<128x128xbf16>
    %cst_158 = arith.constant dense<0.000000e+00> : vector<128x128xf32>
    %145 = tpu.matmul %142, %144, %cst_158 {dimension_numbers = #tpu.dot_dimension_numbers<[1], [0], [0], [1], [0, 0, 1, 1], [], []>} : vector<128x128xbf16>, vector<128x128xbf16>, vector<128x128xf32> -> vector<128x128xf32>
    %146 = arith.addf %139, %145 : vector<128x128xf32>
    %147 = vector.broadcast %6 : vector<1x128xf32> to vector<128x128xf32>
    %148 = arith.mulf %146, %147 : vector<128x128xf32>
    %149 = vector.broadcast %7 : vector<1x128xf32> to vector<128x128xf32>
    %150 = arith.addf %148, %149 : vector<128x128xf32>
    %cst_159 = arith.constant 0.000000e+00 : f32
    %151 = vector.broadcast %cst_159 : f32 to vector<128x128xf32>
    %152 = arith.maximumf %150, %151 : vector<128x128xf32>
    %153 = vector.shape_cast %152 : vector<128x128xf32> to vector<8x16x128xf32>
    %154 = arith.truncf %153 : vector<8x16x128xf32> to vector<8x16x128xbf16>
    %c9_160 = arith.constant 9 : index
    %c1_161 = arith.constant 1 : index
    %c0_162 = arith.constant 0 : index
    %155 = vector.load %arg9[%c9_160, %c1_161, %c0_162] : memref<18x18x128xbf16, #tpu.memory_space<vmem>>, vector<8x16x128xbf16>
    tpu.vector_store %arg9[%c9_160, %c1_161, %c0_162], %154 {strides = array<i32>} : memref<18x18x128xbf16, #tpu.memory_space<vmem>>, vector<8x16x128xbf16>,
    %cst_163 = arith.constant 0.000000e+00 : f32
    %156 = vector.broadcast %cst_163 : f32 to vector<128x128xf32>
    %c0_164 = arith.constant 0 : index
    %c0_165 = arith.constant 0 : index
    %c0_166 = arith.constant 0 : index
    %157 = vector.load %arg9[%c0_164, %c0_165, %c0_166] : memref<18x18x128xbf16, #tpu.memory_space<vmem>>, vector<8x16x128xbf16>
    %158 = vector.shape_cast %157 : vector<8x16x128xbf16> to vector<128x128xbf16>
    %c0_167 = arith.constant 0 : index
    %c0_168 = arith.constant 0 : index
    %c0_169 = arith.constant 0 : index
    %159 = vector.load %arg3[%c0_167, %c0_168, %c0_169] : memref<9x128x128xbf16, #tpu.memory_space<vmem>>, vector<1x128x128xbf16>
    %160 = vector.shape_cast %159 : vector<1x128x128xbf16> to vector<128x128xbf16>
    %cst_170 = arith.constant dense<0.000000e+00> : vector<128x128xf32>
    %161 = tpu.matmul %158, %160, %cst_170 {dimension_numbers = #tpu.dot_dimension_numbers<[1], [0], [0], [1], [0, 0, 1, 1], [], []>} : vector<128x128xbf16>, vector<128x128xbf16>, vector<128x128xf32> -> vector<128x128xf32>
    %162 = arith.addf %156, %161 : vector<128x128xf32>
    %c0_171 = arith.constant 0 : index
    %c1_172 = arith.constant 1 : index
    %c0_173 = arith.constant 0 : index
    %163 = vector.load %arg9[%c0_171, %c1_172, %c0_173] : memref<18x18x128xbf16, #tpu.memory_space<vmem>>, vector<8x16x128xbf16>
    %164 = vector.shape_cast %163 : vector<8x16x128xbf16> to vector<128x128xbf16>
    %c1_174 = arith.constant 1 : index
    %c0_175 = arith.constant 0 : index
    %c0_176 = arith.constant 0 : index
    %165 = vector.load %arg3[%c1_174, %c0_175, %c0_176] : memref<9x128x128xbf16, #tpu.memory_space<vmem>>, vector<1x128x128xbf16>
    %166 = vector.shape_cast %165 : vector<1x128x128xbf16> to vector<128x128xbf16>
    %cst_177 = arith.constant dense<0.000000e+00> : vector<128x128xf32>
    %167 = tpu.matmul %164, %166, %cst_177 {dimension_numbers = #tpu.dot_dimension_numbers<[1], [0], [0], [1], [0, 0, 1, 1], [], []>} : vector<128x128xbf16>, vector<128x128xbf16>, vector<128x128xf32> -> vector<128x128xf32>
    %168 = arith.addf %162, %167 : vector<128x128xf32>
    %c0_178 = arith.constant 0 : index
    %c2_179 = arith.constant 2 : index
    %c0_180 = arith.constant 0 : index
    %169 = vector.load %arg9[%c0_178, %c2_179, %c0_180] : memref<18x18x128xbf16, #tpu.memory_space<vmem>>, vector<8x16x128xbf16>
    %170 = vector.shape_cast %169 : vector<8x16x128xbf16> to vector<128x128xbf16>
    %c2_181 = arith.constant 2 : index
    %c0_182 = arith.constant 0 : index
    %c0_183 = arith.constant 0 : index
    %171 = vector.load %arg3[%c2_181, %c0_182, %c0_183] : memref<9x128x128xbf16, #tpu.memory_space<vmem>>, vector<1x128x128xbf16>
    %172 = vector.shape_cast %171 : vector<1x128x128xbf16> to vector<128x128xbf16>
    %cst_184 = arith.constant dense<0.000000e+00> : vector<128x128xf32>
    %173 = tpu.matmul %170, %172, %cst_184 {dimension_numbers = #tpu.dot_dimension_numbers<[1], [0], [0], [1], [0, 0, 1, 1], [], []>} : vector<128x128xbf16>, vector<128x128xbf16>, vector<128x128xf32> -> vector<128x128xf32>
    %174 = arith.addf %168, %173 : vector<128x128xf32>
    %c1_185 = arith.constant 1 : index
    %c0_186 = arith.constant 0 : index
    %c0_187 = arith.constant 0 : index
    %175 = vector.load %arg9[%c1_185, %c0_186, %c0_187] : memref<18x18x128xbf16, #tpu.memory_space<vmem>>, vector<8x16x128xbf16>
    %176 = vector.shape_cast %175 : vector<8x16x128xbf16> to vector<128x128xbf16>
    %c3_188 = arith.constant 3 : index
    %c0_189 = arith.constant 0 : index
    %c0_190 = arith.constant 0 : index
    %177 = vector.load %arg3[%c3_188, %c0_189, %c0_190] : memref<9x128x128xbf16, #tpu.memory_space<vmem>>, vector<1x128x128xbf16>
    %178 = vector.shape_cast %177 : vector<1x128x128xbf16> to vector<128x128xbf16>
    %cst_191 = arith.constant dense<0.000000e+00> : vector<128x128xf32>
    %179 = tpu.matmul %176, %178, %cst_191 {dimension_numbers = #tpu.dot_dimension_numbers<[1], [0], [0], [1], [0, 0, 1, 1], [], []>} : vector<128x128xbf16>, vector<128x128xbf16>, vector<128x128xf32> -> vector<128x128xf32>
    %180 = arith.addf %174, %179 : vector<128x128xf32>
    %c1_192 = arith.constant 1 : index
    %c1_193 = arith.constant 1 : index
    %c0_194 = arith.constant 0 : index
    %181 = vector.load %arg9[%c1_192, %c1_193, %c0_194] : memref<18x18x128xbf16, #tpu.memory_space<vmem>>, vector<8x16x128xbf16>
    %182 = vector.shape_cast %181 : vector<8x16x128xbf16> to vector<128x128xbf16>
    %c4_195 = arith.constant 4 : index
    %c0_196 = arith.constant 0 : index
    %c0_197 = arith.constant 0 : index
    %183 = vector.load %arg3[%c4_195, %c0_196, %c0_197] : memref<9x128x128xbf16, #tpu.memory_space<vmem>>, vector<1x128x128xbf16>
    %184 = vector.shape_cast %183 : vector<1x128x128xbf16> to vector<128x128xbf16>
    %cst_198 = arith.constant dense<0.000000e+00> : vector<128x128xf32>
    %185 = tpu.matmul %182, %184, %cst_198 {dimension_numbers = #tpu.dot_dimension_numbers<[1], [0], [0], [1], [0, 0, 1, 1], [], []>} : vector<128x128xbf16>, vector<128x128xbf16>, vector<128x128xf32> -> vector<128x128xf32>
    %186 = arith.addf %180, %185 : vector<128x128xf32>
    %c1_199 = arith.constant 1 : index
    %c2_200 = arith.constant 2 : index
    %c0_201 = arith.constant 0 : index
    %187 = vector.load %arg9[%c1_199, %c2_200, %c0_201] : memref<18x18x128xbf16, #tpu.memory_space<vmem>>, vector<8x16x128xbf16>
    %188 = vector.shape_cast %187 : vector<8x16x128xbf16> to vector<128x128xbf16>
    %c5_202 = arith.constant 5 : index
    %c0_203 = arith.constant 0 : index
    %c0_204 = arith.constant 0 : index
    %189 = vector.load %arg3[%c5_202, %c0_203, %c0_204] : memref<9x128x128xbf16, #tpu.memory_space<vmem>>, vector<1x128x128xbf16>
    %190 = vector.shape_cast %189 : vector<1x128x128xbf16> to vector<128x128xbf16>
    %cst_205 = arith.constant dense<0.000000e+00> : vector<128x128xf32>
    %191 = tpu.matmul %188, %190, %cst_205 {dimension_numbers = #tpu.dot_dimension_numbers<[1], [0], [0], [1], [0, 0, 1, 1], [], []>} : vector<128x128xbf16>, vector<128x128xbf16>, vector<128x128xf32> -> vector<128x128xf32>
    %192 = arith.addf %186, %191 : vector<128x128xf32>
    %c2_206 = arith.constant 2 : index
    %c0_207 = arith.constant 0 : index
    %c0_208 = arith.constant 0 : index
    %193 = vector.load %arg9[%c2_206, %c0_207, %c0_208] : memref<18x18x128xbf16, #tpu.memory_space<vmem>>, vector<8x16x128xbf16>
    %194 = vector.shape_cast %193 : vector<8x16x128xbf16> to vector<128x128xbf16>
    %c6_209 = arith.constant 6 : index
    %c0_210 = arith.constant 0 : index
    %c0_211 = arith.constant 0 : index
    %195 = vector.load %arg3[%c6_209, %c0_210, %c0_211] : memref<9x128x128xbf16, #tpu.memory_space<vmem>>, vector<1x128x128xbf16>
    %196 = vector.shape_cast %195 : vector<1x128x128xbf16> to vector<128x128xbf16>
    %cst_212 = arith.constant dense<0.000000e+00> : vector<128x128xf32>
    %197 = tpu.matmul %194, %196, %cst_212 {dimension_numbers = #tpu.dot_dimension_numbers<[1], [0], [0], [1], [0, 0, 1, 1], [], []>} : vector<128x128xbf16>, vector<128x128xbf16>, vector<128x128xf32> -> vector<128x128xf32>
    %198 = arith.addf %192, %197 : vector<128x128xf32>
    %c2_213 = arith.constant 2 : index
    %c1_214 = arith.constant 1 : index
    %c0_215 = arith.constant 0 : index
    %199 = vector.load %arg9[%c2_213, %c1_214, %c0_215] : memref<18x18x128xbf16, #tpu.memory_space<vmem>>, vector<8x16x128xbf16>
    %200 = vector.shape_cast %199 : vector<8x16x128xbf16> to vector<128x128xbf16>
    %c7_216 = arith.constant 7 : index
    %c0_217 = arith.constant 0 : index
    %c0_218 = arith.constant 0 : index
    %201 = vector.load %arg3[%c7_216, %c0_217, %c0_218] : memref<9x128x128xbf16, #tpu.memory_space<vmem>>, vector<1x128x128xbf16>
    %202 = vector.shape_cast %201 : vector<1x128x128xbf16> to vector<128x128xbf16>
    %cst_219 = arith.constant dense<0.000000e+00> : vector<128x128xf32>
    %203 = tpu.matmul %200, %202, %cst_219 {dimension_numbers = #tpu.dot_dimension_numbers<[1], [0], [0], [1], [0, 0, 1, 1], [], []>} : vector<128x128xbf16>, vector<128x128xbf16>, vector<128x128xf32> -> vector<128x128xf32>
    %204 = arith.addf %198, %203 : vector<128x128xf32>
    %c2_220 = arith.constant 2 : index
    %c2_221 = arith.constant 2 : index
    %c0_222 = arith.constant 0 : index
    %205 = vector.load %arg9[%c2_220, %c2_221, %c0_222] : memref<18x18x128xbf16, #tpu.memory_space<vmem>>, vector<8x16x128xbf16>
    %206 = vector.shape_cast %205 : vector<8x16x128xbf16> to vector<128x128xbf16>
    %c8_223 = arith.constant 8 : index
    %c0_224 = arith.constant 0 : index
    %c0_225 = arith.constant 0 : index
    %207 = vector.load %arg3[%c8_223, %c0_224, %c0_225] : memref<9x128x128xbf16, #tpu.memory_space<vmem>>, vector<1x128x128xbf16>
    %208 = vector.shape_cast %207 : vector<1x128x128xbf16> to vector<128x128xbf16>
    %cst_226 = arith.constant dense<0.000000e+00> : vector<128x128xf32>
    %209 = tpu.matmul %206, %208, %cst_226 {dimension_numbers = #tpu.dot_dimension_numbers<[1], [0], [0], [1], [0, 0, 1, 1], [], []>} : vector<128x128xbf16>, vector<128x128xbf16>, vector<128x128xf32> -> vector<128x128xf32>
    %210 = arith.addf %204, %209 : vector<128x128xf32>
    %c0_227 = arith.constant 0 : index
    %c1_228 = arith.constant 1 : index
    %c1_229 = arith.constant 1 : index
    %c0_230 = arith.constant 0 : index
    %211 = vector.load %arg1[%c0_227, %c1_228, %c1_229, %c0_230] : memref<1x18x18x128xbf16, #tpu.memory_space<vmem>>, vector<1x8x16x128xbf16>
    %212 = vector.shape_cast %211 : vector<1x8x16x128xbf16> to vector<8x16x128xbf16>
    %213 = vector.shape_cast %212 : vector<8x16x128xbf16> to vector<128x128xbf16>
    %214 = vector.broadcast %8 : vector<1x128xf32> to vector<128x128xf32>
    %215 = arith.mulf %210, %214 : vector<128x128xf32>
    %216 = vector.broadcast %9 : vector<1x128xf32> to vector<128x128xf32>
    %217 = arith.addf %215, %216 : vector<128x128xf32>
    %218 = arith.extf %213 : vector<128x128xbf16> to vector<128x128xf32>
    %219 = arith.addf %217, %218 : vector<128x128xf32>
    %cst_231 = arith.constant 0.000000e+00 : f32
    %220 = vector.broadcast %cst_231 : f32 to vector<128x128xf32>
    %221 = arith.maximumf %219, %220 : vector<128x128xf32>
    %222 = vector.shape_cast %221 : vector<128x128xf32> to vector<8x16x128xf32>
    %c0_232 = arith.constant 0 : index
    %c0_233 = arith.constant 0 : index
    %c0_234 = arith.constant 0 : index
    %c0_235 = arith.constant 0 : index
    %223 = vector.load %arg8[%c0_232, %c0_233, %c0_234, %c0_235] : memref<1x16x16x128xf32, #tpu.memory_space<vmem>>, vector<1x8x16x128xf32>
    %224 = vector.shape_cast %223 : vector<1x8x16x128xf32> to vector<8x16x128xf32>
    %225 = vector.shape_cast %222 : vector<8x16x128xf32> to vector<1x8x16x128xf32>
    tpu.vector_store %arg8[%c0_232, %c0_233, %c0_234, %c0_235], %225 {strides = array<i32>} : memref<1x16x16x128xf32, #tpu.memory_space<vmem>>, vector<1x8x16x128xf32>,
    %cst_236 = arith.constant 0.000000e+00 : f32
    %226 = vector.broadcast %cst_236 : f32 to vector<128x128xf32>
    %c8_237 = arith.constant 8 : index
    %c0_238 = arith.constant 0 : index
    %c0_239 = arith.constant 0 : index
    %227 = vector.load %arg9[%c8_237, %c0_238, %c0_239] : memref<18x18x128xbf16, #tpu.memory_space<vmem>>, vector<8x16x128xbf16>
    %228 = vector.shape_cast %227 : vector<8x16x128xbf16> to vector<128x128xbf16>
    %c0_240 = arith.constant 0 : index
    %c0_241 = arith.constant 0 : index
    %c0_242 = arith.constant 0 : index
    %229 = vector.load %arg3[%c0_240, %c0_241, %c0_242] : memref<9x128x128xbf16, #tpu.memory_space<vmem>>, vector<1x128x128xbf16>
    %230 = vector.shape_cast %229 : vector<1x128x128xbf16> to vector<128x128xbf16>
    %cst_243 = arith.constant dense<0.000000e+00> : vector<128x128xf32>
    %231 = tpu.matmul %228, %230, %cst_243 {dimension_numbers = #tpu.dot_dimension_numbers<[1], [0], [0], [1], [0, 0, 1, 1], [], []>} : vector<128x128xbf16>, vector<128x128xbf16>, vector<128x128xf32> -> vector<128x128xf32>
    %232 = arith.addf %226, %231 : vector<128x128xf32>
    %c8_244 = arith.constant 8 : index
    %c1_245 = arith.constant 1 : index
    %c0_246 = arith.constant 0 : index
    %233 = vector.load %arg9[%c8_244, %c1_245, %c0_246] : memref<18x18x128xbf16, #tpu.memory_space<vmem>>, vector<8x16x128xbf16>
    %234 = vector.shape_cast %233 : vector<8x16x128xbf16> to vector<128x128xbf16>
    %c1_247 = arith.constant 1 : index
    %c0_248 = arith.constant 0 : index
    %c0_249 = arith.constant 0 : index
    %235 = vector.load %arg3[%c1_247, %c0_248, %c0_249] : memref<9x128x128xbf16, #tpu.memory_space<vmem>>, vector<1x128x128xbf16>
    %236 = vector.shape_cast %235 : vector<1x128x128xbf16> to vector<128x128xbf16>
    %cst_250 = arith.constant dense<0.000000e+00> : vector<128x128xf32>
    %237 = tpu.matmul %234, %236, %cst_250 {dimension_numbers = #tpu.dot_dimension_numbers<[1], [0], [0], [1], [0, 0, 1, 1], [], []>} : vector<128x128xbf16>, vector<128x128xbf16>, vector<128x128xf32> -> vector<128x128xf32>
    %238 = arith.addf %232, %237 : vector<128x128xf32>
    %c8_251 = arith.constant 8 : index
    %c2_252 = arith.constant 2 : index
    %c0_253 = arith.constant 0 : index
    %239 = vector.load %arg9[%c8_251, %c2_252, %c0_253] : memref<18x18x128xbf16, #tpu.memory_space<vmem>>, vector<8x16x128xbf16>
    %240 = vector.shape_cast %239 : vector<8x16x128xbf16> to vector<128x128xbf16>
    %c2_254 = arith.constant 2 : index
    %c0_255 = arith.constant 0 : index
    %c0_256 = arith.constant 0 : index
    %241 = vector.load %arg3[%c2_254, %c0_255, %c0_256] : memref<9x128x128xbf16, #tpu.memory_space<vmem>>, vector<1x128x128xbf16>
    %242 = vector.shape_cast %241 : vector<1x128x128xbf16> to vector<128x128xbf16>
    %cst_257 = arith.constant dense<0.000000e+00> : vector<128x128xf32>
    %243 = tpu.matmul %240, %242, %cst_257 {dimension_numbers = #tpu.dot_dimension_numbers<[1], [0], [0], [1], [0, 0, 1, 1], [], []>} : vector<128x128xbf16>, vector<128x128xbf16>, vector<128x128xf32> -> vector<128x128xf32>
    %244 = arith.addf %238, %243 : vector<128x128xf32>
    %c9_258 = arith.constant 9 : index
    %c0_259 = arith.constant 0 : index
    %c0_260 = arith.constant 0 : index
    %245 = vector.load %arg9[%c9_258, %c0_259, %c0_260] : memref<18x18x128xbf16, #tpu.memory_space<vmem>>, vector<8x16x128xbf16>
    %246 = vector.shape_cast %245 : vector<8x16x128xbf16> to vector<128x128xbf16>
    %c3_261 = arith.constant 3 : index
    %c0_262 = arith.constant 0 : index
    %c0_263 = arith.constant 0 : index
    %247 = vector.load %arg3[%c3_261, %c0_262, %c0_263] : memref<9x128x128xbf16, #tpu.memory_space<vmem>>, vector<1x128x128xbf16>
    %248 = vector.shape_cast %247 : vector<1x128x128xbf16> to vector<128x128xbf16>
    %cst_264 = arith.constant dense<0.000000e+00> : vector<128x128xf32>
    %249 = tpu.matmul %246, %248, %cst_264 {dimension_numbers = #tpu.dot_dimension_numbers<[1], [0], [0], [1], [0, 0, 1, 1], [], []>} : vector<128x128xbf16>, vector<128x128xbf16>, vector<128x128xf32> -> vector<128x128xf32>
    %250 = arith.addf %244, %249 : vector<128x128xf32>
    %c9_265 = arith.constant 9 : index
    %c1_266 = arith.constant 1 : index
    %c0_267 = arith.constant 0 : index
    %251 = vector.load %arg9[%c9_265, %c1_266, %c0_267] : memref<18x18x128xbf16, #tpu.memory_space<vmem>>, vector<8x16x128xbf16>
    %252 = vector.shape_cast %251 : vector<8x16x128xbf16> to vector<128x128xbf16>
    %c4_268 = arith.constant 4 : index
    %c0_269 = arith.constant 0 : index
    %c0_270 = arith.constant 0 : index
    %253 = vector.load %arg3[%c4_268, %c0_269, %c0_270] : memref<9x128x128xbf16, #tpu.memory_space<vmem>>, vector<1x128x128xbf16>
    %254 = vector.shape_cast %253 : vector<1x128x128xbf16> to vector<128x128xbf16>
    %cst_271 = arith.constant dense<0.000000e+00> : vector<128x128xf32>
    %255 = tpu.matmul %252, %254, %cst_271 {dimension_numbers = #tpu.dot_dimension_numbers<[1], [0], [0], [1], [0, 0, 1, 1], [], []>} : vector<128x128xbf16>, vector<128x128xbf16>, vector<128x128xf32> -> vector<128x128xf32>
    %256 = arith.addf %250, %255 : vector<128x128xf32>
    %c9_272 = arith.constant 9 : index
    %c2_273 = arith.constant 2 : index
    %c0_274 = arith.constant 0 : index
    %257 = vector.load %arg9[%c9_272, %c2_273, %c0_274] : memref<18x18x128xbf16, #tpu.memory_space<vmem>>, vector<8x16x128xbf16>
    %258 = vector.shape_cast %257 : vector<8x16x128xbf16> to vector<128x128xbf16>
    %c5_275 = arith.constant 5 : index
    %c0_276 = arith.constant 0 : index
    %c0_277 = arith.constant 0 : index
    %259 = vector.load %arg3[%c5_275, %c0_276, %c0_277] : memref<9x128x128xbf16, #tpu.memory_space<vmem>>, vector<1x128x128xbf16>
    %260 = vector.shape_cast %259 : vector<1x128x128xbf16> to vector<128x128xbf16>
    %cst_278 = arith.constant dense<0.000000e+00> : vector<128x128xf32>
    %261 = tpu.matmul %258, %260, %cst_278 {dimension_numbers = #tpu.dot_dimension_numbers<[1], [0], [0], [1], [0, 0, 1, 1], [], []>} : vector<128x128xbf16>, vector<128x128xbf16>, vector<128x128xf32> -> vector<128x128xf32>
    %262 = arith.addf %256, %261 : vector<128x128xf32>
    %c10_279 = arith.constant 10 : index
    %c0_280 = arith.constant 0 : index
    %c0_281 = arith.constant 0 : index
    %263 = vector.load %arg9[%c10_279, %c0_280, %c0_281] : memref<18x18x128xbf16, #tpu.memory_space<vmem>>, vector<8x16x128xbf16>
    %264 = vector.shape_cast %263 : vector<8x16x128xbf16> to vector<128x128xbf16>
    %c6_282 = arith.constant 6 : index
    %c0_283 = arith.constant 0 : index
    %c0_284 = arith.constant 0 : index
    %265 = vector.load %arg3[%c6_282, %c0_283, %c0_284] : memref<9x128x128xbf16, #tpu.memory_space<vmem>>, vector<1x128x128xbf16>
    %266 = vector.shape_cast %265 : vector<1x128x128xbf16> to vector<128x128xbf16>
    %cst_285 = arith.constant dense<0.000000e+00> : vector<128x128xf32>
    %267 = tpu.matmul %264, %266, %cst_285 {dimension_numbers = #tpu.dot_dimension_numbers<[1], [0], [0], [1], [0, 0, 1, 1], [], []>} : vector<128x128xbf16>, vector<128x128xbf16>, vector<128x128xf32> -> vector<128x128xf32>
    %268 = arith.addf %262, %267 : vector<128x128xf32>
    %c10_286 = arith.constant 10 : index
    %c1_287 = arith.constant 1 : index
    %c0_288 = arith.constant 0 : index
    %269 = vector.load %arg9[%c10_286, %c1_287, %c0_288] : memref<18x18x128xbf16, #tpu.memory_space<vmem>>, vector<8x16x128xbf16>
    %270 = vector.shape_cast %269 : vector<8x16x128xbf16> to vector<128x128xbf16>
    %c7_289 = arith.constant 7 : index
    %c0_290 = arith.constant 0 : index
    %c0_291 = arith.constant 0 : index
    %271 = vector.load %arg3[%c7_289, %c0_290, %c0_291] : memref<9x128x128xbf16, #tpu.memory_space<vmem>>, vector<1x128x128xbf16>
    %272 = vector.shape_cast %271 : vector<1x128x128xbf16> to vector<128x128xbf16>
    %cst_292 = arith.constant dense<0.000000e+00> : vector<128x128xf32>
    %273 = tpu.matmul %270, %272, %cst_292 {dimension_numbers = #tpu.dot_dimension_numbers<[1], [0], [0], [1], [0, 0, 1, 1], [], []>} : vector<128x128xbf16>, vector<128x128xbf16>, vector<128x128xf32> -> vector<128x128xf32>
    %274 = arith.addf %268, %273 : vector<128x128xf32>
    %c10_293 = arith.constant 10 : index
    %c2_294 = arith.constant 2 : index
    %c0_295 = arith.constant 0 : index
    %275 = vector.load %arg9[%c10_293, %c2_294, %c0_295] : memref<18x18x128xbf16, #tpu.memory_space<vmem>>, vector<8x16x128xbf16>
    %276 = vector.shape_cast %275 : vector<8x16x128xbf16> to vector<128x128xbf16>
    %c8_296 = arith.constant 8 : index
    %c0_297 = arith.constant 0 : index
    %c0_298 = arith.constant 0 : index
    %277 = vector.load %arg3[%c8_296, %c0_297, %c0_298] : memref<9x128x128xbf16, #tpu.memory_space<vmem>>, vector<1x128x128xbf16>
    %278 = vector.shape_cast %277 : vector<1x128x128xbf16> to vector<128x128xbf16>
    %cst_299 = arith.constant dense<0.000000e+00> : vector<128x128xf32>
    %279 = tpu.matmul %276, %278, %cst_299 {dimension_numbers = #tpu.dot_dimension_numbers<[1], [0], [0], [1], [0, 0, 1, 1], [], []>} : vector<128x128xbf16>, vector<128x128xbf16>, vector<128x128xf32> -> vector<128x128xf32>
    %280 = arith.addf %274, %279 : vector<128x128xf32>
    %c0_300 = arith.constant 0 : index
    %c9_301 = arith.constant 9 : index
    %c1_302 = arith.constant 1 : index
    %c0_303 = arith.constant 0 : index
    %281 = vector.load %arg1[%c0_300, %c9_301, %c1_302, %c0_303] : memref<1x18x18x128xbf16, #tpu.memory_space<vmem>>, vector<1x8x16x128xbf16>
    %282 = vector.shape_cast %281 : vector<1x8x16x128xbf16> to vector<8x16x128xbf16>
    %283 = vector.shape_cast %282 : vector<8x16x128xbf16> to vector<128x128xbf16>
    %284 = vector.broadcast %8 : vector<1x128xf32> to vector<128x128xf32>
    %285 = arith.mulf %280, %284 : vector<128x128xf32>
    %286 = vector.broadcast %9 : vector<1x128xf32> to vector<128x128xf32>
    %287 = arith.addf %285, %286 : vector<128x128xf32>
    %288 = arith.extf %283 : vector<128x128xbf16> to vector<128x128xf32>
    %289 = arith.addf %287, %288 : vector<128x128xf32>
    %cst_304 = arith.constant 0.000000e+00 : f32
    %290 = vector.broadcast %cst_304 : f32 to vector<128x128xf32>
    %291 = arith.maximumf %289, %290 : vector<128x128xf32>
    %292 = vector.shape_cast %291 : vector<128x128xf32> to vector<8x16x128xf32>
    %c0_305 = arith.constant 0 : index
    %c8_306 = arith.constant 8 : index
    %c0_307 = arith.constant 0 : index
    %c0_308 = arith.constant 0 : index
    %293 = vector.load %arg8[%c0_305, %c8_306, %c0_307, %c0_308] : memref<1x16x16x128xf32, #tpu.memory_space<vmem>>, vector<1x8x16x128xf32>
    %294 = vector.shape_cast %293 : vector<1x8x16x128xf32> to vector<8x16x128xf32>
    %295 = vector.shape_cast %292 : vector<8x16x128xf32> to vector<1x8x16x128xf32>
    tpu.vector_store %arg8[%c0_305, %c8_306, %c0_307, %c0_308], %295 {strides = array<i32>} : memref<1x16x16x128xf32, #tpu.memory_space<vmem>>, vector<1x8x16x128xf32>,
    return
  }
  func.func @transform_0(%arg0: i32) -> (i32, i32, i32, i32) {
    %c0_i32 = arith.constant 0 : i32
    %c0_i32_0 = arith.constant 0 : i32
    %c0_i32_1 = arith.constant 0 : i32
    %c0_i32_2 = arith.constant 0 : i32
    return %arg0, %c0_i32, %c0_i32_0, %c0_i32_1 : i32, i32, i32, i32
  }
  func.func @transform_1(%arg0: i32) -> (i32, i32, i32) {
    %c0_i32 = arith.constant 0 : i32
    %c0_i32_0 = arith.constant 0 : i32
    %c0_i32_1 = arith.constant 0 : i32
    %c0_i32_2 = arith.constant 0 : i32
    return %c0_i32, %c0_i32_0, %c0_i32_1 : i32, i32, i32
  }
  func.func @transform_2(%arg0: i32) -> (i32, i32, i32) {
    %c0_i32 = arith.constant 0 : i32
    %c0_i32_0 = arith.constant 0 : i32
    %c0_i32_1 = arith.constant 0 : i32
    %c0_i32_2 = arith.constant 0 : i32
    return %c0_i32, %c0_i32_0, %c0_i32_1 : i32, i32, i32
  }
  func.func @transform_3(%arg0: i32) -> (i32, i32) {
    %c0_i32 = arith.constant 0 : i32
    %c0_i32_0 = arith.constant 0 : i32
    %c0_i32_1 = arith.constant 0 : i32
    return %c0_i32, %c0_i32_0 : i32, i32
  }
  func.func @transform_4(%arg0: i32) -> (i32, i32) {
    %c0_i32 = arith.constant 0 : i32
    %c0_i32_0 = arith.constant 0 : i32
    %c0_i32_1 = arith.constant 0 : i32
    return %c0_i32, %c0_i32_0 : i32, i32
  }
  func.func @transform_5(%arg0: i32) -> (i32, i32) {
    %c0_i32 = arith.constant 0 : i32
    %c0_i32_0 = arith.constant 0 : i32
    %c0_i32_1 = arith.constant 0 : i32
    return %c0_i32, %c0_i32_0 : i32, i32
  }
  func.func @transform_6(%arg0: i32) -> (i32, i32) {
    %c0_i32 = arith.constant 0 : i32
    %c0_i32_0 = arith.constant 0 : i32
    %c0_i32_1 = arith.constant 0 : i32
    return %c0_i32, %c0_i32_0 : i32, i32
  }
  func.func @transform_7(%arg0: i32) -> (i32, i32, i32, i32) {
    %c0_i32 = arith.constant 0 : i32
    %c0_i32_0 = arith.constant 0 : i32
    %c0_i32_1 = arith.constant 0 : i32
    %c0_i32_2 = arith.constant 0 : i32
    return %arg0, %c0_i32, %c0_i32_0, %c0_i32_1 : i32, i32, i32, i32
  }
}

</mosaic_0001>

<bundles_post_ra>
// kernel: basic_block_forward.1
= control target key start
LH: loop header
LB: loop body
LE: loop exit
PB: predicated region body
PF: predicated region fallthrough
CT: control target
= control target key end

     0   :  { %s14278_s24 = smov 0   ;;  %s18343_s0 = inlined_call_operand.vmem [shape: bf16[2,18,18,128], index: 0, kind: input, shape index: {}]   ;;  %s18344_s1 = inlined_call_operand.vmem [shape: bf16[9,128,128], index: 1, kind: input, shape index: {}]   ;;  %s18345_s2 = inlined_call_operand.vmem [shape: bf16[9,128,128], index: 2, kind: input, shape index: {}]   ;;  %s18346_s3 = inlined_call_operand.vmem [shape: f32[1,128], index: 3, kind: input, shape index: {}]   ;;  %s18347_s4 = inlined_call_operand.vmem [shape: f32[1,128], index: 4, kind: input, shape index: {}]   ;;  %s18348_s5 = inlined_call_operand.vmem [shape: f32[1,128], index: 5, kind: input, shape index: {}]   ;;  %s18349_s6 = inlined_call_operand.vmem [shape: f32[1,128], index: 6, kind: input, shape index: {}]   ;;  %s18350_s7 = inlined_call_operand.vmem [shape: f32[2,16,16,128], index: 7, kind: output, shape index: {}]  }
   0x1 LB: > { %s11316_s25 = sadd.s32 4294967295, %s14235_s24   ;;  %p11320_p0 = scmp.ge.s32.totalorder %s14235_s24, 1  ;;  %s14235_s24 = sphi %s14278_s24, %s17_s24  }
   0x2   : > { %p237_p1 = scmp.lt.s32.totalorder %s14235_s24, 3 }
   0x4   : > { %p238_p2 = pnand %p11320_p0, %p237_p1 }
   0x5   : > { %p269_p3 = scmp.lt.s32.totalorder (!%p238_p2), %s11316_s25, 1 }
   0x6   : > { %241 = sbr.rel (%p238_p2) target bundleno = 1334 (0x536), region = 48 }
   0xb   : > { %v13782_v0 = vld [vmem:[%s18344_s1 + $0x78] sm:$0xff]  ;;  %v13781_v4 = vld [vmem:[%s18344_s1 + $0x70] sm:$0xff]  ;;  %s18366_s25 = smov (!%p269_p3, %s11316_s25), 1  ;;  %v13780_v8 = vld [vmem:[%s18344_s1 + $0x68] sm:$0xff]  ;;  %vm943_vm0 = vcmask 1042432   ;;  %vm944_vm1 = vcmask 1046532  }
   0xc   : > { %v13774_v1 = vld [vmem:[%s18344_s1 + $0x38] sm:$0xff]  ;;  %725 = vmatpush.bf16.msra.mxu0 %v13782_v0  ;;  %v13773_v5 = vld [vmem:[%s18344_s1 + $0x30] sm:$0xff]  ;;  %s14143_s19 = smul.u32 216, %s18366_s25  ;;  %v13772_v9 = vld [vmem:[%s18344_s1 + $0x28] sm:$0xff]  ;;  %vm433_vm2 = vsmask.f32 3328 }
   0xd   : > { %v13790_v2 = vld [vmem:[%s18344_s1 + $0xb8] sm:$0xff]  ;;  %870 = vmatpush.bf16.msra.mxu1 %v13774_v1  ;;  %v13789_v6 = vld [vmem:[%s18344_s1 + $0xb0] sm:$0xff]  ;;  %v13788_v10 = vld [vmem:[%s18344_s1 + $0xa8] sm:$0xff]  ;;  %vm434_vm3 = vsmask.f32 7440  ;;  %vm288_vm6 = vcmask 1040384  }
   0xe   : > { %v13806_v3 = vld [vmem:[%s18344_s1 + $0xf8] sm:$0xff]  ;;  %1099 = vmatpush.bf16.msra.mxu2 %v13790_v2  ;;  %v13805_v7 = vld [vmem:[%s18344_s1 + $0xf0] sm:$0xff]  ;;  %v13804_v11 = vld [vmem:[%s18344_s1 + $0xe8] sm:$0xff]  ;;  %s14328_s9 = scalar_lea.vmem %s18343_s0, %s14143_s19  ;;  %vm289_vm7 = vsmask.f32 256  ;;  %vm3042_vm11 = vcmask 1043456  }
   0xf   : > { %1294 = vmatpush.bf16.msra.mxu3 %v13806_v3  ;;  %v13779_v12 = vld [vmem:[%s18344_s1 + $0x60] sm:$0xff]  ;;  %v425_v18 = vld [vmem:[%s14328_s9 + $0x8] sm:$0x1]  ;;  %v13778_v23 = vld [vmem:[%s18344_s1 + $0x58] sm:$0xff]  ;;  %vm339_vm9 = vsmask.f32 7938 }
  0x10   : > { %726 = vmatpush.bf16.msra.mxu0 %v13781_v4  ;;  %v13771_v13 = vld [vmem:[%s18344_s1 + $0x20] sm:$0xff]  ;;  %v13770_v27 = vld [vmem:[%s18344_s1 + $0x18] sm:$0xff]  ;;  %v456_v30 = vshll.u32 %v425_v18, 16  ;;  %v13777_v36 = vld [vmem:[%s18344_s1 + $0x50] sm:$0xff]  ;;  %v951_v40 = vrot.slane %v425_v18, 5  ;;  %s13758_s16 = sshll.u32 %s18366_s25, 8 }
  0x11   : > { %871 = vmatpush.bf16.msra.mxu1 %v13773_v5  ;;  %v13787_v14 = vld [vmem:[%s18344_s1 + $0xa0] sm:$0xff]  ;;  %v13786_v32 = vld [vmem:[%s18344_s1 + $0x98] sm:$0xff]  ;;  %v13769_v37 = vld [vmem:[%s18344_s1 + $0x10] sm:$0xff]  ;;  %vm2880_vm13 = vsmask.f32 4368  ;;  %s17674_s22 = scalar_lea.vmem %s18350_s7, %s13758_s16 }
  0x12   : > { %1100 = vmatpush.bf16.msra.mxu2 %v13789_v6  ;;  %v13803_v15 = vld [vmem:[%s18344_s1 + $0xe0] sm:$0xff]  ;;  %v13802_v33 = vld [vmem:[%s18344_s1 + $0xd8] sm:$0xff]  ;;  %v13785_v41 = vld [vmem:[%s18344_s1 + $0x90] sm:$0xff]  ;;  %v458_v44 = vrot.slane %v456_v30, 5 }
  0x13   : > { %1295 = vmatpush.bf16.msra.mxu3 %v13805_v7  ;;  %v393_v16 = vld [vmem:[%s14328_s9] sm:$0xf]  ;;  %v394_v17 = vld [vmem:[%s14328_s9 + $0x4] sm:$0xf]  ;;  %vm14369_vm4 = vmor %vm943_vm0, %vm944_vm1 }
  0x14   : > { %727 = vmatpush.bf16.msra.mxu0 %v13780_v8  ;;  %v437_v19 = vshrl.u32 %v393_v16, 16  ;;  %v440_v20 = vshll.u32 %v393_v16, 16  ;;  %v446_v21 = vshll.u32 %v394_v17, 16  ;;  %v450_v22 = vshrl.u32 %v394_v17, 16  ;;  %v919_v31 = vld [vmem:[%s14328_s9] sm:$0xe]  ;;  %vm14379_vm5 = vmor %vm433_vm2, %vm434_vm3 }
  0x15   : > { %872 = vmatpush.bf16.msra.mxu1 %v13772_v9  ;;  %v948_v26 = vrot.slane %v394_v17, 5  ;;  %v11436_v38 = vrot.slane %v919_v31, 9  ;;  %v395_v46 = vld [vmem:[%s14328_s9 + $0xc] sm:$0xf]  ;;  %v13801_v47 = vld [vmem:[%s18344_s1 + $0xd0] sm:$0xff]  ;;  %v13775_v2 = vld [vmem:[%s18344_s1 + $0x40] sm:$0xff] }
  0x16   : > { %1101 = vmatpush.bf16.msra.mxu2 %v13788_v10  ;;  %v439_v24 = vrot.slane %v437_v19, 4  ;;  %v442_v25 = vrot.slane %v440_v20, 5  ;;  %v448_v28 = vrot.slane %v446_v21, 5  ;;  %v452_v29 = vrot.slane %v450_v22, 4  ;;  %v14384_v49 = vld [vmem:[%s14328_s9 + $0x10] sm:$0xf]  ;;  %vm15403_vm8 = vmand %vm288_vm6, %vm289_vm7 }
  0x17   : > { %1296 = vmatpush.bf16.msra.mxu3 %v13804_v11  ;;  %v950_v39 = vrot.slane %v948_v26, 4  ;;  %v949_v50 = vsel %vm14369_vm4, %v11436_v38, %v948_v26  ;;  %v461_v52 = vshrl.u32 %v395_v46, 16  ;;  %v464_v53 = vshll.u32 %v395_v46, 16  ;;  %v13776_v54 = vld [vmem:[%s18344_s1 + $0x48] sm:$0xff]  ;;  %v13767_v3 = vld [vmem:[%s18344_s1] sm:$0xff]  ;;  %v13838_v11 = vld [vmem:[%s18344_s1 + $0x1b8] sm:$0xff] }
  0x18   : > { %728 = vmatpush.bf16.msra.mxu0 %v13779_v12  ;;  %v443_v34 = vor.u32 %v442_v25, %v439_v24  ;;  %v453_v35 = vor.u32 %v452_v29, %v448_v28  ;;  %v13768_v55 = vld [vmem:[%s18344_s1 + $0x8] sm:$0xff]  ;;  %v470_v58 = vshll.u32 %v14384_v49, 16  ;;  %v474_v59 = vshrl.u32 %v14384_v49, 16  ;;  %v13783_v8 = vld [vmem:[%s18344_s1 + $0x80] sm:$0xff]  ;;  %v426_v10 = vld [vmem:[%s14328_s9 + $0x14] sm:$0x1] }
  0x19   : > { %873 = vmatpush.bf16.msra.mxu1 %v13771_v13  ;;  %v952_v51 = vsel %vm14369_vm4, %v950_v39, %v951_v40  ;;  %v13784_v60 = vld [vmem:[%s18344_s1 + $0x88] sm:$0xff]  ;;  %v1019_v0 = vunpack.c.l.b16 %v949_v50  ;;  %v463_v4 = vrot.slane %v461_v52, 4  ;;  %v466_v5 = vrot.slane %v464_v53, 5  ;;  %v13799_v9 = vld [vmem:[%s18344_s1 + $0xc0] sm:$0xff]  ;;  %v13814_v12 = vld [vmem:[%s18344_s1 + $0x138] sm:$0xff] }
  0x1a   : > { %1102 = vmatpush.bf16.msra.mxu2 %v13787_v14  ;;  %v444_v42 = vrot.slane %v443_v34, 4  ;;  %v454_v43 = vrot.slane %v453_v35, 4  ;;  %v13800_v61 = vld [vmem:[%s18344_s1 + $0xc8] sm:$0xff]  ;;  %v1020_v1 = vunpack.c.l.b16 %v952_v51  ;;  %v472_v6 = vrot.slane %v470_v58, 5  ;;  %v13759_v14 = vld [vmem:[%s14328_s9] sm:$0xff]  ;;  %v13846_v20 = vld [vmem:[%s18344_s1 + $0x1f8] sm:$0xff] }
  0x1b   : > { %1297 = vmatpush.bf16.msra.mxu3 %v13803_v15  ;;  %v476_v7 = vrot.slane %v474_v59, 4  ;;  %v13791_v16 = vld [vmem:[%s14328_s9 + $0xc] sm:$0xff]  ;;  %v467_v17 = vor.u32 %v466_v5, %v463_v4  ;;  %v480_v19 = vshll.u32 %v426_v10, 16  ;;  %v13822_v21 = vld [vmem:[%s18344_s1 + $0x178] sm:$0xff]  ;;  %v427_v58 = vld [vmem:[%s14328_s9 + $0x20] sm:$0x1] }
  0x1c   : > { %729 = vmatpush.bf16.msra.mxu0 %v13778_v23  ;;  %v449_v56 = vsel %vm14379_vm5, %v444_v42, %v448_v28  ;;  %v459_v57 = vsel %vm14379_vm5, %v454_v43, %v458_v44  ;;  %v1035_v15 = vpack.c.b16 %v1020_v1, %v1019_v0  ;;  %v920_v22 = vld [vmem:[%s14328_s9 + $0xc] sm:$0xe]  ;;  %v955_v23 = vrot.slane %v14384_v49, 5  ;;  %v13837_v24 = vld [vmem:[%s18344_s1 + $0x1b0] sm:$0xff]  ;;  %v397_v26 = vld [vmem:[%s14328_s9 + $0x18] sm:$0xf] }
  0x1d   : > { %874 = vmatpush.bf16.msra.mxu1 %v13770_v27  ;;  %v645_v62 = vunpack.c.l.b16 %v449_v56  ;;  %v646_v63 = vunpack.c.l.b16 %v459_v57  ;;  %v477_v18 = vor.u32 %v476_v7, %v472_v6  ;;  %v13813_v25 = vld [vmem:[%s18344_s1 + $0x130] sm:$0xff]  ;;  %v468_v27 = vrot.slane %v467_v17, 4  ;;  %v14445_v31 = vld [vmem:[%s14328_s9 + $0x1c] sm:$0xf]  ;;  %v13820_v49 = vld [vmem:[%s18344_s1 + $0x168] sm:$0xff] }
  0x1e   : > { %1103 = vmatpush.bf16.msra.mxu2 %v13786_v32  ;;  %v482_v29 = vrot.slane %v480_v19, 5  ;;  %v11437_v30 = vrot.slane %v920_v22, 9  ;;  %v957_v32 = vrot.slane %v955_v23, 4  ;;  %v13845_v34 = vld [vmem:[%s18344_s1 + $0x1f0] sm:$0xff]  ;;  %v485_v38 = vshrl.u32 %v397_v26, 16  ;;  %vm15438_vm10 = vmand %vm288_vm6, %vm339_vm9 }
  0x1f   : > { %1298 = vmatpush.bf16.msra.mxu3 %v13802_v33  ;;  %v661_v13 = vpack.c.b16 %v646_v63, %v645_v62  ;;  %v478_v28 = vrot.slane %v477_v18, 4  ;;  %v958_v33 = vrot.slane %v426_v10, 5  ;;  %v13821_v35 = vld [vmem:[%s18344_s1 + $0x170] sm:$0xff]  ;;  %v488_v39 = vshll.u32 %v397_v26, 16  ;;  %v13792_v62 = vld [vmem:[%s14328_s9 + $0x18] sm:$0xff]  ;;  %v13811_v10 = vld [vmem:[%s18344_s1 + $0x120] sm:$0xff] }
  0x20   : > { %730 = vmatpush.bf16.msra.mxu0 %v13777_v36  ;;  %v13836_v36 = vld [vmem:[%s18344_s1 + $0x1a8] sm:$0xff]  ;;  %v494_v40 = vshll.u32 %v14445_v31, 16  ;;  %v956_v43 = vsel %vm14369_vm4, %v11437_v30, %v955_v23  ;;  %v498_v44 = vshrl.u32 %v14445_v31, 16  ;;  %v487_v53 = vrot.slane %v485_v38, 4  ;;  %v399_v4 = vld [vmem:[%s14328_s9 + $0x24] sm:$0xf]  ;;  %vm15564_vm12 = vmand %vm3042_vm11, %vm339_vm9 }
  0x21   : > { %875 = vmatpush.bf16.msra.mxu1 %v13769_v37  ;;  %v13812_v37 = vld [vmem:[%s18344_s1 + $0x128] sm:$0xff]  ;;  %v483_v42 = vsel %vm14379_vm5, %v478_v28, %v482_v29  ;;  %v959_v46 = vsel %vm14369_vm4, %v957_v32, %v958_v33  ;;  %v1021_v52 = vunpack.c.l.b16 %v956_v43  ;;  %v504_v1 = vshll.u32 %v427_v58, 16  ;;  %vm15606_vm14 = vmor %vm289_vm7, %vm2880_vm13 }
  0x22   : > { %1104 = vmatpush.bf16.msra.mxu2 %v13785_v41  ;;  %v473_v41 = vsel %vm14379_vm5, %v468_v27, %v472_v6  ;;  %v648_v51 = vunpack.c.l.b16 %v483_v42  ;;  %v496_v56 = vrot.slane %v494_v40, 5  ;;  %v500_v57 = vrot.slane %v498_v44, 4  ;;  %v14482_v5 = vld [vmem:[%s14328_s9 + $0x28] sm:$0xf]  ;;  %v428_v28 = vld [vmem:[%s14328_s9 + $0x2c] sm:$0x1] }
  0x23   : > { %1299 = vmatpush.bf16.msra.mxu3 %v13801_v47  ;;  %v13844_v47 = vld [vmem:[%s18344_s1 + $0x1e8] sm:$0xff]  ;;  %v647_v50 = vunpack.c.l.b16 %v473_v41  ;;  %v512_v17 = vshll.u32 %v399_v4, 16  ;;  %v518_v18 = vshll.u32 %v14482_v5, 16  ;;  %v522_v19 = vshrl.u32 %v14482_v5, 16  ;;  %v922_v41 = vld [vmem:[%s14328_s9 + $0x24] sm:$0xe] }
  0x24   : > { %731 = vmatpush.bf16.msra.mxu0 %v13776_v54  ;;  %v1022_v54 = vunpack.c.l.b16 %v959_v46  ;;  %v501_v0 = vor.u32 %v500_v57, %v496_v56  ;;  %v969_v38 = vrot.slane %v14482_v5, 5  ;;  %v13793_v40 = vld [vmem:[%s14328_s9 + $0x24] sm:$0xff]  ;;  %v11439_v46 = vrot.slane %v922_v41, 9 }
  0x25   : > { %876 = vmatpush.bf16.msra.mxu1 %v13768_v55  ;;  %v490_v55 = vrot.slane %v488_v39, 5  ;;  %v662_v59 = vpack.c.b16 %v648_v51, %v647_v50  ;;  %v520_v29 = vrot.slane %v518_v18, 5  ;;  %v524_v30 = vrot.slane %v522_v19, 4  ;;  %v13834_v50 = vld [vmem:[%s18344_s1 + $0x198] sm:$0xff]  ;;  %v14539_v19 = vld [vmem:[%s14328_s9 + $0x40] sm:$0xf] }
  0x26   : > { %1105 = vmatpush.bf16.msra.mxu2 %v13784_v60  ;;  %v13760_v60 = vld [vmem:[%s14328_s9 + $0xc] sm:$0xff]  ;;  %v502_v7 = vrot.slane %v501_v0, 4  ;;  %v13810_v51 = vld [vmem:[%s18344_s1 + $0x118] sm:$0xff] }
  0x27   : > { %1300 = vmatpush.bf16.msra.mxu3 %v13800_v61  ;;  %v1036_v61 = vpack.c.b16 %v1022_v54, %v1021_v52  ;;  %v491_v63 = vor.u32 %v490_v55, %v487_v53  ;;  %v13842_v52 = vld [vmem:[%s18344_s1 + $0x1d8] sm:$0xff]  ;;  %v401_v53 = vld [vmem:[%s14328_s9 + $0x30] sm:$0xf]  ;;  %v402_v54 = vld [vmem:[%s14328_s9 + $0x34] sm:$0xf] }
  0x28   : > { %732 = vmatpush.bf16.msra.mxu0 %v13775_v2  ;;  %v962_v2 = vrot.slane %v14445_v31, 5  ;;  %v13818_v55 = vld [vmem:[%s18344_s1 + $0x158] sm:$0xff] }
  0x29   : > { %877 = vmatpush.bf16.msra.mxu1 %v13767_v3  ;;  %v921_v3 = vld [vmem:[%s14328_s9 + $0x18] sm:$0xe]  ;;  %v492_v6 = vrot.slane %v491_v63, 4  ;;  %v546_v63 = vshrl.u32 %v402_v54, 16  ;;  %v403_v18 = vld [vmem:[%s14328_s9 + $0x3c] sm:$0xf] }
  0x2a   : > { %1106 = vmatpush.bf16.msra.mxu2 %v13783_v8  ;;  %v506_v8 = vrot.slane %v504_v1, 5 }
  0x2b   : > { %1301 = vmatpush.bf16.msra.mxu3 %v13799_v9  ;;  %733 = vmatmul.bf16.vlgmr.msra.gmra.mxu0 %v661_v13  ;;  %v13835_v9 = vld [vmem:[%s18344_s1 + $0x1a0] sm:$0xff]  ;;  %v964_v13 = vrot.slane %v962_v2, 4 }
  0x2c   : > { %1672 = vmatpush.bf16.msrb.mxu0 %v13814_v12  ;;  %878 = vmatmul.bf16.vlgmr.msra.gmra.mxu1 %v13759_v14  ;;  %v11438_v12 = vrot.slane %v921_v3, 9  ;;  %v965_v14 = vrot.slane %v427_v58, 5  ;;  %v970_v58 = vsel %vm14369_vm4, %v11439_v46, %v969_v38 }
  0x2d   : > { %1107 = vmatmul.bf16.vlgmr.msra.gmra.mxu2 %v1035_v15  ;;  %1922 = vmatpush.bf16.msrb.mxu1 %v13822_v21  ;;  %v13819_v15 = vld [vmem:[%s18344_s1 + $0x160] sm:$0xff]  ;;  %v507_v21 = vsel %vm14379_vm5, %v502_v7, %v506_v8  ;;  %v548_v7 = vrot.slane %v546_v63, 4  ;;  %v429_v8 = vld [vmem:[%s14328_s9 + $0x38] sm:$0x1] }
  0x2e   : > { %2117 = vmatpush.bf16.msrb.mxu2 %v13838_v11  ;;  %1302 = vmatmul.bf16.vlgmr.msra.gmra.mxu3 %v13791_v16  ;;  %v13843_v11 = vld [vmem:[%s18344_s1 + $0x1e0] sm:$0xff]  ;;  %v509_v16 = vshrl.u32 %v399_v4, 16  ;;  %v963_v22 = vsel %vm14369_vm4, %v11438_v12, %v962_v2  ;;  %v966_v23 = vsel %vm14369_vm4, %v964_v13, %v965_v14  ;;  %v650_v27 = vunpack.c.l.b16 %v507_v21  ;;  %v13794_v12 = vld [vmem:[%s14328_s9 + $0x30] sm:$0xff] }
  0x2f   : > { %2495 = vmatpush.bf16.msrb.mxu3 %v13846_v20  ;;  %v497_v20 = vsel %vm14379_vm5, %v492_v6, %v496_v56  ;;  %v1023_v31 = vunpack.c.l.b16 %v963_v22  ;;  %v1024_v32 = vunpack.c.l.b16 %v966_v23  ;;  %v1025_v2 = vunpack.c.l.b16 %v970_v58  ;;  %v13833_v23 = vld [vmem:[%s18344_s1 + $0x190] sm:$0xff] }
  0x30   : > { %1673 = vmatpush.bf16.msrb.mxu0 %v13813_v25  ;;  %v514_v25 = vrot.slane %v512_v17, 5  ;;  %v649_v26 = vunpack.c.l.b16 %v497_v20  ;;  %v923_v17 = vld [vmem:[%s14328_s9 + $0x30] sm:$0xe] }
  0x31   : > { %1923 = vmatpush.bf16.msrb.mxu1 %v13821_v35  ;;  %v1037_v39 = vpack.c.b16 %v1024_v32, %v1023_v31  ;;  %v560_v31 = vshll.u32 %v403_v18, 16  ;;  %v566_v32 = vshll.u32 %v14539_v19, 16 }
  0x32   : > { %2118 = vmatpush.bf16.msrb.mxu2 %v13837_v24  ;;  %v511_v24 = vrot.slane %v509_v16, 4  ;;  %v663_v35 = vpack.c.b16 %v650_v27, %v649_v26  ;;  %v976_v16 = vrot.slane %v402_v54, 5  ;;  %v11440_v26 = vrot.slane %v923_v17, 9 }
  0x33   : > { %2496 = vmatpush.bf16.msrb.mxu3 %v13845_v34  ;;  %v528_v34 = vshll.u32 %v428_v28, 16 }
  0x34   : > { %1674 = vmatpush.bf16.msrb.mxu0 %v13812_v37  ;;  %v515_v33 = vor.u32 %v514_v25, %v511_v24  ;;  %v525_v37 = vor.u32 %v524_v30, %v520_v29  ;;  %v13809_v24 = vld [vmem:[%s18344_s1 + $0x110] sm:$0xff]  ;;  %v978_v27 = vrot.slane %v976_v16, 4  ;;  %v557_v30 = vshrl.u32 %v403_v18, 16 }
  0x35   : > { %1924 = vmatpush.bf16.msrb.mxu1 %v13820_v49  ;;  %v530_v43 = vrot.slane %v528_v34, 5  ;;  %v972_v49 = vrot.slane %v428_v28, 5  ;;  %v13841_v25 = vld [vmem:[%s18344_s1 + $0x1d0] sm:$0xff]  ;;  %v979_v28 = vrot.slane %v429_v8, 5 }
  0x36   : > { %2119 = vmatpush.bf16.msrb.mxu2 %v13836_v36  ;;  %v13761_v36 = vld [vmem:[%s14328_s9 + $0x18] sm:$0xff]  ;;  %v516_v42 = vrot.slane %v515_v33, 4  ;;  %v526_v44 = vrot.slane %v525_v37, 4  ;;  %v570_v33 = vshrl.u32 %v14539_v19, 16 }
  0x37   : > { %2497 = vmatpush.bf16.msrb.mxu3 %v13844_v47  ;;  %v971_v47 = vrot.slane %v969_v38, 4  ;;  %v980_v37 = vsel %vm14369_vm4, %v978_v27, %v979_v28  ;;  %v559_v38 = vrot.slane %v557_v30, 4 }
  0x38   : > { %1675 = vmatpush.bf16.msrb.mxu0 %v13811_v10  ;;  %v521_v56 = vsel %vm14379_vm5, %v516_v42, %v520_v29  ;;  %v531_v57 = vsel %vm14379_vm5, %v526_v44, %v530_v43  ;;  %v13762_v10 = vld [vmem:[%s14328_s9 + $0x24] sm:$0xff]  ;;  %v13817_v29 = vld [vmem:[%s18344_s1 + $0x150] sm:$0xff]  ;;  %v568_v43 = vrot.slane %v566_v32, 5  ;;  %v572_v44 = vrot.slane %v570_v33, 4  ;;  %v14596_v33 = vld [vmem:[%s14328_s9 + $0x58] sm:$0xf] }
  0x39   : > { %1925 = vmatpush.bf16.msrb.mxu1 %v13819_v15  ;;  %v651_v0 = vunpack.c.l.b16 %v521_v56  ;;  %v652_v1 = vunpack.c.l.b16 %v531_v57  ;;  %v552_v15 = vshll.u32 %v429_v8, 16  ;;  %v430_v42 = vld [vmem:[%s14328_s9 + $0x44] sm:$0x1]  ;;  %v13795_v56 = vld [vmem:[%s14328_s9 + $0x3c] sm:$0xff]  ;;  %v407_v32 = vld [vmem:[%s14328_s9 + $0x54] sm:$0xf] }
  0x3a   : > { %2120 = vmatpush.bf16.msrb.mxu2 %v13835_v9  ;;  %v924_v57 = vld [vmem:[%s14328_s9 + $0x3c] sm:$0xe]  ;;  %v986_v63 = vrot.slane %v430_v42, 5 }
  0x3b   : > { %738 = vmatmul.bf16.gmra.mxu0 %v662_v59  ;;  %2498 = vmatpush.bf16.msrb.mxu3 %v13843_v11  ;;  %v973_v59 = vsel %vm14369_vm4, %v971_v47, %v972_v49  ;;  %v664_v9 = vpack.c.b16 %v652_v1, %v651_v0  ;;  %v554_v22 = vrot.slane %v552_v15, 5  ;;  %v1028_v47 = vunpack.c.l.b16 %v980_v37  ;;  %v13832_v0 = vld [vmem:[%s18344_s1 + $0x188] sm:$0xff]  ;;  %v13831_v37 = vld [vmem:[%s18344_s1 + $0x180] sm:$0xff] }
  0x3c   : > { %883 = vmatmul.bf16.gmra.mxu1 %v13760_v60  ;;  %1676 = vmatpush.bf16.msrb.mxu0 %v13810_v51  ;;  %v533_v60 = vshrl.u32 %v401_v53, 16  ;;  %v1026_v3 = vunpack.c.l.b16 %v973_v59  ;;  %v13808_v1 = vld [vmem:[%s18344_s1 + $0x108] sm:$0xff] }
  0x3d   : > { %1112 = vmatmul.bf16.gmra.mxu2 %v1036_v61  ;;  %1926 = vmatpush.bf16.msrb.mxu1 %v13818_v55  ;;  %v536_v61 = vshll.u32 %v401_v53, 16  ;;  %v573_v53 = vor.u32 %v572_v44, %v568_v43  ;;  %v605_v44 = vshrl.u32 %v407_v32, 16 }
  0x3e   : > { %1307 = vmatmul.bf16.gmra.mxu3 %v13792_v62  ;;  %2121 = vmatpush.bf16.msrb.mxu2 %v13834_v50  ;;  %v542_v62 = vshll.u32 %v402_v54, 16  ;;  %v535_v4 = vrot.slane %v533_v60, 4  ;;  %v1038_v11 = vpack.c.b16 %v1026_v3, %v1025_v2  ;;  %v576_v50 = vshll.u32 %v430_v42, 16  ;;  %v13840_v2 = vld [vmem:[%s18344_s1 + $0x1c8] sm:$0xff] }
  0x3f   : > { %2499 = vmatpush.bf16.msrb.mxu3 %v13842_v52  ;;  %v538_v5 = vrot.slane %v536_v61, 5  ;;  %v13763_v52 = vld [vmem:[%s14328_s9 + $0x30] sm:$0xff]  ;;  %v983_v54 = vrot.slane %v14539_v19, 5  ;;  %v574_v60 = vrot.slane %v573_v53, 4  ;;  %v11441_v61 = vrot.slane %v924_v57, 9 }
  0x40   : > { %v544_v6 = vrot.slane %v542_v62, 5  ;;  %1677 = vmatpush.bf16.msrb.mxu0 %v13809_v24  ;;  %v578_v59 = vrot.slane %v576_v50, 5  ;;  %v405_v3 = vld [vmem:[%s14328_s9 + $0x48] sm:$0xf]  ;;  %v13764_v24 = vld [vmem:[%s14328_s9 + $0x3c] sm:$0xff] }
  0x41   : > { %v539_v13 = vor.u32 %v538_v5, %v535_v4  ;;  %1927 = vmatpush.bf16.msrb.mxu1 %v13817_v29  ;;  %v985_v62 = vrot.slane %v983_v54, 4  ;;  %v406_v4 = vld [vmem:[%s14328_s9 + $0x4c] sm:$0xf]  ;;  %v984_v8 = vsel %vm14369_vm4, %v11441_v61, %v983_v54  ;;  %v607_v54 = vrot.slane %v605_v44, 4 }
  0x42   : > { %v549_v14 = vor.u32 %v548_v7, %v544_v6  ;;  %2122 = vmatpush.bf16.msrb.mxu2 %v13833_v23  ;;  %v13816_v5 = vld [vmem:[%s18344_s1 + $0x148] sm:$0xff]  ;;  %v579_v7 = vsel %vm14379_vm5, %v574_v60, %v578_v59  ;;  %v990_v30 = vrot.slane %v406_v4, 5  ;;  %v432_v60 = vld [vmem:[%s14328_s9 + $0x5c] sm:$0x1] }
  0x43   : > { %v540_v20 = vrot.slane %v539_v13, 4  ;;  %2500 = vmatpush.bf16.msrb.mxu3 %v13841_v25  ;;  %v594_v13 = vshrl.u32 %v406_v4, 16  ;;  %v656_v15 = vunpack.c.l.b16 %v579_v7  ;;  %v13797_v7 = vld [vmem:[%s14328_s9 + $0x54] sm:$0xff] }
  0x44   : > { %v550_v21 = vrot.slane %v549_v14, 4  ;;  %1678 = vmatpush.bf16.msrb.mxu0 %v13808_v1  ;;  %v624_v1 = vshll.u32 %v432_v60, 16 }
  0x45   : > { %v545_v34 = vsel %vm14379_vm5, %v540_v20, %v544_v6  ;;  %1928 = vmatpush.bf16.msrb.mxu1 %v13816_v5  ;;  %v997_v5 = vrot.slane %v14596_v33, 5 }
  0x46   : > { %2123 = vmatpush.bf16.msrb.mxu2 %v13832_v0 }
  0x47   : > { %2501 = vmatpush.bf16.msrb.mxu3 %v13840_v2 }
  0x4a   : > { %2124 = vmatpush.bf16.msrb.mxu2 %v13831_v37  ;;  %v13878_v37 = vld [vmem:[%s18344_s1 + $0x78] sm:$0xff] }
  0x4b   : > { %743 = vmatmul.bf16.gmra.mxu0 %v663_v35  ;;  %v555_v35 = vsel %vm14379_vm5, %v550_v21, %v554_v22  ;;  %v596_v21 = vrot.slane %v594_v13, 4  ;;  %v431_v22 = vld [vmem:[%s14328_s9 + $0x50] sm:$0x1]  ;;  %v1000_v13 = vrot.slane %v432_v60, 5 }
  0x4c   : > { %888 = vmatmul.bf16.gmra.mxu1 %v13761_v36  ;;  %v977_v36 = vsel %vm14369_vm4, %v11440_v26, %v976_v16  ;;  %v654_v41 = vunpack.c.l.b16 %v555_v35  ;;  %v1029_v16 = vunpack.c.l.b16 %v984_v8  ;;  %v13796_v26 = vld [vmem:[%s14328_s9 + $0x48] sm:$0xff]  ;;  %v600_v29 = vshll.u32 %v431_v22, 16 }
  0x4d   : > { %1117 = vmatmul.bf16.gmra.mxu2 %v1037_v39  ;;  %v562_v39 = vrot.slane %v560_v31, 5  ;;  %v1027_v46 = vunpack.c.l.b16 %v977_v36  ;;  %v925_v31 = vld [vmem:[%s14328_s9 + $0x48] sm:$0xe]  ;;  %v993_v42 = vrot.slane %v431_v22, 5 }
  0x4e   : > { %1312 = vmatmul.bf16.gmra.mxu3 %v13793_v40  ;;  %v653_v40 = vunpack.c.l.b16 %v545_v34  ;;  %v602_v36 = vrot.slane %v600_v29, 5 }
  0x4f   : > { %v563_v49 = vor.u32 %v562_v39, %v559_v38  ;;  %v1039_v55 = vpack.c.b16 %v1028_v47, %v1027_v46  ;;  %v13807_v38 = vld [vmem:[%s18344_s1 + $0x100] sm:$0xff]  ;;  %v608_v46 = vshll.u32 %v407_v32, 16  ;;  %v614_v47 = vshll.u32 %v14596_v33, 16 }
  0x50   : > { %v665_v51 = vpack.c.b16 %v654_v41, %v653_v40  ;;  %v13839_v39 = vld [vmem:[%s18344_s1 + $0x1c0] sm:$0xff]  ;;  %v11442_v40 = vrot.slane %v925_v31, 9  ;;  %v992_v41 = vrot.slane %v990_v30, 4  ;;  %1679 = vmatpush.bf16.msrb.mxu0 %v13807_v38 }
  0x51   : > { %v564_v58 = vrot.slane %v563_v49, 4  ;;  %v618_v49 = vshrl.u32 %v14596_v33, 16  ;;  %2502 = vmatpush.bf16.msrb.mxu3 %v13839_v39 }
  0x52   : > { %v994_v53 = vsel %vm14369_vm4, %v992_v41, %v993_v42  ;;  %v11590_v42 = vld [vmem:[%s14328_s9 + $0x14] sm:$0x1] }
  0x53   : > { %v569_v6 = vsel %vm14379_vm5, %v564_v58, %v568_v43  ;;  %v13815_v43 = vld [vmem:[%s18344_s1 + $0x140] sm:$0xff]  ;;  %v620_v57 = vrot.slane %v618_v49, 4 }
  0x54   : > { %v655_v14 = vunpack.c.l.b16 %v569_v6  ;;  %1929 = vmatpush.bf16.msrb.mxu1 %v13815_v43  ;;  %v11822_v49 = vld [vmem:[%s14328_s9 + $0x20] sm:$0x1] }
  0x56   : > { %v666_v23 = vpack.c.b16 %v656_v15, %v655_v14  ;;  %v11588_v14 = vld [vmem:[%s14328_s9 + $0xc] sm:$0xf]  ;;  %v14627_v15 = vld [vmem:[%s14328_s9 + $0x10] sm:$0xf] }
  0x57   : > { %v1387_v22 = vshll.u32 %v11588_v14, 16 }
  0x58   : > { %3429 = vmatpush.bf16.msra.mxu1 %v13878_v37  ;;  %v11593_v37 = vld [vmem:[%s14328_s9 + $0x20] sm:$0x1] }
  0x5b   : > { %748 = vmatmul.bf16.gmra.mxu0 %v664_v9  ;;  %v987_v9 = vsel %vm14369_vm4, %v985_v62, %v986_v63  ;;  %v1032_v62 = vunpack.c.l.b16 %v994_v53 }
  0x5c   : > { %893 = vmatmul.bf16.gmra.mxu1 %v13762_v10  ;;  %v581_v10 = vshrl.u32 %v405_v3, 16  ;;  %v1030_v17 = vunpack.c.l.b16 %v987_v9 }
  0x5d   : > { %1122 = vmatmul.bf16.gmra.mxu2 %v1038_v11  ;;  %v584_v11 = vshll.u32 %v405_v3, 16  ;;  %v13765_v3 = vld [vmem:[%s14328_s9 + $0x48] sm:$0xff] }
  0x5e   : > { %1317 = vmatmul.bf16.gmra.mxu3 %v13794_v12  ;;  %v590_v12 = vshll.u32 %v406_v4, 16  ;;  %v583_v18 = vrot.slane %v581_v10, 4  ;;  %v1040_v25 = vpack.c.b16 %v1030_v17, %v1029_v16  ;;  %v926_v4 = vld [vmem:[%s14328_s9 + $0x54] sm:$0xe]  ;;  %v626_v10 = vrot.slane %v624_v1, 5  ;;  %v13870_v16 = vld [vmem:[%s18344_s1 + $0x38] sm:$0xff] }
  0x5f   : > { %v586_v19 = vrot.slane %v584_v11, 5  ;;  %v11443_v11 = vrot.slane %v926_v4, 9  ;;  %v13854_v17 = vld [vmem:[%s18344_s1 + $0x238] sm:$0xff]  ;;  %3574 = vmatpush.bf16.msra.mxu2 %v13870_v16  ;;  %v11823_v16 = vld [vmem:[%s14328_s9 + $0x24] sm:$0xf] }
  0x60   : > { %v592_v20 = vrot.slane %v590_v12, 5  ;;  %v999_v12 = vrot.slane %v997_v5, 4  ;;  %2745 = vmatpush.bf16.msra.mxu0 %v13854_v17 }
  0x61   : > { %v587_v27 = vor.u32 %v586_v19, %v583_v18  ;;  %v13886_v18 = vld [vmem:[%s18344_s1 + $0xb8] sm:$0xff] }
  0x62   : > { %v597_v28 = vor.u32 %v596_v21, %v592_v20  ;;  %v11820_v19 = vld [vmem:[%s14328_s9 + $0x18] sm:$0xf]  ;;  %v1384_v21 = vshrl.u32 %v11588_v14, 16  ;;  %3799 = vmatpush.bf16.msra.mxu3 %v13886_v18 }
  0x63   : > { %v588_v34 = vrot.slane %v587_v27, 4  ;;  %v998_v27 = vsel %vm14369_vm4, %v11443_v11, %v997_v5  ;;  %v2207_v29 = vshrl.u32 %v11820_v19, 16  ;;  %v1774_v5 = vrot.slane %v11590_v42, 5  ;;  %v13869_v11 = vld [vmem:[%s18344_s1 + $0x30] sm:$0xff] }
  0x64   : > { %v598_v35 = vrot.slane %v597_v28, 4  ;;  %v1001_v28 = vsel %vm14369_vm4, %v999_v12, %v1000_v13  ;;  %v1386_v33 = vrot.slane %v1384_v21, 4  ;;  %v13853_v12 = vld [vmem:[%s18344_s1 + $0x230] sm:$0xff]  ;;  %3575 = vmatpush.bf16.msra.mxu2 %v13869_v11 }
  0x65   : > { %v593_v50 = vsel %vm14379_vm5, %v588_v34, %v592_v20  ;;  %v11821_v20 = vld [vmem:[%s14328_s9 + $0x1c] sm:$0xf]  ;;  %v1389_v34 = vrot.slane %v1387_v22, 5  ;;  %v1034_v41 = vunpack.c.l.b16 %v1001_v28  ;;  %v2209_v43 = vrot.slane %v2207_v29, 4  ;;  %v13885_v13 = vld [vmem:[%s18344_s1 + $0xb0] sm:$0xff]  ;;  %2746 = vmatpush.bf16.msra.mxu0 %v13853_v12  ;;  %v13868_v12 = vld [vmem:[%s18344_s1 + $0x28] sm:$0xff] }
  0x66   : > { %v657_v58 = vunpack.c.l.b16 %v593_v50  ;;  %v2216_v31 = vshll.u32 %v11821_v20, 16  ;;  %v2220_v32 = vshrl.u32 %v11821_v20, 16  ;;  %3800 = vmatpush.bf16.msra.mxu3 %v13885_v13  ;;  %v13852_v13 = vld [vmem:[%s18344_s1 + $0x228] sm:$0xff] }
  0x67   : > { %v1390_v50 = vor.u32 %v1389_v34, %v1386_v33  ;;  %v13877_v33 = vld [vmem:[%s18344_s1 + $0x70] sm:$0xff] }
  0x68   : > { %3430 = vmatpush.bf16.msra.mxu1 %v13877_v33  ;;  %3576 = vmatpush.bf16.msra.mxu2 %v13868_v12 }
  0x69   : > { %2747 = vmatpush.bf16.msra.mxu0 %v13852_v13  ;;  %v14758_v13 = vld [vmem:[%s14328_s9 + $0x34] sm:$0xf] }
  0x6b   : > { %753 = vmatmul.bf16.gmra.mxu0 %v665_v51  ;;  %v603_v51 = vsel %vm14379_vm5, %v598_v35, %v602_v36 }
  0x6c   : > { %898 = vmatmul.bf16.gmra.mxu1 %v13763_v52  ;;  %v991_v52 = vsel %vm14369_vm4, %v11442_v40, %v990_v30  ;;  %v658_v59 = vunpack.c.l.b16 %v603_v51  ;;  %v2210_v30 = vshll.u32 %v11820_v19, 16  ;;  %v1033_v40 = vunpack.c.l.b16 %v998_v27  ;;  %v11824_v19 = vld [vmem:[%s14328_s9 + $0x28] sm:$0xf] }
  0x6d   : > { %1127 = vmatmul.bf16.gmra.mxu2 %v1039_v55  ;;  %v610_v55 = vrot.slane %v608_v46, 5  ;;  %v1031_v61 = vunpack.c.l.b16 %v991_v52  ;;  %v14656_v46 = vrot.slane %v2216_v31, 5  ;;  %v1403_v52 = vshll.u32 %v11590_v42, 16 }
  0x6e   : > { %1322 = vmatmul.bf16.gmra.mxu3 %v13795_v56  ;;  %v616_v56 = vrot.slane %v614_v47, 5  ;;  %v667_v2 = vpack.c.b16 %v658_v59, %v657_v58  ;;  %v2212_v44 = vrot.slane %v2210_v30, 5  ;;  %v2222_v47 = vrot.slane %v2220_v32, 4  ;;  %v13798_v58 = vld [vmem:[%s14328_s9 + $0x60] sm:$0xff] }
  0x6f   : > { %v611_v63 = vor.u32 %v610_v55, %v607_v54  ;;  %v1041_v6 = vpack.c.b16 %v1032_v62, %v1031_v61  ;;  %v13766_v54 = vld [vmem:[%s14328_s9 + $0x54] sm:$0xff]  ;;  %v11660_v55 = vld [vmem:[%s14328_s9 + $0xc] sm:$0xe]  ;;  %v2226_v61 = vshll.u32 %v11822_v49, 16  ;;  %v1405_v1 = vrot.slane %v1403_v52, 5 }
  0x70   : > { %v621_v0 = vor.u32 %v620_v57, %v616_v56  ;;  %v1042_v57 = vpack.c.b16 %v1034_v41, %v1033_v40  ;;  %v2213_v59 = vor.u32 %v2212_v44, %v2209_v43  ;;  %v2223_v60 = vor.u32 %v2222_v47, %v14656_v46  ;;  %v11591_v62 = vld [vmem:[%s14328_s9 + $0x18] sm:$0xf] }
  0x71   : > { %v612_v8 = vrot.slane %v611_v63, 4  ;;  %v1391_v63 = vrot.slane %v1390_v50, 4  ;;  %v2234_v27 = vshll.u32 %v11823_v16, 16  ;;  %v2240_v30 = vshll.u32 %v11824_v19, 16  ;;  %v11825_v50 = vld [vmem:[%s14328_s9 + $0x2c] sm:$0x1] }
  0x72   : > { %v622_v9 = vrot.slane %v621_v0, 4  ;;  %v2244_v31 = vshrl.u32 %v11824_v19, 16  ;;  %v1427_v47 = vshll.u32 %v11593_v37, 16 }
  0x73   : > { %v2236_v42 = vrot.slane %v2234_v27, 5  ;;  %v14700_v44 = vrot.slane %v2240_v30, 5 }
  0x7b   : > { %758 = vmatmul.bf16.gmra.mxu0 %v666_v23  ;;  %v1393_v23 = vshll.u32 %v14627_v15, 16 }
  0x7c   : > { %903 = vmatmul.bf16.gmra.mxu1 %v13764_v24  ;;  %v1397_v24 = vshrl.u32 %v14627_v15, 16 }
  0x7d   : > { %1132 = vmatmul.bf16.gmra.mxu2 %v1040_v25  ;;  %v617_v25 = vsel %vm14379_vm5, %v612_v8, %v616_v56  ;;  %v14650_v35 = vrot.slane %v1393_v23, 5  ;;  %v1771_v56 = vrot.slane %v14627_v15, 5  ;;  %v2214_v8 = vrot.slane %v2213_v59, 4 }
  0x7e   : > { %1327 = vmatmul.bf16.gmra.mxu3 %v13796_v26  ;;  %v627_v26 = vsel %vm14379_vm5, %v622_v9, %v626_v10  ;;  %v1399_v36 = vrot.slane %v1397_v24, 4  ;;  %v659_v38 = vunpack.c.l.b16 %v617_v25  ;;  %v2224_v9 = vrot.slane %v2223_v60, 4 }
  0x7f   : > { %v660_v39 = vunpack.c.l.b16 %v627_v26  ;;  %v1773_v4 = vrot.slane %v1771_v56, 4  ;;  %v2228_v10 = vrot.slane %v2226_v61, 5  ;;  %v1396_v17 = vsel %vm14379_vm5, %v1391_v63, %v14650_v35 }
  0x80   : > { %v1400_v51 = vor.u32 %v1399_v36, %v14650_v35  ;;  %v2219_v24 = vsel %vm14379_vm5, %v2214_v8, %v14656_v46  ;;  %v2231_v26 = vshrl.u32 %v11823_v16, 16  ;;  %v1592_v32 = vunpack.c.l.b16 %v1396_v17  ;;  %v11827_v8 = vld [vmem:[%s14328_s9 + $0x34] sm:$0xf] }
  0x81   : > { %v668_v53 = vpack.c.b16 %v660_v39, %v659_v38  ;;  %v1775_v21 = vsel %vm14369_vm4, %v1773_v4, %v1774_v5  ;;  %v2229_v25 = vsel %vm14379_vm5, %v2224_v9, %v2228_v10  ;;  %v2415_v39 = vunpack.c.l.b16 %v2219_v24  ;;  %v14709_v5 = vld [vmem:[%s14328_s9 + $0x28] sm:$0xf] }
  0x82   : > { %v1401_v0 = vrot.slane %v1400_v51, 4  ;;  %v1843_v36 = vunpack.c.l.b16 %v1775_v21  ;;  %v2416_v40 = vunpack.c.l.b16 %v2229_v25  ;;  %v2233_v41 = vrot.slane %v2231_v26, 4 }
  0x83   : > { %v2246_v46 = vrot.slane %v2244_v31, 4  ;;  %v2250_v63 = vshll.u32 %v11825_v50, 16  ;;  %v1781_v4 = vrot.slane %v11593_v37, 5  ;;  %v1441_v17 = vshll.u32 %v14709_v5, 16 }
  0x84   : > { %v1406_v18 = vsel %vm14379_vm5, %v1401_v0, %v1405_v1  ;;  %v2237_v59 = vor.u32 %v2236_v42, %v2233_v41  ;;  %v11594_v0 = vld [vmem:[%s14328_s9 + $0x24] sm:$0xf]  ;;  %v1429_v1 = vrot.slane %v1427_v47, 5  ;;  %v2264_v27 = vshll.u32 %v11827_v8, 16 }
  0x85   : > { %v1593_v34 = vunpack.c.l.b16 %v1406_v18  ;;  %v1432_v10 = vshrl.u32 %v11594_v0, 16  ;;  %v1435_v11 = vshll.u32 %v11594_v0, 16  ;;  %v2252_v16 = vrot.slane %v2250_v63, 5 }
  0x86   : > { %v2238_v9 = vrot.slane %v2237_v59, 4  ;;  %v1445_v18 = vshrl.u32 %v14709_v5, 16  ;;  %v14739_v37 = vrot.slane %v1441_v17, 5  ;;  %v14748_v50 = vrot.slane %v2264_v27, 5 }
  0x87   : > { %v1608_v51 = vpack.c.b16 %v1593_v34, %v1592_v32  ;;  %v1434_v33 = vrot.slane %v1432_v10, 4  ;;  %v1437_v34 = vrot.slane %v1435_v11, 5 }
  0x88   : > { %v2243_v32 = vsel %vm14379_vm5, %v2238_v9, %v14700_v44  ;;  %v11597_v9 = vld [vmem:[%s14328_s9 + $0x30] sm:$0xf] }
  0x8b   : > { %763 = vmatmul.bf16.gmra.mxu0 %v667_v2  ;;  %v11668_v2 = vrot.slane %v11660_v55, 9 }
  0x8c   : > { %908 = vmatmul.bf16.gmra.mxu1 %v13765_v3  ;;  %v14667_v3 = vld [vmem:[%s14328_s9 + $0x1c] sm:$0xf] }
  0x8d   : > { %1137 = vmatmul.bf16.gmra.mxu2 %v1041_v6  ;;  %v1408_v6 = vshrl.u32 %v11591_v62, 16  ;;  %v1417_v14 = vshll.u32 %v14667_v3, 16  ;;  %v1421_v15 = vshrl.u32 %v14667_v3, 16  ;;  %v1772_v20 = vsel %vm14369_vm4, %v11668_v2, %v1771_v56 }
  0x8e   : > { %1332 = vmatmul.bf16.gmra.mxu3 %v13797_v7  ;;  %v1411_v7 = vshll.u32 %v11591_v62, 16  ;;  %v1842_v35 = vunpack.c.l.b16 %v1772_v20  ;;  %v1778_v49 = vrot.slane %v14667_v3, 5  ;;  %v2247_v62 = vor.u32 %v2246_v46, %v14700_v44  ;;  %v13876_v44 = vld [vmem:[%s18344_s1 + $0x68] sm:$0xff]  ;;  %v11828_v46 = vld [vmem:[%s14328_s9 + $0x38] sm:$0x1] }
  0x8f   : > { %v1410_v22 = vrot.slane %v1408_v6, 4  ;;  %v1419_v28 = vrot.slane %v1417_v14, 5  ;;  %v1423_v29 = vrot.slane %v1421_v15, 4  ;;  %v13884_v14 = vld [vmem:[%s18344_s1 + $0xa8] sm:$0xff]  ;;  %3431 = vmatpush.bf16.msra.mxu1 %v13876_v44  ;;  %v2274_v59 = vshll.u32 %v11828_v46, 16 }
  0x90   : > { %v1413_v23 = vrot.slane %v1411_v7, 5  ;;  %v1858_v52 = vpack.c.b16 %v1843_v36, %v1842_v35  ;;  %v1780_v3 = vrot.slane %v1778_v49, 4  ;;  %v11826_v7 = vld [vmem:[%s14328_s9 + $0x30] sm:$0xf]  ;;  %v2248_v15 = vrot.slane %v2247_v62, 4  ;;  %3801 = vmatpush.bf16.msra.mxu3 %v13884_v14 }
  0x91   : > { %v1424_v43 = vor.u32 %v1423_v29, %v1419_v28  ;;  %v2255_v25 = vshrl.u32 %v11826_v7, 16  ;;  %v2258_v26 = vshll.u32 %v11826_v7, 16  ;;  %v2276_v17 = vrot.slane %v2274_v59, 5 }
  0x92   : > { %v1414_v38 = vor.u32 %v1413_v23, %v1410_v22  ;;  %v1782_v22 = vsel %vm14369_vm4, %v1780_v3, %v1781_v4  ;;  %v2253_v36 = vsel %vm14379_vm5, %v2248_v15, %v2252_v16 }
  0x93   : > { %v1425_v61 = vrot.slane %v1424_v43, 4  ;;  %v1845_v42 = vunpack.c.l.b16 %v1782_v22  ;;  %v11596_v43 = vld [vmem:[%s14328_s9 + $0x2c] sm:$0x1]  ;;  %v2257_v47 = vrot.slane %v2255_v25, 4  ;;  %v1465_v22 = vshll.u32 %v14758_v13, 16  ;;  %v13851_v25 = vld [vmem:[%s18344_s1 + $0x220] sm:$0xff] }
  0x94   : > { %v1788_v16 = vrot.slane %v11596_v43, 5  ;;  %2748 = vmatpush.bf16.msra.mxu0 %v13851_v25  ;;  %v11600_v25 = vld [vmem:[%s14328_s9 + $0x3c] sm:$0xf] }
  0x95   : > { %v1430_v19 = vsel %vm14379_vm5, %v1425_v61, %v1429_v1 }
  0x9b   : > { %768 = vmatmul.bf16.gmra.mxu0 %v668_v53  ;;  %v1415_v53 = vrot.slane %v1414_v38, 4  ;;  %v1447_v38 = vrot.slane %v1445_v18, 4 }
  0x9c   : > { %913 = vmatmul.bf16.gmra.mxu1 %v13766_v54  ;;  %v11661_v54 = vld [vmem:[%s14328_s9 + $0x18] sm:$0xe] }
  0x9d   : > { %1142 = vmatmul.bf16.gmra.mxu2 %v1042_v57  ;;  %v13823_v57 = vld [vmem:[%s14328_s9 + $0x18] sm:$0xff]  ;;  %v11669_v2 = vrot.slane %v11661_v54, 9  ;;  %v1420_v6 = vsel %vm14379_vm5, %v1415_v53, %v1419_v28  ;;  %v2268_v28 = vshrl.u32 %v11827_v8, 16  ;;  %v2418_v53 = vunpack.c.l.b16 %v2253_v36 }
  0x9e   : > { %1337 = vmatmul.bf16.gmra.mxu3 %v13798_v58  ;;  %v2431_v58 = vpack.c.b16 %v2416_v40, %v2415_v39  ;;  %v14728_v20 = vunpack.c.l.b16 %v1420_v6  ;;  %v1595_v40 = vunpack.c.l.b16 %v1430_v19  ;;  %v1438_v54 = vor.u32 %v1437_v34, %v1434_v33  ;;  %v13824_v6 = vld [vmem:[%s14328_s9 + $0x24] sm:$0xff] }
  0x9f   : > { %v1779_v21 = vsel %vm14369_vm4, %v11669_v2, %v1778_v49  ;;  %v2260_v49 = vrot.slane %v2258_v26, 5  ;;  %v13883_v26 = vld [vmem:[%s18344_s1 + $0xa0] sm:$0xff] }
  0xa0   : > { %v1844_v41 = vunpack.c.l.b16 %v1779_v21  ;;  %v1609_v62 = vpack.c.b16 %v1595_v40, %v14728_v20  ;;  %v1439_v8 = vrot.slane %v1438_v54, 4  ;;  %v1456_v20 = vshrl.u32 %v11597_v9, 16  ;;  %3802 = vmatpush.bf16.msra.mxu3 %v13883_v26 }
  0xa1   : > { %v2261_v0 = vor.u32 %v2260_v49, %v2257_v47  ;;  %v1459_v21 = vshll.u32 %v11597_v9, 16  ;;  %v14792_v49 = vld [vmem:[%s14328_s9 + $0x38] sm:$0x1] }
  0xa2   : > { %v1859_v63 = vpack.c.b16 %v1845_v42, %v1844_v41  ;;  %v1444_v27 = vsel %vm14379_vm5, %v1439_v8, %v14739_v37 }
  0xa3   : > { %v2262_v18 = vrot.slane %v2261_v0, 4  ;;  %v1596_v54 = vunpack.c.l.b16 %v1444_v27  ;;  %v11663_v0 = vld [vmem:[%s14328_s9 + $0x30] sm:$0xe] }
  0xa8   : > { %v734_v55 = vpop.f32.mrf.mxu0 }
  0xa9   : > { %v879_v56 = vpop.f32.mrf.mxu1 }
  0xaa   : > { %v880_v60 = vadd.f32 %v879_v56, %v734_v55  ;;  %v1448_v55 = vor.u32 %v1447_v38, %v14739_v37  ;;  %v1451_v56 = vshll.u32 %v11596_v43, 16  ;;  %v1458_v37 = vrot.slane %v1456_v20, 4 }
  0xab   : > { %1680 = vmatmul.bf16.vlgmr.msrb.gmra.mxu0 %v1608_v51  ;;  %v2270_v51 = vrot.slane %v2268_v28, 4  ;;  %v11829_v28 = vld [vmem:[%s14328_s9 + $0x3c] sm:$0xf]  ;;  %v1461_v38 = vrot.slane %v1459_v21, 5  ;;  %v14789_v43 = vrot.slane %v1465_v22, 5  ;;  %v11671_v21 = vrot.slane %v11663_v0, 9 }
  0xac   : > { %1930 = vmatmul.bf16.vlgmr.msrb.gmra.mxu1 %v1858_v52  ;;  %v2417_v52 = vunpack.c.l.b16 %v2243_v32  ;;  %v1449_v11 = vrot.slane %v1448_v55, 4  ;;  %v11830_v32 = vld [vmem:[%s14328_s9 + $0x40] sm:$0xf]  ;;  %v2279_v46 = vshrl.u32 %v11829_v28, 16 }
  0xad   : > { %2125 = vmatmul.bf16.vlgmr.msrb.gmra.mxu2 %v13823_v57  ;;  %v11662_v57 = vld [vmem:[%s14328_s9 + $0x24] sm:$0xe]  ;;  %v2271_v1 = vor.u32 %v2270_v51, %v14748_v50  ;;  %v2282_v51 = vshll.u32 %v11829_v28, 16  ;;  %v1795_v28 = vrot.slane %v14792_v49, 5 }
  0xae   : > { %2503 = vmatmul.bf16.vlgmr.msrb.gmra.mxu3 %v2431_v58  ;;  %v1785_v58 = vrot.slane %v14709_v5, 5  ;;  %v2432_v7 = vpack.c.b16 %v2418_v53, %v2417_v52  ;;  %v1453_v5 = vrot.slane %v1451_v56, 5  ;;  %v11670_v12 = vrot.slane %v11662_v57, 9  ;;  %v13875_v57 = vld [vmem:[%s18344_s1 + $0x60] sm:$0xff] }
  0xaf   : > { %v2272_v19 = vrot.slane %v2271_v1, 4  ;;  %v2288_v52 = vshll.u32 %v11830_v32, 16  ;;  %3432 = vmatpush.bf16.msra.mxu1 %v13875_v57  ;;  %v2281_v1 = vrot.slane %v2279_v46, 4 }
  0xb0   : > { %v1108_v23 = vpop.f32.mrf.mxu2  ;;  %v736_v30 = vpop.f32.mrf.mxu0  ;;  %v1787_v15 = vrot.slane %v1785_v58, 4 }
  0xb1   : > { %v1303_v24 = vpop.f32.mrf.mxu3  ;;  %v1148_v29 = vadd.f32 %v1108_v23, %v880_v60  ;;  %v881_v31 = vpop.f32.mrf.mxu1  ;;  %v1469_v23 = vshrl.u32 %v14758_v13, 16  ;;  %v2277_v36 = vsel %vm14379_vm5, %v2272_v19, %v2276_v17 }
  0xb2   : > { %v882_v35 = vadd.f32 %v881_v31, %v736_v30  ;;  %v1786_v30 = vsel %vm14369_vm4, %v11670_v12, %v1785_v58  ;;  %v1789_v31 = vsel %vm14369_vm4, %v1787_v15, %v1788_v16 }
  0xb3   : > { %v14741_v39 = vadd.f32 %v1303_v24, %v1148_v29  ;;  %v13867_v24 = vld [vmem:[%s18344_s1 + $0x20] sm:$0xff]  ;;  %v1454_v29 = vsel %vm14379_vm5, %v1449_v11, %v1453_v5  ;;  %v1471_v44 = vrot.slane %v1469_v23, 4  ;;  %v1846_v56 = vunpack.c.l.b16 %v1786_v30 }
  0xb4   : > { %3577 = vmatpush.bf16.msra.mxu2 %v13867_v24  ;;  %v1597_v55 = vunpack.c.l.b16 %v1454_v29  ;;  %v1847_v58 = vunpack.c.l.b16 %v1789_v31  ;;  %v14816_v30 = vld [vmem:[%s14328_s9 + $0x40] sm:$0xf]  ;;  %v11832_v31 = vld [vmem:[%s14328_s9 + $0x48] sm:$0xf] }
  0xb6   : > { %v1860_v11 = vpack.c.b16 %v1847_v58, %v1846_v56 }
  0xb8   : > { %v1110_v60 = vpop.f32.mrf.mxu2  ;;  %v739_v3 = vpop.f32.mrf.mxu0 }
  0xb9   : > { %v1305_v61 = vpop.f32.mrf.mxu3  ;;  %v1149_v2 = vadd.f32 %v1110_v60, %v882_v35  ;;  %v884_v4 = vpop.f32.mrf.mxu1  ;;  %v2267_v35 = vsel %vm14379_vm5, %v2262_v18, %v14748_v50  ;;  %v2292_v50 = vshrl.u32 %v11830_v32, 16  ;;  %v2420_v60 = vunpack.c.l.b16 %v2277_v36  ;;  %v13825_v18 = vld [vmem:[%s14328_s9 + $0x30] sm:$0xff]  ;;  %v11833_v32 = vld [vmem:[%s14328_s9 + $0x4c] sm:$0xf]  ;;  %v13866_v36 = vld [vmem:[%s18344_s1 + $0x18] sm:$0xff] }
  0xba   : > { %v885_v10 = vadd.f32 %v884_v4, %v739_v3  ;;  %v2419_v59 = vunpack.c.l.b16 %v2267_v35  ;;  %v14802_v3 = vrot.slane %v2288_v52, 5  ;;  %v1483_v35 = vshll.u32 %v11600_v25, 16  ;;  %3578 = vmatpush.bf16.msra.mxu2 %v13866_v36  ;;  %v11603_v36 = vld [vmem:[%s14328_s9 + $0x48] sm:$0xf] }
  0xbb   : > { %v14760_v14 = vadd.f32 %v1305_v61, %v1149_v2  ;;  %1685 = vmatmul.bf16.gmra.mxu0 %v1609_v62  ;;  %v1462_v61 = vor.u32 %v1461_v38, %v1458_v37  ;;  %v1472_v62 = vor.u32 %v1471_v44, %v14789_v43  ;;  %v2284_v2 = vrot.slane %v2282_v51, 5  ;;  %v13850_v37 = vld [vmem:[%s18344_s1 + $0x218] sm:$0xff] }
  0xbc   : > { %1935 = vmatmul.bf16.gmra.mxu1 %v1859_v63  ;;  %v1475_v63 = vshll.u32 %v14792_v49, 16  ;;  %v2294_v4 = vrot.slane %v2292_v50, 4  ;;  %v2433_v5 = vpack.c.b16 %v2420_v60, %v2419_v59  ;;  %v13882_v38 = vld [vmem:[%s18344_s1 + $0x98] sm:$0xff]  ;;  %v1493_v49 = vshrl.u32 %v14816_v30, 16  ;;  %2749 = vmatpush.bf16.msra.mxu0 %v13850_v37 }
  0xbd   : > { %2130 = vmatmul.bf16.gmra.mxu2 %v13824_v6  ;;  %v1792_v6 = vrot.slane %v14758_v13, 5  ;;  %v1463_v12 = vrot.slane %v1462_v61, 4  ;;  %v1473_v19 = vrot.slane %v1472_v62, 4  ;;  %v2285_v13 = vor.u32 %v2284_v2, %v2281_v1  ;;  %3803 = vmatpush.bf16.msra.mxu3 %v13882_v38 }
  0xbe   : > { %2508 = vmatmul.bf16.gmra.mxu3 %v2432_v7  ;;  %v11831_v7 = vld [vmem:[%s14328_s9 + $0x44] sm:$0x1]  ;;  %v1477_v20 = vrot.slane %v1475_v63, 5  ;;  %v2295_v23 = vor.u32 %v2294_v4, %v14802_v3  ;;  %v2303_v50 = vshrl.u32 %v11832_v31, 16  ;;  %v2316_v56 = vshrl.u32 %v11833_v32, 16 }
  0xbf   : > { %v2298_v24 = vshll.u32 %v11831_v7, 16  ;;  %v1794_v27 = vrot.slane %v1792_v6, 4  ;;  %v1468_v29 = vsel %vm14379_vm5, %v1463_v12, %v14789_v43  ;;  %v1485_v62 = vrot.slane %v1483_v35, 5  ;;  %v11602_v7 = vld [vmem:[%s14328_s9 + $0x44] sm:$0x1] }
  0xc0   : > { %v1113_v33 = vpop.f32.mrf.mxu2  ;;  %v741_v41 = vpop.f32.mrf.mxu0  ;;  %v14833_v44 = vunpack.c.l.b16 %v1468_v29 }
  0xc1   : > { %v1308_v34 = vpop.f32.mrf.mxu3  ;;  %v1150_v40 = vadd.f32 %v1113_v33, %v885_v10  ;;  %v886_v42 = vpop.f32.mrf.mxu1  ;;  %v1610_v10 = vpack.c.b16 %v1597_v55, %v1596_v54  ;;  %v1793_v33 = vsel %vm14369_vm4, %v11671_v21, %v1792_v6  ;;  %v2300_v43 = vrot.slane %v2298_v24, 5 }
  0xc2   : > { %v887_v47 = vadd.f32 %v886_v42, %v741_v41  ;;  %v2286_v41 = vrot.slane %v2285_v13, 4  ;;  %v2296_v42 = vrot.slane %v2295_v23, 4  ;;  %v1796_v46 = vsel %vm14369_vm4, %v1794_v27, %v1795_v28 }
  0xc3   : > { %v14794_v53 = vadd.f32 %v1308_v34, %v1150_v40  ;;  %v1480_v34 = vshrl.u32 %v11600_v25, 16  ;;  %v1478_v40 = vsel %vm14379_vm5, %v1473_v19, %v1477_v20  ;;  %v2306_v54 = vshll.u32 %v11832_v31, 16 }
  0xc4   : > { %v2312_v55 = vshll.u32 %v11833_v32, 16  ;;  %v1599_v60 = vunpack.c.l.b16 %v1478_v40  ;;  %v1848_v0 = vunpack.c.l.b16 %v1793_v33  ;;  %v2291_v1 = vsel %vm14379_vm5, %v2286_v41, %v14802_v3 }
  0xc5   : > { %v1482_v61 = vrot.slane %v1480_v34, 4  ;;  %v2301_v2 = vsel %vm14379_vm5, %v2296_v42, %v2300_v43  ;;  %v1849_v6 = vunpack.c.l.b16 %v1796_v46  ;;  %v2308_v12 = vrot.slane %v2306_v54, 5  ;;  %v13826_v34 = vld [vmem:[%s14328_s9 + $0x3c] sm:$0xff]  ;;  %v14863_v42 = vld [vmem:[%s14328_s9 + $0x4c] sm:$0xf] }
  0xc6   : > { %v2318_v3 = vrot.slane %v2316_v56, 4  ;;  %v1499_v19 = vshll.u32 %v11602_v7, 16  ;;  %v1799_v20 = vrot.slane %v14816_v30, 5  ;;  %v1611_v25 = vpack.c.b16 %v1599_v60, %v14833_v44  ;;  %v13849_v56 = vld [vmem:[%s18344_s1 + $0x210] sm:$0xff] }
  0xc7   : > { %v1861_v27 = vpack.c.b16 %v1849_v6, %v1848_v0  ;;  %v1802_v46 = vrot.slane %v11602_v7, 5  ;;  %v1513_v54 = vshll.u32 %v14863_v42, 16  ;;  %v11835_v60 = vld [vmem:[%s14328_s9 + $0x54] sm:$0xf]  ;;  %v11836_v0 = vld [vmem:[%s14328_s9 + $0x58] sm:$0xf]  ;;  %2750 = vmatpush.bf16.msra.mxu0 %v13849_v56 }
  0xc8   : > { %v1115_v8 = vpop.f32.mrf.mxu2  ;;  %v744_v16 = vpop.f32.mrf.mxu0  ;;  %v1501_v38 = vrot.slane %v1499_v19, 5  ;;  %v1801_v41 = vrot.slane %v1799_v20, 4  ;;  %v13827_v56 = vld [vmem:[%s14328_s9 + $0x48] sm:$0xff] }
  0xc9   : > { %v1310_v9 = vpop.f32.mrf.mxu3  ;;  %v1151_v15 = vadd.f32 %v1115_v8, %v887_v47  ;;  %v889_v17 = vpop.f32.mrf.mxu1  ;;  %v1489_v47 = vshll.u32 %v14816_v30, 16 }
  0xca   : > { %v890_v22 = vadd.f32 %v889_v17, %v744_v16  ;;  %v2421_v16 = vunpack.c.l.b16 %v2291_v1  ;;  %v2422_v17 = vunpack.c.l.b16 %v2301_v2 }
  0xcb   : > { %v14809_v26 = vadd.f32 %v1310_v9, %v1151_v15  ;;  %1690 = vmatmul.bf16.gmra.mxu0 %v1610_v10  ;;  %v14847_v8 = vrot.slane %v1489_v47, 5  ;;  %v1495_v9 = vrot.slane %v1493_v49, 4  ;;  %v13874_v10 = vld [vmem:[%s18344_s1 + $0x58] sm:$0xff]  ;;  %v14853_v15 = vrot.slane %v2312_v55, 5  ;;  %v13865_v55 = vld [vmem:[%s18344_s1 + $0x10] sm:$0xff] }
  0xcc   : > { %1940 = vmatmul.bf16.gmra.mxu1 %v1860_v11  ;;  %v11834_v11 = vld [vmem:[%s14328_s9 + $0x50] sm:$0x1]  ;;  %v2434_v35 = vpack.c.b16 %v2422_v17, %v2421_v16  ;;  %3579 = vmatpush.bf16.msra.mxu2 %v13865_v55  ;;  %v2330_v16 = vshll.u32 %v11835_v60, 16 }
  0xcd   : > { %2135 = vmatmul.bf16.gmra.mxu2 %v13825_v18  ;;  %v1486_v18 = vor.u32 %v1485_v62, %v1482_v61  ;;  %3433 = vmatpush.bf16.msra.mxu1 %v13874_v10  ;;  %v1496_v21 = vor.u32 %v1495_v9, %v14847_v8  ;;  %v2322_v13 = vshll.u32 %v11834_v11, 16  ;;  %v2319_v29 = vor.u32 %v2318_v3, %v14853_v15 }
  0xce   : > { %2513 = vmatmul.bf16.gmra.mxu3 %v2433_v5  ;;  %v2305_v5 = vrot.slane %v2303_v50, 4  ;;  %v1507_v50 = vshll.u32 %v11603_v36, 16  ;;  %v2327_v3 = vshrl.u32 %v11835_v60, 16 }
  0xcf   : > { %v1487_v30 = vrot.slane %v1486_v18, 4  ;;  %v1497_v44 = vrot.slane %v1496_v21, 4  ;;  %v2324_v47 = vrot.slane %v2322_v13, 5  ;;  %v14897_v18 = vld [vmem:[%s14328_s9 + $0x50] sm:$0x1] }
  0xd0   : > { %v1118_v51 = vpop.f32.mrf.mxu2  ;;  %v746_v58 = vpop.f32.mrf.mxu0  ;;  %v2309_v28 = vor.u32 %v2308_v12, %v2305_v5  ;;  %v1509_v9 = vrot.slane %v1507_v50, 5  ;;  %v14894_v12 = vrot.slane %v1513_v54, 5 }
  0xd1   : > { %v1313_v52 = vpop.f32.mrf.mxu3  ;;  %v1152_v57 = vadd.f32 %v1118_v51, %v890_v22  ;;  %v891_v59 = vpop.f32.mrf.mxu1  ;;  %v11664_v22 = vld [vmem:[%s14328_s9 + $0x3c] sm:$0xe]  ;;  %v2320_v51 = vrot.slane %v2319_v29, 4  ;;  %v1502_v61 = vsel %vm14379_vm5, %v1497_v44, %v1501_v38 }
  0xd2   : > { %v892_v63 = vadd.f32 %v891_v59, %v746_v58  ;;  %v11672_v40 = vrot.slane %v11664_v22, 9  ;;  %v2310_v49 = vrot.slane %v2309_v28, 4  ;;  %v1492_v58 = vsel %vm14379_vm5, %v1487_v30, %v14847_v8  ;;  %v11665_v30 = vld [vmem:[%s14328_s9 + $0x48] sm:$0xe] }
  0xd3   : > { %v14844_v4 = vadd.f32 %v1313_v52, %v1152_v57  ;;  %v1504_v52 = vshrl.u32 %v11603_v36, 16  ;;  %v13881_v57 = vld [vmem:[%s18344_s1 + $0x90] sm:$0xff]  ;;  %v1517_v59 = vshrl.u32 %v14863_v42, 16  ;;  %v2325_v7 = vsel %vm14379_vm5, %v2320_v51, %v2324_v47 }
  0xd4   : > { %v1800_v62 = vsel %vm14369_vm4, %v11672_v40, %v1799_v20  ;;  %v2315_v6 = vsel %vm14379_vm5, %v2310_v49, %v14853_v15  ;;  %3804 = vmatpush.bf16.msra.mxu3 %v13881_v57  ;;  %v2336_v20 = vshll.u32 %v11836_v0, 16  ;;  %v2340_v15 = vshrl.u32 %v11836_v0, 16 }
  0xd5   : > { %v1506_v8 = vrot.slane %v1504_v52, 4  ;;  %v1519_v19 = vrot.slane %v1517_v59, 4  ;;  %v1600_v22 = vunpack.c.l.b16 %v1492_v58  ;;  %v1601_v13 = vunpack.c.l.b16 %v1502_v61  ;;  %v11606_v52 = vld [vmem:[%s14328_s9 + $0x54] sm:$0xf]  ;;  %v14914_v59 = vld [vmem:[%s14328_s9 + $0x58] sm:$0xf] }
  0xd6   : > { %v2424_v28 = vunpack.c.l.b16 %v2325_v7  ;;  %v1806_v36 = vrot.slane %v14863_v42, 5  ;;  %v2342_v38 = vrot.slane %v2340_v15, 4  ;;  %v11673_v58 = vrot.slane %v11665_v30, 9  ;;  %v11838_v7 = vld [vmem:[%s14328_s9 + $0x60] sm:$0xf] }
  0xd7   : > { %v1510_v29 = vor.u32 %v1509_v9, %v1506_v8  ;;  %v1612_v40 = vpack.c.b16 %v1601_v13, %v1600_v22  ;;  %v1537_v8 = vshll.u32 %v14914_v59, 16  ;;  %v1541_v9 = vshrl.u32 %v14914_v59, 16 }
  0xd8   : > { %v1120_v23 = vpop.f32.mrf.mxu2  ;;  %v749_v32 = vpop.f32.mrf.mxu0  ;;  %v2351_v15 = vshrl.u32 %v11838_v7, 16  ;;  %v1807_v22 = vsel %vm14369_vm4, %v11673_v58, %v1806_v36 }
  0xd9   : > { %v1315_v24 = vpop.f32.mrf.mxu3  ;;  %v1153_v31 = vadd.f32 %v1120_v23, %v892_v63  ;;  %v894_v33 = vpop.f32.mrf.mxu1  ;;  %v1803_v63 = vsel %vm14369_vm4, %v1801_v41, %v1802_v46  ;;  %v1850_v23 = vunpack.c.l.b16 %v1800_v62  ;;  %v1511_v49 = vrot.slane %v1510_v29, 4 }
  0xda   : > { %v895_v37 = vadd.f32 %v894_v33, %v749_v32  ;;  %v11837_v32 = vld [vmem:[%s14328_s9 + $0x5c] sm:$0x1]  ;;  %v2329_v33 = vrot.slane %v2327_v3, 4  ;;  %v1808_v62 = vrot.slane %v1806_v36, 4  ;;  %v1543_v29 = vrot.slane %v1541_v9, 4 }
  0xdb   : > { %v14865_v43 = vadd.f32 %v1315_v24, %v1153_v31  ;;  %1695 = vmatmul.bf16.gmra.mxu0 %v1611_v25  ;;  %v13873_v24 = vld [vmem:[%s18344_s1 + $0x50] sm:$0xff]  ;;  %v1851_v25 = vunpack.c.l.b16 %v1803_v63  ;;  %v1523_v31 = vshll.u32 %v14897_v18, 16  ;;  %v2346_v51 = vshll.u32 %v11837_v32, 16 }
  0xdc   : > { %1945 = vmatmul.bf16.gmra.mxu1 %v1861_v27  ;;  %v2423_v27 = vunpack.c.l.b16 %v2315_v6  ;;  %v1531_v6 = vshll.u32 %v11606_v52, 16 }
  0xdd   : > { %2140 = vmatmul.bf16.gmra.mxu2 %v13826_v34  ;;  %v2332_v34 = vrot.slane %v2330_v16, 5  ;;  %3434 = vmatpush.bf16.msra.mxu1 %v13873_v24  ;;  %v1862_v46 = vpack.c.b16 %v1851_v25, %v1850_v23  ;;  %v1525_v57 = vrot.slane %v1523_v31, 5  ;;  %v2348_v3 = vrot.slane %v2346_v51, 5  ;;  %v13864_v16 = vld [vmem:[%s18344_s1 + $0x8] sm:$0xff] }
  0xde   : > { %2518 = vmatmul.bf16.gmra.mxu3 %v2434_v35  ;;  %v1520_v35 = vor.u32 %v1519_v19, %v14894_v12  ;;  %v2435_v47 = vpack.c.b16 %v2424_v28, %v2423_v27  ;;  %v1533_v24 = vrot.slane %v1531_v6, 5  ;;  %3580 = vmatpush.bf16.msra.mxu2 %v13864_v16  ;;  %v14942_v28 = vrot.slane %v1537_v8, 5 }
  0xdf   : > { %v2333_v42 = vor.u32 %v2332_v34, %v2329_v33  ;;  %v1852_v51 = vunpack.c.l.b16 %v1807_v22 }
  0xe0   : > { %v1123_v1 = vpop.f32.mrf.mxu2  ;;  %v751_v11 = vpop.f32.mrf.mxu0  ;;  %v1521_v61 = vrot.slane %v1520_v35, 4 }
  0xe1   : > { %v1318_v2 = vpop.f32.mrf.mxu3  ;;  %v1154_v10 = vadd.f32 %v1123_v1, %v895_v37  ;;  %v896_v5 = vpop.f32.mrf.mxu1  ;;  %v14909_v37 = vrot.slane %v2336_v20, 5  ;;  %v1809_v1 = vrot.slane %v14897_v18, 5  ;;  %v13880_v18 = vld [vmem:[%s18344_s1 + $0x88] sm:$0xff] }
  0xe2   : > { %v897_v17 = vadd.f32 %v896_v5, %v751_v11  ;;  %v1516_v11 = vsel %vm14379_vm5, %v1511_v49, %v14894_v12  ;;  %v2334_v5 = vrot.slane %v2333_v42, 4  ;;  %v1526_v19 = vsel %vm14379_vm5, %v1521_v61, %v1525_v57  ;;  %3805 = vmatpush.bf16.msra.mxu3 %v13880_v18  ;;  %v11666_v61 = vld [vmem:[%s14328_s9 + $0x54] sm:$0xe] }
  0xe3   : > { %v14899_v21 = vadd.f32 %v1318_v2, %v1154_v10  ;;  %v2343_v63 = vor.u32 %v2342_v38, %v14909_v37  ;;  %v1528_v2 = vshrl.u32 %v11606_v52, 16  ;;  %v11839_v10 = vld [vmem:[%s14328_s9 + $0x64] sm:$0xf]  ;;  %v2354_v12 = vshll.u32 %v11838_v7, 16  ;;  %v13828_v18 = vld [vmem:[%s14328_s9 + $0x54] sm:$0xff] }
  0xe4   : > { %v1810_v13 = vsel %vm14369_vm4, %v1808_v62, %v1809_v1  ;;  %v2360_v31 = vshll.u32 %v11839_v10, 16  ;;  %v2364_v32 = vshrl.u32 %v11839_v10, 16  ;;  %v1602_v30 = vunpack.c.l.b16 %v1516_v11 }
  0xe5   : > { %v2344_v20 = vrot.slane %v2343_v63, 4  ;;  %v1530_v23 = vrot.slane %v1528_v2, 4  ;;  %v1603_v36 = vunpack.c.l.b16 %v1526_v19  ;;  %v2339_v38 = vsel %vm14379_vm5, %v2334_v5, %v14909_v37 }
  0xe6   : > { %v1853_v52 = vunpack.c.l.b16 %v1810_v13  ;;  %v14957_v57 = vrot.slane %v2360_v31, 5  ;;  %v2366_v58 = vrot.slane %v2364_v32, 4  ;;  %v2425_v42 = vunpack.c.l.b16 %v2339_v38  ;;  %v14972_v31 = vld [vmem:[%s14328_s9 + $0x64] sm:$0xf] }
  0xe7   : > { %v1813_v62 = vrot.slane %v14914_v59, 5  ;;  %v1613_v1 = vpack.c.b16 %v1603_v36, %v1602_v30 }
  0xe8   : > { %v1125_v41 = vpop.f32.mrf.mxu2  ;;  %v754_v54 = vpop.f32.mrf.mxu0  ;;  %v1863_v2 = vpack.c.b16 %v1853_v52, %v1852_v51  ;;  %v2367_v5 = vor.u32 %v2366_v58, %v14957_v57  ;;  %v11842_v51 = vld [vmem:[%s14328_s9 + $0x70] sm:$0xf] }
  0xe9   : > { %v1320_v44 = vpop.f32.mrf.mxu3  ;;  %v1155_v50 = vadd.f32 %v1125_v41, %v897_v17  ;;  %v899_v55 = vpop.f32.mrf.mxu1  ;;  %v13848_v17 = vld [vmem:[%s18344_s1 + $0x208] sm:$0xff] }
  0xea   : > { %v900_v60 = vadd.f32 %v899_v55, %v754_v54  ;;  %2751 = vmatpush.bf16.msra.mxu0 %v13848_v17  ;;  %v13872_v54 = vld [vmem:[%s18344_s1 + $0x48] sm:$0xff]  ;;  %v1544_v55 = vor.u32 %v1543_v29, %v14942_v28  ;;  %v11609_v29 = vld [vmem:[%s14328_s9 + $0x60] sm:$0xf] }
  0xeb   : > { %v14917_v0 = vadd.f32 %v1320_v44, %v1155_v50  ;;  %1700 = vmatmul.bf16.gmra.mxu0 %v1612_v40  ;;  %v11608_v40 = vld [vmem:[%s14328_s9 + $0x5c] sm:$0x1]  ;;  %v2349_v44 = vsel %vm14379_vm5, %v2344_v20, %v2348_v3  ;;  %v1534_v50 = vor.u32 %v1533_v24, %v1530_v23  ;;  %3435 = vmatpush.bf16.msra.mxu1 %v13872_v54  ;;  %v11674_v20 = vrot.slane %v11666_v61, 9 }
  0xec   : > { %1950 = vmatmul.bf16.gmra.mxu1 %v1862_v46  ;;  %v2353_v46 = vrot.slane %v2351_v15, 4  ;;  %v1547_v37 = vshll.u32 %v11608_v40, 16  ;;  %v1545_v10 = vrot.slane %v1544_v55, 4  ;;  %v1815_v15 = vrot.slane %v1813_v62, 4 }
  0xed   : > { %2145 = vmatmul.bf16.gmra.mxu2 %v13827_v56  ;;  %v11840_v56 = vld [vmem:[%s14328_s9 + $0x68] sm:$0x1]  ;;  %v1535_v9 = vrot.slane %v1534_v50, 4  ;;  %v1814_v32 = vsel %vm14369_vm4, %v11674_v20, %v1813_v62 }
  0xee   : > { %2523 = vmatmul.bf16.gmra.mxu3 %v2435_v47  ;;  %v2356_v47 = vrot.slane %v2354_v12, 5  ;;  %v2370_v6 = vshll.u32 %v11840_v56, 16  ;;  %v1549_v11 = vrot.slane %v1547_v37, 5  ;;  %v1816_v12 = vrot.slane %v11608_v40, 5  ;;  %v11841_v40 = vld [vmem:[%s14328_s9 + $0x6c] sm:$0xf] }
  0xef   : > { %v1540_v23 = vsel %vm14379_vm5, %v1535_v9, %v14942_v28  ;;  %v13847_v28 = vld [vmem:[%s18344_s1 + $0x200] sm:$0xff]  ;;  %v1854_v54 = vunpack.c.l.b16 %v1814_v32  ;;  %v1561_v37 = vshll.u32 %v14972_v31, 16  ;;  %v1565_v56 = vshrl.u32 %v14972_v31, 16  ;;  %v11843_v32 = vld [vmem:[%s14328_s9 + $0x74] sm:$0x1] }
  0xf0   : > { %v1128_v25 = vpop.f32.mrf.mxu2  ;;  %v756_v34 = vpop.f32.mrf.mxu0  ;;  %v2357_v63 = vor.u32 %v2356_v47, %v2353_v46  ;;  %v1550_v24 = vsel %vm14379_vm5, %v1545_v10, %v1549_v11  ;;  %v1817_v36 = vsel %vm14369_vm4, %v1815_v15, %v1816_v12  ;;  %v1552_v46 = vshrl.u32 %v11609_v29, 16  ;;  %2752 = vmatpush.bf16.msra.mxu0 %v13847_v28  ;;  %v13871_v11 = vld [vmem:[%s18344_s1 + $0x40] sm:$0xff] }
  0xf1   : > { %v1323_v27 = vpop.f32.mrf.mxu3  ;;  %v1156_v33 = vadd.f32 %v1128_v25, %v900_v60  ;;  %v901_v35 = vpop.f32.mrf.mxu1  ;;  %v2426_v60 = vunpack.c.l.b16 %v2349_v44  ;;  %v2368_v25 = vrot.slane %v2367_v5, 4  ;;  %v14994_v44 = vunpack.c.l.b16 %v1550_v24  ;;  %3436 = vmatpush.bf16.msra.mxu1 %v13871_v11  ;;  %v15044_v11 = vld [vmem:[%s14328_s9 + $0x64] sm:$0xf] }
  0xf2   : > { %v902_v41 = vadd.f32 %v901_v35, %v756_v34  ;;  %v2358_v22 = vrot.slane %v2357_v63, 4  ;;  %v13879_v34 = vld [vmem:[%s18344_s1 + $0x80] sm:$0xff]  ;;  %v14157_v35 = vld [vmem:[%s14328_s9 + $0x1c] sm:$0xf]  ;;  %v1555_v47 = vshll.u32 %v11609_v29, 16  ;;  %v2375_v62 = vshrl.u32 %v11841_v40, 16 }
  0xf3   : > { %v14950_v49 = vadd.f32 %v1323_v27, %v1156_v33  ;;  %v2436_v19 = vpack.c.b16 %v2426_v60, %v2425_v42  ;;  %v2372_v27 = vrot.slane %v2370_v6, 5  ;;  %v13863_v33 = vld [vmem:[%s18344_s1] sm:$0xff]  ;;  %v2594_v30 = vrot.slane %v14157_v35, 5  ;;  %3806 = vmatpush.bf16.msra.mxu3 %v13879_v34 }
  0xf4   : > { %v2363_v38 = vsel %vm14379_vm5, %v2358_v22, %v14957_v57  ;;  %3581 = vmatpush.bf16.msra.mxu2 %v13863_v33  ;;  %v1855_v60 = vunpack.c.l.b16 %v1817_v36  ;;  %v2388_v6 = vshrl.u32 %v11842_v51, 16  ;;  %v1554_v9 = vrot.slane %v1552_v46, 4 }
  0xf5   : > { %v2373_v55 = vsel %vm14379_vm5, %v2368_v25, %v2372_v27  ;;  %v2427_v61 = vunpack.c.l.b16 %v2363_v38  ;;  %v1557_v10 = vrot.slane %v1555_v47, 5  ;;  %v2596_v5 = vrot.slane %v2594_v30, 4 }
  0xf6   : > { %v2377_v20 = vrot.slane %v2375_v62, 4  ;;  %v2390_v22 = vrot.slane %v2388_v6, 4  ;;  %v1864_v25 = vpack.c.b16 %v1855_v60, %v1854_v54  ;;  %v11956_v62 = vld [vmem:[%s14328_s9 + $0x60] sm:$0xf]  ;;  %v13934_v6 = vld [vmem:[%s18344_s1 + $0x1b8] sm:$0xff] }
  0xf7   : > { %v1558_v29 = vor.u32 %v1557_v10, %v1554_v9  ;;  %4813 = vmatpush.bf16.msrb.mxu3 %v13934_v6  ;;  %v12092_v6 = vld [vmem:[%s14328_s9 + $0x60] sm:$0xe] }
  0xf8   : > { %v1130_v7 = vpop.f32.mrf.mxu2  ;;  %v759_v16 = vpop.f32.mrf.mxu0 }
  0xf9   : > { %v1325_v8 = vpop.f32.mrf.mxu3  ;;  %v1157_v3 = vadd.f32 %v1130_v7, %v902_v41  ;;  %v904_v17 = vpop.f32.mrf.mxu1  ;;  %v14992_v41 = vunpack.c.l.b16 %v1540_v23 }
  0xfa   : > { %v905_v59 = vadd.f32 %v904_v17, %v759_v16  ;;  %v15007_v17 = vrot.slane %v1561_v37, 5 }
  0xfb   : > { %v14963_v13 = vadd.f32 %v1325_v8, %v1157_v3  ;;  %1705 = vmatmul.bf16.gmra.mxu0 %v1613_v1  ;;  %v2378_v1 = vshll.u32 %v11841_v40, 16  ;;  %v2428_v8 = vunpack.c.l.b16 %v2373_v55  ;;  %v14158_v3 = vld [vmem:[%s14328_s9 + $0x20] sm:$0x1]  ;;  %v1614_v24 = vpack.c.b16 %v14994_v44, %v14992_v41  ;;  %v11667_v44 = vld [vmem:[%s14328_s9 + $0x60] sm:$0xe] }
  0xfc   : > { %1955 = vmatmul.bf16.gmra.mxu1 %v1863_v2  ;;  %v2384_v2 = vshll.u32 %v11842_v51, 16  ;;  %v2597_v16 = vrot.slane %v14158_v3, 5  ;;  %v13829_v41 = vld [vmem:[%s14328_s9 + $0x60] sm:$0xff]  ;;  %v1820_v51 = vrot.slane %v14972_v31, 5 }
  0xfd   : > { %2150 = vmatmul.bf16.gmra.mxu2 %v13828_v18  ;;  %v1567_v18 = vrot.slane %v1565_v56, 4  ;;  %v2380_v15 = vrot.slane %v2378_v1, 5  ;;  %v2437_v27 = vpack.c.b16 %v2428_v8, %v2427_v61  ;;  %v2394_v56 = vshll.u32 %v11843_v32, 16  ;;  %v13918_v1 = vld [vmem:[%s18344_s1 + $0x178] sm:$0xff] }
  0xfe   : > { %2528 = vmatmul.bf16.gmra.mxu3 %v2436_v19  ;;  %v15010_v19 = vld [vmem:[%s14328_s9 + $0x68] sm:$0x1]  ;;  %v15013_v12 = vrot.slane %v2384_v2, 5  ;;  %v2598_v38 = vsel %vm14369_vm4, %v2596_v5, %v2597_v16  ;;  %v11675_v61 = vrot.slane %v11667_v44, 9  ;;  %v1822_v31 = vrot.slane %v1820_v51, 4  ;;  %v13902_v2 = vld [vmem:[%s18344_s1 + $0xf8] sm:$0xff]  ;;  %4619 = vmatpush.bf16.msrb.mxu2 %v13918_v1 }
  0xff   : > { %v1568_v34 = vor.u32 %v1567_v18, %v15007_v17  ;;  %v1571_v35 = vshll.u32 %v15010_v19, 16  ;;  %v2381_v55 = vor.u32 %v2380_v15, %v2377_v20  ;;  %v2396_v10 = vrot.slane %v2394_v56, 5  ;;  %3993 = vmatpush.bf16.msrb.mxu0 %v13902_v2 }
 0x100   : > { %v1133_v52 = vpop.f32.mrf.mxu2  ;;  %v761_v58 = vpop.f32.mrf.mxu0  ;;  %v2391_v37 = vor.u32 %v2390_v22, %v15013_v12  ;;  %v3142_v20 = vshrl.u32 %v11956_v62, 16  ;;  %v3649_v1 = vrot.slane %v15044_v11, 5 }
 0x101   : > { %v1328_v50 = vpop.f32.mrf.mxu3  ;;  %v1158_v57 = vadd.f32 %v1133_v52, %v905_v59  ;;  %v906_v42 = vpop.f32.mrf.mxu1  ;;  %v11892_v59 = vld [vmem:[%s14328_s9 + $0x18] sm:$0xe]  ;;  %v1573_v60 = vrot.slane %v1571_v35, 5  ;;  %v2382_v8 = vrot.slane %v2381_v55, 4 }
 0x102   : > { %v907_v63 = vadd.f32 %v906_v42, %v761_v58  ;;  %v11900_v23 = vrot.slane %v11892_v59, 9  ;;  %v1569_v42 = vrot.slane %v1568_v34, 4  ;;  %v2392_v9 = vrot.slane %v2391_v37, 4  ;;  %v13910_v35 = vld [vmem:[%s18344_s1 + $0x138] sm:$0xff] }
 0x103   : > { %v15001_v7 = vadd.f32 %v1328_v50, %v1158_v57  ;;  %v2666_v50 = vunpack.c.l.b16 %v2598_v38  ;;  %v3145_v59 = vshll.u32 %v11956_v62, 16  ;;  %4370 = vmatpush.bf16.msrb.mxu1 %v13910_v35 }
 0x104   : > { %v2595_v36 = vsel %vm14369_vm4, %v11900_v23, %v2594_v30  ;;  %v1559_v30 = vrot.slane %v1558_v29, 4  ;;  %v1574_v18 = vsel %vm14379_vm5, %v1569_v42, %v1573_v60  ;;  %v2387_v29 = vsel %vm14379_vm5, %v2382_v8, %v15013_v12  ;;  %v13830_v60 = vld [vmem:[%s14328_s9 + $0x6c] sm:$0xff] }
 0x105   : > { %v2665_v52 = vunpack.c.l.b16 %v2595_v36  ;;  %v2397_v32 = vsel %vm14379_vm5, %v2392_v9, %v2396_v10  ;;  %v1607_v34 = vunpack.c.l.b16 %v1574_v18  ;;  %v11958_v9 = vld [vmem:[%s14328_s9 + $0x6c] sm:$0xf]  ;;  %v12100_v18 = vrot.slane %v12092_v6, 9  ;;  %v13855_v6 = vld [vmem:[%s14328_s9 + $0x60] sm:$0xff] }
 0x106   : > { %v1564_v5 = vsel %vm14379_vm5, %v1559_v30, %v15007_v17  ;;  %v3151_v17 = vshll.u32 %v15044_v11, 16 }
 0x107   : > { %v15030_v58 = vpack.c.b16 %v2666_v50, %v2665_v52 }
 0x108   : > { %v1135_v33 = vpop.f32.mrf.mxu2  ;;  %v764_v46 = vpop.f32.mrf.mxu0  ;;  %v3153_v44 = vrot.slane %v3151_v17, 5  ;;  %v3169_v17 = vshll.u32 %v11958_v9, 16 }
 0x109   : > { %v1330_v28 = vpop.f32.mrf.mxu3  ;;  %v1159_v40 = vadd.f32 %v1135_v33, %v907_v63  ;;  %v909_v47 = vpop.f32.mrf.mxu1  ;;  %v1823_v63 = vrot.slane %v15010_v19, 5  ;;  %v1821_v19 = vsel %vm14369_vm4, %v11675_v61, %v1820_v51  ;;  %v11972_v51 = vld [vmem:[%s14328_s9 + $0x68] sm:$0x1] }
 0x10a   : > { %v910_v54 = vadd.f32 %v909_v47, %v764_v46  ;;  %v1856_v36 = vunpack.c.l.b16 %v1821_v19  ;;  %v3147_v46 = vrot.slane %v3145_v59, 5  ;;  %v2429_v47 = vunpack.c.l.b16 %v2387_v29  ;;  %v15084_v59 = vld [vmem:[%s14328_s9 + $0x70] sm:$0xf] }
 0x10b   : > { %v15028_v57 = vadd.f32 %v1330_v28, %v1159_v40  ;;  %1710 = vmatmul.bf16.gmra.mxu0 %v1614_v24  ;;  %v1824_v24 = vsel %vm14369_vm4, %v1822_v31, %v1823_v63  ;;  %v1606_v28 = vunpack.c.l.b16 %v1564_v5  ;;  %v3144_v40 = vrot.slane %v3142_v20, 4 }
 0x10c   : > { %1960 = vmatmul.bf16.gmra.mxu1 %v1864_v25  ;;  %v3155_v25 = vshrl.u32 %v15044_v11, 16  ;;  %v1857_v38 = vunpack.c.l.b16 %v1824_v24  ;;  %v3161_v31 = vshll.u32 %v11972_v51, 16  ;;  %v13901_v11 = vld [vmem:[%s18344_s1 + $0xf0] sm:$0xff]  ;;  %v3651_v19 = vrot.slane %v3649_v1, 4 }
 0x10d   : > { %2155 = vmatmul.bf16.gmra.mxu2 %v13829_v41  ;;  %v2430_v41 = vunpack.c.l.b16 %v2397_v32  ;;  %v3148_v37 = vor.u32 %v3147_v46, %v3144_v40  ;;  %v3652_v20 = vrot.slane %v11972_v51, 5  ;;  %3994 = vmatpush.bf16.msrb.mxu0 %v13901_v11  ;;  %v3166_v24 = vshrl.u32 %v11958_v9, 16  ;;  %v13909_v46 = vld [vmem:[%s18344_s1 + $0x130] sm:$0xff] }
 0x10e   : > { %2533 = vmatmul.bf16.gmra.mxu3 %v2437_v27  ;;  %v3157_v12 = vrot.slane %v3155_v25, 4  ;;  %v1865_v55 = vpack.c.b16 %v1857_v38, %v1856_v36  ;;  %v3163_v5 = vrot.slane %v3161_v31, 5  ;;  %v3650_v36 = vsel %vm14369_vm4, %v12100_v18, %v3649_v1  ;;  %4371 = vmatpush.bf16.msrb.mxu1 %v13909_v46  ;;  %v12093_v18 = vld [vmem:[%s14328_s9 + $0x6c] sm:$0xe] }
 0x10f   : > { %v2438_v61 = vpack.c.b16 %v2430_v41, %v2429_v47  ;;  %v3149_v8 = vrot.slane %v3148_v37, 4  ;;  %v3653_v38 = vsel %vm14369_vm4, %v3651_v19, %v3652_v20  ;;  %v3719_v51 = vunpack.c.l.b16 %v3650_v36 }
 0x110   : > { %v1138_v3 = vpop.f32.mrf.mxu2  ;;  %v766_v22 = vpop.f32.mrf.mxu0  ;;  %v3158_v62 = vor.u32 %v3157_v12, %v3153_v44  ;;  %v3171_v12 = vrot.slane %v3169_v17, 5 }
 0x111   : > { %v1333_v16 = vpop.f32.mrf.mxu3  ;;  %v1160_v15 = vadd.f32 %v1138_v3, %v910_v54  ;;  %v911_v23 = vpop.f32.mrf.mxu1  ;;  %v1615_v54 = vpack.c.b16 %v1607_v34, %v1606_v28  ;;  %v13917_v3 = vld [vmem:[%s18344_s1 + $0x170] sm:$0xff]  ;;  %v3175_v28 = vshll.u32 %v15084_v59, 16  ;;  %v3179_v34 = vshrl.u32 %v15084_v59, 16 }
 0x112   : > { %v912_v27 = vadd.f32 %v911_v23, %v766_v22  ;;  %v3159_v10 = vrot.slane %v3158_v62, 4  ;;  %4620 = vmatpush.bf16.msrb.mxu2 %v13917_v3  ;;  %v3154_v23 = vsel %vm14379_vm5, %v3149_v8, %v3153_v44  ;;  %v3168_v44 = vrot.slane %v3166_v24, 4  ;;  %v11960_v24 = vld [vmem:[%s14328_s9 + $0x78] sm:$0xf] }
 0x113   : > { %v15062_v33 = vadd.f32 %v1333_v16, %v1160_v15  ;;  %v13933_v16 = vld [vmem:[%s18344_s1 + $0x1b0] sm:$0xff]  ;;  %v3349_v47 = vunpack.c.l.b16 %v3154_v23  ;;  %v3656_v3 = vrot.slane %v15084_v59, 5  ;;  %v13916_v59 = vld [vmem:[%s18344_s1 + $0x168] sm:$0xff] }
 0x114   : > { %4814 = vmatpush.bf16.msrb.mxu3 %v13933_v16  ;;  %v3164_v32 = vsel %vm14379_vm5, %v3159_v10, %v3163_v5  ;;  %v3172_v62 = vor.u32 %v3171_v12, %v3168_v44 }
 0x115   : > { %v3350_v41 = vunpack.c.l.b16 %v3164_v32 }
 0x116   : > { %v3173_v23 = vrot.slane %v3172_v62, 4  ;;  %4621 = vmatpush.bf16.msrb.mxu2 %v13916_v59  ;;  %v13908_v62 = vld [vmem:[%s18344_s1 + $0x128] sm:$0xff] }
 0x117   : > { %4372 = vmatpush.bf16.msrb.mxu1 %v13908_v62  ;;  %v13856_v59 = vld [vmem:[%s14328_s9 + $0x6c] sm:$0xff] }
 0x118   : > { %v1140_v52 = vpop.f32.mrf.mxu2  ;;  %v769_v30 = vpop.f32.mrf.mxu0 }
 0x119   : > { %v1335_v50 = vpop.f32.mrf.mxu3  ;;  %v1161_v56 = vadd.f32 %v1140_v52, %v912_v27  ;;  %v914_v42 = vpop.f32.mrf.mxu1  ;;  %v3720_v52 = vunpack.c.l.b16 %v3653_v38 }
 0x11a   : > { %v915_v63 = vadd.f32 %v914_v42, %v769_v30  ;;  %v3365_v30 = vpack.c.b16 %v3350_v41, %v3349_v47  ;;  %v11893_v42 = vld [vmem:[%s14328_s9 + $0x24] sm:$0xe]  ;;  %v3190_v47 = vshrl.u32 %v11960_v24, 16  ;;  %v3193_v41 = vshll.u32 %v11960_v24, 16 }
 0x11b   : > { %v15070_v2 = vadd.f32 %v1335_v50, %v1161_v56  ;;  %1715 = vmatmul.bf16.gmra.mxu0 %v1615_v54  ;;  %v15101_v50 = vrot.slane %v3175_v28, 5  ;;  %v3181_v54 = vrot.slane %v3179_v34, 4  ;;  %v3735_v8 = vpack.c.b16 %v3720_v52, %v3719_v51  ;;  %v15126_v28 = vld [vmem:[%s14328_s9 + $0x7c] sm:$0xf] }
 0x11c   : > { %1965 = vmatmul.bf16.gmra.mxu1 %v1865_v55  ;;  %v11973_v55 = vld [vmem:[%s14328_s9 + $0x74] sm:$0x1]  ;;  %v11901_v16 = vrot.slane %v11893_v42, 9 }
 0x11d   : > { %2160 = vmatmul.bf16.gmra.mxu2 %v13830_v60  ;;  %v14159_v60 = vld [vmem:[%s14328_s9 + $0x28] sm:$0xf]  ;;  %v3182_v9 = vor.u32 %v3181_v54, %v15101_v50  ;;  %v3185_v10 = vshll.u32 %v11973_v55, 16  ;;  %v3659_v32 = vrot.slane %v11973_v55, 5  ;;  %v3178_v46 = vsel %vm14379_vm5, %v3173_v23, %v15101_v50 }
 0x11e   : > { %2538 = vmatmul.bf16.gmra.mxu3 %v2438_v61  ;;  %v2601_v61 = vrot.slane %v14159_v60, 5  ;;  %v3199_v54 = vshll.u32 %v15126_v28, 16  ;;  %v3203_v55 = vshrl.u32 %v15126_v28, 16 }
 0x11f   : > { %v3183_v17 = vrot.slane %v3182_v9, 4 }
 0x120   : > { %v1143_v15 = vpop.f32.mrf.mxu2  ;;  %v771_v27 = vpop.f32.mrf.mxu0  ;;  %v2603_v20 = vrot.slane %v2601_v61, 4  ;;  %v2602_v34 = vsel %vm14369_vm4, %v11901_v16, %v2601_v61  ;;  %v3351_v61 = vunpack.c.l.b16 %v3178_v46  ;;  %v15149_v9 = vrot.slane %v3199_v54, 5  ;;  %v13931_v54 = vld [vmem:[%s18344_s1 + $0x1a0] sm:$0xff] }
 0x121   : > { %v1338_v22 = vpop.f32.mrf.mxu3  ;;  %v1162_v25 = vadd.f32 %v1143_v15, %v915_v63  ;;  %v916_v29 = vpop.f32.mrf.mxu1  ;;  %v14160_v15 = vld [vmem:[%s14328_s9 + $0x2c] sm:$0x1]  ;;  %v2667_v42 = vunpack.c.l.b16 %v2602_v34 }
 0x122   : > { %v917_v35 = vadd.f32 %v916_v29, %v771_v27  ;;  %v12101_v27 = vrot.slane %v12093_v18, 9  ;;  %v3658_v29 = vrot.slane %v3656_v3, 4 }
 0x123   : > { %v15096_v40 = vadd.f32 %v1338_v22, %v1162_v25  ;;  %v2604_v22 = vrot.slane %v14160_v15, 5  ;;  %v13900_v25 = vld [vmem:[%s18344_s1 + $0xe8] sm:$0xff]  ;;  %v14161_v15 = vld [vmem:[%s14328_s9 + $0x34] sm:$0xf] }
 0x124   : > { %3995 = vmatpush.bf16.msrb.mxu0 %v13900_v25  ;;  %v3660_v50 = vsel %vm14369_vm4, %v3658_v29, %v3659_v32  ;;  %v3663_v32 = vrot.slane %v15126_v28, 5  ;;  %v13899_v28 = vld [vmem:[%s18344_s1 + $0xe0] sm:$0xff] }
 0x125   : > { %v2605_v38 = vsel %vm14369_vm4, %v2603_v20, %v2604_v22  ;;  %v11894_v20 = vld [vmem:[%s14328_s9 + $0x30] sm:$0xe]  ;;  %v2608_v22 = vrot.slane %v14161_v15, 5 }
 0x126   : > { %v2668_v60 = vunpack.c.l.b16 %v2605_v38 }
 0x127   : > { %v2610_v46 = vrot.slane %v2608_v22, 4 }
 0x128   : > { %v1145_v37 = vpop.f32.mrf.mxu2  ;;  %v1681_v63 = vpop.f32.mrf.mxu0  ;;  %v2682_v18 = vpack.c.b16 %v2668_v60, %v2667_v42  ;;  %3996 = vmatpush.bf16.msrb.mxu0 %v13899_v28 }
 0x129   : > { %v1340_v56 = vpop.f32.mrf.mxu3  ;;  %v1163_v31 = vadd.f32 %v1145_v37, %v917_v35  ;;  %v1931_v1 = vpop.f32.mrf.mxu1  ;;  %v1721_v5 = vadd.f32 %v1681_v63, %v14741_v39  ;;  %v3187_v39 = vrot.slane %v3185_v10, 5  ;;  %v3192_v63 = vrot.slane %v3190_v47, 4  ;;  %v14162_v47 = vld [vmem:[%s14328_s9 + $0x38] sm:$0x1] }
 0x12a   : > { %v3205_v10 = vrot.slane %v3203_v55, 4 }
 0x12b   : > { %v15110_v11 = vadd.f32 %v1340_v56, %v1163_v31  ;;  %v1971_v19 = vadd.f32 %v1931_v1, %v1721_v5  ;;  %2753 = vmatmul.bf16.vlgmr.msra.gmra.mxu0 %v15030_v58  ;;  %v13932_v58 = vld [vmem:[%s18344_s1 + $0x1a8] sm:$0xff]  ;;  %v3188_v52 = vsel %vm14379_vm5, %v3183_v17, %v3187_v39  ;;  %v3657_v56 = vsel %vm14369_vm4, %v12101_v27, %v3656_v3  ;;  %v11974_v5 = vld [vmem:[%s14328_s9 + $0x80] sm:$0x1] }
 0x12c   : > { %3437 = vmatmul.bf16.vlgmr.msra.gmra.mxu1 %v3365_v30  ;;  %4815 = vmatpush.bf16.msrb.mxu3 %v13932_v58  ;;  %v3195_v1 = vrot.slane %v3193_v41, 5  ;;  %v3206_v58 = vor.u32 %v3205_v10, %v15149_v9  ;;  %v3209_v27 = vshll.u32 %v11974_v5, 16  ;;  %v2611_v41 = vrot.slane %v14162_v47, 5  ;;  %v14163_v47 = vld [vmem:[%s14328_s9 + $0x40] sm:$0xf] }
 0x12d   : > { %3582 = vmatmul.bf16.vlgmr.msra.gmra.mxu2 %v13855_v6  ;;  %v3721_v6 = vunpack.c.l.b16 %v3657_v56  ;;  %v3666_v56 = vrot.slane %v11974_v5, 5 }
 0x12e   : > { %3807 = vmatmul.bf16.vlgmr.msra.gmra.mxu3 %v3735_v8  ;;  %v3722_v8 = vunpack.c.l.b16 %v3660_v50  ;;  %v3196_v23 = vor.u32 %v3195_v1, %v3192_v63  ;;  %v15173_v50 = vld [vmem:[%s14328_s9 + $0x88] sm:$0xf]  ;;  %v2612_v62 = vsel %vm14369_vm4, %v2610_v46, %v2611_v41  ;;  %v11895_v46 = vld [vmem:[%s14328_s9 + $0x3c] sm:$0xe]  ;;  %v2615_v41 = vrot.slane %v14163_v47, 5 }
 0x12f   : > { %v3223_v5 = vshll.u32 %v15173_v50, 16  ;;  %v2670_v15 = vunpack.c.l.b16 %v2612_v62 }
 0x130   : > { %v2126_v35 = vpop.f32.mrf.mxu2  ;;  %v1683_v12 = vpop.f32.mrf.mxu0  ;;  %v3736_v25 = vpack.c.b16 %v3722_v8, %v3721_v6  ;;  %4816 = vmatpush.bf16.msrb.mxu3 %v13931_v54 }
 0x131   : > { %v2504_v36 = vpop.f32.mrf.mxu3  ;;  %v2166_v44 = vadd.f32 %v2126_v35, %v1971_v19  ;;  %v1933_v51 = vpop.f32.mrf.mxu1  ;;  %v1722_v37 = vadd.f32 %v1683_v12, %v14760_v14  ;;  %v3352_v14 = vunpack.c.l.b16 %v3188_v52  ;;  %v11902_v35 = vrot.slane %v11894_v20, 9  ;;  %v11962_v12 = vld [vmem:[%s14328_s9 + $0x84] sm:$0xf] }
 0x132   : > { %v3211_v52 = vrot.slane %v3209_v27, 5  ;;  %v3217_v63 = vshll.u32 %v11962_v12, 16 }
 0x133   : > { %v15144_v30 = vadd.f32 %v2504_v36, %v2166_v44  ;;  %v1972_v31 = vadd.f32 %v1933_v51, %v1722_v37  ;;  %v3366_v19 = vpack.c.b16 %v3352_v14, %v3351_v61  ;;  %v12094_v36 = vld [vmem:[%s14328_s9 + $0x78] sm:$0xe]  ;;  %v3197_v44 = vrot.slane %v3196_v23, 4  ;;  %v13907_v23 = vld [vmem:[%s18344_s1 + $0x120] sm:$0xff] }
 0x134   : > { %v3207_v51 = vrot.slane %v3206_v58, 4  ;;  %v12102_v55 = vrot.slane %v12094_v36, 9  ;;  %v3665_v37 = vrot.slane %v3663_v32, 4  ;;  %v2609_v42 = vsel %vm14369_vm4, %v11902_v35, %v2608_v22  ;;  %4373 = vmatpush.bf16.msrb.mxu1 %v13907_v23 }
 0x135   : > { %v3214_v14 = vshrl.u32 %v11962_v12, 16  ;;  %v2669_v20 = vunpack.c.l.b16 %v2609_v42  ;;  %v15196_v58 = vrot.slane %v3223_v5, 5  ;;  %v13930_v5 = vld [vmem:[%s18344_s1 + $0x198] sm:$0xff] }
 0x136   : > { %v3212_v10 = vsel %vm14379_vm5, %v3207_v51, %v3211_v52  ;;  %4817 = vmatpush.bf16.msrb.mxu3 %v13930_v5 }
 0x137   : > { %v2683_v36 = vpack.c.b16 %v2670_v15, %v2669_v20 }
 0x138   : > { %v2128_v3 = vpop.f32.mrf.mxu2  ;;  %v1686_v17 = vpop.f32.mrf.mxu0 }
 0x139   : > { %v2506_v16 = vpop.f32.mrf.mxu3  ;;  %v2167_v24 = vadd.f32 %v2128_v3, %v1972_v31  ;;  %v1936_v39 = vpop.f32.mrf.mxu1  ;;  %v1723_v29 = vadd.f32 %v1686_v17, %v14794_v53  ;;  %v13915_v53 = vld [vmem:[%s18344_s1 + $0x160] sm:$0xff]  ;;  %v3202_v31 = vsel %vm14379_vm5, %v3197_v44, %v15149_v9  ;;  %v3227_v3 = vshrl.u32 %v15173_v50, 16 }
 0x13a   : > { %4622 = vmatpush.bf16.msrb.mxu2 %v13915_v53  ;;  %v3667_v9 = vsel %vm14369_vm4, %v3665_v37, %v3666_v56  ;;  %v3353_v22 = vunpack.c.l.b16 %v3202_v31  ;;  %v3216_v17 = vrot.slane %v3214_v14, 4  ;;  %v13857_v53 = vld [vmem:[%s14328_s9 + $0x78] sm:$0xff]  ;;  %v3670_v56 = vrot.slane %v15173_v50, 5  ;;  %v14164_v14 = vld [vmem:[%s14328_s9 + $0x44] sm:$0x1] }
 0x13b   : > { %v15158_v34 = vadd.f32 %v2506_v16, %v2167_v24  ;;  %v1973_v38 = vadd.f32 %v1936_v39, %v1723_v29  ;;  %2758 = vmatmul.bf16.gmra.mxu0 %v2682_v18  ;;  %v3664_v18 = vsel %vm14369_vm4, %v12102_v55, %v3663_v32  ;;  %v3219_v39 = vrot.slane %v3217_v63, 5  ;;  %v11975_v29 = vld [vmem:[%s14328_s9 + $0x8c] sm:$0x1]  ;;  %v13898_v50 = vld [vmem:[%s18344_s1 + $0xd8] sm:$0xff] }
 0x13c   : > { %3442 = vmatmul.bf16.gmra.mxu1 %v3366_v19  ;;  %v3229_v27 = vrot.slane %v3227_v3, 4  ;;  %v3233_v55 = vshll.u32 %v11975_v29, 16  ;;  %v2617_v31 = vrot.slane %v2615_v41, 4  ;;  %v2618_v63 = vrot.slane %v14164_v14, 5  ;;  %3997 = vmatpush.bf16.msrb.mxu0 %v13898_v50  ;;  %v14165_v14 = vld [vmem:[%s14328_s9 + $0x4c] sm:$0xf] }
 0x13d   : > { %3587 = vmatmul.bf16.gmra.mxu2 %v13856_v59  ;;  %v3723_v59 = vunpack.c.l.b16 %v3664_v18  ;;  %v3220_v44 = vor.u32 %v3219_v39, %v3216_v17  ;;  %v3673_v18 = vrot.slane %v11975_v29, 5 }
 0x13e   : > { %3812 = vmatmul.bf16.gmra.mxu3 %v3736_v25  ;;  %v3724_v25 = vunpack.c.l.b16 %v3667_v9  ;;  %v3230_v54 = vor.u32 %v3229_v27, %v15196_v58  ;;  %v15220_v9 = vld [vmem:[%s14328_s9 + $0x94] sm:$0xf]  ;;  %v2619_v23 = vsel %vm14369_vm4, %v2617_v31, %v2618_v63  ;;  %v11896_v31 = vld [vmem:[%s14328_s9 + $0x48] sm:$0xe]  ;;  %v2622_v63 = vrot.slane %v14165_v14, 5 }
 0x13f   : > { %v3247_v29 = vshll.u32 %v15220_v9, 16  ;;  %v2672_v47 = vunpack.c.l.b16 %v2619_v23 }
 0x140   : > { %v2131_v60 = vpop.f32.mrf.mxu2  ;;  %v1688_v6 = vpop.f32.mrf.mxu0  ;;  %v3737_v28 = vpack.c.b16 %v3724_v25, %v3723_v59 }
 0x141   : > { %v2509_v61 = vpop.f32.mrf.mxu3  ;;  %v2168_v1 = vadd.f32 %v2131_v60, %v1973_v38  ;;  %v1938_v8 = vpop.f32.mrf.mxu1  ;;  %v1724_v16 = vadd.f32 %v1688_v6, %v14809_v26  ;;  %v3354_v26 = vunpack.c.l.b16 %v3212_v10  ;;  %v11903_v60 = vrot.slane %v11895_v46, 9  ;;  %v11964_v6 = vld [vmem:[%s14328_s9 + $0x90] sm:$0xf] }
 0x142   : > { %v3235_v10 = vrot.slane %v3233_v55, 5  ;;  %v3241_v17 = vshll.u32 %v11964_v6, 16 }
 0x143   : > { %v15191_v19 = vadd.f32 %v2509_v61, %v2168_v1  ;;  %v1974_v24 = vadd.f32 %v1938_v8, %v1724_v16  ;;  %v3367_v38 = vpack.c.b16 %v3354_v26, %v3353_v22  ;;  %v12095_v61 = vld [vmem:[%s14328_s9 + $0x84] sm:$0xe]  ;;  %v3221_v1 = vrot.slane %v3220_v44, 4  ;;  %v13906_v44 = vld [vmem:[%s18344_s1 + $0x118] sm:$0xff] }
 0x144   : > { %v3231_v8 = vrot.slane %v3230_v54, 4  ;;  %v12103_v3 = vrot.slane %v12095_v61, 9  ;;  %v3672_v16 = vrot.slane %v3670_v56, 4  ;;  %v2616_v20 = vsel %vm14369_vm4, %v11903_v60, %v2615_v41  ;;  %4374 = vmatpush.bf16.msrb.mxu1 %v13906_v44 }
 0x145   : > { %v3238_v26 = vshrl.u32 %v11964_v6, 16  ;;  %v2671_v46 = vunpack.c.l.b16 %v2616_v20  ;;  %v15243_v54 = vrot.slane %v3247_v29, 5  ;;  %v13929_v29 = vld [vmem:[%s18344_s1 + $0x190] sm:$0xff] }
 0x146   : > { %v3236_v27 = vsel %vm14379_vm5, %v3231_v8, %v3235_v10  ;;  %4818 = vmatpush.bf16.msrb.mxu3 %v13929_v29 }
 0x147   : > { %v2684_v61 = vpack.c.b16 %v2672_v47, %v2671_v46 }
 0x148   : > { %v2133_v32 = vpop.f32.mrf.mxu2  ;;  %v1691_v51 = vpop.f32.mrf.mxu0 }
 0x149   : > { %v2511_v35 = vpop.f32.mrf.mxu3  ;;  %v2169_v12 = vadd.f32 %v2133_v32, %v1974_v24  ;;  %v1941_v52 = vpop.f32.mrf.mxu1  ;;  %v1725_v37 = vadd.f32 %v1691_v51, %v14844_v4  ;;  %v13914_v4 = vld [vmem:[%s18344_s1 + $0x158] sm:$0xff]  ;;  %v3226_v24 = vsel %vm14379_vm5, %v3221_v1, %v15196_v58  ;;  %v3251_v32 = vshrl.u32 %v15220_v9, 16 }
 0x14a   : > { %4623 = vmatpush.bf16.msrb.mxu2 %v13914_v4  ;;  %v3674_v58 = vsel %vm14369_vm4, %v3672_v16, %v3673_v18  ;;  %v3355_v41 = vunpack.c.l.b16 %v3226_v24  ;;  %v3240_v51 = vrot.slane %v3238_v26, 4  ;;  %v13858_v4 = vld [vmem:[%s14328_s9 + $0x84] sm:$0xff]  ;;  %v3677_v18 = vrot.slane %v15220_v9, 5  ;;  %v14166_v26 = vld [vmem:[%s14328_s9 + $0x50] sm:$0x1] }
 0x14b   : > { %v15205_v42 = vadd.f32 %v2511_v35, %v2169_v12  ;;  %v1975_v62 = vadd.f32 %v1941_v52, %v1725_v37  ;;  %2763 = vmatmul.bf16.gmra.mxu0 %v2683_v36  ;;  %v3671_v36 = vsel %vm14369_vm4, %v12103_v3, %v3670_v56  ;;  %v3243_v52 = vrot.slane %v3241_v17, 5  ;;  %v11976_v37 = vld [vmem:[%s14328_s9 + $0x98] sm:$0x1]  ;;  %v13897_v9 = vld [vmem:[%s18344_s1 + $0xd0] sm:$0xff] }
 0x14c   : > { %3447 = vmatmul.bf16.gmra.mxu1 %v3367_v38  ;;  %v3253_v55 = vrot.slane %v3251_v32, 4  ;;  %v3257_v3 = vshll.u32 %v11976_v37, 16  ;;  %v2624_v24 = vrot.slane %v2622_v63, 4  ;;  %v2625_v17 = vrot.slane %v14166_v26, 5  ;;  %3998 = vmatpush.bf16.msrb.mxu0 %v13897_v9 }
 0x14d   : > { %3592 = vmatmul.bf16.gmra.mxu2 %v13857_v53  ;;  %v3725_v53 = vunpack.c.l.b16 %v3671_v36  ;;  %v3244_v1 = vor.u32 %v3243_v52, %v3240_v51  ;;  %v3680_v36 = vrot.slane %v11976_v37, 5 }
 0x14e   : > { %3817 = vmatmul.bf16.gmra.mxu3 %v3737_v28  ;;  %v3726_v28 = vunpack.c.l.b16 %v3674_v58  ;;  %v3254_v5 = vor.u32 %v3253_v55, %v15243_v54  ;;  %v15267_v58 = vld [vmem:[%s14328_s9 + $0xa0] sm:$0xf]  ;;  %v2626_v44 = vsel %vm14369_vm4, %v2624_v24, %v2625_v17 }
 0x14f   : > { %v3271_v37 = vshll.u32 %v15267_v58, 16  ;;  %v2674_v14 = vunpack.c.l.b16 %v2626_v44  ;;  %v14168_v44 = vld [vmem:[%s14328_s9 + $0x5c] sm:$0x1] }
 0x150   : > { %v2136_v15 = vpop.f32.mrf.mxu2  ;;  %v1693_v59 = vpop.f32.mrf.mxu0  ;;  %v3738_v50 = vpack.c.b16 %v3726_v28, %v3725_v53 }
 0x151   : > { %v2514_v22 = vpop.f32.mrf.mxu3  ;;  %v2170_v39 = vadd.f32 %v2136_v15, %v1975_v62  ;;  %v1943_v25 = vpop.f32.mrf.mxu1  ;;  %v1726_v35 = vadd.f32 %v1693_v59, %v14865_v43  ;;  %v3356_v43 = vunpack.c.l.b16 %v3236_v27  ;;  %v11904_v15 = vrot.slane %v11896_v31, 9  ;;  %v11966_v59 = vld [vmem:[%s14328_s9 + $0x9c] sm:$0xf] }
 0x152   : > { %v3259_v27 = vrot.slane %v3257_v3, 5  ;;  %v3265_v51 = vshll.u32 %v11966_v59, 16 }
 0x153   : > { %v15238_v38 = vadd.f32 %v2514_v22, %v2170_v39  ;;  %v1976_v12 = vadd.f32 %v1943_v25, %v1726_v35  ;;  %v3368_v62 = vpack.c.b16 %v3356_v43, %v3355_v41  ;;  %v12096_v22 = vld [vmem:[%s14328_s9 + $0x90] sm:$0xe]  ;;  %v3245_v39 = vrot.slane %v3244_v1, 4 }
 0x154   : > { %v3255_v25 = vrot.slane %v3254_v5, 4  ;;  %v12104_v32 = vrot.slane %v12096_v22, 9  ;;  %v3679_v35 = vrot.slane %v3677_v18, 4  ;;  %v2623_v46 = vsel %vm14369_vm4, %v11904_v15, %v2622_v63  ;;  %v13905_v1 = vld [vmem:[%s18344_s1 + $0x110] sm:$0xff]  ;;  %v14167_v15 = vld [vmem:[%s14328_s9 + $0x58] sm:$0xf] }
 0x155   : > { %v3262_v43 = vshrl.u32 %v11966_v59, 16  ;;  %v2673_v31 = vunpack.c.l.b16 %v2623_v46  ;;  %v15290_v5 = vrot.slane %v3271_v37, 5  ;;  %4375 = vmatpush.bf16.msrb.mxu1 %v13905_v1  ;;  %v2629_v22 = vrot.slane %v14167_v15, 5  ;;  %v13896_v37 = vld [vmem:[%s18344_s1 + $0xc8] sm:$0xff] }
 0x156   : > { %v3260_v55 = vsel %vm14379_vm5, %v3255_v25, %v3259_v27  ;;  %v3684_v46 = vrot.slane %v15267_v58, 5  ;;  %3999 = vmatpush.bf16.msrb.mxu0 %v13896_v37 }
 0x157   : > { %v2685_v26 = vpack.c.b16 %v2674_v14, %v2673_v31 }
 0x158   : > { %v2138_v56 = vpop.f32.mrf.mxu2  ;;  %v1696_v8 = vpop.f32.mrf.mxu0 }
 0x159   : > { %v2516_v60 = vpop.f32.mrf.mxu3  ;;  %v2171_v6 = vadd.f32 %v2138_v56, %v1976_v12  ;;  %v1946_v10 = vpop.f32.mrf.mxu1  ;;  %v1727_v16 = vadd.f32 %v1696_v8, %v14899_v21  ;;  %v13913_v21 = vld [vmem:[%s18344_s1 + $0x150] sm:$0xff]  ;;  %v3250_v12 = vsel %vm14379_vm5, %v3245_v39, %v15243_v54  ;;  %v3275_v56 = vshrl.u32 %v15267_v58, 16  ;;  %v13912_v58 = vld [vmem:[%s18344_s1 + $0x148] sm:$0xff] }
 0x15a   : > { %4624 = vmatpush.bf16.msrb.mxu2 %v13913_v21  ;;  %v3681_v54 = vsel %vm14369_vm4, %v3679_v35, %v3680_v36  ;;  %v3357_v63 = vunpack.c.l.b16 %v3250_v12  ;;  %v3264_v8 = vrot.slane %v3262_v43, 4  ;;  %v13859_v21 = vld [vmem:[%s14328_s9 + $0x90] sm:$0xff]  ;;  %v2632_v12 = vrot.slane %v14168_v44, 5  ;;  %v12097_v43 = vld [vmem:[%s14328_s9 + $0x9c] sm:$0xe] }
 0x15b   : > { %v15252_v20 = vadd.f32 %v2516_v60, %v2171_v6  ;;  %v1977_v23 = vadd.f32 %v1946_v10, %v1727_v16  ;;  %2768 = vmatmul.bf16.gmra.mxu0 %v2684_v61  ;;  %v3678_v61 = vsel %vm14369_vm4, %v12104_v32, %v3677_v18  ;;  %v3267_v10 = vrot.slane %v3265_v51, 5  ;;  %v11977_v16 = vld [vmem:[%s14328_s9 + $0xa4] sm:$0x1]  ;;  %v11897_v18 = vld [vmem:[%s14328_s9 + $0x54] sm:$0xe] }
 0x15c   : > { %3452 = vmatmul.bf16.gmra.mxu1 %v3368_v62  ;;  %v3277_v3 = vrot.slane %v3275_v56, 4  ;;  %v3281_v32 = vshll.u32 %v11977_v16, 16  ;;  %v11905_v36 = vrot.slane %v11897_v18, 9  ;;  %v13928_v56 = vld [vmem:[%s18344_s1 + $0x188] sm:$0xff]  ;;  %v3687_v31 = vrot.slane %v11977_v16, 5 }
 0x15d   : > { %3597 = vmatmul.bf16.gmra.mxu2 %v13858_v4  ;;  %v3727_v4 = vunpack.c.l.b16 %v3678_v61  ;;  %v3268_v39 = vor.u32 %v3267_v10, %v3264_v8  ;;  %v12105_v61 = vrot.slane %v12097_v43, 9  ;;  %4819 = vmatpush.bf16.msrb.mxu3 %v13928_v56  ;;  %v13860_v56 = vld [vmem:[%s14328_s9 + $0x9c] sm:$0xff] }
 0x15e   : > { %3822 = vmatmul.bf16.gmra.mxu3 %v3738_v50  ;;  %v3728_v50 = vunpack.c.l.b16 %v3681_v54  ;;  %v3278_v29 = vor.u32 %v3277_v3, %v15290_v5  ;;  %v3686_v54 = vrot.slane %v3684_v46, 4  ;;  %4625 = vmatpush.bf16.msrb.mxu2 %v13912_v58 }
 0x160   : > { %v2141_v47 = vpop.f32.mrf.mxu2  ;;  %v1698_v53 = vpop.f32.mrf.mxu0  ;;  %v3739_v9 = vpack.c.b16 %v3728_v50, %v3727_v4 }
 0x161   : > { %v2519_v41 = vpop.f32.mrf.mxu3  ;;  %v2172_v52 = vadd.f32 %v2141_v47, %v1977_v23  ;;  %v1948_v28 = vpop.f32.mrf.mxu1  ;;  %v1728_v60 = vadd.f32 %v1698_v53, %v14917_v0  ;;  %v3358_v0 = vunpack.c.l.b16 %v3260_v55  ;;  %v11968_v53 = vld [vmem:[%s14328_s9 + $0xa8] sm:$0xf]  ;;  %v3279_v55 = vrot.slane %v3278_v29, 4 }
 0x162   : > { %v3289_v1 = vshll.u32 %v11968_v53, 16 }
 0x163   : > { %v15285_v62 = vadd.f32 %v2519_v41, %v2172_v52  ;;  %v1978_v6 = vadd.f32 %v1948_v28, %v1728_v60  ;;  %v3369_v17 = vpack.c.b16 %v3358_v0, %v3357_v63  ;;  %v2631_v41 = vrot.slane %v2629_v22, 4  ;;  %v15305_v28 = vld [vmem:[%s14328_s9 + $0xac] sm:$0xf] }
 0x164   : > { %v3269_v52 = vrot.slane %v3268_v39, 4  ;;  %v2630_v60 = vsel %vm14369_vm4, %v11905_v36, %v2629_v22  ;;  %v3286_v63 = vshrl.u32 %v11968_v53, 16  ;;  %v3295_v10 = vshll.u32 %v15305_v28, 16  ;;  %v11898_v36 = vld [vmem:[%s14328_s9 + $0x60] sm:$0xe] }
 0x165   : > { %v2633_v14 = vsel %vm14369_vm4, %v2631_v41, %v2632_v12  ;;  %v3299_v4 = vshrl.u32 %v15305_v28, 16  ;;  %v2675_v18 = vunpack.c.l.b16 %v2630_v60 }
 0x166   : > { %v3274_v8 = vsel %vm14379_vm5, %v3269_v52, %v15290_v5  ;;  %v3685_v5 = vsel %vm14369_vm4, %v12105_v61, %v3684_v46  ;;  %v3288_v39 = vrot.slane %v3286_v63, 4  ;;  %v14169_v46 = vld [vmem:[%s14328_s9 + $0x64] sm:$0xf] }
 0x167   : > { %v3729_v29 = vunpack.c.l.b16 %v3685_v5  ;;  %v2636_v41 = vrot.slane %v14169_v46, 5 }
 0x168   : > { %v2143_v23 = vpop.f32.mrf.mxu2  ;;  %v1701_v25 = vpop.f32.mrf.mxu0 }
 0x169   : > { %v2521_v24 = vpop.f32.mrf.mxu3  ;;  %v2173_v59 = vadd.f32 %v2143_v23, %v1978_v6  ;;  %v1951_v27 = vpop.f32.mrf.mxu1  ;;  %v1729_v35 = vadd.f32 %v1701_v25, %v14950_v49  ;;  %v3283_v49 = vrot.slane %v3281_v32, 5  ;;  %v2676_v23 = vunpack.c.l.b16 %v2633_v14  ;;  %v13904_v25 = vld [vmem:[%s18344_s1 + $0x108] sm:$0xff] }
 0x16a   : > { %4376 = vmatpush.bf16.msrb.mxu1 %v13904_v25  ;;  %v2638_v63 = vrot.slane %v2636_v41, 4 }
 0x16b   : > { %v15299_v47 = vadd.f32 %v2521_v24, %v2173_v59  ;;  %v1979_v51 = vadd.f32 %v1951_v27, %v1729_v35  ;;  %2773 = vmatmul.bf16.gmra.mxu0 %v2685_v26  ;;  %v3284_v15 = vsel %vm14379_vm5, %v3279_v55, %v3283_v49  ;;  %v3688_v24 = vsel %vm14369_vm4, %v3686_v54, %v3687_v31  ;;  %v15340_v35 = vld [vmem:[%s14328_s9 + $0xb0] sm:$0x1] }
 0x16c   : > { %3457 = vmatmul.bf16.gmra.mxu1 %v3369_v17  ;;  %v3359_v17 = vunpack.c.l.b16 %v3274_v8  ;;  %v3291_v59 = vrot.slane %v3289_v1, 5  ;;  %v3730_v32 = vunpack.c.l.b16 %v3688_v24  ;;  %v3305_v55 = vshll.u32 %v15340_v35, 16  ;;  %v14170_v1 = vld [vmem:[%s14328_s9 + $0x68] sm:$0x1]  ;;  %v12098_v8 = vld [vmem:[%s14328_s9 + $0xa8] sm:$0xe] }
 0x16d   : > { %3602 = vmatmul.bf16.gmra.mxu2 %v13859_v21  ;;  %v15337_v21 = vrot.slane %v3295_v10, 5  ;;  %v11906_v54 = vrot.slane %v11898_v36, 9  ;;  %v3691_v31 = vrot.slane %v15305_v28, 5  ;;  %v13895_v28 = vld [vmem:[%s18344_s1 + $0xc0] sm:$0xff]  ;;  %v3694_v5 = vrot.slane %v15340_v35, 5 }
 0x16e   : > { %3827 = vmatmul.bf16.gmra.mxu3 %v3739_v9  ;;  %v3301_v9 = vrot.slane %v3299_v4, 4  ;;  %v3292_v44 = vor.u32 %v3291_v59, %v3288_v39  ;;  %v3740_v60 = vpack.c.b16 %v3730_v32, %v3729_v29  ;;  %4000 = vmatpush.bf16.msrb.mxu0 %v13895_v28 }
 0x170   : > { %v2146_v6 = vpop.f32.mrf.mxu2  ;;  %v1703_v3 = vpop.f32.mrf.mxu0  ;;  %v3302_v53 = vor.u32 %v3301_v9, %v15337_v21 }
 0x171   : > { %v2524_v0 = vpop.f32.mrf.mxu3  ;;  %v2174_v50 = vadd.f32 %v2146_v6, %v1979_v51  ;;  %v1953_v16 = vpop.f32.mrf.mxu1  ;;  %v1730_v22 = vadd.f32 %v1703_v3, %v14963_v13  ;;  %v3360_v13 = vunpack.c.l.b16 %v3284_v15  ;;  %v2686_v51 = vpack.c.b16 %v2676_v23, %v2675_v18  ;;  %v11970_v3 = vld [vmem:[%s14328_s9 + $0xb4] sm:$0xf]  ;;  %v13927_v18 = vld [vmem:[%s18344_s1 + $0x180] sm:$0xff] }
 0x172   : > { %v2639_v6 = vrot.slane %v14170_v1, 5  ;;  %v3303_v4 = vrot.slane %v3302_v53, 4  ;;  %v2637_v15 = vsel %vm14369_vm4, %v11906_v54, %v2636_v41  ;;  %v3693_v23 = vrot.slane %v3691_v31, 4  ;;  %4820 = vmatpush.bf16.msrb.mxu3 %v13927_v18  ;;  %v14171_v54 = vld [vmem:[%s14328_s9 + $0x70] sm:$0xf]  ;;  %v13861_v18 = vld [vmem:[%s14328_s9 + $0xa8] sm:$0xff] }
 0x173   : > { %v15332_v26 = vadd.f32 %v2524_v0, %v2174_v50  ;;  %v1980_v27 = vadd.f32 %v1953_v16, %v1730_v22  ;;  %v3370_v52 = vpack.c.b16 %v3360_v13, %v3359_v17  ;;  %v3293_v0 = vrot.slane %v3292_v44, 4  ;;  %v15355_v16 = vld [vmem:[%s14328_s9 + $0xb8] sm:$0xf]  ;;  %v11899_v1 = vld [vmem:[%s14328_s9 + $0x6c] sm:$0xe] }
 0x174   : > { %v3307_v50 = vrot.slane %v3305_v55, 5  ;;  %v12106_v22 = vrot.slane %v12098_v8, 9  ;;  %v2640_v24 = vsel %vm14369_vm4, %v2638_v63, %v2639_v6  ;;  %v3310_v39 = vshrl.u32 %v11970_v3, 16  ;;  %v13903_v55 = vld [vmem:[%s18344_s1 + $0x100] sm:$0xff] }
 0x175   : > { %v3298_v17 = vsel %vm14379_vm5, %v3293_v0, %v15337_v21  ;;  %v3313_v13 = vshll.u32 %v11970_v3, 16  ;;  %v3319_v9 = vshll.u32 %v15355_v16, 16  ;;  %v3323_v29 = vshrl.u32 %v15355_v16, 16  ;;  %4377 = vmatpush.bf16.msrb.mxu1 %v13903_v55 }
 0x176   : > { %v2677_v46 = vunpack.c.l.b16 %v2637_v15  ;;  %v2678_v41 = vunpack.c.l.b16 %v2640_v24  ;;  %v3692_v44 = vsel %vm14369_vm4, %v12106_v22, %v3691_v31  ;;  %v3312_v53 = vrot.slane %v3310_v39, 4  ;;  %v12099_v24 = vld [vmem:[%s14328_s9 + $0xb4] sm:$0xe] }
 0x177   : > { %v2643_v31 = vrot.slane %v14171_v54, 5 }
 0x178   : > { %v2148_v12 = vpop.f32.mrf.mxu2  ;;  %v1706_v58 = vpop.f32.mrf.mxu0  ;;  %v2687_v63 = vpack.c.b16 %v2678_v41, %v2677_v46  ;;  %v15411_v41 = vld [vmem:[%s14328_s9 + $0x70] sm:$0xf] }
 0x179   : > { %v2526_v43 = vpop.f32.mrf.mxu3  ;;  %v2175_v49 = vadd.f32 %v2148_v12, %v1980_v27  ;;  %v1956_v37 = vpop.f32.mrf.mxu1  ;;  %v1731_v61 = vadd.f32 %v1706_v58, %v15001_v7  ;;  %v13911_v7 = vld [vmem:[%s18344_s1 + $0x140] sm:$0xff]  ;;  %v3308_v27 = vsel %vm14379_vm5, %v3303_v4, %v3307_v50  ;;  %v3695_v12 = vsel %vm14369_vm4, %v3693_v23, %v3694_v5 }
 0x17a   : > { %4626 = vmatpush.bf16.msrb.mxu2 %v13911_v7  ;;  %v15388_v58 = vrot.slane %v3319_v9, 5  ;;  %v11907_v23 = vrot.slane %v11899_v1, 9  ;;  %v2645_v5 = vrot.slane %v2643_v31, 4  ;;  %v4096_v54 = vshrl.u32 %v15411_v41, 16 }
 0x17b   : > { %v15349_v14 = vadd.f32 %v2526_v43, %v2175_v49  ;;  %v1981_v10 = vadd.f32 %v1956_v37, %v1731_v61  ;;  %2778 = vmatmul.bf16.gmra.mxu0 %v2686_v51  ;;  %v3361_v51 = vunpack.c.l.b16 %v3298_v17  ;;  %v3325_v37 = vrot.slane %v3323_v29, 4  ;;  %v11979_v61 = vld [vmem:[%s14328_s9 + $0xbc] sm:$0x1] }
 0x17c   : > { %3462 = vmatmul.bf16.gmra.mxu1 %v3370_v52  ;;  %v3362_v52 = vunpack.c.l.b16 %v3308_v27  ;;  %v3329_v50 = vshll.u32 %v11979_v61, 16  ;;  %v3698_v17 = vrot.slane %v15355_v16, 5  ;;  %v291_v27 = vld [vmem:[#allocation2 + $0xc] sm:$0x1]  ;;  %v12107_v16 = vrot.slane %v12099_v24, 9 }
 0x17d   : > { %3607 = vmatmul.bf16.gmra.mxu2 %v13860_v56  ;;  %v3731_v56 = vunpack.c.l.b16 %v3692_v44  ;;  %v3326_v4 = vor.u32 %v3325_v37, %v15388_v58  ;;  %v2644_v44 = vsel %vm14369_vm4, %v11907_v23, %v2643_v31 }
 0x17e   : > { %3832 = vmatmul.bf16.gmra.mxu3 %v3740_v60  ;;  %v3732_v60 = vunpack.c.l.b16 %v3695_v12  ;;  %v3371_v8 = vpack.c.b16 %v3362_v52, %v3361_v51  ;;  %v3700_v46 = vrot.slane %v3698_v17, 4  ;;  %v3699_v1 = vsel %vm14369_vm4, %v12107_v16, %v3698_v17 }
 0x17f   : > { %v3327_v29 = vrot.slane %v3326_v4, 4 }
 0x180   : > { %v2151_v59 = vpop.f32.mrf.mxu2  ;;  %v1708_v35 = vpop.f32.mrf.mxu0  ;;  %v3741_v15 = vpack.c.b16 %v3732_v60, %v3731_v56 }
 0x181   : > { %v2529_v25 = vpop.f32.mrf.mxu3  ;;  %v2176_v32 = vadd.f32 %v2151_v59, %v1981_v10  ;;  %v1958_v36 = vpop.f32.mrf.mxu1  ;;  %v1732_v21 = vadd.f32 %v1708_v35, %v15028_v57  ;;  %v3315_v57 = vrot.slane %v3313_v13, 5  ;;  %v14172_v59 = vld [vmem:[%s14328_s9 + $0x74] sm:$0x1]  ;;  %v292_v35 = vsel %vm15403_vm8, 0, %v291_v27 }
 0x182   : > { %293 = vst [vmem:[#allocation2 + $0xc] sm:$0x1] %v292_v35  ;;  %v341_v35 = vld [vmem:[#allocation2 + $0x14] sm:$0x1] }
 0x183   : > { %v15383_v43 = vadd.f32 %v2529_v25, %v2176_v32  ;;  %v1982_v49 = vadd.f32 %v1958_v36, %v1732_v21  ;;  %v3316_v10 = vor.u32 %v3315_v57, %v3312_v53  ;;  %v2646_v25 = vrot.slane %v14172_v59, 5  ;;  %v12252_v36 = vld [vmem:[%s14328_s9 + $0x6c] sm:$0xf] }
 0x184   : > { %v3701_v21 = vrot.slane %v11979_v61, 5  ;;  %v4086_v57 = vshll.u32 %v12252_v36, 16  ;;  %v4092_v61 = vshll.u32 %v15411_v41, 16 }
 0x185   : > { %v3317_v9 = vrot.slane %v3316_v10, 4  ;;  %v2647_v12 = vsel %vm14369_vm4, %v2645_v5, %v2646_v25 }
 0x187   : > { %v3322_v53 = vsel %vm14379_vm5, %v3317_v9, %v15388_v58  ;;  %v3702_v58 = vsel %vm14369_vm4, %v3700_v46, %v3701_v21  ;;  %v13862_v9 = vld [vmem:[%s14328_s9 + $0xb4] sm:$0xff]  ;;  %v12324_v21 = vld [vmem:[%s14328_s9 + $0x6c] sm:$0xe] }
 0x188   : > { %v2153_v6 = vpop.f32.mrf.mxu2  ;;  %v1711_v7 = vpop.f32.mrf.mxu0 }
 0x189   : > { %v2531_v0 = vpop.f32.mrf.mxu3  ;;  %v2177_v3 = vadd.f32 %v2153_v6, %v1982_v49  ;;  %v1961_v28 = vpop.f32.mrf.mxu1  ;;  %v1733_v22 = vadd.f32 %v1711_v7, %v15062_v33  ;;  %v3331_v33 = vrot.slane %v3329_v50, 5  ;;  %v4083_v49 = vshrl.u32 %v12252_v36, 16  ;;  %v12255_v36 = vld [vmem:[%s14328_s9 + $0x78] sm:$0xf] }
 0x18a   : > { %v3733_v7 = vunpack.c.l.b16 %v3699_v1 }
 0x18b   : > { %v15398_v39 = vadd.f32 %v2531_v0, %v2177_v3  ;;  %v1983_v13 = vadd.f32 %v1961_v28, %v1733_v22  ;;  %2783 = vmatmul.bf16.gmra.mxu0 %v2687_v63  ;;  %v3332_v55 = vsel %vm14379_vm5, %v3327_v29, %v3331_v33  ;;  %v2679_v63 = vunpack.c.l.b16 %v2644_v44 }
 0x18c   : > { %3467 = vmatmul.bf16.gmra.mxu1 %v3371_v8  ;;  %v2680_v0 = vunpack.c.l.b16 %v2647_v12  ;;  %v3363_v8 = vunpack.c.l.b16 %v3322_v53  ;;  %v3364_v10 = vunpack.c.l.b16 %v3332_v55  ;;  %v4085_v50 = vrot.slane %v4083_v49, 4  ;;  %v13974_v53 = vld [vmem:[%s18345_s2 + $0x78] sm:$0xff] }
 0x18d   : > { %3612 = vmatmul.bf16.gmra.mxu2 %v13861_v18  ;;  %v4088_v3 = vrot.slane %v4086_v57, 5  ;;  %v15431_v28 = vrot.slane %v4092_v61, 5  ;;  %v4098_v18 = vrot.slane %v4096_v54, 4  ;;  %v4469_v44 = vrot.slane %v15411_v41, 5  ;;  %v13942_v55 = vld [vmem:[%s18344_s1 + $0x1f8] sm:$0xff] }
 0x18e   : > { %3837 = vmatmul.bf16.gmra.mxu3 %v3741_v15  ;;  %v15434_v15 = vld [vmem:[%s14328_s9 + $0x74] sm:$0x1]  ;;  %v2688_v24 = vpack.c.b16 %v2680_v0, %v2679_v63  ;;  %v3372_v17 = vpack.c.b16 %v3364_v10, %v3363_v8  ;;  %v342_v12 = vsel %vm15438_vm10, 0, %v341_v35  ;;  %v13950_v57 = vld [vmem:[%s18344_s1 + $0x238] sm:$0xff]  ;;  %v12332_v63 = vrot.slane %v12324_v21, 9  ;;  %6114 = vmatpush.bf16.msra.mxu2 %v13974_v53 }
 0x18f   : > { %v4089_v59 = vor.u32 %v4088_v3, %v4085_v50  ;;  %v4099_v33 = vor.u32 %v4098_v18, %v15431_v28  ;;  %v4102_v16 = vshll.u32 %v15434_v15, 16  ;;  %343 = vst [vmem:[#allocation2 + $0x14] sm:$0x1] %v342_v12  ;;  %v4471_v1 = vrot.slane %v4469_v44, 4  ;;  %5190 = vmatpush.bf16.msra.mxu0 %v13942_v55  ;;  %5439 = vmatpush.bf16.msra.mxu1 %v13950_v57  ;;  %v12258_v12 = vld [vmem:[%s14328_s9 + $0x84] sm:$0xf] }
 0x190   : > { %v2156_v51 = vpop.f32.mrf.mxu2  ;;  %v1713_v56 = vpop.f32.mrf.mxu0 }
 0x191   : > { %v2534_v52 = vpop.f32.mrf.mxu3  ;;  %v2178_v37 = vadd.f32 %v2156_v51, %v1983_v13  ;;  %v1963_v60 = vpop.f32.mrf.mxu1  ;;  %v1734_v31 = vadd.f32 %v1713_v56, %v15070_v2  ;;  %v3734_v2 = vunpack.c.l.b16 %v3702_v58  ;;  %v15452_v51 = vld [vmem:[%s14328_s9 + $0x7c] sm:$0xf]  ;;  %v4090_v49 = vrot.slane %v4089_v59, 4 }
 0x192   : > { %v4110_v56 = vshll.u32 %v12255_v36, 16  ;;  %v4104_v61 = vrot.slane %v4102_v16, 5  ;;  %v4116_v54 = vshll.u32 %v15452_v51, 16  ;;  %v4472_v58 = vrot.slane %v15434_v15, 5  ;;  %v15477_v15 = vld [vmem:[%s14328_s9 + $0x80] sm:$0x1] }
 0x193   : > { %v15429_v6 = vadd.f32 %v2534_v52, %v2178_v37  ;;  %v1984_v4 = vadd.f32 %v1963_v60, %v1734_v31  ;;  %v3742_v29 = vpack.c.b16 %v3734_v2, %v3733_v7  ;;  %v4107_v37 = vshrl.u32 %v12255_v36, 16 }
 0x194   : > { %v4100_v60 = vrot.slane %v4099_v33, 4  ;;  %v4120_v31 = vshrl.u32 %v15452_v51, 16  ;;  %v4095_v10 = vsel %vm14379_vm5, %v4090_v49, %v15431_v28  ;;  %v4112_v50 = vrot.slane %v4110_v56, 5  ;;  %v13919_v49 = vld [vmem:[%s14328_s9 + $0x78] sm:$0xff] }
 0x195   : > { %v4470_v28 = vsel %vm14369_vm4, %v12332_v63, %v4469_v44  ;;  %v4473_v59 = vsel %vm14369_vm4, %v4471_v1, %v4472_v58  ;;  %v4476_v21 = vrot.slane %v15452_v51, 5  ;;  %v13887_v44 = vld [vmem:[%s14328_s9 + $0x6c] sm:$0xff]  ;;  %v344_v1 = vld [vmem:[#allocation2 + $0x20] sm:$0x1]  ;;  %v15503_v58 = vld [vmem:[%s14328_s9 + $0x88] sm:$0xf] }
 0x196   : > { %v4105_v18 = vsel %vm14379_vm5, %v4100_v60, %v4104_v61  ;;  %v4539_v16 = vunpack.c.l.b16 %v4470_v28  ;;  %v4540_v35 = vunpack.c.l.b16 %v4473_v59 }
 0x197   : > { %v4478_v63 = vrot.slane %v4476_v21, 4 }
 0x198   : > { %v2158_v23 = vpop.f32.mrf.mxu2  ;;  %v1716_v27 = vpop.f32.mrf.mxu0 }
 0x199   : > { %v2536_v5 = vpop.f32.mrf.mxu3  ;;  %v2179_v25 = vadd.f32 %v2158_v23, %v1984_v4  ;;  %v1966_v13 = vpop.f32.mrf.mxu1  ;;  %v1735_v46 = vadd.f32 %v1716_v27, %v15096_v40  ;;  %v13966_v40 = vld [vmem:[%s18345_s2 + $0x38] sm:$0xff]  ;;  %v4109_v4 = vrot.slane %v4107_v37, 4 }
 0x19a   : > { %6259 = vmatpush.bf16.msra.mxu3 %v13966_v40  ;;  %v294_v23 = vld [vmem:[#allocation2 + $0x18] sm:$0x1]  ;;  %v15499_v40 = vld [vmem:[%s18346_s3] ss:$0 sm:$0xff] }
 0x19b   : > { %v15454_v52 = vadd.f32 %v2536_v5, %v2179_v25  ;;  %v1985_v41 = vadd.f32 %v1966_v13, %v1735_v46  ;;  %2788 = vmatmul.bf16.gmra.mxu0 %v2688_v24  ;;  %v15479_v5 = vrot.slane %v4116_v54, 5  ;;  %v4122_v24 = vrot.slane %v4120_v31, 4  ;;  %v12325_v46 = vld [vmem:[%s14328_s9 + $0x78] sm:$0xe] }
 0x19c   : > { %3472 = vmatmul.bf16.gmra.mxu1 %v3372_v17  ;;  %v295_v25 = vsel %vm15403_vm8, 0, %v294_v23  ;;  %v4290_v13 = vunpack.c.l.b16 %v4095_v10  ;;  %v4113_v33 = vor.u32 %v4112_v50, %v4109_v4  ;;  %v12333_v56 = vrot.slane %v12325_v46, 9 }
 0x19d   : > { %3617 = vmatmul.bf16.gmra.mxu2 %v13862_v9  ;;  %296 = vst [vmem:[#allocation2 + $0x18] sm:$0x1] %v295_v25  ;;  %v4123_v36 = vor.u32 %v4122_v24, %v15479_v5  ;;  %v4555_v31 = vpack.c.b16 %v4540_v35, %v4539_v16  ;;  %v4479_v10 = vrot.slane %v15477_v15, 5  ;;  %v345_v4 = vsel %vm15438_vm10, 0, %v344_v1  ;;  %v15542_v35 = vld [vmem:[%s14328_s9 + $0x8c] sm:$0x1] }
 0x19e   : > { %3842 = vmatmul.bf16.gmra.mxu3 %v3742_v29  ;;  %v4291_v29 = vunpack.c.l.b16 %v4105_v18  ;;  %v4114_v57 = vrot.slane %v4113_v33, 4  ;;  %v4131_v50 = vshrl.u32 %v12258_v12, 16  ;;  %346 = vst [vmem:[#allocation2 + $0x20] sm:$0x1] %v345_v4  ;;  %v4134_v18 = vshll.u32 %v12258_v12, 16 }
 0x19f   : > { %v4124_v51 = vrot.slane %v4123_v36, 4  ;;  %v4140_v24 = vshll.u32 %v15503_v58, 16 }
 0x1a0   : > { %v2161_v0 = vpop.f32.mrf.mxu2  ;;  %v1718_v7 = vpop.f32.mrf.mxu0  ;;  %v4119_v28 = vsel %vm14379_vm5, %v4114_v57, %v15479_v5  ;;  %v4136_v33 = vrot.slane %v4134_v18, 5  ;;  %v15561_v18 = vld [vmem:[%s14328_s9 + $0x94] sm:$0xf] }
 0x1a1   : > { %v2539_v8 = vpop.f32.mrf.mxu3  ;;  %v2180_v3 = vadd.f32 %v2161_v0, %v1985_v41  ;;  %v1968_v2 = vpop.f32.mrf.mxu1  ;;  %v1736_v17 = vadd.f32 %v1718_v7, %v15110_v11  ;;  %v4126_v11 = vshll.u32 %v15477_v15, 16  ;;  %v4306_v41 = vpack.c.b16 %v4291_v29, %v4290_v13  ;;  %v13973_v7 = vld [vmem:[%s18345_s2 + $0x70] sm:$0xff] }
 0x1a2   : > { %v13949_v15 = vld [vmem:[%s18344_s1 + $0x230] sm:$0xff]  ;;  %v4477_v13 = vsel %vm14369_vm4, %v12333_v56, %v4476_v21  ;;  %6115 = vmatpush.bf16.msra.mxu2 %v13973_v7  ;;  %v4133_v29 = vrot.slane %v4131_v50, 4  ;;  %v15544_v36 = vrot.slane %v4140_v24, 5 }
 0x1a3   : > { %v15488_v27 = vadd.f32 %v2539_v8, %v2180_v3  ;;  %v1986_v9 = vadd.f32 %v1968_v2, %v1736_v17  ;;  %v4128_v37 = vrot.slane %v4126_v11, 5  ;;  %v15509_v8 = vld [vmem:[%s18347_s4] ss:$0 sm:$0xff]  ;;  %v13965_v2 = vld [vmem:[%s18345_s2 + $0x30] sm:$0xff]  ;;  %v4144_v17 = vshrl.u32 %v15503_v58, 16  ;;  %5440 = vmatpush.bf16.msra.mxu1 %v13949_v15 }
 0x1a4   : > { %6260 = vmatpush.bf16.msra.mxu3 %v13965_v2  ;;  %v12261_v2 = vld [vmem:[%s14328_s9 + $0x90] sm:$0xf] }
 0x1a5   : > { %v4129_v25 = vsel %vm14379_vm5, %v4124_v51, %v4128_v37  ;;  %v4146_v46 = vrot.slane %v4144_v17, 4  ;;  %v4483_v51 = vrot.slane %v15503_v58, 5 }
 0x1a8   : > { %v2163_v53 = vpop.f32.mrf.mxu2  ;;  %v2754_v61 = vpop.f32.mrf.mxu0 }
 0x1a9   : > { %v2541_v55 = vpop.f32.mrf.mxu3  ;;  %v2181_v60 = vadd.f32 %v2163_v53, %v1986_v9  ;;  %v3438_v54 = vpop.f32.mrf.mxu1  ;;  %v2794_v0 = vadd.f32 %v2754_v61, %v15144_v30  ;;  %v13941_v30 = vld [vmem:[%s18344_s1 + $0x1f0] sm:$0xff]  ;;  %v4480_v9 = vsel %vm14369_vm4, %v4478_v63, %v4479_v10  ;;  %v4292_v53 = vunpack.c.l.b16 %v4119_v28 }
 0x1aa   : > { %5191 = vmatpush.bf16.msra.mxu0 %v13941_v30  ;;  %v4542_v56 = vunpack.c.l.b16 %v4480_v9  ;;  %v4485_v28 = vrot.slane %v4483_v51, 4 }
 0x1ab   : > { %v15514_v3 = vadd.f32 %v2541_v55, %v2181_v60  ;;  %v2813_v23 = vmul.f32 %v15499_v40, %v2794_v0  ;;  %4001 = vmatmul.bf16.vlgmr.msrb.gmra.mxu0 %v13887_v44  ;;  %v4293_v55 = vunpack.c.l.b16 %v4129_v25  ;;  %v12326_v0 = vld [vmem:[%s14328_s9 + $0x84] sm:$0xe] }
 0x1ac   : > { %4378 = vmatmul.bf16.vlgmr.msrb.gmra.mxu1 %v4306_v41  ;;  %v4541_v41 = vunpack.c.l.b16 %v4477_v13  ;;  %v12334_v17 = vrot.slane %v12326_v0, 9 }
 0x1ad   : > { %4627 = vmatmul.bf16.vlgmr.msrb.gmra.mxu2 %v4555_v31  ;;  %v2832_v59 = vadd.f32 %v15509_v8, %v2813_v23  ;;  %v4150_v31 = vshll.u32 %v15542_v35, 16  ;;  %v4307_v10 = vpack.c.b16 %v4293_v55, %v4292_v53  ;;  %v3044_v23 = vld [vmem:[#allocation2 + $0xc] sm:$0xf]  ;;  %v4155_v53 = vshrl.u32 %v12261_v2, 16 }
 0x1ae   : > { %4821 = vmatmul.bf16.vlgmr.msrb.gmra.mxu3 %v13919_v49  ;;  %v297_v49 = vld [vmem:[#allocation2 + $0x24] sm:$0x1]  ;;  %v4556_v30 = vpack.c.b16 %v4542_v56, %v4541_v41  ;;  %v4158_v55 = vshll.u32 %v12261_v2, 16  ;;  %v4164_v41 = vshll.u32 %v15561_v18, 16  ;;  %v4484_v0 = vsel %vm14369_vm4, %v12334_v17, %v4483_v51 }
 0x1af   : > { %v2848_v11 = vmax.f32 %v2832_v59, 0.0  ;;  %v298_v60 = vsel %vm15403_vm8, 0, %v297_v49  ;;  %v4152_v24 = vrot.slane %v4150_v31, 5  ;;  %v4168_v31 = vshrl.u32 %v15561_v18, 16 }
 0x1b0   : > { %v3583_v16 = vpop.f32.mrf.mxu2  ;;  %v2756_v12 = vpop.f32.mrf.mxu0  ;;  %299 = vst [vmem:[#allocation2 + $0x24] sm:$0x1] %v298_v60  ;;  %v13972_v60 = vld [vmem:[%s18345_s2 + $0x68] sm:$0xff] }
 0x1b1   : > { %v3808_v5 = vpop.f32.mrf.mxu3  ;;  %v3584_v44 = vadd.f32 %v3583_v16, %v3438_v54  ;;  %v3440_v21 = vpop.f32.mrf.mxu1  ;;  %v2864_v57 = vpack.c.bf16 %v2848_v11, %v2848_v11  ;;  %v2795_v37 = vadd.f32 %v2756_v12, %v15158_v34  ;;  %v4137_v54 = vor.u32 %v4136_v33, %v4133_v29  ;;  %v13888_v29 = vld [vmem:[%s14328_s9 + $0x78] sm:$0xff]  ;;  %v347_v12 = vld [vmem:[#allocation2 + $0x2c] sm:$0x1]  ;;  %6116 = vmatpush.bf16.msra.mxu2 %v13972_v60 }
 0x1b2   : > { %v4147_v34 = vor.u32 %v4146_v46, %v15544_v36  ;;  %v4486_v11 = vrot.slane %v15542_v35, 5  ;;  %v348_v56 = vsel %vm15438_vm10, 0, %v347_v12 }
 0x1b3   : > { %v15549_v61 = vadd.f32 %v3808_v5, %v3584_v44  ;;  %v2883_v63 = vshrl.u32 %v2864_v57, 16  ;;  %v2814_v1 = vmul.f32 %v15499_v40, %v2795_v37  ;;  %v2886_v50 = vshll.u32 %v2864_v57, 16  ;;  %v13920_v44 = vld [vmem:[%s14328_s9 + $0x84] sm:$0xff]  ;;  %349 = vst [vmem:[#allocation2 + $0x2c] sm:$0x1] %v348_v56 }
 0x1b4   : > { %v4138_v15 = vrot.slane %v4137_v54, 4  ;;  %v4148_v33 = vrot.slane %v4147_v34, 4  ;;  %v13940_v54 = vld [vmem:[%s18344_s1 + $0x1e8] sm:$0xff] }
 0x1b5   : > { %v15556_v4 = vrot.slane %v2883_v63, 7  ;;  %v2833_v7 = vadd.f32 %v15509_v8, %v2814_v1  ;;  %v13948_v34 = vld [vmem:[%s18344_s1 + $0x228] sm:$0xff]  ;;  %5192 = vmatpush.bf16.msra.mxu0 %v13940_v54  ;;  %v4490_v54 = vrot.slane %v15561_v18, 5  ;;  %v15641_v18 = vld [vmem:[%s14328_s9 + $0xa0] sm:$0xf] }
 0x1b6   : > { %5441 = vmatpush.bf16.msra.mxu1 %v13948_v34 }
 0x1b7   : > { %v2888_v59 = vor.u32 %v2886_v50, %v15556_v4  ;;  %v2849_v25 = vmax.f32 %v2833_v7, 0.0  ;;  %v4157_v50 = vrot.slane %v4155_v53, 4  ;;  %v4160_v7 = vrot.slane %v4158_v55, 5 }
 0x1b8   : > { %v3585_v13 = vpop.f32.mrf.mxu2  ;;  %v2759_v5 = vpop.f32.mrf.mxu0  ;;  %v4543_v53 = vunpack.c.l.b16 %v4484_v0 }
 0x1b9   : > { %v3810_v9 = vpop.f32.mrf.mxu3  ;;  %v3586_v16 = vadd.f32 %v3585_v13, %v3440_v21  ;;  %v3443_v46 = vpop.f32.mrf.mxu1  ;;  %v3045_v49 = vsel %vm15564_vm12, %v2888_v59, %v3044_v23  ;;  %v2865_v57 = vpack.c.bf16 %v2849_v25, %v2849_v25  ;;  %v2796_v37 = vadd.f32 %v2759_v5, %v15191_v19  ;;  %v13964_v19 = vld [vmem:[%s18345_s2 + $0x28] sm:$0xff] }
 0x1ba   : > { %3046 = vst [vmem:[#allocation2 + $0xc] sm:$0xf] %v3045_v49  ;;  %v4143_v21 = vsel %vm14379_vm5, %v4138_v15, %v15544_v36  ;;  %v4153_v36 = vsel %vm14379_vm5, %v4148_v33, %v4152_v24  ;;  %v3048_v24 = vld [vmem:[#allocation2 + $0x14] sm:$0x1]  ;;  %6261 = vmatpush.bf16.msra.mxu3 %v13964_v19  ;;  %v15614_v59 = vrot.slane %v4164_v41, 5  ;;  %v4170_v25 = vrot.slane %v4168_v31, 4 }
 0x1bb   : > { %v15578_v35 = vadd.f32 %v3810_v9, %v3586_v16  ;;  %v2891_v63 = vshrl.u32 %v2865_v57, 16  ;;  %v2815_v1 = vmul.f32 %v15499_v40, %v2796_v37  ;;  %4006 = vmatmul.bf16.gmra.mxu0 %v13888_v29  ;;  %v2894_v23 = vshll.u32 %v2865_v57, 16  ;;  %v15618_v16 = vld [vmem:[%s14328_s9 + $0x98] sm:$0x1]  ;;  %v300_v49 = vld [vmem:[#allocation2 + $0x30] sm:$0x1] }
 0x1bc   : > { %4383 = vmatmul.bf16.gmra.mxu1 %v4307_v10  ;;  %v4487_v10 = vsel %vm14369_vm4, %v4485_v28, %v4486_v11  ;;  %v15610_v51 = vunpack.c.l.b16 %v4143_v21  ;;  %v15612_v17 = vunpack.c.l.b16 %v4153_v36  ;;  %v2889_v28 = vrot.slane %v15556_v4, 4 }
 0x1bd   : > { %4632 = vmatmul.bf16.gmra.mxu2 %v4556_v30  ;;  %v2893_v2 = vrot.slane %v2891_v63, 7  ;;  %v2834_v15 = vadd.f32 %v15509_v8, %v2815_v1  ;;  %v4544_v55 = vunpack.c.l.b16 %v4487_v10  ;;  %v4161_v57 = vor.u32 %v4160_v7, %v4157_v50  ;;  %v12327_v1 = vld [vmem:[%s14328_s9 + $0x90] sm:$0xe]  ;;  %v12264_v7 = vld [vmem:[%s14328_s9 + $0x9c] sm:$0xf] }
 0x1be   : > { %4826 = vmatmul.bf16.gmra.mxu3 %v13920_v44  ;;  %v4174_v60 = vshll.u32 %v15618_v16, 16  ;;  %v4171_v63 = vor.u32 %v4170_v25, %v15614_v59  ;;  %v12335_v10 = vrot.slane %v12327_v1, 9 }
 0x1bf   : > { %v2896_v13 = vor.u32 %v2894_v23, %v2893_v2  ;;  %v2898_v9 = vrot.slane %v2893_v2, 4  ;;  %v2850_v29 = vmax.f32 %v2834_v15, 0.0  ;;  %v4557_v50 = vpack.c.b16 %v4544_v55, %v4543_v53  ;;  %v3051_v2 = vld [vmem:[#allocation2 + $0x18] sm:$0xf] }
 0x1c0   : > { %v3588_v33 = vpop.f32.mrf.mxu2  ;;  %v2761_v44 = vpop.f32.mrf.mxu0  ;;  %v4162_v23 = vrot.slane %v4161_v57, 4  ;;  %v15643_v15 = vrot.slane %v4174_v60, 5  ;;  %v350_v53 = vld [vmem:[#allocation2 + $0x38] sm:$0x1]  ;;  %v4179_v55 = vshrl.u32 %v12264_v7, 16  ;;  %v4188_v57 = vshll.u32 %v15641_v18, 16 }
 0x1c1   : > { %v3813_v11 = vpop.f32.mrf.mxu3  ;;  %v3589_v5 = vadd.f32 %v3588_v33, %v3443_v46  ;;  %v3445_v12 = vpop.f32.mrf.mxu1  ;;  %v2897_v41 = vsel %vm15606_vm14, %v2889_v28, %v2896_v13  ;;  %v3049_v4 = vsel %vm15403_vm8, %v2898_v9, %v3048_v24  ;;  %v2866_v37 = vpack.c.bf16 %v2850_v29, %v2850_v29  ;;  %v13889_v13 = vld [vmem:[%s14328_s9 + $0x84] sm:$0xff] }
 0x1c2   : > { %v2797_v56 = vadd.f32 %v2761_v44, %v15205_v42  ;;  %3047 = vst [vmem:[#allocation2 + $0x10] sm:$0xf] %v2897_v41  ;;  %v301_v46 = vsel %vm15403_vm8, 0, %v300_v49  ;;  %v4308_v42 = vpack.c.b16 %v15612_v17, %v15610_v51  ;;  %v4492_v24 = vrot.slane %v4490_v54, 4  ;;  %v13921_v44 = vld [vmem:[%s14328_s9 + $0x90] sm:$0xff]  ;;  %v13939_v60 = vld [vmem:[%s18344_s1 + $0x1e0] sm:$0xff] }
 0x1c3   : > { %v15625_v21 = vadd.f32 %v3813_v11, %v3589_v5  ;;  %3050 = vst [vmem:[#allocation2 + $0x14] sm:$0x1] %v3049_v4  ;;  %v2900_v19 = vshrl.u32 %v2866_v37, 16  ;;  %v2903_v34 = vshll.u32 %v2866_v37, 16  ;;  %v4172_v9 = vrot.slane %v4171_v63, 4  ;;  %5193 = vmatpush.bf16.msra.mxu0 %v13939_v60 }
 0x1c4   : > { %v2816_v31 = vmul.f32 %v15499_v40, %v2797_v56  ;;  %302 = vst [vmem:[#allocation2 + $0x30] sm:$0x1] %v301_v46  ;;  %v4493_v29 = vrot.slane %v15618_v16, 5  ;;  %v4182_v49 = vshll.u32 %v12264_v7, 16  ;;  %v351_v56 = vsel %vm15438_vm10, 0, %v350_v53  ;;  %v13971_v46 = vld [vmem:[%s18345_s2 + $0x60] sm:$0xff] }
 0x1c5   : > { %v15636_v36 = vrot.slane %v2900_v19, 7  ;;  %v4192_v19 = vshrl.u32 %v15641_v18, 16  ;;  %v4177_v1 = vsel %vm14379_vm5, %v4172_v9, %v15643_v15  ;;  %352 = vst [vmem:[#allocation2 + $0x38] sm:$0x1] %v351_v56  ;;  %6117 = vmatpush.bf16.msra.mxu2 %v13971_v46  ;;  %v4181_v15 = vrot.slane %v4179_v55, 4 }
 0x1c6   : > { %v2835_v0 = vadd.f32 %v15509_v8, %v2816_v31  ;;  %v4297_v53 = vunpack.c.l.b16 %v4177_v1 }
 0x1c7   : > { %v2905_v51 = vor.u32 %v2903_v34, %v15636_v36  ;;  %v4491_v34 = vsel %vm14369_vm4, %v12335_v10, %v4490_v54  ;;  %v4194_v54 = vrot.slane %v4192_v19, 4  ;;  %v2906_v10 = vrot.slane %v15636_v36, 4 }
 0x1c8   : > { %v2851_v17 = vmax.f32 %v2835_v0, 0.0  ;;  %v3590_v25 = vpop.f32.mrf.mxu2  ;;  %v2764_v11 = vpop.f32.mrf.mxu0  ;;  %v4494_v0 = vsel %vm14369_vm4, %v4492_v24, %v4493_v29  ;;  %v15688_v29 = vld [vmem:[%s14328_s9 + $0xa4] sm:$0x1] }
 0x1c9   : > { %v3815_v28 = vpop.f32.mrf.mxu3  ;;  %v3591_v33 = vadd.f32 %v3590_v25, %v3445_v12  ;;  %v3448_v5 = vpop.f32.mrf.mxu1  ;;  %v3052_v41 = vsel %vm15564_vm12, %v2905_v51, %v3051_v2  ;;  %v2798_v37 = vadd.f32 %v2764_v11, %v15238_v38  ;;  %v4167_v12 = vsel %vm14379_vm5, %v4162_v23, %v15614_v59  ;;  %v13963_v38 = vld [vmem:[%s18345_s2 + $0x20] sm:$0xff] }
 0x1ca   : > { %v2867_v4 = vpack.c.bf16 %v2851_v17, %v2851_v17  ;;  %3053 = vst [vmem:[#allocation2 + $0x18] sm:$0xf] %v3052_v41  ;;  %v13947_v59 = vld [vmem:[%s18344_s1 + $0x220] sm:$0xff]  ;;  %v15682_v23 = vunpack.c.l.b16 %v4167_v12  ;;  %6262 = vmatpush.bf16.msra.mxu3 %v13963_v38  ;;  %v4184_v51 = vrot.slane %v4182_v49, 5  ;;  %v15684_v17 = vrot.slane %v4188_v57, 5 }
 0x1cb   : > { %v15655_v16 = vadd.f32 %v3815_v28, %v3591_v33  ;;  %v2817_v63 = vmul.f32 %v15499_v40, %v2798_v37  ;;  %4011 = vmatmul.bf16.gmra.mxu0 %v13889_v13  ;;  %5442 = vmatpush.bf16.msra.mxu1 %v13947_v59  ;;  %v4545_v41 = vunpack.c.l.b16 %v4491_v34  ;;  %v4546_v55 = vunpack.c.l.b16 %v4494_v0  ;;  %v303_v49 = vld [vmem:[#allocation2 + $0x3c] sm:$0x1] }
 0x1cc   : > { %v2908_v31 = vshrl.u32 %v2867_v4, 16  ;;  %4388 = vmatmul.bf16.gmra.mxu1 %v4308_v42  ;;  %v2911_v2 = vshll.u32 %v2867_v4, 16  ;;  %v4185_v12 = vor.u32 %v4184_v51, %v4181_v15  ;;  %v4198_v46 = vshll.u32 %v15688_v29, 16 }
 0x1cd   : > { %4637 = vmatmul.bf16.gmra.mxu2 %v4557_v50  ;;  %v2836_v42 = vadd.f32 %v15509_v8, %v2817_v63  ;;  %v3055_v50 = vld [vmem:[#allocation2 + $0x20] sm:$0x1]  ;;  %v4195_v19 = vor.u32 %v4194_v54, %v15684_v17  ;;  %v4309_v63 = vpack.c.b16 %v4297_v53, %v15682_v23  ;;  %v4558_v0 = vpack.c.b16 %v4546_v55, %v4545_v41  ;;  %v353_v41 = vld [vmem:[#allocation2 + $0x44] sm:$0x1] }
 0x1ce   : > { %4831 = vmatmul.bf16.gmra.mxu3 %v13921_v44  ;;  %v2910_v7 = vrot.slane %v2908_v31, 7  ;;  %v12328_v31 = vld [vmem:[%s14328_s9 + $0x9c] sm:$0xe]  ;;  %v15712_v15 = vrot.slane %v4198_v46, 5 }
 0x1cf   : > { %v2852_v28 = vmax.f32 %v2836_v42, 0.0  ;;  %v3058_v42 = vld [vmem:[#allocation2 + $0x24] sm:$0xf]  ;;  %v12336_v51 = vrot.slane %v12328_v31, 9  ;;  %v13922_v53 = vld [vmem:[%s14328_s9 + $0x9c] sm:$0xff] }
 0x1d0   : > { %v2913_v24 = vor.u32 %v2911_v2, %v2910_v7  ;;  %v2915_v25 = vrot.slane %v2910_v7, 4  ;;  %v3593_v13 = vpop.f32.mrf.mxu2  ;;  %v2766_v11 = vpop.f32.mrf.mxu0  ;;  %v12267_v7 = vld [vmem:[%s14328_s9 + $0xa8] sm:$0xf]  ;;  %v15710_v2 = vld [vmem:[%s14328_s9 + $0xac] sm:$0xf]  ;;  %v13938_v46 = vld [vmem:[%s18344_s1 + $0x1d8] sm:$0xff] }
 0x1d1   : > { %v3818_v9 = vpop.f32.mrf.mxu3  ;;  %v3594_v33 = vadd.f32 %v3593_v13, %v3448_v5  ;;  %v3450_v44 = vpop.f32.mrf.mxu1  ;;  %v2868_v4 = vpack.c.bf16 %v2852_v28, %v2852_v28  ;;  %v2799_v37 = vadd.f32 %v2766_v11, %v15252_v20  ;;  %v304_v5 = vsel %vm15403_vm8, 0, %v303_v49  ;;  %5194 = vmatpush.bf16.msra.mxu0 %v13938_v46 }
 0x1d2   : > { %v2914_v57 = vsel %vm15606_vm14, %v2906_v10, %v2913_v24  ;;  %v3056_v36 = vsel %vm15403_vm8, %v2915_v25, %v3055_v50  ;;  %v4497_v20 = vrot.slane %v15641_v18, 5  ;;  %305 = vst [vmem:[#allocation2 + $0x3c] sm:$0x1] %v304_v5  ;;  %v4186_v50 = vrot.slane %v4185_v12, 4  ;;  %v13890_v25 = vld [vmem:[%s14328_s9 + $0x90] sm:$0xff]  ;;  %v13970_v12 = vld [vmem:[%s18345_s2 + $0x58] sm:$0xff] }
 0x1d3   : > { %3054 = vst [vmem:[#allocation2 + $0x1c] sm:$0xf] %v2914_v57  ;;  %v15695_v56 = vadd.f32 %v3818_v9, %v3594_v33  ;;  %v2917_v60 = vshrl.u32 %v2868_v4, 16  ;;  %v2818_v38 = vmul.f32 %v15499_v40, %v2799_v37  ;;  %v2920_v1 = vshll.u32 %v2868_v4, 16  ;;  %6118 = vmatpush.bf16.msra.mxu2 %v13970_v12 }
 0x1d4   : > { %3057 = vst [vmem:[#allocation2 + $0x20] sm:$0x1] %v3056_v36  ;;  %v4500_v18 = vrot.slane %v15688_v29, 5  ;;  %v4196_v28 = vrot.slane %v4195_v19, 4  ;;  %v4499_v13 = vrot.slane %v4497_v20, 4  ;;  %v4203_v55 = vshrl.u32 %v12267_v7, 16 }
 0x1d5   : > { %v15705_v59 = vrot.slane %v2917_v60, 7  ;;  %v2837_v34 = vadd.f32 %v15509_v8, %v2818_v38  ;;  %v4206_v49 = vshll.u32 %v12267_v7, 16  ;;  %v4212_v57 = vshll.u32 %v15710_v2, 16 }
 0x1d6   : > { %v354_v37 = vsel %vm15438_vm10, 0, %v353_v41  ;;  %v4216_v60 = vshrl.u32 %v15710_v2, 16  ;;  %v4201_v31 = vsel %vm14379_vm5, %v4196_v28, %v15712_v15  ;;  %v4205_v15 = vrot.slane %v4203_v55, 4 }
 0x1d7   : > { %v2922_v23 = vor.u32 %v2920_v1, %v15705_v59  ;;  %v2853_v54 = vmax.f32 %v2837_v34, 0.0  ;;  %v4498_v1 = vsel %vm14369_vm4, %v12336_v51, %v4497_v20  ;;  %v4501_v34 = vsel %vm14369_vm4, %v4499_v13, %v4500_v18  ;;  %355 = vst [vmem:[#allocation2 + $0x44] sm:$0x1] %v354_v37  ;;  %v15757_v13 = vld [vmem:[%s14328_s9 + $0xb0] sm:$0x1] }
 0x1d8   : > { %v3595_v10 = vpop.f32.mrf.mxu2  ;;  %v2769_v33 = vpop.f32.mrf.mxu0  ;;  %v4218_v20 = vrot.slane %v4216_v60, 4  ;;  %v2923_v51 = vrot.slane %v15705_v59, 4  ;;  %v15759_v41 = vunpack.c.l.b16 %v4201_v31  ;;  %v4548_v55 = vunpack.c.l.b16 %v4501_v34  ;;  %v15766_v37 = vld [vmem:[#allocation2 + $0xc] sm:$0xf] }
 0x1d9   : > { %v3820_v24 = vpop.f32.mrf.mxu3  ;;  %v3596_v9 = vadd.f32 %v3595_v10, %v3450_v44  ;;  %v3453_v11 = vpop.f32.mrf.mxu1  ;;  %v3059_v29 = vsel %vm15564_vm12, %v2922_v23, %v3058_v42  ;;  %v2869_v36 = vpack.c.bf16 %v2853_v54, %v2853_v54  ;;  %v2800_v4 = vadd.f32 %v2769_v33, %v15285_v62  ;;  %v13962_v62 = vld [vmem:[%s18345_s2 + $0x18] sm:$0xff] }
 0x1da   : > { %3060 = vst [vmem:[#allocation2 + $0x24] sm:$0xf] %v3059_v29  ;;  %v4191_v44 = vsel %vm14379_vm5, %v4186_v50, %v15684_v17  ;;  %v13946_v17 = vld [vmem:[%s18344_s1 + $0x218] sm:$0xff]  ;;  %6263 = vmatpush.bf16.msra.mxu3 %v13962_v62  ;;  %v4208_v23 = vrot.slane %v4206_v49, 5  ;;  %v15753_v54 = vrot.slane %v4212_v57, 5  ;;  %v4547_v29 = vunpack.c.l.b16 %v4498_v1 }
 0x1db   : > { %v15724_v5 = vadd.f32 %v3820_v24, %v3596_v9  ;;  %v2925_v38 = vshrl.u32 %v2869_v36, 16  ;;  %v2819_v19 = vmul.f32 %v15499_v40, %v2800_v4  ;;  %4016 = vmatmul.bf16.gmra.mxu0 %v13890_v25  ;;  %v2928_v42 = vshll.u32 %v2869_v36, 16  ;;  %5443 = vmatpush.bf16.msra.mxu1 %v13946_v17  ;;  %v306_v49 = vld [vmem:[#allocation2 + $0x48] sm:$0x1] }
 0x1dc   : > { %4393 = vmatmul.bf16.gmra.mxu1 %v4309_v63  ;;  %v15751_v50 = vunpack.c.l.b16 %v4191_v44  ;;  %v307_v44 = vsel %vm15403_vm8, 0, %v306_v49  ;;  %v4209_v12 = vor.u32 %v4208_v23, %v4205_v15  ;;  %v4222_v46 = vshll.u32 %v15757_v13, 16  ;;  %v15786_v15 = vld [vmem:[%s14328_s9 + $0xb8] sm:$0xf]  ;;  %v3065_v23 = vld [vmem:[#allocation2 + $0x30] sm:$0xf] }
 0x1dd   : > { %4642 = vmatmul.bf16.gmra.mxu2 %v4558_v0  ;;  %v2927_v7 = vrot.slane %v2925_v38, 7  ;;  %v2838_v63 = vadd.f32 %v15509_v8, %v2819_v19  ;;  %v3062_v0 = vld [vmem:[#allocation2 + $0x2c] sm:$0x1]  ;;  %v4219_v38 = vor.u32 %v4218_v20, %v15753_v54  ;;  %v4504_v19 = vrot.slane %v15710_v2, 5  ;;  %308 = vst [vmem:[#allocation2 + $0x48] sm:$0x1] %v307_v44 }
 0x1de   : > { %4836 = vmatmul.bf16.gmra.mxu3 %v13922_v53  ;;  %v4310_v17 = vpack.c.b16 %v15759_v41, %v15751_v50  ;;  %v5850_v31 = vshrl.u32 %v15766_v37, 16  ;;  %v5853_v1 = vshll.u32 %v15766_v37, 16  ;;  %v4210_v2 = vrot.slane %v4209_v12, 4  ;;  %v15793_v41 = vld [vmem:[#allocation2 + $0x10] sm:$0xf] }
 0x1df   : > { %v2930_v18 = vor.u32 %v2928_v42, %v2927_v7  ;;  %v2932_v10 = vrot.slane %v2927_v7, 4  ;;  %v2854_v24 = vmax.f32 %v2838_v63, 0.0  ;;  %v4559_v63 = vpack.c.b16 %v4548_v55, %v4547_v29 }
 0x1e0   : > { %v3598_v25 = vpop.f32.mrf.mxu2  ;;  %v2771_v33 = vpop.f32.mrf.mxu0  ;;  %v15788_v20 = vrot.slane %v4222_v46, 5  ;;  %v4236_v44 = vshll.u32 %v15786_v15, 16 }
 0x1e1   : > { %v3823_v28 = vpop.f32.mrf.mxu3  ;;  %v3599_v9 = vadd.f32 %v3598_v25, %v3453_v11  ;;  %v3455_v53 = vpop.f32.mrf.mxu1  ;;  %v2931_v57 = vsel %vm15606_vm14, %v2923_v51, %v2930_v18  ;;  %v3063_v59 = vsel %vm15403_vm8, %v2932_v10, %v3062_v0  ;;  %v2870_v36 = vpack.c.bf16 %v2854_v24, %v2854_v24  ;;  %v12270_v0 = vld [vmem:[%s14328_s9 + $0xb4] sm:$0xf] }
 0x1e2   : > { %v2801_v4 = vadd.f32 %v2771_v33, %v15299_v47  ;;  %3061 = vst [vmem:[#allocation2 + $0x28] sm:$0xf] %v2931_v57  ;;  %v12329_v47 = vld [vmem:[%s14328_s9 + $0xa8] sm:$0xe]  ;;  %v4507_v51 = vrot.slane %v15757_v13, 5  ;;  %v4506_v33 = vrot.slane %v4504_v19, 4 }
 0x1e3   : > { %v15768_v11 = vadd.f32 %v3823_v28, %v3599_v9  ;;  %3064 = vst [vmem:[#allocation2 + $0x2c] sm:$0x1] %v3063_v59  ;;  %v2934_v62 = vshrl.u32 %v2870_v36, 16  ;;  %v2937_v7 = vshll.u32 %v2870_v36, 16  ;;  %v12337_v50 = vrot.slane %v12329_v47, 9  ;;  %v13891_v28 = vld [vmem:[%s14328_s9 + $0x9c] sm:$0xff] }
 0x1e4   : > { %v2820_v60 = vmul.f32 %v15499_v40, %v2801_v4  ;;  %v4220_v9 = vrot.slane %v4219_v38, 4  ;;  %v13923_v57 = vld [vmem:[%s14328_s9 + $0xa8] sm:$0xff]  ;;  %v356_v59 = vld [vmem:[#allocation2 + $0x50] sm:$0x1]  ;;  %v4227_v36 = vshrl.u32 %v12270_v0, 16  ;;  %v4230_v4 = vshll.u32 %v12270_v0, 16 }
 0x1e5   : > { %v15781_v34 = vrot.slane %v2934_v62, 7  ;;  %v357_v62 = vsel %vm15438_vm10, 0, %v356_v59  ;;  %v13969_v38 = vld [vmem:[%s18345_s2 + $0x50] sm:$0xff] }
 0x1e6   : > { %v2839_v42 = vadd.f32 %v15509_v8, %v2820_v60  ;;  %v13937_v47 = vld [vmem:[%s18344_s1 + $0x1d0] sm:$0xff]  ;;  %358 = vst [vmem:[#allocation2 + $0x50] sm:$0x1] %v357_v62  ;;  %6119 = vmatpush.bf16.msra.mxu2 %v13969_v38 }
 0x1e7   : > { %v2939_v18 = vor.u32 %v2937_v7, %v15781_v34  ;;  %v4240_v7 = vshrl.u32 %v15786_v15, 16  ;;  %5195 = vmatpush.bf16.msra.mxu0 %v13937_v47 }
 0x1e8   : > { %v2855_v10 = vmax.f32 %v2839_v42, 0.0  ;;  %v3600_v24 = vpop.f32.mrf.mxu2  ;;  %v2774_v55 = vpop.f32.mrf.mxu0 }
 0x1e9   : > { %v3825_v25 = vpop.f32.mrf.mxu3  ;;  %v3601_v29 = vadd.f32 %v3600_v24, %v3455_v53  ;;  %v3458_v49 = vpop.f32.mrf.mxu1  ;;  %v3066_v13 = vsel %vm15564_vm12, %v2939_v18, %v3065_v23  ;;  %v2802_v46 = vadd.f32 %v2774_v55, %v15332_v26  ;;  %v4215_v53 = vsel %vm14379_vm5, %v4210_v2, %v15753_v54  ;;  %v13961_v26 = vld [vmem:[%s18345_s2 + $0x10] sm:$0xff] }
 0x1ea   : > { %v2871_v12 = vpack.c.bf16 %v2855_v10, %v2855_v10  ;;  %3067 = vst [vmem:[#allocation2 + $0x30] sm:$0xf] %v3066_v13  ;;  %v13945_v54 = vld [vmem:[%s18344_s1 + $0x210] sm:$0xff]  ;;  %v15821_v23 = vrot.slane %v5850_v31, 4  ;;  %v5859_v2 = vshll.u32 %v15793_v41, 16  ;;  %v4225_v18 = vsel %vm14379_vm5, %v4220_v9, %v15788_v20  ;;  %6264 = vmatpush.bf16.msra.mxu3 %v13961_v26 }
 0x1eb   : > { %v15802_v60 = vadd.f32 %v3825_v25, %v3601_v29  ;;  %v2821_v0 = vmul.f32 %v15499_v40, %v2802_v46  ;;  %4021 = vmatmul.bf16.gmra.mxu0 %v13891_v28  ;;  %v4505_v10 = vsel %vm14369_vm4, %v12337_v50, %v4504_v19  ;;  %v15832_v28 = vunpack.c.l.b16 %v4215_v53  ;;  %5444 = vmatpush.bf16.msra.mxu1 %v13945_v54  ;;  %v15838_v13 = vld [vmem:[%s14328_s9 + $0xbc] sm:$0x1] }
 0x1ec   : > { %v2942_v42 = vshrl.u32 %v2871_v12, 16  ;;  %4398 = vmatmul.bf16.gmra.mxu1 %v4310_v17  ;;  %v4508_v17 = vsel %vm14369_vm4, %v4506_v33, %v4507_v51  ;;  %v2945_v25 = vshll.u32 %v2871_v12, 16  ;;  %v4229_v20 = vrot.slane %v4227_v36, 4 }
 0x1ed   : > { %4647 = vmatmul.bf16.gmra.mxu2 %v4559_v63  ;;  %v2840_v31 = vadd.f32 %v15509_v8, %v2821_v0  ;;  %v3069_v63 = vld [vmem:[#allocation2 + $0x38] sm:$0x1]  ;;  %v4232_v9 = vrot.slane %v4230_v4, 5  ;;  %v15834_v29 = vrot.slane %v4236_v44, 5  ;;  %v4242_v19 = vrot.slane %v4240_v7, 4 }
 0x1ee   : > { %4841 = vmatmul.bf16.gmra.mxu3 %v13923_v57  ;;  %v2944_v24 = vrot.slane %v2942_v42, 7  ;;  %v2940_v50 = vrot.slane %v15781_v34, 4  ;;  %v15840_v53 = vunpack.c.l.b16 %v4225_v18  ;;  %v4549_v38 = vunpack.c.l.b16 %v4505_v10  ;;  %v309_v4 = vld [vmem:[#allocation2 + $0x54] sm:$0x1] }
 0x1ef   : > { %v2856_v55 = vmax.f32 %v2840_v31, 0.0  ;;  %v4550_v36 = vunpack.c.l.b16 %v4508_v17  ;;  %v4233_v42 = vor.u32 %v4232_v9, %v4229_v20  ;;  %v4246_v0 = vshll.u32 %v15838_v13, 16  ;;  %v12330_v17 = vld [vmem:[%s14328_s9 + $0xb4] sm:$0xe] }
 0x1f0   : > { %v2947_v51 = vor.u32 %v2945_v25, %v2944_v24  ;;  %v2949_v33 = vrot.slane %v2944_v24, 4  ;;  %v3603_v57 = vpop.f32.mrf.mxu2  ;;  %v2776_v46 = vpop.f32.mrf.mxu0  ;;  %v4243_v10 = vor.u32 %v4242_v19, %v15834_v29  ;;  %v4311_v24 = vpack.c.b16 %v15840_v53, %v15832_v28  ;;  %v3072_v28 = vld [vmem:[#allocation2 + $0x3c] sm:$0xf] }
 0x1f1   : > { %v3828_v59 = vpop.f32.mrf.mxu3  ;;  %v3604_v12 = vadd.f32 %v3603_v57, %v3458_v49  ;;  %v3460_v62 = vpop.f32.mrf.mxu1  ;;  %v2872_v47 = vpack.c.bf16 %v2856_v55, %v2856_v55  ;;  %v2803_v26 = vadd.f32 %v2776_v46, %v15349_v14  ;;  %v310_v49 = vsel %vm15403_vm8, 0, %v309_v4  ;;  %v13892_v46 = vld [vmem:[%s14328_s9 + $0xa8] sm:$0xff] }
 0x1f2   : > { %v2948_v44 = vsel %vm15606_vm14, %v2940_v50, %v2947_v51  ;;  %v3070_v34 = vsel %vm15403_vm8, %v2949_v33, %v3069_v63  ;;  %v4511_v14 = vrot.slane %v15786_v15, 5  ;;  %311 = vst [vmem:[#allocation2 + $0x54] sm:$0x1] %v310_v49  ;;  %v15860_v25 = vrot.slane %v5853_v1, 5  ;;  %v12273_v15 = vld [vmem:[%s14328_s9 + $0xc0] sm:$0xf] }
 0x1f3   : > { %3068 = vst [vmem:[#allocation2 + $0x34] sm:$0xf] %v2948_v44  ;;  %v15847_v7 = vadd.f32 %v3828_v59, %v3604_v12  ;;  %v2951_v54 = vshrl.u32 %v2872_v47, 16  ;;  %v2822_v18 = vmul.f32 %v15499_v40, %v2803_v26  ;;  %v15862_v31 = vrot.slane %v5859_v2, 5  ;;  %v15870_v51 = vld [vmem:[%s14328_s9 + $0xc4] sm:$0xf] }
 0x1f4   : > { %3071 = vst [vmem:[#allocation2 + $0x38] sm:$0x1] %v3070_v34  ;;  %v5863_v63 = vshrl.u32 %v15793_v41, 16  ;;  %v2954_v9 = vshll.u32 %v2872_v47, 16  ;;  %v4560_v50 = vpack.c.b16 %v4550_v36, %v4549_v38  ;;  %v4234_v33 = vrot.slane %v4233_v42, 4  ;;  %v13924_v34 = vld [vmem:[%s14328_s9 + $0xb4] sm:$0xff] }
 0x1f5   : > { %v15865_v20 = vrot.slane %v2951_v54, 7  ;;  %v2841_v19 = vadd.f32 %v15509_v8, %v2822_v18  ;;  %v4248_v37 = vrot.slane %v4246_v0, 5  ;;  %v12338_v1 = vrot.slane %v12330_v17, 9  ;;  %v359_v47 = vld [vmem:[#allocation2 + $0x5c] sm:$0x1]  ;;  %v13968_v17 = vld [vmem:[%s18345_s2 + $0x48] sm:$0xff] }
 0x1f6   : > { %v4514_v2 = vrot.slane %v15838_v13, 5  ;;  %v4244_v53 = vrot.slane %v4243_v10, 4  ;;  %v4513_v4 = vrot.slane %v4511_v14, 4  ;;  %v4251_v26 = vshrl.u32 %v12273_v15, 16  ;;  %6120 = vmatpush.bf16.msra.mxu2 %v13968_v17 }
 0x1f7   : > { %v2956_v55 = vor.u32 %v2954_v9, %v15865_v20  ;;  %v2857_v57 = vmax.f32 %v2841_v19, 0.0  ;;  %v4254_v49 = vshll.u32 %v12273_v15, 16  ;;  %v4260_v42 = vshll.u32 %v15870_v51, 16  ;;  %v13936_v9 = vld [vmem:[%s18344_s1 + $0x1c8] sm:$0xff] }
 0x1f8   : > { %v3605_v59 = vpop.f32.mrf.mxu2  ;;  %v2779_v38 = vpop.f32.mrf.mxu0  ;;  %v360_v18 = vsel %vm15438_vm10, 0, %v359_v47  ;;  %v4264_v19 = vshrl.u32 %v15870_v51, 16  ;;  %5196 = vmatpush.bf16.msra.mxu0 %v13936_v9  ;;  %v15929_v17 = vrot.slane %v5863_v63, 4 }
 0x1f9   : > { %v3830_v12 = vpop.f32.mrf.mxu3  ;;  %v3606_v44 = vadd.f32 %v3605_v59, %v3460_v62  ;;  %v3463_v36 = vpop.f32.mrf.mxu1  ;;  %v3073_v13 = vsel %vm15564_vm12, %v2956_v55, %v3072_v28  ;;  %v2873_v0 = vpack.c.bf16 %v2857_v57, %v2857_v57  ;;  %v2804_v54 = vadd.f32 %v2779_v38, %v15383_v43  ;;  %v13960_v43 = vld [vmem:[%s18345_s2 + $0x8] sm:$0xff]  ;;  %361 = vst [vmem:[#allocation2 + $0x5c] sm:$0x1] %v360_v18 }
 0x1fa   : > { %3074 = vst [vmem:[#allocation2 + $0x3c] sm:$0xf] %v3073_v13  ;;  %v4239_v62 = vsel %vm14379_vm5, %v4234_v33, %v15834_v29  ;;  %v4249_v29 = vsel %vm14379_vm5, %v4244_v53, %v4248_v37  ;;  %v15902_v33 = vsel %vm14369_vm4, %v12338_v1, %v4511_v14  ;;  %v13944_v55 = vld [vmem:[%s18344_s1 + $0x208] sm:$0xff]  ;;  %v15909_v57 = vsel %vm14369_vm4, %v4513_v4, %v4514_v2 }
 0x1fb   : > { %v15882_v10 = vadd.f32 %v3830_v12, %v3606_v44  ;;  %v2959_v15 = vshrl.u32 %v2873_v0, 16  ;;  %v2823_v28 = vmul.f32 %v15499_v40, %v2804_v54  ;;  %4026 = vmatmul.bf16.gmra.mxu0 %v13892_v46  ;;  %v4253_v40 = vrot.slane %v4251_v26, 4  ;;  %v3076_v12 = vld [vmem:[#allocation2 + $0x44] sm:$0x1]  ;;  %6265 = vmatpush.bf16.msra.mxu3 %v13960_v43  ;;  %v15919_v53 = vld [vmem:[%s14328_s9 + $0xc8] sm:$0x1] }
 0x1fc   : > { %4403 = vmatmul.bf16.gmra.mxu1 %v4311_v24  ;;  %v4256_v24 = vrot.slane %v4254_v49, 5  ;;  %v2962_v37 = vshll.u32 %v2873_v0, 16  ;;  %v15912_v1 = vunpack.c.l.b16 %v4239_v62  ;;  %v14237_v46 = vmov 0   ;;  %v312_v62 = vld [vmem:[#allocation2 + $0x60] sm:$0x1] }
 0x1fd   : > { %4652 = vmatmul.bf16.gmra.mxu2 %v4560_v50  ;;  %v2961_v59 = vrot.slane %v2959_v15, 7  ;;  %v2842_v14 = vadd.f32 %v15509_v8, %v2823_v28  ;;  %280 = vst [vmem:[#allocation2] sm:$0xf] %v14237_v46  ;;  %v15915_v50 = vunpack.c.l.b16 %v4249_v29  ;;  %v4551_v2 = vunpack.c.l.b16 %v15902_v33  ;;  %5445 = vmatpush.bf16.msra.mxu1 %v13944_v55 }
 0x1fe   : > { %4846 = vmatmul.bf16.gmra.mxu3 %v13924_v34  ;;  %v15921_v4 = vrot.slane %v4260_v42, 5  ;;  %v4266_v44 = vrot.slane %v4264_v19, 4  ;;  %281 = vst [vmem:[#allocation2 + $0x4] sm:$0xf] %v14237_v46  ;;  %v2957_v8 = vrot.slane %v15865_v20, 4  ;;  %v4552_v18 = vunpack.c.l.b16 %v15909_v57 }
 0x1ff   : > { %v2964_v38 = vor.u32 %v2962_v37, %v2961_v59  ;;  %v2966_v34 = vrot.slane %v2961_v59, 4  ;;  %v2858_v47 = vmax.f32 %v2842_v14, 0.0  ;;  %282 = vst [vmem:[#allocation2 + $0x8] sm:$0x1] %v14237_v46  ;;  %v4257_v42 = vor.u32 %v4256_v24, %v4253_v40  ;;  %v12331_v24 = vld [vmem:[%s14328_s9 + $0xc0] sm:$0xe] }
 0x200   : > { %v3608_v26 = vpop.f32.mrf.mxu2  ;;  %v2781_v0 = vpop.f32.mrf.mxu0  ;;  %284 = vst [vmem:[#allocation2 + $0xcc] sm:$0xf] %v14237_v46  ;;  %v313_v41 = vsel %vm15403_vm8, 0, %v312_v62  ;;  %v4267_v63 = vor.u32 %v4266_v44, %v15921_v4  ;;  %v4270_v28 = vshll.u32 %v15919_v53, 16  ;;  %v4518_v55 = vrot.slane %v15870_v51, 5 }
 0x201   : > { %v3833_v49 = vpop.f32.mrf.mxu3  ;;  %v3609_v13 = vadd.f32 %v3608_v26, %v3463_v36  ;;  %v3465_v54 = vpop.f32.mrf.mxu1  ;;  %v2965_v20 = vsel %vm15606_vm14, %v2957_v8, %v2964_v38  ;;  %v3077_v9 = vsel %vm15403_vm8, %v2966_v34, %v3076_v12  ;;  %v2874_v43 = vpack.c.bf16 %v2858_v47, %v2858_v47  ;;  %v15937_v36 = vld [vmem:[#allocation2 + $0x14] sm:$0x1]  ;;  %314 = vst [vmem:[#allocation2 + $0x60] sm:$0x1] %v313_v41  ;;  %v3079_v44 = vld [vmem:[#allocation2 + $0x48] sm:$0xf] }
 0x202   : > { %v2805_v19 = vadd.f32 %v2781_v0, %v15398_v39  ;;  %3075 = vst [vmem:[#allocation2 + $0x40] sm:$0xf] %v2965_v20  ;;  %v15948_v39 = vld [vmem:[%s18346_s3] ss:$0 sm:$0xff]  ;;  %v4312_v57 = vpack.c.b16 %v15915_v50, %v15912_v1  ;;  %v4258_v40 = vrot.slane %v4257_v42, 4  ;;  %v5869_v37 = vshll.u32 %v15937_v36, 16 }
 0x203   : > { %v15939_v15 = vadd.f32 %v3833_v49, %v3609_v13  ;;  %3078 = vst [vmem:[#allocation2 + $0x44] sm:$0x1] %v3077_v9  ;;  %v2968_v29 = vshrl.u32 %v2874_v43, 16  ;;  %v2971_v14 = vshll.u32 %v2874_v43, 16  ;;  %v15963_v51 = vld [vmem:[%s18347_s4] ss:$0 sm:$0xff]  ;;  %v4561_v50 = vpack.c.b16 %v4552_v18, %v4551_v2 }
 0x204   : > { %v2824_v33 = vmul.f32 %v15948_v39, %v2805_v19  ;;  %v12484_v8 = vld [vmem:[%s14328_s9 + $0x78] sm:$0xf]  ;;  %v4268_v34 = vrot.slane %v4267_v63, 4  ;;  %v4272_v47 = vrot.slane %v4270_v28, 5  ;;  %v4521_v26 = vrot.slane %v15919_v53, 5  ;;  %v13967_v2 = vld [vmem:[%s18345_s2 + $0x40] sm:$0xff] }
 0x205   : > { %v15958_v12 = vrot.slane %v2968_v29, 7  ;;  %v13893_v38 = vld [vmem:[%s14328_s9 + $0xb4] sm:$0xff]  ;;  %v15970_v49 = vld [vmem:[%s14328_s9 + $0x7c] sm:$0xf]  ;;  %v5866_v13 = vor.u32 %v15929_v17, %v15862_v31  ;;  %v12339_v9 = vrot.slane %v12331_v24, 9  ;;  %v4520_v43 = vrot.slane %v4518_v55, 4  ;;  %6121 = vmatpush.bf16.msra.mxu2 %v13967_v2 }
 0x206   : > { %v2843_v1 = vadd.f32 %v15963_v51, %v2824_v33  ;;  %v13935_v53 = vld [vmem:[%s18344_s1 + $0x1c0] sm:$0xff]  ;;  %v4263_v28 = vsel %vm14379_vm5, %v4258_v40, %v15921_v4  ;;  %v362_v33 = vld [vmem:[#allocation2 + $0x68] sm:$0x1]  ;;  %v4903_v24 = vshrl.u32 %v12484_v8, 16  ;;  %v4273_v40 = vsel %vm14379_vm5, %v4268_v34, %v4272_v47  ;;  %285 = vst [vmem:[#allocation2 + $0xd0] sm:$0xf] %v14237_v46 }
 0x207   : > { %v2973_v0 = vor.u32 %v2971_v14, %v15958_v12  ;;  %v13959_v18 = vld [vmem:[%s18345_s2] sm:$0xff]  ;;  %v4906_v14 = vshll.u32 %v12484_v8, 16  ;;  %5197 = vmatpush.bf16.msra.mxu0 %v13935_v53  ;;  %v4912_v8 = vshll.u32 %v15970_v49, 16  ;;  %v16007_v2 = vrot.slane %v5869_v37, 5  ;;  %286 = vst [vmem:[#allocation2 + $0xd4] sm:$0x1] %v14237_v46 }
 0x208   : > { %v2859_v62 = vmax.f32 %v2843_v1, 0.0  ;;  %v3610_v42 = vpop.f32.mrf.mxu2  ;;  %v2784_v36 = vpop.f32.mrf.mxu0  ;;  %v13925_v63 = vld [vmem:[%s14328_s9 + $0xc0] sm:$0xff]  ;;  %6266 = vmatpush.bf16.msra.mxu3 %v13959_v18  ;;  %v16009_v34 = vunpack.c.l.b16 %v4263_v28  ;;  %v16013_v47 = vsel %vm14369_vm4, %v4520_v43, %v4521_v26  ;;  %v16020_v37 = vunpack.c.l.b16 %v4273_v40 }
 0x209   : > { %v3835_v20 = vpop.f32.mrf.mxu3  ;;  %v3611_v19 = vadd.f32 %v3610_v42, %v3465_v54  ;;  %v3468_v41 = vpop.f32.mrf.mxu1  ;;  %v13943_v29 = vld [vmem:[%s18344_s1 + $0x200] sm:$0xff]  ;;  %v3080_v1 = vsel %vm15564_vm12, %v2973_v0, %v3079_v44  ;;  %v2806_v54 = vadd.f32 %v2784_v36, %v15429_v6  ;;  %v363_v42 = vsel %vm15438_vm10, 0, %v362_v33 }
 0x20a   : > { %v2875_v59 = vpack.c.bf16 %v2859_v62, %v2859_v62  ;;  %3081 = vst [vmem:[#allocation2 + $0x48] sm:$0xf] %v3080_v1  ;;  %5446 = vmatpush.bf16.msra.mxu1 %v13943_v29  ;;  %v4916_v44 = vshrl.u32 %v15970_v49, 16  ;;  %v16005_v62 = vsel %vm14369_vm4, %v12339_v9, %v4518_v55  ;;  %v16016_v53 = vld [vmem:[%s14328_s9 + $0x80] sm:$0x1]  ;;  %v16023_v36 = vrot.slane %v4912_v8, 5 }
 0x20b   : > { %v15996_v4 = vadd.f32 %v3835_v20, %v3611_v19  ;;  %v2825_v6 = vmul.f32 %v15948_v39, %v2806_v54  ;;  %4031 = vmatmul.bf16.gmra.mxu0 %v13893_v38  ;;  %364 = vst [vmem:[#allocation2 + $0x68] sm:$0x1] %v363_v42  ;;  %v5785_v20 = vld [vmem:[#allocation2] sm:$0xf]  ;;  %v4905_v38 = vrot.slane %v4903_v24, 4  ;;  %v2974_v28 = vrot.slane %v15958_v12, 4 }
 0x20c   : > { %v2976_v0 = vshrl.u32 %v2875_v59, 16  ;;  %4408 = vmatmul.bf16.gmra.mxu1 %v4312_v57  ;;  %v4908_v57 = vrot.slane %v4906_v14, 5  ;;  %v2979_v9 = vshll.u32 %v2875_v59, 16  ;;  %v3083_v19 = vld [vmem:[#allocation2 + $0x50] sm:$0x1]  ;;  %v4918_v26 = vrot.slane %v4916_v44, 4 }
 0x20d   : > { %4657 = vmatmul.bf16.gmra.mxu2 %v4561_v50  ;;  %v2844_v18 = vadd.f32 %v15963_v51, %v2825_v6  ;;  %v5786_v50 = vld [vmem:[#allocation2 + $0x4] sm:$0xf]  ;;  %v5826_v43 = vshrl.u32 %v5785_v20, 16  ;;  %v4922_v40 = vshll.u32 %v16016_v53, 16 }
 0x20e   : > { %4851 = vmatmul.bf16.gmra.mxu3 %v13925_v63  ;;  %v2978_v55 = vrot.slane %v2976_v0, 7  ;;  %v5829_v63 = vshll.u32 %v5785_v20, 16  ;;  %v5835_v0 = vshll.u32 %v5786_v50, 16  ;;  %v5839_v46 = vshrl.u32 %v5786_v50, 16 }
 0x20f   : > { %v2860_v24 = vmax.f32 %v2844_v18, 0.0 }
 0x210   : > { %v2981_v29 = vor.u32 %v2979_v9, %v2978_v55  ;;  %v2983_v33 = vrot.slane %v2978_v55, 4  ;;  %v3613_v14 = vpop.f32.mrf.mxu2  ;;  %v2786_v54 = vpop.f32.mrf.mxu0  ;;  %v5828_v55 = vrot.slane %v5826_v43, 4  ;;  %v5831_v9 = vrot.slane %v5829_v63, 5  ;;  %v12556_v63 = vld [vmem:[%s14328_s9 + $0x78] sm:$0xe] }
 0x211   : > { %v3838_v59 = vpop.f32.mrf.mxu3  ;;  %v3614_v1 = vadd.f32 %v3613_v14, %v3468_v41  ;;  %v3470_v42 = vpop.f32.mrf.mxu1  ;;  %v2876_v6 = vpack.c.bf16 %v2860_v24, %v2860_v24  ;;  %v2807_v12 = vadd.f32 %v2786_v54, %v15454_v52  ;;  %v4909_v41 = vor.u32 %v4908_v57, %v4905_v38  ;;  %v13982_v52 = vld [vmem:[%s18345_s2 + $0xb8] sm:$0xff] }
 0x212   : > { %v2982_v8 = vsel %vm15606_vm14, %v2974_v28, %v2981_v29  ;;  %v3084_v44 = vsel %vm15403_vm8, %v2983_v33, %v3083_v19  ;;  %v4919_v14 = vor.u32 %v4918_v26, %v16023_v36  ;;  %v14006_v19 = vld [vmem:[%s18345_s2 + $0x138] sm:$0xff]  ;;  %v16045_v38 = vrot.slane %v5866_v13, 4  ;;  %6485 = vmatpush.bf16.msrb.mxu0 %v13982_v52  ;;  %v13926_v52 = vld [vmem:[%s14328_s9 + $0xcc] sm:$0xff] }
 0x213   : > { %3082 = vst [vmem:[#allocation2 + $0x4c] sm:$0xf] %v2982_v8  ;;  %v16032_v20 = vadd.f32 %v3838_v59, %v3614_v1  ;;  %v2985_v18 = vshrl.u32 %v2876_v6, 16  ;;  %v2826_v50 = vmul.f32 %v15948_v39, %v2807_v12  ;;  %v4553_v57 = vunpack.c.l.b16 %v16005_v62  ;;  %v14014_v29 = vld [vmem:[%s18345_s2 + $0x178] sm:$0xff]  ;;  %7057 = vmatpush.bf16.msrb.mxu2 %v14006_v19  ;;  %v3086_v59 = vld [vmem:[#allocation2 + $0x54] sm:$0xf] }
 0x214   : > { %3085 = vst [vmem:[#allocation2 + $0x50] sm:$0x1] %v3084_v44  ;;  %v4554_v43 = vunpack.c.l.b16 %v16013_v47  ;;  %v16050_v28 = vrot.slane %v5835_v0, 5  ;;  %v5841_v26 = vrot.slane %v5839_v46, 4  ;;  %v13998_v33 = vld [vmem:[%s18345_s2 + $0xf8] sm:$0xff]  ;;  %v2988_v17 = vshll.u32 %v2876_v6, 16  ;;  %7307 = vmatpush.bf16.msrb.mxu3 %v14014_v29 }
 0x215   : > { %v16058_v24 = vrot.slane %v2985_v18, 7  ;;  %v2845_v13 = vadd.f32 %v15963_v51, %v2826_v50  ;;  %v4313_v62 = vpack.c.b16 %v16020_v37, %v16009_v34  ;;  %v5817_v47 = vld [vmem:[#allocation2 + $0x8] sm:$0x1]  ;;  %v4910_v1 = vrot.slane %v4909_v41, 4  ;;  %6679 = vmatpush.bf16.msrb.mxu1 %v13998_v33  ;;  %v13894_v34 = vld [vmem:[%s14328_s9 + $0xc0] sm:$0xff] }
 0x216   : > { %v16063_v54 = vrot.slane %v4922_v40, 5  ;;  %v5289_v0 = vrot.slane %v15970_v49, 5  ;;  %v5832_v46 = vor.u32 %v5831_v9, %v5828_v55  ;;  %v16068_v37 = vrot.slane %v4919_v14, 4  ;;  %v12487_v14 = vld [vmem:[%s14328_s9 + $0x84] sm:$0xf] }
 0x217   : > { %v2990_v8 = vor.u32 %v2988_v17, %v16058_v24  ;;  %v2861_v44 = vmax.f32 %v2845_v13, 0.0  ;;  %v12564_v18 = vrot.slane %v12556_v63, 9  ;;  %v4562_v19 = vpack.c.b16 %v4554_v43, %v4553_v57 }
 0x218   : > { %v3615_v6 = vpop.f32.mrf.mxu2  ;;  %v2789_v41 = vpop.f32.mrf.mxu0  ;;  %v5842_v49 = vor.u32 %v5841_v26, %v16050_v28  ;;  %v5845_v55 = vshll.u32 %v5817_v47, 16  ;;  %v5292_v17 = vrot.slane %v16016_v53, 5  ;;  %v5291_v57 = vrot.slane %v5289_v0, 4  ;;  %v16092_v47 = vld [vmem:[%s14328_s9 + $0x88] sm:$0xf] }
 0x219   : > { %v3840_v12 = vpop.f32.mrf.mxu3  ;;  %v3616_v50 = vadd.f32 %v3615_v6, %v3470_v42  ;;  %v3473_v40 = vpop.f32.mrf.mxu1  ;;  %v3087_v9 = vsel %vm15564_vm12, %v2990_v8, %v3086_v59  ;;  %v2877_v29 = vpack.c.bf16 %v2861_v44, %v2861_v44  ;;  %v2808_v33 = vadd.f32 %v2789_v41, %v15488_v27 }
 0x21a   : > { %3088 = vst [vmem:[#allocation2 + $0x54] sm:$0xf] %v3087_v9  ;;  %v4915_v42 = vsel %vm14379_vm5, %v4910_v1, %v16023_v36  ;;  %v5833_v43 = vrot.slane %v5832_v46, 4  ;;  %v4925_v27 = vsel %vm14379_vm5, %v16068_v37, %v16063_v54  ;;  %v16089_v53 = vsel %vm14369_vm4, %v12564_v18, %v5289_v0  ;;  %v13981_v54 = vld [vmem:[%s18345_s2 + $0xb0] sm:$0xff] }
 0x21b   : > { %v16077_v63 = vadd.f32 %v3840_v12, %v3616_v50  ;;  %v2993_v26 = vshrl.u32 %v2877_v29, 16  ;;  %v2827_v13 = vmul.f32 %v15948_v39, %v2808_v33  ;;  %4036 = vmatmul.bf16.gmra.mxu0 %v13894_v34  ;;  %v5843_v36 = vrot.slane %v5842_v49, 4  ;;  %v14013_v12 = vld [vmem:[%s18345_s2 + $0x170] sm:$0xff]  ;;  %v3090_v34 = vld [vmem:[#allocation2 + $0x5c] sm:$0x1] }
 0x21c   : > { %4413 = vmatmul.bf16.gmra.mxu1 %v4313_v62  ;;  %v5847_v59 = vrot.slane %v5845_v55, 5  ;;  %v4927_v1 = vshrl.u32 %v12487_v14, 16  ;;  %v4930_v46 = vshll.u32 %v12487_v14, 16  ;;  %v14005_v62 = vld [vmem:[%s18345_s2 + $0x130] sm:$0xff]  ;;  %v2996_v44 = vshll.u32 %v2877_v29, 16  ;;  %6486 = vmatpush.bf16.msrb.mxu0 %v13981_v54 }
 0x21d   : > { %4662 = vmatmul.bf16.gmra.mxu2 %v4562_v19  ;;  %v2995_v8 = vrot.slane %v2993_v26, 7  ;;  %v2846_v0 = vadd.f32 %v15963_v51, %v2827_v13  ;;  %v16101_v6 = vunpack.c.l.b16 %v4915_v42  ;;  %v5293_v37 = vsel %vm14369_vm4, %v5291_v57, %v5292_v17  ;;  %7308 = vmatpush.bf16.msrb.mxu3 %v14013_v12 }
 0x21e   : > { %4856 = vmatmul.bf16.gmra.mxu3 %v13926_v52  ;;  %v5838_v18 = vsel %vm14379_vm5, %v5833_v43, %v16050_v28  ;;  %v4936_v50 = vshll.u32 %v16092_v47, 16  ;;  %v4940_v41 = vshrl.u32 %v16092_v47, 16  ;;  %7058 = vmatpush.bf16.msrb.mxu2 %v14005_v62  ;;  %v2991_v19 = vrot.slane %v16058_v24, 4  ;;  %v16122_v62 = vld [vmem:[%s14328_s9 + $0x8c] sm:$0x1] }
 0x21f   : > { %v2998_v52 = vor.u32 %v2996_v44, %v2995_v8  ;;  %v3000_v49 = vrot.slane %v2995_v8, 4  ;;  %v2862_v55 = vmax.f32 %v2846_v0, 0.0  ;;  %v5848_v28 = vsel %vm14379_vm5, %v5843_v36, %v5847_v59  ;;  %v13997_v59 = vld [vmem:[%s18345_s2 + $0xf0] sm:$0xff] }
 0x220   : > { %v3618_v9 = vpop.f32.mrf.mxu2  ;;  %v2791_v17 = vpop.f32.mrf.mxu0  ;;  %v4929_v42 = vrot.slane %v4927_v1, 4  ;;  %v4932_v57 = vrot.slane %v4930_v46, 5  ;;  %v5111_v54 = vunpack.c.l.b16 %v4925_v27  ;;  %v16126_v8 = vrot.slane %v4936_v50, 5  ;;  %6680 = vmatpush.bf16.msrb.mxu1 %v13997_v59 }
 0x221   : > { %v3843_v29 = vpop.f32.mrf.mxu3  ;;  %v3619_v33 = vadd.f32 %v3618_v9, %v3473_v40  ;;  %v3475_v14 = vpop.f32.mrf.mxu1  ;;  %v2999_v43 = vsel %vm15606_vm14, %v2991_v19, %v2998_v52  ;;  %v3091_v24 = vsel %vm15403_vm8, %v3000_v49, %v3090_v34  ;;  %v2878_v26 = vpack.c.bf16 %v2862_v55, %v2862_v55  ;;  %v3093_v52 = vld [vmem:[#allocation2 + $0x60] sm:$0xf]  ;;  %v12557_v55 = vld [vmem:[%s14328_s9 + $0x84] sm:$0xe] }
 0x222   : > { %v2809_v13 = vadd.f32 %v2791_v17, %v15514_v3  ;;  %3089 = vst [vmem:[#allocation2 + $0x58] sm:$0xf] %v2999_v43  ;;  %v4942_v36 = vrot.slane %v4940_v41, 4  ;;  %v5359_v3 = vunpack.c.l.b16 %v16089_v53  ;;  %v5360_v44 = vunpack.c.l.b16 %v5293_v37 }
 0x223   : > { %v16124_v40 = vadd.f32 %v3843_v29, %v3619_v33  ;;  %3092 = vst [vmem:[#allocation2 + $0x5c] sm:$0x1] %v3091_v24  ;;  %v3002_v1 = vshrl.u32 %v2878_v26, 16  ;;  %v6034_v0 = vunpack.c.l.b16 %v5838_v18  ;;  %v6035_v12 = vunpack.c.l.b16 %v5848_v28 }
 0x224   : > { %v2828_v46 = vmul.f32 %v15948_v39, %v2809_v13  ;;  %v4933_v34 = vor.u32 %v4932_v57, %v4929_v42  ;;  %v4946_v27 = vshll.u32 %v16122_v62, 16  ;;  %v3005_v41 = vshll.u32 %v2878_v26, 16 }
 0x225   : > { %v16134_v50 = vrot.slane %v3002_v1, 7  ;;  %v4943_v49 = vor.u32 %v4942_v36, %v16126_v8  ;;  %v5296_v39 = vrot.slane %v16092_v47, 5  ;;  %v18363_v53 = vor.u32 %v15860_v25, %v15821_v23  ;;  %v13951_v23 = vld [vmem:[#allocation2] sm:$0xff]  ;;  %v16154_v36 = vld [vmem:[#allocation2 + $0x18] sm:$0xf] }
 0x226   : > { %v2847_v19 = vadd.f32 %v15963_v51, %v2828_v46  ;;  %v5872_v18 = vsel %vm14379_vm5, %v16045_v38, %v16007_v2  ;;  %v5126_v17 = vpack.c.b16 %v5111_v54, %v16101_v6  ;;  %v5375_v28 = vpack.c.b16 %v5360_v44, %v5359_v3  ;;  %v12490_v44 = vld [vmem:[%s14328_s9 + $0x90] sm:$0xf] }
 0x227   : > { %v16143_v37 = vrot.slane %v18363_v53, 4  ;;  %v3007_v9 = vor.u32 %v3005_v41, %v16134_v50  ;;  %v6050_v43 = vpack.c.b16 %v6035_v12, %v6034_v0  ;;  %v4934_v25 = vrot.slane %v4933_v34, 4  ;;  %v16173_v41 = vld [vmem:[%s14328_s9 + $0x94] sm:$0xf] }
 0x228   : > { %v2863_v29 = vmax.f32 %v2847_v19, 0.0  ;;  %v3620_v51 = vpop.f32.mrf.mxu2  ;;  %v4002_v47 = vpop.f32.mrf.mxu0  ;;  %v4948_v24 = vrot.slane %v4946_v27, 5  ;;  %v12565_v38 = vrot.slane %v12557_v55, 9  ;;  %v5298_v54 = vrot.slane %v5296_v39, 4  ;;  %v5790_v19 = vld [vmem:[#allocation2 + $0x1c] sm:$0xf] }
 0x229   : > { %v3845_v33 = vpop.f32.mrf.mxu3  ;;  %v3621_v42 = vadd.f32 %v3620_v51, %v3475_v14  ;;  %v4379_v57 = vpop.f32.mrf.mxu1  ;;  %v3094_v26 = vsel %vm15564_vm12, %v3007_v9, %v3093_v52  ;;  %v4042_v2 = vadd.f32 %v4002_v47, %v15549_v61  ;;  %v4944_v14 = vrot.slane %v4943_v49, 4 }
 0x22a   : > { %v2879_v13 = vpack.c.bf16 %v2863_v29, %v2863_v29  ;;  %3095 = vst [vmem:[#allocation2 + $0x60] sm:$0xf] %v3094_v26  ;;  %v5299_v59 = vrot.slane %v16122_v62, 5  ;;  %v5862_v61 = vsel %vm14379_vm5, %v16143_v37, %v15862_v31  ;;  %v16163_v3 = vunpack.c.l.b16 %v5872_v18  ;;  %v3097_v31 = vld [vmem:[#allocation2 + $0x68] sm:$0x1] }
 0x22b   : > { %v16156_v6 = vadd.f32 %v3845_v33, %v3621_v42  ;;  %v4419_v46 = vadd.f32 %v4379_v57, %v4042_v2  ;;  %5198 = vmatmul.bf16.vlgmr.msra.gmra.mxu0 %v5126_v17  ;;  %v5874_v0 = vshrl.u32 %v16154_v36, 16  ;;  %v4939_v62 = vsel %vm14379_vm5, %v4934_v25, %v16126_v8  ;;  %v14004_v8 = vld [vmem:[%s18345_s2 + $0x128] sm:$0xff] }
 0x22c   : > { %v3010_v1 = vshrl.u32 %v2879_v13, 16  ;;  %5447 = vmatmul.bf16.vlgmr.msra.gmra.mxu1 %v5375_v28  ;;  %v3013_v34 = vshll.u32 %v2879_v13, 16  ;;  %v5297_v27 = vsel %vm14369_vm4, %v12565_v38, %v5296_v39  ;;  %v3008_v52 = vrot.slane %v16134_v50, 4  ;;  %v13980_v39 = vld [vmem:[%s18345_s2 + $0xa8] sm:$0xff]  ;;  %7059 = vmatpush.bf16.msrb.mxu2 %v14004_v8 }
 0x22d   : > { %6122 = vmatmul.bf16.vlgmr.msra.gmra.mxu2 %v6050_v43  ;;  %v4949_v49 = vsel %vm14379_vm5, %v4944_v14, %v4948_v24  ;;  %v5300_v55 = vsel %vm14369_vm4, %v5298_v54, %v5299_v59  ;;  %v5877_v53 = vshll.u32 %v16154_v36, 16  ;;  %v4951_v29 = vshrl.u32 %v12490_v44, 16  ;;  %v14012_v33 = vld [vmem:[%s18345_s2 + $0x168] sm:$0xff]  ;;  %6487 = vmatpush.bf16.msrb.mxu0 %v13980_v39 }
 0x22e   : > { %6267 = vmatmul.bf16.vlgmr.msra.gmra.mxu3 %v13951_v23  ;;  %v3012_v12 = vrot.slane %v3010_v1, 7  ;;  %v4954_v51 = vshll.u32 %v12490_v44, 16  ;;  %v4960_v47 = vshll.u32 %v16173_v41, 16  ;;  %v4964_v57 = vshrl.u32 %v16173_v41, 16  ;;  %v13996_v14 = vld [vmem:[%s18345_s2 + $0xe8] sm:$0xff] }
 0x22f   : > { %v5883_v43 = vshll.u32 %v5790_v19, 16  ;;  %v5887_v26 = vshrl.u32 %v5790_v19, 16  ;;  %7309 = vmatpush.bf16.msrb.mxu3 %v14012_v33  ;;  %v5112_v2 = vunpack.c.l.b16 %v4939_v62  ;;  %v5113_v38 = vunpack.c.l.b16 %v4949_v49  ;;  %6681 = vmatpush.bf16.msrb.mxu1 %v13996_v14  ;;  %v5791_v19 = vld [vmem:[#allocation2 + $0x24] sm:$0xf]  ;;  %v12492_v62 = vld [vmem:[%s14328_s9 + $0x98] sm:$0x1] }
 0x230   : > { %v3015_v37 = vor.u32 %v3013_v34, %v3012_v12  ;;  %v3017_v18 = vrot.slane %v3012_v12, 4  ;;  %v4628_v50 = vpop.f32.mrf.mxu2  ;;  %v4004_v28 = vpop.f32.mrf.mxu0  ;;  %v5361_v36 = vunpack.c.l.b16 %v5297_v27  ;;  %v5362_v59 = vunpack.c.l.b16 %v5300_v55  ;;  %v5819_v34 = vld [vmem:[#allocation2 + $0x20] sm:$0x1] }
 0x231   : > { %v4822_v9 = vpop.f32.mrf.mxu3  ;;  %v4668_v17 = vadd.f32 %v4628_v50, %v4419_v46  ;;  %v4381_v42 = vpop.f32.mrf.mxu1  ;;  %v4043_v24 = vadd.f32 %v4004_v28, %v15578_v35  ;;  %v4953_v1 = vrot.slane %v4951_v29, 4  ;;  %v4956_v46 = vrot.slane %v4954_v51, 5 }
 0x232   : > { %v3016_v23 = vsel %vm15606_vm14, %v3008_v52, %v3015_v37  ;;  %v3098_v25 = vsel %vm15403_vm8, %v3017_v18, %v3097_v31  ;;  %v6036_v44 = vunpack.c.l.b16 %v5862_v61  ;;  %v16202_v35 = vrot.slane %v4960_v47, 5 }
 0x233   : > { %3096 = vst [vmem:[#allocation2 + $0x64] sm:$0xf] %v3016_v23  ;;  %v16197_v13 = vadd.f32 %v4822_v9, %v4668_v17  ;;  %v4420_v54 = vadd.f32 %v4381_v42, %v4043_v24  ;;  %v4966_v12 = vrot.slane %v4964_v57, 4  ;;  %v5876_v52 = vrot.slane %v5874_v0, 4  ;;  %v12558_v9 = vld [vmem:[%s14328_s9 + $0x90] sm:$0xe] }
 0x234   : > { %3099 = vst [vmem:[#allocation2 + $0x68] sm:$0x1] %v3098_v25  ;;  %v5879_v27 = vrot.slane %v5877_v53, 5  ;;  %v16205_v31 = vrot.slane %v5883_v43, 5  ;;  %v5889_v49 = vrot.slane %v5887_v26, 4  ;;  %v6051_v8 = vpack.c.b16 %v16163_v3, %v6036_v44  ;;  %v13952_v43 = vld [vmem:[#allocation2 + $0xc] sm:$0xff] }
 0x235   : > { %v5303_v55 = vrot.slane %v16173_v41, 5  ;;  %v5127_v61 = vpack.c.b16 %v5113_v38, %v5112_v2  ;;  %v5376_v18 = vpack.c.b16 %v5362_v59, %v5361_v36  ;;  %v4957_v50 = vor.u32 %v4956_v46, %v4953_v1  ;;  %v5792_v38 = vld [vmem:[#allocation2 + $0x28] sm:$0xf]  ;;  %v16217_v59 = vld [vmem:[%s14328_s9 + $0xa0] sm:$0xf] }
 0x236   : > { %v5893_v29 = vshll.u32 %v5819_v34, 16  ;;  %v4967_v0 = vor.u32 %v4966_v12, %v16202_v35  ;;  %v4970_v53 = vshll.u32 %v12492_v62, 16  ;;  %v5898_v28 = vshrl.u32 %v5791_v19, 16  ;;  %v14003_v44 = vld [vmem:[%s18345_s2 + $0x120] sm:$0xff] }
 0x237   : > { %v5880_v47 = vor.u32 %v5879_v27, %v5876_v52  ;;  %v5890_v3 = vor.u32 %v5889_v49, %v16205_v31  ;;  %v5901_v41 = vshll.u32 %v5791_v19, 16  ;;  %v12566_v23 = vrot.slane %v12558_v9, 9  ;;  %v13979_v12 = vld [vmem:[%s18345_s2 + $0xa0] sm:$0xff]  ;;  %7060 = vmatpush.bf16.msrb.mxu2 %v14003_v44 }
 0x238   : > { %v4630_v39 = vpop.f32.mrf.mxu2  ;;  %v4007_v33 = vpop.f32.mrf.mxu0  ;;  %v5305_v25 = vrot.slane %v5303_v55, 4  ;;  %v5306_v24 = vrot.slane %v12492_v62, 5  ;;  %v4958_v2 = vrot.slane %v4957_v50, 4  ;;  %v4972_v36 = vrot.slane %v4970_v53, 5  ;;  %v14011_v27 = vld [vmem:[%s18345_s2 + $0x160] sm:$0xff]  ;;  %6488 = vmatpush.bf16.msrb.mxu0 %v13979_v12 }
 0x239   : > { %v4824_v37 = vpop.f32.mrf.mxu3  ;;  %v4669_v51 = vadd.f32 %v4630_v39, %v4420_v54  ;;  %v4384_v17 = vpop.f32.mrf.mxu1  ;;  %v4044_v42 = vadd.f32 %v4007_v33, %v15625_v21  ;;  %v4968_v21 = vrot.slane %v4967_v0, 4  ;;  %v5895_v14 = vrot.slane %v5893_v29, 5  ;;  %v12493_v54 = vld [vmem:[%s14328_s9 + $0x9c] sm:$0xf]  ;;  %7310 = vmatpush.bf16.msrb.mxu3 %v14011_v27  ;;  %v5820_v27 = vld [vmem:[#allocation2 + $0x2c] sm:$0x1] }
 0x23a   : > { %v5900_v1 = vrot.slane %v5898_v28, 4  ;;  %v5903_v46 = vrot.slane %v5901_v41, 5  ;;  %v5304_v34 = vsel %vm14369_vm4, %v12566_v23, %v5303_v55  ;;  %v5307_v19 = vsel %vm14369_vm4, %v5305_v25, %v5306_v24  ;;  %v13995_v41 = vld [vmem:[%s18345_s2 + $0xe0] sm:$0xff] }
 0x23b   : > { %v16213_v57 = vadd.f32 %v4824_v37, %v4669_v51  ;;  %v4421_v26 = vadd.f32 %v4384_v17, %v4044_v42  ;;  %5203 = vmatmul.bf16.gmra.mxu0 %v5127_v61  ;;  %v5881_v62 = vrot.slane %v5880_v47, 4  ;;  %v5891_v52 = vrot.slane %v5890_v3, 4  ;;  %6682 = vmatpush.bf16.msrb.mxu1 %v13995_v41 }
 0x23c   : > { %5452 = vmatmul.bf16.gmra.mxu1 %v5376_v18  ;;  %v4963_v39 = vsel %vm14379_vm5, %v4958_v2, %v16202_v35  ;;  %v4975_v37 = vshrl.u32 %v12493_v54, 16  ;;  %v4978_v61 = vshll.u32 %v12493_v54, 16  ;;  %v5907_v18 = vshll.u32 %v5792_v38, 16  ;;  %v12495_v2 = vld [vmem:[%s14328_s9 + $0xa4] sm:$0x1] }
 0x23d   : > { %6127 = vmatmul.bf16.gmra.mxu2 %v6051_v8  ;;  %v4973_v29 = vsel %vm14379_vm5, %v4968_v21, %v4972_v36  ;;  %v4984_v51 = vshll.u32 %v16217_v59, 16  ;;  %v4988_v33 = vshrl.u32 %v16217_v59, 16  ;;  %v5363_v0 = vunpack.c.l.b16 %v5304_v34 }
 0x23e   : > { %6272 = vmatmul.bf16.gmra.mxu3 %v13952_v43  ;;  %v5364_v35 = vunpack.c.l.b16 %v5307_v19  ;;  %v5886_v53 = vsel %vm14379_vm5, %v5881_v62, %v16205_v31  ;;  %v5114_v42 = vunpack.c.l.b16 %v4963_v39  ;;  %v5896_v47 = vsel %vm14379_vm5, %v5891_v52, %v5895_v14  ;;  %v12559_v62 = vld [vmem:[%s14328_s9 + $0x9c] sm:$0xe] }
 0x23f   : > { %v5911_v3 = vshrl.u32 %v5792_v38, 16  ;;  %v4977_v23 = vrot.slane %v4975_v37, 4  ;;  %v4980_v25 = vrot.slane %v4978_v61, 5  ;;  %v16250_v24 = vrot.slane %v4984_v51, 5 }
 0x240   : > { %v4633_v49 = vpop.f32.mrf.mxu2  ;;  %v4009_v50 = vpop.f32.mrf.mxu0  ;;  %v6039_v31 = vunpack.c.l.b16 %v5896_v47  ;;  %v5904_v21 = vor.u32 %v5903_v46, %v5900_v1  ;;  %v6038_v36 = vunpack.c.l.b16 %v5886_v53  ;;  %v16253_v54 = vrot.slane %v5907_v18, 5  ;;  %v12496_v47 = vld [vmem:[%s14328_s9 + $0xa8] sm:$0xf] }
 0x241   : > { %v4827_v8 = vpop.f32.mrf.mxu3  ;;  %v4670_v55 = vadd.f32 %v4633_v49, %v4421_v26  ;;  %v4386_v9 = vpop.f32.mrf.mxu1  ;;  %v4045_v17 = vadd.f32 %v4009_v50, %v15655_v16  ;;  %v5115_v16 = vunpack.c.l.b16 %v4973_v29  ;;  %v4990_v26 = vrot.slane %v4988_v33, 4  ;;  %v5794_v33 = vld [vmem:[#allocation2 + $0x34] sm:$0xf] }
 0x242   : > { %v5913_v38 = vrot.slane %v5911_v3, 4  ;;  %v5377_v34 = vpack.c.b16 %v5364_v35, %v5363_v0  ;;  %v4981_v19 = vor.u32 %v4980_v25, %v4977_v23  ;;  %v5310_v52 = vrot.slane %v16217_v59, 5  ;;  %v14002_v25 = vld [vmem:[%s18345_s2 + $0x118] sm:$0xff] }
 0x243   : > { %v16243_v28 = vadd.f32 %v4827_v8, %v4670_v55  ;;  %v4422_v43 = vadd.f32 %v4386_v9, %v4045_v17  ;;  %v5128_v12 = vpack.c.b16 %v5115_v16, %v5114_v42  ;;  %v4991_v37 = vor.u32 %v4990_v26, %v16250_v24  ;;  %v5793_v55 = vld [vmem:[#allocation2 + $0x30] sm:$0xf]  ;;  %v13953_v9 = vld [vmem:[#allocation2 + $0x18] sm:$0xff]  ;;  %7061 = vmatpush.bf16.msrb.mxu2 %v14002_v25 }
 0x244   : > { %v4994_v61 = vshll.u32 %v12495_v2, 16  ;;  %v6052_v46 = vpack.c.b16 %v6039_v31, %v6038_v36  ;;  %v16259_v18 = vrot.slane %v5904_v21, 4  ;;  %v12567_v29 = vrot.slane %v12559_v62, 9  ;;  %v13978_v26 = vld [vmem:[%s18345_s2 + $0x98] sm:$0xff] }
 0x245   : > { %v5914_v59 = vor.u32 %v5913_v38, %v16253_v54  ;;  %v5917_v51 = vshll.u32 %v5820_v27, 16  ;;  %v4982_v0 = vrot.slane %v4981_v19, 4  ;;  %v5312_v35 = vrot.slane %v5310_v52, 4  ;;  %6489 = vmatpush.bf16.msrb.mxu0 %v13978_v26  ;;  %v5795_v25 = vld [vmem:[#allocation2 + $0x3c] sm:$0xf] }
 0x246   : > { %v4992_v53 = vrot.slane %v4991_v37, 4  ;;  %v4996_v42 = vrot.slane %v4994_v61, 5  ;;  %v5922_v3 = vshrl.u32 %v5793_v55, 16  ;;  %v5910_v41 = vsel %vm14379_vm5, %v16259_v18, %v16253_v54  ;;  %v14010_v54 = vld [vmem:[%s18345_s2 + $0x158] sm:$0xff] }
 0x247   : > { %v5925_v16 = vshll.u32 %v5793_v55, 16  ;;  %v5931_v23 = vshll.u32 %v5794_v33, 16  ;;  %v5311_v31 = vsel %vm14369_vm4, %v12567_v29, %v5310_v52  ;;  %v5919_v21 = vrot.slane %v5917_v51, 5  ;;  %7311 = vmatpush.bf16.msrb.mxu3 %v14010_v54  ;;  %v13994_v29 = vld [vmem:[%s18345_s2 + $0xd8] sm:$0xff] }
 0x248   : > { %v4635_v14 = vpop.f32.mrf.mxu2  ;;  %v4012_v8 = vpop.f32.mrf.mxu0  ;;  %v5935_v36 = vshrl.u32 %v5794_v33, 16  ;;  %v5002_v19 = vshll.u32 %v12496_v47, 16  ;;  %v5365_v37 = vunpack.c.l.b16 %v5311_v31  ;;  %v5924_v61 = vrot.slane %v5922_v3, 4  ;;  %6683 = vmatpush.bf16.msrb.mxu1 %v13994_v29 }
 0x249   : > { %v4829_v44 = vpop.f32.mrf.mxu3  ;;  %v4671_v49 = vadd.f32 %v4635_v14, %v4422_v43  ;;  %v4389_v39 = vpop.f32.mrf.mxu1  ;;  %v4046_v1 = vadd.f32 %v4012_v8, %v15695_v56  ;;  %v5313_v56 = vrot.slane %v12495_v2, 5  ;;  %v16270_v43 = vld [vmem:[%s14328_s9 + $0xac] sm:$0xf]  ;;  %v5915_v2 = vrot.slane %v5914_v59, 4 }
 0x24a   : > { %v5008_v8 = vshll.u32 %v16270_v43, 16  ;;  %v5317_v3 = vrot.slane %v16270_v43, 5 }
 0x24b   : > { %v16261_v50 = vadd.f32 %v4829_v44, %v4671_v49  ;;  %v4423_v17 = vadd.f32 %v4389_v39, %v4046_v1  ;;  %5208 = vmatmul.bf16.gmra.mxu0 %v5128_v12  ;;  %v4987_v44 = vsel %vm14379_vm5, %v4982_v0, %v16250_v24  ;;  %v5314_v12 = vsel %vm14369_vm4, %v5312_v35, %v5313_v56 }
 0x24c   : > { %5457 = vmatmul.bf16.gmra.mxu1 %v5377_v34  ;;  %v4999_v34 = vshrl.u32 %v12496_v47, 16  ;;  %v4997_v49 = vsel %vm14379_vm5, %v4992_v53, %v4996_v42  ;;  %v5012_v39 = vshrl.u32 %v16270_v43, 16  ;;  %v5927_v1 = vrot.slane %v5925_v16, 5  ;;  %v12498_v42 = vld [vmem:[%s14328_s9 + $0xb0] sm:$0x1] }
 0x24d   : > { %6132 = vmatmul.bf16.gmra.mxu2 %v6052_v46  ;;  %v5116_v18 = vunpack.c.l.b16 %v4987_v44  ;;  %v5366_v55 = vunpack.c.l.b16 %v5314_v12  ;;  %v5117_v51 = vunpack.c.l.b16 %v4997_v49  ;;  %v16302_v35 = vrot.slane %v5931_v23, 5  ;;  %v5821_v16 = vld [vmem:[#allocation2 + $0x38] sm:$0x1] }
 0x24e   : > { %6277 = vmatmul.bf16.gmra.mxu3 %v13953_v9  ;;  %v5920_v9 = vsel %vm14379_vm5, %v5915_v2, %v5919_v21  ;;  %v5001_v33 = vrot.slane %v4999_v34, 4  ;;  %v5014_v0 = vrot.slane %v5012_v39, 4  ;;  %v5937_v56 = vrot.slane %v5935_v36, 4 }
 0x24f   : > { %v6041_v53 = vunpack.c.l.b16 %v5920_v9  ;;  %v6040_v47 = vunpack.c.l.b16 %v5910_v41  ;;  %v5129_v2 = vpack.c.b16 %v5117_v51, %v5116_v18  ;;  %v5378_v21 = vpack.c.b16 %v5366_v55, %v5365_v37  ;;  %v12499_v55 = vld [vmem:[%s14328_s9 + $0xb4] sm:$0xf]  ;;  %v16314_v51 = vld [vmem:[%s14328_s9 + $0xb8] sm:$0xf] }
 0x250   : > { %v4638_v38 = vpop.f32.mrf.mxu2  ;;  %v4014_v52 = vpop.f32.mrf.mxu0  ;;  %v5018_v34 = vshll.u32 %v12498_v42, 16  ;;  %v5320_v37 = vrot.slane %v12498_v42, 5  ;;  %v5949_v9 = vshll.u32 %v5795_v25, 16  ;;  %v14001_v42 = vld [vmem:[%s18345_s2 + $0x110] sm:$0xff] }
 0x251   : > { %v4832_v14 = vpop.f32.mrf.mxu3  ;;  %v4672_v62 = vadd.f32 %v4638_v38, %v4423_v17  ;;  %v4391_v27 = vpop.f32.mrf.mxu1  ;;  %v4047_v24 = vadd.f32 %v4014_v52, %v15724_v5  ;;  %v5004_v17 = vrot.slane %v5002_v19, 5  ;;  %v16300_v5 = vrot.slane %v5008_v8, 5  ;;  %v12560_v38 = vld [vmem:[%s14328_s9 + $0xa8] sm:$0xe]  ;;  %v5796_v52 = vld [vmem:[#allocation2 + $0x40] sm:$0xf]  ;;  %7062 = vmatpush.bf16.msrb.mxu2 %v14001_v42 }
 0x252   : > { %v5938_v19 = vor.u32 %v5937_v56, %v16302_v35  ;;  %v6053_v43 = vpack.c.b16 %v6041_v53, %v6040_v47  ;;  %v13954_v8 = vld [vmem:[#allocation2 + $0x24] sm:$0xff]  ;;  %v12568_v39 = vrot.slane %v12560_v38, 9  ;;  %v5020_v29 = vrot.slane %v5018_v34, 5  ;;  %v13977_v47 = vld [vmem:[%s18345_s2 + $0x90] sm:$0xff] }
 0x253   : > { %v16293_v46 = vadd.f32 %v4832_v14, %v4672_v62  ;;  %v4424_v59 = vadd.f32 %v4391_v27, %v4047_v24  ;;  %v5005_v54 = vor.u32 %v5004_v17, %v5001_v33  ;;  %v5928_v14 = vor.u32 %v5927_v1, %v5924_v61  ;;  %6490 = vmatpush.bf16.msrb.mxu0 %v13977_v47 }
 0x254   : > { %v5015_v36 = vor.u32 %v5014_v0, %v16300_v5  ;;  %v5941_v62 = vshll.u32 %v5821_v16, 16  ;;  %v5946_v27 = vshrl.u32 %v5795_v25, 16  ;;  %v5319_v24 = vrot.slane %v5317_v3, 4 }
 0x255   : > { %v5006_v1 = vrot.slane %v5005_v54, 4  ;;  %v5929_v18 = vrot.slane %v5928_v14, 4  ;;  %v5955_v33 = vshll.u32 %v5796_v52, 16  ;;  %v5959_v53 = vshrl.u32 %v5796_v52, 16 }
 0x256   : > { %v5943_v0 = vrot.slane %v5941_v62, 5  ;;  %v16319_v56 = vrot.slane %v5946_v27, 4  ;;  %v5318_v16 = vsel %vm14369_vm4, %v12568_v39, %v5317_v3  ;;  %v5321_v25 = vsel %vm14369_vm4, %v5319_v24, %v5320_v37  ;;  %v5822_v62 = vld [vmem:[#allocation2 + $0x44] sm:$0x1]  ;;  %v13993_v37 = vld [vmem:[%s18345_s2 + $0xd0] sm:$0xff] }
 0x257   : > { %v5934_v17 = vsel %vm14379_vm5, %v5929_v18, %v16302_v35  ;;  %v5026_v35 = vshll.u32 %v12499_v55, 16  ;;  %v5011_v54 = vsel %vm14379_vm5, %v5006_v1, %v16300_v5  ;;  %v5032_v38 = vshll.u32 %v16314_v51, 16  ;;  %6684 = vmatpush.bf16.msrb.mxu1 %v13993_v37  ;;  %v14000_v37 = vld [vmem:[%s18345_s2 + $0x108] sm:$0xff] }
 0x258   : > { %v4640_v26 = vpop.f32.mrf.mxu2  ;;  %v4017_v12 = vpop.f32.mrf.mxu0  ;;  %v5036_v14 = vshrl.u32 %v16314_v51, 16  ;;  %v5951_v3 = vrot.slane %v5949_v9, 5  ;;  %v5961_v52 = vrot.slane %v5959_v53, 4  ;;  %v5965_v9 = vshll.u32 %v5822_v62, 16  ;;  %v12502_v62 = vld [vmem:[%s14328_s9 + $0xc0] sm:$0xf]  ;;  %7063 = vmatpush.bf16.msrb.mxu2 %v14000_v37 }
 0x259   : > { %v4834_v31 = vpop.f32.mrf.mxu3  ;;  %v4673_v44 = vadd.f32 %v4640_v26, %v4424_v59  ;;  %v4394_v23 = vpop.f32.mrf.mxu1  ;;  %v4048_v41 = vadd.f32 %v4017_v12, %v15768_v11  ;;  %v5016_v11 = vrot.slane %v5015_v36, 4  ;;  %v5939_v59 = vrot.slane %v5938_v19, 4 }
 0x25a   : > { %v5023_v26 = vshrl.u32 %v12499_v55, 16  ;;  %v16343_v19 = vrot.slane %v5955_v33, 5  ;;  %v5028_v24 = vrot.slane %v5026_v35, 5  ;;  %v16351_v18 = vrot.slane %v5032_v38, 5 }
 0x25b   : > { %v16310_v49 = vadd.f32 %v4834_v31, %v4673_v44  ;;  %v4425_v61 = vadd.f32 %v4394_v23, %v4048_v41  ;;  %5213 = vmatmul.bf16.gmra.mxu0 %v5129_v2  ;;  %v14009_v31 = vld [vmem:[%s18345_s2 + $0x150] sm:$0xff]  ;;  %v5021_v36 = vsel %vm14379_vm5, %v5016_v11, %v5020_v29  ;;  %v5944_v34 = vsel %vm14379_vm5, %v5939_v59, %v5943_v0 }
 0x25c   : > { %5462 = vmatmul.bf16.gmra.mxu1 %v5378_v21  ;;  %7312 = vmatpush.bf16.msrb.mxu3 %v14009_v31  ;;  %v5367_v41 = vunpack.c.l.b16 %v5318_v16  ;;  %v5025_v39 = vrot.slane %v5023_v26, 4  ;;  %v5119_v1 = vunpack.c.l.b16 %v5021_v36  ;;  %v5038_v55 = vrot.slane %v5036_v14, 4  ;;  %v12561_v0 = vld [vmem:[%s14328_s9 + $0xb4] sm:$0xe] }
 0x25d   : > { %6137 = vmatmul.bf16.gmra.mxu2 %v6053_v43  ;;  %v5368_v43 = vunpack.c.l.b16 %v5321_v25  ;;  %v6043_v11 = vunpack.c.l.b16 %v5944_v34  ;;  %v5962_v29 = vor.u32 %v5961_v52, %v16343_v19  ;;  %v6042_v59 = vunpack.c.l.b16 %v5934_v17  ;;  %v5797_v52 = vld [vmem:[#allocation2 + $0x48] sm:$0xf] }
 0x25e   : > { %6282 = vmatmul.bf16.gmra.mxu3 %v13954_v8  ;;  %v5118_v8 = vunpack.c.l.b16 %v5011_v54  ;;  %v5029_v33 = vor.u32 %v5028_v24, %v5025_v39  ;;  %v5324_v53 = vrot.slane %v16314_v51, 5  ;;  %v5952_v42 = vor.u32 %v5951_v3, %v16319_v56  ;;  %v13955_v56 = vld [vmem:[#allocation2 + $0x30] sm:$0xff]  ;;  %v5798_v24 = vld [vmem:[#allocation2 + $0x4c] sm:$0xf] }
 0x25f   : > { %v5379_v26 = vpack.c.b16 %v5368_v43, %v5367_v41  ;;  %v5039_v35 = vor.u32 %v5038_v55, %v16351_v18  ;;  %v5967_v38 = vrot.slane %v5965_v9, 5  ;;  %v6054_v14 = vpack.c.b16 %v6043_v11, %v6042_v59  ;;  %v14008_v9 = vld [vmem:[%s18345_s2 + $0x148] sm:$0xff] }
 0x260   : > { %v4643_v2 = vpop.f32.mrf.mxu2  ;;  %v4019_v12 = vpop.f32.mrf.mxu0  ;;  %v5130_v25 = vpack.c.b16 %v5119_v1, %v5118_v8  ;;  %v5963_v51 = vrot.slane %v5962_v29, 4  ;;  %v5030_v3 = vrot.slane %v5029_v33, 4  ;;  %v5953_v43 = vrot.slane %v5952_v42, 4  ;;  %7313 = vmatpush.bf16.msrb.mxu3 %v14008_v9 }
 0x261   : > { %v4837_v21 = vpop.f32.mrf.mxu3  ;;  %v4674_v44 = vadd.f32 %v4643_v2, %v4425_v61  ;;  %v4396_v23 = vpop.f32.mrf.mxu1  ;;  %v4049_v5 = vadd.f32 %v4019_v12, %v15802_v60  ;;  %v12501_v60 = vld [vmem:[%s14328_s9 + $0xbc] sm:$0x1]  ;;  %v5050_v33 = vshll.u32 %v12502_v62, 16 }
 0x262   : > { %v5042_v31 = vshll.u32 %v12501_v60, 16  ;;  %v5327_v36 = vrot.slane %v12501_v60, 5  ;;  %v5958_v8 = vsel %vm14379_vm5, %v5953_v43, %v16343_v19  ;;  %v5968_v39 = vsel %vm14379_vm5, %v5963_v51, %v5967_v38 }
 0x263   : > { %v16346_v27 = vadd.f32 %v4837_v21, %v4674_v44  ;;  %v4426_v61 = vadd.f32 %v4396_v23, %v4049_v5  ;;  %v12569_v44 = vrot.slane %v12561_v0, 9  ;;  %v5326_v23 = vrot.slane %v5324_v53, 4 }
 0x264   : > { %v5040_v5 = vrot.slane %v5039_v35, 4  ;;  %v5044_v41 = vrot.slane %v5042_v31, 5  ;;  %v5035_v1 = vsel %vm14379_vm5, %v5030_v3, %v16351_v18  ;;  %v5047_v60 = vshrl.u32 %v12502_v62, 16 }
 0x265   : > { %v5325_v55 = vsel %vm14369_vm4, %v12569_v44, %v5324_v53  ;;  %v5328_v19 = vsel %vm14369_vm4, %v5326_v23, %v5327_v36  ;;  %v5120_v38 = vunpack.c.l.b16 %v5035_v1  ;;  %v13992_v44 = vld [vmem:[%s18345_s2 + $0xc8] sm:$0xff]  ;;  %v5052_v3 = vrot.slane %v5050_v33, 5 }
 0x266   : > { %v5045_v59 = vsel %vm14379_vm5, %v5040_v5, %v5044_v41  ;;  %v5369_v31 = vunpack.c.l.b16 %v5325_v55  ;;  %6685 = vmatpush.bf16.msrb.mxu1 %v13992_v44  ;;  %v6044_v37 = vunpack.c.l.b16 %v5958_v8  ;;  %v12505_v44 = vld [vmem:[%s14328_s9 + $0xcc] sm:$0xf] }
 0x268   : > { %v4645_v47 = vpop.f32.mrf.mxu2  ;;  %v4022_v21 = vpop.f32.mrf.mxu0 }
 0x269   : > { %v4839_v16 = vpop.f32.mrf.mxu3  ;;  %v4675_v2 = vadd.f32 %v4645_v47, %v4426_v61  ;;  %v4399_v54 = vpop.f32.mrf.mxu1  ;;  %v4050_v17 = vadd.f32 %v4022_v21, %v15847_v7  ;;  %v16364_v7 = vld [vmem:[%s14328_s9 + $0xc4] sm:$0xf]  ;;  %v13976_v61 = vld [vmem:[%s18345_s2 + $0x88] sm:$0xff]  ;;  %v5983_v21 = vshrl.u32 %v5798_v24, 16 }
 0x26a   : > { %v5056_v0 = vshll.u32 %v16364_v7, 16  ;;  %v5060_v18 = vshrl.u32 %v16364_v7, 16  ;;  %6491 = vmatpush.bf16.msrb.mxu0 %v13976_v61 }
 0x26b   : > { %v16360_v12 = vadd.f32 %v4839_v16, %v4675_v2  ;;  %v4427_v34 = vadd.f32 %v4399_v54, %v4050_v17  ;;  %5218 = vmatmul.bf16.gmra.mxu0 %v5130_v25  ;;  %v5970_v16 = vshrl.u32 %v5797_v52, 16  ;;  %v5973_v25 = vshll.u32 %v5797_v52, 16  ;;  %v5799_v52 = vld [vmem:[#allocation2 + $0x54] sm:$0xf] }
 0x26c   : > { %5467 = vmatmul.bf16.gmra.mxu1 %v5379_v26  ;;  %v5979_v26 = vshll.u32 %v5798_v24, 16  ;;  %v5370_v2 = vunpack.c.l.b16 %v5328_v19  ;;  %v5121_v17 = vunpack.c.l.b16 %v5045_v59  ;;  %v16400_v23 = vrot.slane %v5056_v0, 5 }
 0x26d   : > { %6142 = vmatmul.bf16.gmra.mxu2 %v6054_v14  ;;  %v5049_v14 = vrot.slane %v5047_v60, 4  ;;  %v5062_v36 = vrot.slane %v5060_v18, 4  ;;  %v5972_v5 = vrot.slane %v5970_v16, 4  ;;  %v5975_v41 = vrot.slane %v5973_v25, 5 }
 0x26e   : > { %6287 = vmatmul.bf16.gmra.mxu3 %v13955_v56  ;;  %v16398_v56 = vld [vmem:[%s14328_s9 + $0xc8] sm:$0x1]  ;;  %v16402_v43 = vrot.slane %v5979_v26, 5  ;;  %v5985_v62 = vrot.slane %v5983_v21, 4  ;;  %v5380_v24 = vpack.c.b16 %v5370_v2, %v5369_v31  ;;  %v5131_v19 = vpack.c.b16 %v5121_v17, %v5120_v38  ;;  %v13956_v26 = vld [vmem:[#allocation2 + $0x3c] sm:$0xff] }
 0x26f   : > { %v5066_v61 = vshll.u32 %v16398_v56, 16  ;;  %v5053_v60 = vor.u32 %v5052_v3, %v5049_v14  ;;  %v5063_v9 = vor.u32 %v5062_v36, %v16400_v23  ;;  %v5976_v8 = vor.u32 %v5975_v41, %v5972_v5  ;;  %v16417_v36 = vld [vmem:[%s14328_s9 + $0xd0] sm:$0xf] }
 0x270   : > { %v4648_v11 = vpop.f32.mrf.mxu2  ;;  %v4024_v42 = vpop.f32.mrf.mxu0  ;;  %v5997_v16 = vshll.u32 %v5799_v52, 16 }
 0x271   : > { %v4842_v29 = vpop.f32.mrf.mxu3  ;;  %v4676_v53 = vadd.f32 %v4648_v11, %v4427_v34  ;;  %v4401_v47 = vpop.f32.mrf.mxu1  ;;  %v4051_v35 = vadd.f32 %v4024_v42, %v15882_v10  ;;  %v6045_v10 = vunpack.c.l.b16 %v5968_v39  ;;  %v5823_v34 = vld [vmem:[#allocation2 + $0x50] sm:$0x1]  ;;  %v12562_v39 = vld [vmem:[%s14328_s9 + $0xc0] sm:$0xe]  ;;  %v5331_v11 = vrot.slane %v16364_v7, 5 }
 0x272   : > { %v5989_v18 = vshll.u32 %v5823_v34, 16  ;;  %v12570_v31 = vrot.slane %v12562_v39, 9  ;;  %v5334_v7 = vrot.slane %v16398_v56, 5  ;;  %v5054_v21 = vrot.slane %v5053_v60, 4  ;;  %v13999_v56 = vld [vmem:[%s18345_s2 + $0x100] sm:$0xff] }
 0x273   : > { %v16392_v54 = vadd.f32 %v4842_v29, %v4676_v53  ;;  %v4428_v51 = vadd.f32 %v4401_v47, %v4051_v35  ;;  %v6055_v0 = vpack.c.b16 %v6045_v10, %v6044_v37  ;;  %v5994_v53 = vshrl.u32 %v5799_v52, 16  ;;  %v13975_v34 = vld [vmem:[%s18345_s2 + $0x80] sm:$0xff]  ;;  %v6744_v37 = vld [vmem:[#allocation2 + $0xc] sm:$0xf]  ;;  %7064 = vmatpush.bf16.msrb.mxu2 %v13999_v56 }
 0x274   : > { %v5986_v47 = vor.u32 %v5985_v62, %v16402_v43  ;;  %v5068_v35 = vrot.slane %v5066_v61, 5  ;;  %v5064_v38 = vrot.slane %v5063_v9, 4  ;;  %v5333_v17 = vrot.slane %v5331_v11, 4  ;;  %6492 = vmatpush.bf16.msrb.mxu0 %v13975_v34 }
 0x275   : > { %v5991_v14 = vrot.slane %v5989_v18, 5  ;;  %v16419_v10 = vrot.slane %v5997_v16, 5  ;;  %v5332_v5 = vsel %vm14369_vm4, %v12570_v31, %v5331_v11  ;;  %v5977_v41 = vrot.slane %v5976_v8, 4 }
 0x276   : > { %v5987_v3 = vrot.slane %v5986_v47, 4  ;;  %v5335_v60 = vsel %vm14369_vm4, %v5333_v17, %v5334_v7  ;;  %v5071_v9 = vshrl.u32 %v12505_v44, 16  ;;  %v5371_v47 = vunpack.c.l.b16 %v5332_v5 }
 0x277   : > { %v5982_v18 = vsel %vm14379_vm5, %v5977_v41, %v16402_v43  ;;  %v16455_v43 = vld [vmem:[%s14328_s9 + $0xd4] sm:$0x1] }
 0x278   : > { %v4650_v1 = vpop.f32.mrf.mxu2  ;;  %v4027_v59 = vpop.f32.mrf.mxu0  ;;  %v6046_v56 = vunpack.c.l.b16 %v5982_v18 }
 0x279   : > { %v4844_v55 = vpop.f32.mrf.mxu3  ;;  %v4677_v29 = vadd.f32 %v4650_v1, %v4428_v51  ;;  %v4404_v33 = vpop.f32.mrf.mxu1  ;;  %v4052_v42 = vadd.f32 %v4027_v59, %v15939_v15  ;;  %v5800_v15 = vld [vmem:[#allocation2 + $0x58] sm:$0xf]  ;;  %v16414_v51 = vrot.slane %v5994_v53, 4  ;;  %v5074_v59 = vshll.u32 %v12505_v44, 16 }
 0x27a   : > { %v6003_v62 = vshll.u32 %v5800_v15, 16  ;;  %v6007_v52 = vshrl.u32 %v5800_v15, 16  ;;  %v5992_v53 = vsel %vm14379_vm5, %v5987_v3, %v5991_v14  ;;  %v6772_v3 = vshll.u32 %v6744_v37, 16 }
 0x27b   : > { %v16410_v25 = vadd.f32 %v4844_v55, %v4677_v29  ;;  %v4429_v2 = vadd.f32 %v4404_v33, %v4052_v42  ;;  %5223 = vmatmul.bf16.gmra.mxu0 %v5131_v19  ;;  %v5059_v55 = vsel %vm14379_vm5, %v5054_v21, %v16400_v23  ;;  %v5069_v19 = vsel %vm14379_vm5, %v5064_v38, %v5068_v35  ;;  %v13991_v35 = vld [vmem:[%s18345_s2 + $0xc0] sm:$0xff]  ;;  %v5824_v21 = vld [vmem:[#allocation2 + $0x5c] sm:$0x1] }
 0x27c   : > { %5472 = vmatmul.bf16.gmra.mxu1 %v5380_v24  ;;  %v14007_v24 = vld [vmem:[%s18345_s2 + $0x140] sm:$0xff]  ;;  %v5080_v33 = vshll.u32 %v16417_v36, 16  ;;  %v6769_v42 = vshrl.u32 %v6744_v37, 16  ;;  %v16449_v16 = vrot.slane %v6003_v62, 5  ;;  %v5123_v7 = vunpack.c.l.b16 %v5069_v19  ;;  %v16462_v62 = vld [vmem:[#allocation2 + $0x10] sm:$0xf] }
 0x27d   : > { %6147 = vmatmul.bf16.gmra.mxu2 %v6055_v0  ;;  %v5084_v0 = vshrl.u32 %v16417_v36, 16  ;;  %7314 = vmatpush.bf16.msrb.mxu3 %v14007_v24  ;;  %v5073_v38 = vrot.slane %v5071_v9, 4  ;;  %v5076_v17 = vrot.slane %v5074_v59, 5  ;;  %v6000_v44 = vor.u32 %v16419_v10, %v16414_v51  ;;  %v12563_v37 = vld [vmem:[%s14328_s9 + $0xcc] sm:$0xe] }
 0x27e   : > { %6292 = vmatmul.bf16.gmra.mxu3 %v13956_v26  ;;  %v6009_v26 = vrot.slane %v6007_v52, 4  ;;  %v16457_v15 = vrot.slane %v5080_v33, 5  ;;  %6686 = vmatpush.bf16.msrb.mxu1 %v13991_v35  ;;  %v6047_v34 = vunpack.c.l.b16 %v5992_v53  ;;  %v6013_v41 = vshll.u32 %v5824_v21, 16  ;;  %v13957_v53 = vld [vmem:[#allocation2 + $0x48] sm:$0xff] }
 0x27f   : > { %v5086_v14 = vrot.slane %v5084_v0, 4  ;;  %v6771_v19 = vrot.slane %v6769_v42, 4  ;;  %v5077_v51 = vor.u32 %v5076_v17, %v5073_v38  ;;  %v6774_v59 = vrot.slane %v6772_v3, 5 }
 0x280   : > { %v4653_v61 = vpop.f32.mrf.mxu2  ;;  %v4029_v11 = vpop.f32.mrf.mxu0  ;;  %v6010_v5 = vor.u32 %v6009_v26, %v16449_v16  ;;  %v6778_v33 = vshll.u32 %v16462_v62, 16  ;;  %v6782_v0 = vshrl.u32 %v16462_v62, 16  ;;  %v6056_v18 = vpack.c.b16 %v6047_v34, %v6046_v56  ;;  %v315_v26 = vld [vmem:[#allocation2 + $0x6c] sm:$0x1] }
 0x281   : > { %v4847_v1 = vpop.f32.mrf.mxu3  ;;  %v4678_v39 = vadd.f32 %v4653_v61, %v4429_v2  ;;  %v4406_v29 = vpop.f32.mrf.mxu1  ;;  %v4053_v23 = vadd.f32 %v4029_v11, %v15996_v4  ;;  %v5122_v4 = vunpack.c.l.b16 %v5059_v55  ;;  %v5372_v2 = vunpack.c.l.b16 %v5335_v60 }
 0x282   : > { %v5090_v55 = vshll.u32 %v16455_v43, 16  ;;  %v5087_v10 = vor.u32 %v5086_v14, %v16457_v15  ;;  %v5338_v11 = vrot.slane %v16417_v36, 5  ;;  %v6011_v42 = vrot.slane %v6010_v5, 4 }
 0x283   : > { %v16447_v8 = vadd.f32 %v4847_v1, %v4678_v39  ;;  %v4430_v31 = vadd.f32 %v4406_v29, %v4053_v23  ;;  %v5132_v61 = vpack.c.b16 %v5123_v7, %v5122_v4  ;;  %v5381_v1 = vpack.c.b16 %v5372_v2, %v5371_v47 }
 0x284   : > { %v6015_v47 = vrot.slane %v6013_v41, 5  ;;  %v5341_v36 = vrot.slane %v16455_v43, 5  ;;  %v5078_v4 = vrot.slane %v5077_v51, 4  ;;  %v5088_v7 = vrot.slane %v5087_v10, 4 }
 0x285   : > { %v5092_v2 = vrot.slane %v5090_v55, 5  ;;  %v5340_v21 = vrot.slane %v5338_v11, 4  ;;  %v6001_v38 = vrot.slane %v6000_v44, 4  ;;  %v6775_v17 = vor.u32 %v6774_v59, %v6771_v19 }
 0x286   : > { %v6780_v14 = vrot.slane %v6778_v33, 5  ;;  %v6784_v3 = vrot.slane %v6782_v0, 4  ;;  %v6016_v56 = vsel %vm14379_vm5, %v6011_v42, %v6015_v47  ;;  %v5083_v44 = vsel %vm14379_vm5, %v5078_v4, %v16457_v15  ;;  %v16494_v0 = vld [vmem:[#allocation2 + $0x1c] sm:$0xf]  ;;  %v7122_v47 = vld [vmem:[#allocation2 + $0xc] sm:$0xe] }
 0x287   : > { %v6006_v41 = vsel %vm14379_vm5, %v6001_v38, %v16449_v16  ;;  %v5093_v55 = vsel %vm14379_vm5, %v5088_v7, %v5092_v2  ;;  %v5342_v19 = vsel %vm14369_vm4, %v5340_v21, %v5341_v36  ;;  %v5124_v59 = vunpack.c.l.b16 %v5083_v44 }
 0x288   : > { %v4655_v52 = vpop.f32.mrf.mxu2  ;;  %v4032_v9 = vpop.f32.mrf.mxu0  ;;  %v6785_v51 = vor.u32 %v6784_v3, %v6780_v14  ;;  %v5125_v15 = vunpack.c.l.b16 %v5093_v55  ;;  %v5374_v33 = vunpack.c.l.b16 %v5342_v19  ;;  %v13958_v19 = vld [vmem:[#allocation2 + $0x54] sm:$0xff] }
 0x289   : > { %v4849_v24 = vpop.f32.mrf.mxu3  ;;  %v4679_v60 = vadd.f32 %v4655_v52, %v4430_v31  ;;  %v4409_v39 = vpop.f32.mrf.mxu1  ;;  %v4054_v29 = vadd.f32 %v4032_v9, %v16032_v20  ;;  %v12571_v31 = vrot.slane %v12563_v37, 9  ;;  %v316_v20 = vsel %vm15403_vm8, 0, %v315_v26  ;;  %v6746_v52 = vld [vmem:[#allocation2 + $0x14] sm:$0x1]  ;;  %v16498_v26 = vld [vmem:[#allocation2 + $0x10] sm:$0xf] }
 0x28a   : > { %317 = vst [vmem:[#allocation2 + $0x6c] sm:$0x1] %v316_v20  ;;  %v6049_v9 = vunpack.c.l.b16 %v6016_v56  ;;  %v6788_v37 = vshll.u32 %v6746_v52, 16  ;;  %v6786_v42 = vrot.slane %v6785_v51, 4  ;;  %v6806_v20 = vshrl.u32 %v16494_v0, 16 }
 0x28b   : > { %v16471_v23 = vadd.f32 %v4849_v24, %v4679_v60  ;;  %v4431_v35 = vadd.f32 %v4409_v39, %v4054_v29  ;;  %5228 = vmatmul.bf16.gmra.mxu0 %v5132_v61  ;;  %v5339_v43 = vsel %vm14369_vm4, %v12571_v31, %v5338_v11  ;;  %v6776_v39 = vrot.slane %v6775_v17, 4  ;;  %v14176_v51 = vld [vmem:[#allocation2 + $0x14] sm:$0x1] }
 0x28c   : > { %5477 = vmatmul.bf16.gmra.mxu1 %v5381_v1  ;;  %v5373_v10 = vunpack.c.l.b16 %v5339_v43  ;;  %v7156_v11 = vrot.slane %v16462_v62, 5  ;;  %v6802_v62 = vshll.u32 %v16494_v0, 16  ;;  %v5133_v2 = vpack.c.b16 %v5125_v15, %v5124_v59  ;;  %v14177_v59 = vld [vmem:[#allocation2 + $0x4] sm:$0xf] }
 0x28d   : > { %6152 = vmatmul.bf16.gmra.mxu2 %v6056_v18  ;;  %v6048_v18 = vunpack.c.l.b16 %v6006_v41  ;;  %v6790_v38 = vrot.slane %v6788_v37, 5  ;;  %v7159_v43 = vrot.slane %v6746_v52, 5  ;;  %v6309_v41 = vld [vmem:[#allocation2 + $0xc] sm:$0xe]  ;;  %v6334_v15 = vrot.slane %v14177_v59, 5 }
 0x28e   : > { %6297 = vmatmul.bf16.gmra.mxu3 %v13957_v53  ;;  %v6747_v53 = vld [vmem:[#allocation2 + $0x18] sm:$0xf]  ;;  %v7158_v36 = vrot.slane %v7156_v11, 4  ;;  %v5382_v21 = vpack.c.b16 %v5374_v33, %v5373_v10  ;;  %v6344_v10 = vrot.slane %v14176_v51, 5  ;;  %v14178_v33 = vld [vmem:[#allocation2 + $0x8] sm:$0x1] }
 0x28f   : > { %v6057_v31 = vpack.c.b16 %v6049_v9, %v6048_v18  ;;  %v6793_v17 = vshrl.u32 %v6747_v53, 16  ;;  %v6796_v44 = vshll.u32 %v6747_v53, 16  ;;  %v16514_v9 = vrot.slane %v6802_v62, 5  ;;  %v14070_v62 = vld [vmem:[%s18345_s2 + $0x78] sm:$0xff] }
 0x290   : > { %v4658_v34 = vpop.f32.mrf.mxu2  ;;  %v4034_v61 = vpop.f32.mrf.mxu0  ;;  %v6337_v18 = vrot.slane %v14178_v33, 5  ;;  %8858 = vmatpush.bf16.msra.mxu3 %v14070_v62  ;;  %v7123_v51 = vld [vmem:[#allocation2 + $0x18] sm:$0xe]  ;;  %v16559_v33 = vld [vmem:[#allocation2 + $0x28] sm:$0xf] }
 0x291   : > { %v4852_v5 = vpop.f32.mrf.mxu3  ;;  %v4680_v24 = vadd.f32 %v4658_v34, %v4431_v35  ;;  %v4411_v1 = vpop.f32.mrf.mxu1  ;;  %v4055_v60 = vadd.f32 %v4034_v61, %v16077_v63  ;;  %v6781_v63 = vsel %vm14379_vm5, %v6776_v39, %v6780_v14  ;;  %v6341_v35 = vrot.slane %v16498_v26, 5  ;;  %v318_v62 = vld [vmem:[#allocation2 + $0x78] sm:$0x1] }
 0x292   : > { %v16503_v34 = vunpack.c.l.b16 %v6781_v63  ;;  %v6791_v61 = vsel %vm14379_vm5, %v6786_v42, %v6790_v38  ;;  %v6808_v39 = vrot.slane %v6806_v20, 4  ;;  %v16516_v37 = vrot.slane %v6793_v17, 4  ;;  %v14046_v42 = vld [vmem:[%s18345_s2 + $0x238] sm:$0xff]  ;;  %v6749_v38 = vld [vmem:[#allocation2 + $0x20] sm:$0x1] }
 0x293   : > { %v16491_v16 = vadd.f32 %v4852_v5, %v4680_v24  ;;  %v4432_v29 = vadd.f32 %v4411_v1, %v4055_v60  ;;  %v12916_v5 = vrot.slane %v7122_v47, 9  ;;  %v6343_v1 = vrot.slane %v6341_v35, 4  ;;  %v14030_v47 = vld [vmem:[%s18345_s2 + $0x1b8] sm:$0xff]  ;;  %8130 = vmatpush.bf16.msra.mxu2 %v14046_v42 }
 0x294   : > { %v7160_v60 = vsel %vm14369_vm4, %v7158_v36, %v7159_v43  ;;  %v16518_v53 = vunpack.c.l.b16 %v6791_v61  ;;  %v14038_v20 = vld [vmem:[%s18345_s2 + $0x1f8] sm:$0xff]  ;;  %7502 = vmatpush.bf16.msra.mxu0 %v14030_v47  ;;  %v6809_v17 = vor.u32 %v6808_v39, %v16514_v9  ;;  %v7166_v47 = vrot.slane %v6749_v38, 5 }
 0x295   : > { %v7157_v63 = vsel %vm14369_vm4, %v12916_v5, %v7156_v11  ;;  %v7228_v36 = vunpack.c.l.b16 %v7160_v60  ;;  %v16536_v11 = vsel %vm14369_vm4, %v6343_v1, %v6344_v10  ;;  %7880 = vmatpush.bf16.msra.mxu1 %v14038_v20  ;;  %v6750_v10 = vld [vmem:[#allocation2 + $0x24] sm:$0xf] }
 0x296   : > { %v7227_v5 = vunpack.c.l.b16 %v7157_v63  ;;  %v6993_v60 = vpack.c.b16 %v16518_v53, %v16503_v34  ;;  %v6810_v59 = vrot.slane %v6809_v17, 4  ;;  %v6310_v34 = vld [vmem:[#allocation2 + $0x18] sm:$0xe] }
 0x298   : > { %v4660_v4 = vpop.f32.mrf.mxu2  ;;  %v4037_v14 = vpop.f32.mrf.mxu0  ;;  %v7243_v39 = vpack.c.b16 %v7228_v36, %v7227_v5  ;;  %v6820_v36 = vshll.u32 %v6750_v10, 16 }
 0x299   : > { %v4854_v7 = vpop.f32.mrf.mxu3  ;;  %v4681_v3 = vadd.f32 %v4660_v4, %v4432_v29  ;;  %v4414_v56 = vpop.f32.mrf.mxu1  ;;  %v4056_v24 = vadd.f32 %v4037_v14, %v16124_v40  ;;  %v12733_v40 = vrot.slane %v6309_v41, 9  ;;  %v6308_v29 = vld [vmem:[#allocation2] sm:$0xe]  ;;  %v365_v4 = vld [vmem:[#allocation2 + $0x74] sm:$0x1] }
 0x29a   : > { %v14179_v41 = vld [vmem:[#allocation2 + $0x1c] sm:$0xf] }
 0x29b   : > { %v16510_v55 = vadd.f32 %v4854_v7, %v4681_v3  ;;  %v4433_v52 = vadd.f32 %v4414_v56, %v4056_v24  ;;  %5233 = vmatmul.bf16.gmra.mxu0 %v5133_v2  ;;  %v6798_v7 = vrot.slane %v6796_v44, 5  ;;  %v6336_v2 = vrot.slane %v6334_v15, 4 }
 0x29c   : > { %5482 = vmatmul.bf16.gmra.mxu1 %v5382_v21  ;;  %v366_v21 = vsel %vm15438_vm10, 0, %v365_v4  ;;  %v7163_v3 = vrot.slane %v16494_v0, 5  ;;  %v16546_v43 = vsel %vm14369_vm4, %v12733_v40, %v6341_v35  ;;  %v6348_v24 = vrot.slane %v14179_v41, 5  ;;  %v14180_v4 = vld [vmem:[#allocation2 + $0x20] sm:$0x1] }
 0x29d   : > { %6157 = vmatmul.bf16.gmra.mxu2 %v6057_v31  ;;  %v12732_v31 = vrot.slane %v6308_v29, 9  ;;  %367 = vst [vmem:[#allocation2 + $0x74] sm:$0x1] %v366_v21  ;;  %v6408_v35 = vunpack.c.l.b16 %v16536_v11  ;;  %v6812_v40 = vshll.u32 %v6749_v38, 16  ;;  %v6799_v29 = vor.u32 %v6798_v7, %v16516_v37 }
 0x29e   : > { %6302 = vmatmul.bf16.gmra.mxu3 %v13958_v19  ;;  %v6338_v19 = vsel %vm14369_vm4, %v6336_v2, %v6337_v18  ;;  %v6350_v53 = vrot.slane %v6348_v24, 4  ;;  %v6351_v2 = vrot.slane %v14180_v4, 5  ;;  %v6826_v21 = vshll.u32 %v16559_v33, 16  ;;  %v14069_v4 = vld [vmem:[%s18345_s2 + $0x70] sm:$0xff] }
 0x29f   : > { %v6335_v0 = vsel %vm14369_vm4, %v12732_v31, %v6334_v15  ;;  %v7165_v15 = vrot.slane %v7163_v3, 4  ;;  %v6406_v42 = vunpack.c.l.b16 %v6338_v19  ;;  %v6817_v31 = vshrl.u32 %v6750_v10, 16  ;;  %8859 = vmatpush.bf16.msra.mxu3 %v14069_v4 }
 0x2a0   : > { %v4663_v14 = vpop.f32.mrf.mxu2  ;;  %v4039_v1 = vpop.f32.mrf.mxu0  ;;  %v6405_v63 = vunpack.c.l.b16 %v6335_v0  ;;  %v6814_v20 = vrot.slane %v6812_v40, 5  ;;  %v6830_v37 = vshrl.u32 %v16559_v33, 16  ;;  %v319_v7 = vsel %vm15403_vm8, 0, %v318_v62  ;;  %v14045_v62 = vld [vmem:[%s18345_s2 + $0x230] sm:$0xff] }
 0x2a1   : > { %v4857_v56 = vpop.f32.mrf.mxu3  ;;  %v4682_v61 = vadd.f32 %v4663_v14, %v4433_v52  ;;  %v4416_v44 = vpop.f32.mrf.mxu1  ;;  %v4057_v26 = vadd.f32 %v4039_v1, %v16156_v6  ;;  %v12917_v6 = vrot.slane %v7123_v51, 9  ;;  %v6800_v17 = vrot.slane %v6799_v29, 4  ;;  %320 = vst [vmem:[#allocation2 + $0x78] sm:$0x1] %v319_v7  ;;  %v13983_v29 = vld [vmem:[#allocation2 + $0xc] sm:$0xff]  ;;  %8131 = vmatpush.bf16.msra.mxu2 %v14045_v62 }
 0x2a2   : > { %v6421_v41 = vpack.c.b16 %v6406_v42, %v6405_v63  ;;  %v7167_v1 = vsel %vm14369_vm4, %v7165_v15, %v7166_v47  ;;  %v6819_v40 = vrot.slane %v6817_v31, 4  ;;  %v6822_v51 = vrot.slane %v6820_v36, 5  ;;  %v16579_v63 = vld [vmem:[#allocation2 + $0x2c] sm:$0x1]  ;;  %v7124_v31 = vld [vmem:[#allocation2 + $0x24] sm:$0xe] }
 0x2a3   : > { %v16556_v52 = vadd.f32 %v4857_v56, %v4682_v61  ;;  %v4434_v18 = vadd.f32 %v4416_v44, %v4057_v26  ;;  %v7164_v14 = vsel %vm14369_vm4, %v12917_v6, %v7163_v3  ;;  %v12734_v56 = vrot.slane %v6310_v34, 9  ;;  %v6753_v36 = vld [vmem:[#allocation2 + $0x30] sm:$0xf] }
 0x2a4   : > { %v6815_v61 = vsel %vm14379_vm5, %v6810_v59, %v6814_v20  ;;  %v6352_v44 = vsel %vm14369_vm4, %v6350_v53, %v6351_v2  ;;  %v6805_v3 = vsel %vm14379_vm5, %v6800_v17, %v16514_v9  ;;  %v16581_v15 = vrot.slane %v6826_v21, 5  ;;  %v14029_v20 = vld [vmem:[%s18345_s2 + $0x1b0] sm:$0xff]  ;;  %v368_v17 = vld [vmem:[#allocation2 + $0x80] sm:$0x1] }
 0x2a5   : > { %v6349_v59 = vsel %vm14369_vm4, %v12734_v56, %v6348_v24  ;;  %v6832_v42 = vrot.slane %v6830_v37, 4  ;;  %v16585_v34 = vunpack.c.l.b16 %v6815_v61  ;;  %v7230_v53 = vunpack.c.l.b16 %v7167_v1  ;;  %v14037_v7 = vld [vmem:[%s18345_s2 + $0x1f0] sm:$0xff]  ;;  %7503 = vmatpush.bf16.msra.mxu0 %v14029_v20  ;;  %v16628_v1 = vld [vmem:[%s18347_s4] ss:$0 sm:$0xff] }
 0x2a6   : > { %v6410_v6 = vunpack.c.l.b16 %v6352_v44  ;;  %v7229_v47 = vunpack.c.l.b16 %v7164_v14  ;;  %v16588_v24 = vunpack.c.l.b16 %v6805_v3  ;;  %v6823_v2 = vor.u32 %v6822_v51, %v6819_v40  ;;  %v16623_v61 = vld [vmem:[#allocation2 + $0x34] sm:$0xf]  ;;  %7881 = vmatpush.bf16.msra.mxu1 %v14037_v7 }
 0x2a7   : > { %v6836_v21 = vshll.u32 %v16579_v63, 16  ;;  %v6833_v14 = vor.u32 %v6832_v42, %v16581_v15  ;;  %v7170_v56 = vrot.slane %v16559_v33, 5  ;;  %v369_v11 = vsel %vm15438_vm10, 0, %v368_v17  ;;  %v14183_v42 = vld [vmem:[#allocation2 + $0x28] sm:$0xf] }
 0x2a8   : > { %v4665_v5 = vpop.f32.mrf.mxu2  ;;  %v5199_v19 = vpop.f32.mrf.mxu0  ;;  %370 = vst [vmem:[#allocation2 + $0x80] sm:$0x1] %v369_v11  ;;  %v6844_v3 = vshll.u32 %v6753_v36, 16  ;;  %v7173_v62 = vrot.slane %v16579_v63, 5  ;;  %v14184_v17 = vld [vmem:[#allocation2 + $0x2c] sm:$0x1] }
 0x2a9   : > { %v4859_v38 = vpop.f32.mrf.mxu3  ;;  %v4683_v0 = vadd.f32 %v4665_v5, %v4434_v18  ;;  %v5448_v26 = vpop.f32.mrf.mxu1  ;;  %v5239_v10 = vadd.f32 %v5199_v19, %v16197_v13  ;;  %v6407_v13 = vunpack.c.l.b16 %v16546_v43  ;;  %v6409_v43 = vunpack.c.l.b16 %v6349_v59 }
 0x2aa   : > { %v6994_v5 = vpack.c.b16 %v16585_v34, %v16588_v24  ;;  %v12918_v19 = vrot.slane %v7124_v31, 9  ;;  %v6838_v59 = vrot.slane %v6836_v21, 5  ;;  %v6850_v31 = vshll.u32 %v16623_v61, 16  ;;  %v14068_v34 = vld [vmem:[%s18345_s2 + $0x68] sm:$0xff] }
 0x2ab   : > { %v16583_v18 = vadd.f32 %v4859_v38, %v4683_v0  ;;  %v5488_v9 = vadd.f32 %v5448_v26, %v5239_v10  ;;  %6493 = vmatmul.bf16.vlgmr.msrb.gmra.mxu0 %v6421_v41  ;;  %v16608_v37 = vpack.c.b16 %v6408_v35, %v6407_v13  ;;  %v16617_v38 = vpack.c.b16 %v7230_v53, %v7229_v47  ;;  %v6311_v41 = vld [vmem:[#allocation2 + $0x24] sm:$0xe] }
 0x2ac   : > { %6687 = vmatmul.bf16.vlgmr.msrb.gmra.mxu1 %v13983_v29  ;;  %v16621_v35 = vpack.c.b16 %v6410_v6, %v6409_v43  ;;  %v6841_v26 = vshrl.u32 %v6753_v36, 16  ;;  %v6824_v29 = vrot.slane %v6823_v2, 4  ;;  %v6355_v53 = vrot.slane %v14183_v42, 5  ;;  %v5729_v42 = vld [vmem:[#allocation2 + $0x6c] sm:$0xf]  ;;  %8860 = vmatpush.bf16.msra.mxu3 %v14068_v34 }
 0x2ad   : > { %7065 = vmatmul.bf16.vlgmr.msrb.gmra.mxu2 %v6993_v60  ;;  %v16603_v60 = vld [vmem:[%s18346_s3] ss:$0 sm:$0xff]  ;;  %v6834_v13 = vrot.slane %v6833_v14, 4  ;;  %v7172_v47 = vrot.slane %v7170_v56, 4  ;;  %v12735_v20 = vrot.slane %v6311_v41, 9  ;;  %v6854_v36 = vshrl.u32 %v16623_v61, 16 }
 0x2ae   : > { %7315 = vmatmul.bf16.vlgmr.msrb.gmra.mxu3 %v7243_v39  ;;  %v5504_v39 = vmul.f32 %v16603_v60, %v5488_v9  ;;  %v6846_v7 = vrot.slane %v6844_v3, 5  ;;  %v6829_v2 = vsel %vm14379_vm5, %v6824_v29, %v16581_v15  ;;  %v6357_v21 = vrot.slane %v6355_v53, 4  ;;  %v321_v41 = vld [vmem:[#allocation2 + $0x84] sm:$0x1] }
 0x2af   : > { %v6358_v14 = vrot.slane %v14184_v17, 5  ;;  %v16651_v15 = vsel %vm14369_vm4, %v12735_v20, %v6355_v53  ;;  %v7125_v17 = vld [vmem:[#allocation2 + $0x30] sm:$0xe] }
 0x2b0   : > { %v5520_v33 = vadd.f32 %v16628_v1, %v5504_v39  ;;  %v6123_v44 = vpop.f32.mrf.mxu2  ;;  %v5201_v51 = vpop.f32.mrf.mxu0  ;;  %v6843_v39 = vrot.slane %v6841_v26, 4 }
 0x2b1   : > { %v6268_v0 = vpop.f32.mrf.mxu3  ;;  %v5450_v10 = vpop.f32.mrf.mxu1  ;;  %v5240_v9 = vadd.f32 %v5201_v51, %v16213_v57  ;;  %v7171_v57 = vsel %vm14369_vm4, %v12918_v19, %v7170_v56  ;;  %v16653_v56 = vrot.slane %v6850_v31, 5  ;;  %v16655_v19 = vrot.slane %v6854_v36, 4 }
 0x2b2   : > { %v16631_v40 = vadd.f32 %v6268_v0, %v6123_v44  ;;  %v5536_v6 = vmax.f32 %v5520_v33, 0.0  ;;  %v6839_v33 = vsel %vm14379_vm5, %v6834_v13, %v6838_v59  ;;  %v7174_v44 = vsel %vm14369_vm4, %v7172_v47, %v7173_v62 }
 0x2b3   : > { %v5489_v43 = vadd.f32 %v5450_v10, %v5240_v9  ;;  %v322_v0 = vsel %vm15403_vm8, 0, %v321_v41  ;;  %v6847_v59 = vor.u32 %v6846_v7, %v6843_v39  ;;  %v16662_v53 = vunpack.c.l.b16 %v6839_v33 }
 0x2b4   : > { %v5552_v4 = vpack.c.bf16 %v5536_v6, %v5536_v6  ;;  %323 = vst [vmem:[#allocation2 + $0x84] sm:$0x1] %v322_v0  ;;  %v7231_v47 = vunpack.c.l.b16 %v7171_v57  ;;  %v7232_v62 = vunpack.c.l.b16 %v7174_v44  ;;  %v16668_v39 = vunpack.c.l.b16 %v6829_v2  ;;  %v14028_v44 = vld [vmem:[%s18345_s2 + $0x1a8] sm:$0xff] }
 0x2b5   : > { %v5505_v11 = vmul.f32 %v16603_v60, %v5489_v43  ;;  %v6359_v43 = vsel %vm14369_vm4, %v6357_v21, %v6358_v14  ;;  %v6411_v7 = vunpack.c.l.b16 %v16651_v15  ;;  %v7177_v57 = vrot.slane %v16623_v61, 5  ;;  %v16677_v14 = vld [vmem:[#allocation2 + $0x3c] sm:$0xf]  ;;  %v14036_v15 = vld [vmem:[%s18345_s2 + $0x1e8] sm:$0xff]  ;;  %7504 = vmatpush.bf16.msra.mxu0 %v14028_v44 }
 0x2b6   : > { %v5569_v63 = vshrl.u32 %v5552_v4, 16  ;;  %v5572_v3 = vshll.u32 %v5552_v4, 16  ;;  %v13984_v4 = vld [vmem:[#allocation2 + $0x18] sm:$0xff]  ;;  %v6848_v21 = vrot.slane %v6847_v59, 4  ;;  %v6995_v61 = vpack.c.b16 %v16662_v53, %v16668_v39  ;;  %7882 = vmatpush.bf16.msra.mxu1 %v14036_v15  ;;  %v16726_v15 = vld [vmem:[#allocation2 + $0x40] sm:$0xf] }
 0x2b7   : > { %v5521_v51 = vadd.f32 %v16628_v1, %v5505_v11  ;;  %v6857_v11 = vor.u32 %v16655_v19, %v16653_v56  ;;  %v16685_v2 = vpack.c.b16 %v7232_v62, %v7231_v47  ;;  %v6412_v24 = vunpack.c.l.b16 %v6359_v43  ;;  %v371_v19 = vld [vmem:[#allocation2 + $0x8c] sm:$0x1] }
 0x2b8   : > { %v16657_v26 = vrot.slane %v5569_v63, 7  ;;  %v6125_v10 = vpop.f32.mrf.mxu2  ;;  %v5204_v9 = vpop.f32.mrf.mxu0  ;;  %v6755_v63 = vld [vmem:[#allocation2 + $0x38] sm:$0x1]  ;;  %v7179_v59 = vrot.slane %v7177_v57, 4 }
 0x2b9   : > { %v6270_v29 = vpop.f32.mrf.mxu3  ;;  %v5453_v13 = vpop.f32.mrf.mxu1  ;;  %v5537_v31 = vmax.f32 %v5521_v51, 0.0  ;;  %v5241_v36 = vadd.f32 %v5204_v9, %v16243_v28  ;;  %v6860_v51 = vshll.u32 %v6755_v63, 16  ;;  %v16716_v44 = vpack.c.b16 %v6412_v24, %v6411_v7  ;;  %v14185_v24 = vld [vmem:[#allocation2 + $0x34] sm:$0xf] }
 0x2ba   : > { %v16660_v6 = vadd.f32 %v6270_v29, %v6125_v10  ;;  %v5574_v20 = vor.u32 %v5572_v3, %v16657_v26  ;;  %v6853_v3 = vsel %vm14379_vm5, %v6848_v21, %v16653_v56  ;;  %v372_v10 = vsel %vm15438_vm10, 0, %v371_v19 }
 0x2bb   : > { %v5553_v33 = vpack.c.bf16 %v5537_v31, %v5537_v31  ;;  %v5490_v28 = vadd.f32 %v5453_v13, %v5241_v36  ;;  %6498 = vmatmul.bf16.gmra.mxu0 %v16608_v37  ;;  %v14044_v37 = vld [vmem:[%s18345_s2 + $0x228] sm:$0xff]  ;;  %373 = vst [vmem:[#allocation2 + $0x8c] sm:$0x1] %v372_v10  ;;  %v6858_v56 = vrot.slane %v6857_v11, 4  ;;  %v5575_v31 = vrot.slane %v16657_v26, 4 }
 0x2bc   : > { %v5730_v41 = vsel %vm15564_vm12, %v5574_v20, %v5729_v42  ;;  %6692 = vmatmul.bf16.gmra.mxu1 %v13984_v4  ;;  %8132 = vmatpush.bf16.msra.mxu2 %v14044_v37  ;;  %v7180_v42 = vrot.slane %v6755_v63, 5  ;;  %v5733_v36 = vld [vmem:[#allocation2 + $0x74] sm:$0x1]  ;;  %v6868_v63 = vshll.u32 %v16677_v14, 16  ;;  %v6312_v37 = vld [vmem:[#allocation2 + $0x30] sm:$0xe]  ;;  %v16718_v34 = vunpack.c.l.b16 %v6853_v3 }
 0x2bd   : > { %5731 = vst [vmem:[#allocation2 + $0x6c] sm:$0xf] %v5730_v41  ;;  %7070 = vmatmul.bf16.gmra.mxu2 %v6994_v5  ;;  %v12919_v5 = vrot.slane %v7125_v17, 9  ;;  %v5506_v0 = vmul.f32 %v16603_v60, %v5490_v28  ;;  %v5580_v13 = vshll.u32 %v5553_v33, 16  ;;  %v6862_v11 = vrot.slane %v6860_v51, 5 }
 0x2be   : > { %7320 = vmatmul.bf16.gmra.mxu3 %v16617_v38  ;;  %v5577_v38 = vshrl.u32 %v5553_v33, 16  ;;  %v7181_v26 = vsel %vm14369_vm4, %v7179_v59, %v7180_v42  ;;  %v12736_v7 = vrot.slane %v6312_v37, 9  ;;  %v6362_v19 = vrot.slane %v14185_v24, 5  ;;  %v324_v59 = vld [vmem:[#allocation2 + $0x90] sm:$0x1] }
 0x2bf   : > { %v16707_v29 = vsel %vm14369_vm4, %v12919_v5, %v7177_v57  ;;  %v5522_v47 = vadd.f32 %v16628_v1, %v5506_v0  ;;  %v6865_v57 = vshrl.u32 %v16677_v14, 16  ;;  %v6863_v42 = vsel %vm14379_vm5, %v6858_v56, %v6862_v11  ;;  %v14186_v56 = vld [vmem:[#allocation2 + $0x38] sm:$0x1] }
 0x2c0   : > { %v5579_v9 = vrot.slane %v5577_v38, 7  ;;  %v6128_v62 = vpop.f32.mrf.mxu2  ;;  %v5206_v43 = vpop.f32.mrf.mxu0  ;;  %v16743_v37 = vunpack.c.l.b16 %v6863_v42  ;;  %v16747_v11 = vsel %vm14369_vm4, %v12736_v7, %v6362_v19 }
 0x2c1   : > { %v6273_v20 = vpop.f32.mrf.mxu3  ;;  %v5455_v17 = vpop.f32.mrf.mxu1  ;;  %v5538_v28 = vmax.f32 %v5522_v47, 0.0  ;;  %v5242_v21 = vadd.f32 %v5206_v43, %v16261_v50  ;;  %v7233_v50 = vunpack.c.l.b16 %v16707_v29  ;;  %v6867_v3 = vrot.slane %v6865_v57, 4 }
 0x2c2   : > { %v16711_v4 = vadd.f32 %v6273_v20, %v6128_v62  ;;  %v5582_v41 = vor.u32 %v5580_v13, %v5579_v9  ;;  %v5584_v33 = vrot.slane %v5579_v9, 4  ;;  %v6870_v9 = vrot.slane %v6868_v63, 5  ;;  %v16734_v62 = vld [vmem:[#allocation2 + $0x44] sm:$0x1] }
 0x2c3   : > { %v5554_v38 = vpack.c.bf16 %v5538_v28, %v5538_v28  ;;  %v5491_v0 = vadd.f32 %v5455_v17, %v5242_v21  ;;  %v325_v13 = vsel %vm15403_vm8, 0, %v324_v59  ;;  %v7234_v47 = vunpack.c.l.b16 %v7181_v26 }
 0x2c4   : > { %v5583_v5 = vsel %vm15606_vm14, %v5575_v31, %v5582_v41  ;;  %v5734_v14 = vsel %vm15403_vm8, %v5584_v33, %v5733_v36  ;;  %v6874_v29 = vshll.u32 %v16726_v15, 16  ;;  %v6878_v20 = vshrl.u32 %v16726_v15, 16  ;;  %326 = vst [vmem:[#allocation2 + $0x90] sm:$0x1] %v325_v13  ;;  %v5736_v41 = vld [vmem:[#allocation2 + $0x78] sm:$0xf] }
 0x2c5   : > { %5732 = vst [vmem:[#allocation2 + $0x70] sm:$0xf] %v5583_v5  ;;  %v5586_v51 = vshrl.u32 %v5554_v38, 16  ;;  %v5507_v10 = vmul.f32 %v16603_v60, %v5491_v0  ;;  %v5589_v36 = vshll.u32 %v5554_v38, 16  ;;  %v6365_v63 = vrot.slane %v14186_v56, 5  ;;  %v13985_v0 = vld [vmem:[#allocation2 + $0x24] sm:$0xff] }
 0x2c6   : > { %5735 = vst [vmem:[#allocation2 + $0x74] sm:$0x1] %v5734_v14  ;;  %v6364_v26 = vrot.slane %v6362_v19, 4  ;;  %v6871_v24 = vor.u32 %v6870_v9, %v6867_v3  ;;  %v6880_v59 = vrot.slane %v6878_v20, 4  ;;  %v6884_v42 = vshll.u32 %v16734_v62, 16  ;;  %v14027_v3 = vld [vmem:[%s18345_s2 + $0x1a0] sm:$0xff] }
 0x2c7   : > { %v16738_v31 = vrot.slane %v5586_v51, 7  ;;  %v5523_v43 = vadd.f32 %v16628_v1, %v5507_v10  ;;  %v16751_v51 = vpack.c.b16 %v7234_v47, %v7233_v50  ;;  %v16753_v10 = vrot.slane %v6874_v29, 5  ;;  %v16756_v13 = vld [vmem:[#allocation2 + $0x3c] sm:$0xe]  ;;  %v14043_v50 = vld [vmem:[%s18345_s2 + $0x220] sm:$0xff]  ;;  %7505 = vmatpush.bf16.msra.mxu0 %v14027_v3 }
 0x2c8   : > { %v6130_v17 = vpop.f32.mrf.mxu2  ;;  %v5209_v28 = vpop.f32.mrf.mxu0  ;;  %v16778_v53 = vsel %vm14369_vm4, %v6364_v26, %v6365_v63  ;;  %v6413_v39 = vunpack.c.l.b16 %v16747_v11  ;;  %v14035_v47 = vld [vmem:[%s18345_s2 + $0x1e0] sm:$0xff]  ;;  %v374_v29 = vld [vmem:[#allocation2 + $0x98] sm:$0x1]  ;;  %v16786_v20 = vrot.slane %v6871_v24, 4  ;;  %8133 = vmatpush.bf16.msra.mxu2 %v14043_v50  ;;  %v7187_v56 = vrot.slane %v16734_v62, 5 }
 0x2c9   : > { %v6275_v57 = vpop.f32.mrf.mxu3  ;;  %v5458_v21 = vpop.f32.mrf.mxu1  ;;  %v5591_v5 = vor.u32 %v5589_v36, %v16738_v31  ;;  %v5539_v14 = vmax.f32 %v5523_v43, 0.0  ;;  %v5243_v38 = vadd.f32 %v5209_v28, %v16293_v46  ;;  %v6996_v46 = vpack.c.b16 %v16743_v37, %v16718_v34  ;;  %v16795_v63 = vld [vmem:[#allocation2 + $0x3c] sm:$0xe]  ;;  %7883 = vmatpush.bf16.msra.mxu1 %v14035_v47  ;;  %v5740_v24 = vld [vmem:[#allocation2 + $0x80] sm:$0x1] }
 0x2ca   : > { %v16741_v33 = vadd.f32 %v6275_v57, %v6130_v17  ;;  %v12920_v36 = vrot.slane %v16756_v13, 9  ;;  %v375_v43 = vsel %vm15438_vm10, 0, %v374_v29  ;;  %v6881_v57 = vor.u32 %v6880_v59, %v16753_v10  ;;  %v14066_v34 = vld [vmem:[%s18345_s2 + $0x58] sm:$0xff] }
 0x2cb   : > { %v5737_v7 = vsel %vm15564_vm12, %v5591_v5, %v5736_v41  ;;  %v5555_v19 = vpack.c.bf16 %v5539_v14, %v5539_v14  ;;  %v5492_v17 = vadd.f32 %v5458_v21, %v5243_v38  ;;  %6503 = vmatmul.bf16.gmra.mxu0 %v16621_v35  ;;  %v14067_v35 = vld [vmem:[%s18345_s2 + $0x60] sm:$0xff]  ;;  %376 = vst [vmem:[#allocation2 + $0x98] sm:$0x1] %v375_v43  ;;  %v16799_v38 = vld [vmem:[#allocation2 + $0x4c] sm:$0xf]  ;;  %v12737_v47 = vrot.slane %v16795_v63, 9 }
 0x2cc   : > { %6697 = vmatmul.bf16.gmra.mxu1 %v13985_v0  ;;  %5738 = vst [vmem:[#allocation2 + $0x78] sm:$0xf] %v5737_v7  ;;  %8861 = vmatpush.bf16.msra.mxu3 %v14067_v35  ;;  %v5592_v0 = vrot.slane %v16738_v31, 4  ;;  %v14187_v7 = vld [vmem:[#allocation2 + $0x40] sm:$0xf]  ;;  %v6898_v29 = vshll.u32 %v16799_v38, 16 }
 0x2cd   : > { %7075 = vmatmul.bf16.gmra.mxu2 %v6995_v61  ;;  %v7184_v61 = vrot.slane %v16726_v15, 5  ;;  %v5508_v9 = vmul.f32 %v16603_v60, %v5492_v17  ;;  %v16792_v15 = vrot.slane %v6884_v42, 5  ;;  %v5597_v28 = vshll.u32 %v5555_v19, 16  ;;  %v16837_v14 = vld [vmem:[#allocation2 + $0x50] sm:$0x1] }
 0x2ce   : > { %7325 = vmatmul.bf16.gmra.mxu3 %v16685_v2  ;;  %v5594_v2 = vshrl.u32 %v5555_v19, 16  ;;  %v6369_v19 = vrot.slane %v14187_v7, 5  ;;  %v6902_v31 = vshrl.u32 %v16799_v38, 16  ;;  %v327_v7 = vld [vmem:[#allocation2 + $0x9c] sm:$0x1]  ;;  %v6908_v11 = vshll.u32 %v16837_v14, 16 }
 0x2cf   : > { %v5524_v21 = vadd.f32 %v16628_v1, %v5508_v9  ;;  %v7186_v13 = vrot.slane %v7184_v61, 4  ;;  %v6882_v9 = vrot.slane %v6881_v57, 4 }
 0x2d0   : > { %v5596_v41 = vrot.slane %v5594_v2, 7  ;;  %v6133_v26 = vpop.f32.mrf.mxu2  ;;  %v5211_v62 = vpop.f32.mrf.mxu0  ;;  %v6759_v2 = vld [vmem:[#allocation2 + $0x48] sm:$0xf]  ;;  %v6371_v57 = vrot.slane %v6369_v19, 4  ;;  %8862 = vmatpush.bf16.msra.mxu3 %v14066_v34 }
 0x2d1   : > { %v6278_v5 = vpop.f32.mrf.mxu3  ;;  %v5460_v42 = vpop.f32.mrf.mxu1  ;;  %v5540_v3 = vmax.f32 %v5524_v21, 0.0  ;;  %v5244_v35 = vadd.f32 %v5211_v62, %v16310_v49  ;;  %v6877_v49 = vsel %vm14379_vm5, %v16786_v20, %v16753_v10  ;;  %v6889_v63 = vshrl.u32 %v6759_v2, 16 }
 0x2d2   : > { %v16802_v59 = vadd.f32 %v6278_v5, %v6133_v26  ;;  %v5599_v17 = vor.u32 %v5597_v28, %v5596_v41  ;;  %v5601_v50 = vrot.slane %v5596_v41, 4  ;;  %v6892_v41 = vshll.u32 %v6759_v2, 16 }
 0x2d3   : > { %v5556_v5 = vpack.c.bf16 %v5540_v3, %v5540_v3  ;;  %v5493_v28 = vadd.f32 %v5460_v42, %v5244_v35  ;;  %v328_v42 = vsel %vm15403_vm8, 0, %v327_v7  ;;  %v16823_v10 = vrot.slane %v6898_v29, 5 }
 0x2d4   : > { %v5600_v43 = vsel %vm15606_vm14, %v5592_v0, %v5599_v17  ;;  %v5741_v26 = vsel %vm15403_vm8, %v5601_v50, %v5740_v24  ;;  %v7185_v0 = vsel %vm14369_vm4, %v12920_v36, %v7184_v61  ;;  %v7188_v24 = vsel %vm14369_vm4, %v7186_v13, %v7187_v56  ;;  %v14188_v17 = vld [vmem:[#allocation2 + $0x44] sm:$0x1]  ;;  %329 = vst [vmem:[#allocation2 + $0x9c] sm:$0x1] %v328_v42  ;;  %v13986_v42 = vld [vmem:[#allocation2 + $0x30] sm:$0xff] }
 0x2d5   : > { %5739 = vst [vmem:[#allocation2 + $0x7c] sm:$0xf] %v5600_v43  ;;  %v5603_v21 = vshrl.u32 %v5556_v5, 16  ;;  %v5509_v62 = vmul.f32 %v16603_v60, %v5493_v28  ;;  %v6372_v50 = vrot.slane %v14188_v17, 5  ;;  %v6904_v20 = vrot.slane %v6902_v31, 4 }
 0x2d6   : > { %5742 = vst [vmem:[#allocation2 + $0x80] sm:$0x1] %v5741_v26  ;;  %v5606_v35 = vshll.u32 %v5556_v5, 16  ;;  %v6887_v61 = vsel %vm14379_vm5, %v6882_v9, %v16792_v15  ;;  %v5743_v36 = vld [vmem:[#allocation2 + $0x84] sm:$0xf]  ;;  %v6891_v31 = vrot.slane %v6889_v63, 4  ;;  %v7236_v17 = vunpack.c.l.b16 %v7188_v24 }
 0x2d7   : > { %v16825_v3 = vrot.slane %v5603_v21, 7  ;;  %v5525_v2 = vadd.f32 %v16628_v1, %v5509_v62  ;;  %v6373_v29 = vsel %vm14369_vm4, %v6371_v57, %v6372_v50  ;;  %v6894_v21 = vrot.slane %v6892_v41, 5  ;;  %v14026_v24 = vld [vmem:[%s18345_s2 + $0x198] sm:$0xff] }
 0x2d8   : > { %v6135_v43 = vpop.f32.mrf.mxu2  ;;  %v5214_v13 = vpop.f32.mrf.mxu0  ;;  %v16839_v15 = vunpack.c.l.b16 %v6887_v61  ;;  %v7235_v9 = vunpack.c.l.b16 %v7185_v0  ;;  %v16857_v0 = vunpack.c.l.b16 %v6877_v49  ;;  %v377_v49 = vld [vmem:[#allocation2 + $0xa4] sm:$0x1]  ;;  %7506 = vmatpush.bf16.msra.mxu0 %v14026_v24  ;;  %v7191_v61 = vrot.slane %v16799_v38, 5 }
 0x2d9   : > { %v6280_v26 = vpop.f32.mrf.mxu3  ;;  %v5463_v28 = vpop.f32.mrf.mxu1  ;;  %v5608_v5 = vor.u32 %v5606_v35, %v16825_v3  ;;  %v5541_v62 = vmax.f32 %v5525_v2, 0.0  ;;  %v5245_v7 = vadd.f32 %v5214_v13, %v16346_v27  ;;  %v6416_v27 = vunpack.c.l.b16 %v6373_v29 }
 0x2da   : > { %v16831_v56 = vadd.f32 %v6280_v26, %v6135_v43  ;;  %v6370_v43 = vsel %vm14369_vm4, %v12737_v47, %v6369_v19  ;;  %v6905_v26 = vor.u32 %v6904_v20, %v16823_v10  ;;  %v18364_v19 = vunpack.c.l.b16 %v16778_v53 }
 0x2db   : > { %v5744_v57 = vsel %vm15564_vm12, %v5608_v5, %v5743_v36  ;;  %v5557_v63 = vpack.c.bf16 %v5541_v62, %v5541_v62  ;;  %v5494_v41 = vadd.f32 %v5463_v28, %v5245_v7  ;;  %6508 = vmatmul.bf16.gmra.mxu0 %v16716_v44  ;;  %v14042_v44 = vld [vmem:[%s18345_s2 + $0x218] sm:$0xff]  ;;  %v6895_v37 = vor.u32 %v6894_v21, %v6891_v31  ;;  %v7127_v5 = vld [vmem:[#allocation2 + $0x48] sm:$0xe]  ;;  %v5747_v7 = vld [vmem:[#allocation2 + $0x8c] sm:$0x1] }
 0x2dc   : > { %6702 = vmatmul.bf16.gmra.mxu1 %v13986_v42  ;;  %5745 = vst [vmem:[#allocation2 + $0x84] sm:$0xf] %v5744_v57  ;;  %v16855_v47 = vpack.c.b16 %v18364_v19, %v6413_v39  ;;  %v16870_v53 = vpack.c.b16 %v7236_v17, %v7235_v9  ;;  %v14034_v39 = vld [vmem:[%s18345_s2 + $0x1d8] sm:$0xff]  ;;  %v6415_v50 = vunpack.c.l.b16 %v6370_v43  ;;  %v6997_v20 = vpack.c.b16 %v16839_v15, %v16857_v0 }
 0x2dd   : > { %7080 = vmatmul.bf16.gmra.mxu2 %v6996_v46  ;;  %v5510_v46 = vmul.f32 %v16603_v60, %v5494_v41  ;;  %v378_v35 = vsel %vm15438_vm10, 0, %v377_v49  ;;  %v6906_v2 = vrot.slane %v6905_v26, 4  ;;  %v5614_v13 = vshll.u32 %v5557_v63, 16  ;;  %7884 = vmatpush.bf16.msra.mxu1 %v14034_v39  ;;  %v16887_v19 = vld [vmem:[#allocation2 + $0x58] sm:$0xf] }
 0x2de   : > { %7330 = vmatmul.bf16.gmra.mxu3 %v16751_v51  ;;  %v5611_v51 = vshrl.u32 %v5557_v63, 16  ;;  %8134 = vmatpush.bf16.msra.mxu2 %v14042_v44  ;;  %379 = vst [vmem:[#allocation2 + $0xa4] sm:$0x1] %v378_v35  ;;  %v16881_v21 = vpack.c.b16 %v6416_v27, %v6415_v50  ;;  %v5609_v62 = vrot.slane %v16825_v3, 4  ;;  %v6896_v38 = vrot.slane %v6895_v37, 4 }
 0x2df   : > { %v5526_v28 = vadd.f32 %v16628_v1, %v5510_v46  ;;  %v6910_v43 = vrot.slane %v6908_v11, 5  ;;  %v12921_v44 = vrot.slane %v7127_v5, 9  ;;  %v7193_v24 = vrot.slane %v7191_v61, 4  ;;  %v6762_v46 = vld [vmem:[#allocation2 + $0x54] sm:$0xf] }
 0x2e0   : > { %v5613_v36 = vrot.slane %v5611_v51, 7  ;;  %v6138_v29 = vpop.f32.mrf.mxu2  ;;  %v5216_v17 = vpop.f32.mrf.mxu0  ;;  %v6901_v27 = vsel %vm14379_vm5, %v6896_v38, %v16823_v10  ;;  %v14189_v10 = vld [vmem:[#allocation2 + $0x4c] sm:$0xf]  ;;  %v6922_v50 = vshll.u32 %v16887_v19, 16  ;;  %v6926_v35 = vshrl.u32 %v16887_v19, 16 }
 0x2e1   : > { %v6283_v31 = vpop.f32.mrf.mxu3  ;;  %v5465_v9 = vpop.f32.mrf.mxu1  ;;  %v5542_v63 = vmax.f32 %v5526_v28, 0.0  ;;  %v5246_v41 = vadd.f32 %v5216_v17, %v16360_v12  ;;  %v6911_v3 = vsel %vm14379_vm5, %v6906_v2, %v6910_v43  ;;  %v6314_v12 = vld [vmem:[#allocation2 + $0x48] sm:$0xe]  ;;  %v16900_v39 = vsel %vm14369_vm4, %v12921_v44, %v7191_v61 }
 0x2e2   : > { %v16884_v42 = vadd.f32 %v6283_v31, %v6138_v29  ;;  %v5616_v26 = vor.u32 %v5614_v13, %v5613_v36  ;;  %v5618_v57 = vrot.slane %v5613_v36, 4  ;;  %v6376_v49 = vrot.slane %v14189_v10, 5  ;;  %v330_v13 = vld [vmem:[#allocation2 + $0xa8] sm:$0x1]  ;;  %v14190_v10 = vld [vmem:[#allocation2 + $0x50] sm:$0x1] }
 0x2e3   : > { %v5558_v11 = vpack.c.bf16 %v5542_v63, %v5542_v63  ;;  %v5495_v51 = vadd.f32 %v5465_v9, %v5246_v41  ;;  %v16905_v28 = vunpack.c.l.b16 %v6911_v3  ;;  %v7194_v29 = vrot.slane %v16837_v14, 5 }
 0x2e4   : > { %v5617_v34 = vsel %vm15606_vm14, %v5609_v62, %v5616_v26  ;;  %v5748_v37 = vsel %vm15403_vm8, %v5618_v57, %v5747_v7  ;;  %v331_v31 = vsel %vm15403_vm8, 0, %v330_v13  ;;  %v12738_v61 = vrot.slane %v6314_v12, 9  ;;  %v5750_v57 = vld [vmem:[#allocation2 + $0x90] sm:$0xf]  ;;  %v13987_v12 = vld [vmem:[#allocation2 + $0x3c] sm:$0xff] }
 0x2e5   : > { %5746 = vst [vmem:[#allocation2 + $0x88] sm:$0xf] %v5617_v34  ;;  %v5620_v2 = vshrl.u32 %v5558_v11, 16  ;;  %v5511_v36 = vmul.f32 %v16603_v60, %v5495_v51  ;;  %v6913_v5 = vshrl.u32 %v6762_v46, 16  ;;  %v6916_v62 = vshll.u32 %v6762_v46, 16 }
 0x2e6   : > { %5749 = vst [vmem:[#allocation2 + $0x8c] sm:$0x1] %v5748_v37  ;;  %v5623_v17 = vshll.u32 %v5558_v11, 16  ;;  %v7195_v26 = vsel %vm14369_vm4, %v7193_v24, %v7194_v29  ;;  %v6378_v3 = vrot.slane %v6376_v49, 4  ;;  %v16917_v44 = vrot.slane %v6922_v50, 5 }
 0x2e7   : > { %v16910_v7 = vrot.slane %v5620_v2, 7  ;;  %v5527_v9 = vadd.f32 %v16628_v1, %v5511_v36  ;;  %332 = vst [vmem:[#allocation2 + $0xa8] sm:$0x1] %v331_v31  ;;  %v6928_v34 = vrot.slane %v6926_v35, 4  ;;  %v16923_v46 = vsel %vm14369_vm4, %v12738_v61, %v6376_v49  ;;  %v14041_v61 = vld [vmem:[%s18345_s2 + $0x210] sm:$0xff] }
 0x2e8   : > { %v6140_v38 = vpop.f32.mrf.mxu2  ;;  %v5219_v14 = vpop.f32.mrf.mxu0  ;;  %v7238_v24 = vunpack.c.l.b16 %v7195_v26  ;;  %v6379_v2 = vrot.slane %v14190_v10, 5  ;;  %v6915_v36 = vrot.slane %v6913_v5, 4  ;;  %v6918_v13 = vrot.slane %v6916_v62, 5  ;;  %v14033_v62 = vld [vmem:[%s18345_s2 + $0x1d0] sm:$0xff]  ;;  %8135 = vmatpush.bf16.msra.mxu2 %v14041_v61 }
 0x2e9   : > { %v6285_v43 = vpop.f32.mrf.mxu3  ;;  %v5468_v41 = vpop.f32.mrf.mxu1  ;;  %v5625_v37 = vor.u32 %v5623_v17, %v16910_v7  ;;  %v5543_v11 = vmax.f32 %v5527_v9, 0.0  ;;  %v5247_v51 = vadd.f32 %v5219_v14, %v16392_v54  ;;  %v16928_v31 = vunpack.c.l.b16 %v6901_v27  ;;  %v16930_v54 = vld [vmem:[#allocation2 + $0x5c] sm:$0x1]  ;;  %v14065_v27 = vld [vmem:[%s18345_s2 + $0x50] sm:$0xff]  ;;  %7885 = vmatpush.bf16.msra.mxu1 %v14033_v62  ;;  %v16972_v62 = vld [vmem:[#allocation2 + $0x64] sm:$0xf] }
 0x2ea   : > { %v16915_v63 = vadd.f32 %v6285_v43, %v6140_v38  ;;  %v7237_v49 = vunpack.c.l.b16 %v16900_v39  ;;  %v6380_v15 = vsel %vm14369_vm4, %v6378_v3, %v6379_v2  ;;  %v6929_v0 = vor.u32 %v6928_v34, %v16917_v44  ;;  %v380_v17 = vld [vmem:[#allocation2 + $0xb0] sm:$0x1]  ;;  %8863 = vmatpush.bf16.msra.mxu3 %v14065_v27 }
 0x2eb   : > { %v5751_v50 = vsel %vm15564_vm12, %v5625_v37, %v5750_v57  ;;  %v5559_v29 = vpack.c.bf16 %v5543_v11, %v5543_v11  ;;  %v5496_v35 = vadd.f32 %v5468_v41, %v5247_v51  ;;  %6513 = vmatmul.bf16.gmra.mxu0 %v16855_v47  ;;  %v14025_v47 = vld [vmem:[%s18345_s2 + $0x190] sm:$0xff]  ;;  %v6998_v5 = vpack.c.b16 %v16905_v28, %v16928_v31  ;;  %v14064_v28 = vld [vmem:[%s18345_s2 + $0x48] sm:$0xff]  ;;  %v14192_v31 = vld [vmem:[#allocation2 + $0x5c] sm:$0x1] }
 0x2ec   : > { %6707 = vmatmul.bf16.gmra.mxu1 %v13987_v12  ;;  %5752 = vst [vmem:[#allocation2 + $0x90] sm:$0xf] %v5751_v50  ;;  %v6417_v9 = vunpack.c.l.b16 %v16923_v46  ;;  %v16957_v38 = vpack.c.b16 %v7238_v24, %v7237_v49  ;;  %7507 = vmatpush.bf16.msra.mxu0 %v14025_v47  ;;  %v6919_v43 = vor.u32 %v6918_v13, %v6915_v36  ;;  %v6932_v26 = vshll.u32 %v16930_v54, 16  ;;  %v7128_v11 = vld [vmem:[#allocation2 + $0x54] sm:$0xe] }
 0x2ed   : > { %7085 = vmatmul.bf16.gmra.mxu2 %v6997_v20  ;;  %v5628_v20 = vshrl.u32 %v5559_v29, 16  ;;  %v5512_v39 = vmul.f32 %v16603_v60, %v5496_v35  ;;  %v5631_v14 = vshll.u32 %v5559_v29, 16  ;;  %v6418_v37 = vunpack.c.l.b16 %v6380_v15  ;;  %v5754_v12 = vld [vmem:[#allocation2 + $0x98] sm:$0x1]  ;;  %v6765_v15 = vld [vmem:[#allocation2 + $0x60] sm:$0xf] }
 0x2ee   : > { %7335 = vmatmul.bf16.gmra.mxu3 %v16870_v53  ;;  %v7198_v53 = vrot.slane %v16887_v19, 5  ;;  %v381_v19 = vsel %vm15438_vm10, 0, %v380_v17  ;;  %v5626_v51 = vrot.slane %v16910_v7, 4  ;;  %v6930_v2 = vrot.slane %v6929_v0, 4 }
 0x2ef   : > { %v5630_v57 = vrot.slane %v5628_v20, 7  ;;  %v5528_v41 = vadd.f32 %v16628_v1, %v5512_v39  ;;  %382 = vst [vmem:[#allocation2 + $0xb0] sm:$0x1] %v381_v19  ;;  %v6920_v49 = vrot.slane %v6919_v43, 4  ;;  %v6934_v61 = vrot.slane %v6932_v26, 5  ;;  %8864 = vmatpush.bf16.msra.mxu3 %v14064_v28 }
 0x2f0   : > { %v6143_v3 = vpop.f32.mrf.mxu2  ;;  %v5221_v24 = vpop.f32.mrf.mxu0  ;;  %v7200_v36 = vrot.slane %v7198_v53, 4  ;;  %v12922_v47 = vrot.slane %v7128_v11, 9  ;;  %v7201_v27 = vrot.slane %v16930_v54, 5  ;;  %v16974_v17 = vpack.c.b16 %v6418_v37, %v6417_v9 }
 0x2f1   : > { %v6288_v34 = vpop.f32.mrf.mxu3  ;;  %v5470_v10 = vpop.f32.mrf.mxu1  ;;  %v5633_v13 = vor.u32 %v5631_v14, %v5630_v57  ;;  %v5635_v50 = vrot.slane %v5630_v57, 4  ;;  %v5544_v29 = vmax.f32 %v5528_v41, 0.0  ;;  %v5248_v35 = vadd.f32 %v5221_v24, %v16410_v25  ;;  %v333_v57 = vld [vmem:[#allocation2 + $0xb4] sm:$0x1] }
 0x2f2   : > { %v16964_v46 = vadd.f32 %v6288_v34, %v6143_v3  ;;  %v6925_v25 = vsel %vm14379_vm5, %v6920_v49, %v16917_v44  ;;  %v6935_v54 = vsel %vm14379_vm5, %v6930_v2, %v6934_v61  ;;  %v7199_v19 = vsel %vm14369_vm4, %v12922_v47, %v7198_v53  ;;  %v6315_v49 = vld [vmem:[#allocation2 + $0x54] sm:$0xe] }
 0x2f3   : > { %v5634_v7 = vsel %vm15606_vm14, %v5626_v51, %v5633_v13  ;;  %v5755_v20 = vsel %vm15403_vm8, %v5635_v50, %v5754_v12  ;;  %v5560_v39 = vpack.c.bf16 %v5544_v29, %v5544_v29  ;;  %v5497_v0 = vadd.f32 %v5470_v10, %v5248_v35  ;;  %v5757_v10 = vld [vmem:[#allocation2 + $0x9c] sm:$0xf] }
 0x2f4   : > { %5753 = vst [vmem:[#allocation2 + $0x94] sm:$0xf] %v5634_v7  ;;  %v7202_v14 = vsel %vm14369_vm4, %v7200_v36, %v7201_v27  ;;  %v6937_v9 = vshrl.u32 %v6765_v15, 16  ;;  %v334_v41 = vsel %vm15403_vm8, 0, %v333_v57  ;;  %v6940_v3 = vshll.u32 %v6765_v15, 16  ;;  %v13988_v15 = vld [vmem:[#allocation2 + $0x48] sm:$0xff] }
 0x2f5   : > { %5756 = vst [vmem:[#allocation2 + $0x98] sm:$0x1] %v5755_v20  ;;  %v5637_v43 = vshrl.u32 %v5560_v39, 16  ;;  %v5513_v26 = vmul.f32 %v16603_v60, %v5497_v0  ;;  %v6946_v44 = vshll.u32 %v16972_v62, 16  ;;  %v6950_v34 = vshrl.u32 %v16972_v62, 16 }
 0x2f6   : > { %v5640_v53 = vshll.u32 %v5560_v39, 16  ;;  %335 = vst [vmem:[#allocation2 + $0xb4] sm:$0x1] %v334_v41  ;;  %v7239_v24 = vunpack.c.l.b16 %v7199_v19  ;;  %v16995_v50 = vunpack.c.l.b16 %v6925_v25  ;;  %v16997_v29 = vunpack.c.l.b16 %v6935_v54  ;;  %v14191_v7 = vld [vmem:[#allocation2 + $0x58] sm:$0xf] }
 0x2f7   : > { %v16990_v37 = vrot.slane %v5637_v43, 7  ;;  %v5529_v11 = vadd.f32 %v16628_v1, %v5513_v26  ;;  %v7240_v35 = vunpack.c.l.b16 %v7202_v14  ;;  %v6383_v20 = vrot.slane %v14191_v7, 5  ;;  %v17006_v14 = vld [vmem:[#allocation2 + $0x68] sm:$0x1]  ;;  %v5761_v7 = vld [vmem:[#allocation2 + $0xa4] sm:$0x1] }
 0x2f8   : > { %v6145_v51 = vpop.f32.mrf.mxu2  ;;  %v5224_v36 = vpop.f32.mrf.mxu0  ;;  %v6939_v39 = vrot.slane %v6937_v9, 4  ;;  %v6942_v0 = vrot.slane %v6940_v3, 5  ;;  %v17001_v19 = vrot.slane %v6946_v44, 5  ;;  %v6952_v43 = vrot.slane %v6950_v34, 4  ;;  %v14024_v3 = vld [vmem:[%s18345_s2 + $0x188] sm:$0xff] }
 0x2f9   : > { %v6290_v12 = vpop.f32.mrf.mxu3  ;;  %v5473_v13 = vpop.f32.mrf.mxu1  ;;  %v5642_v61 = vor.u32 %v5640_v53, %v16990_v37  ;;  %v5545_v47 = vmax.f32 %v5529_v11, 0.0  ;;  %v5249_v27 = vadd.f32 %v5224_v36, %v16447_v8  ;;  %v12739_v57 = vrot.slane %v6315_v49, 9  ;;  %v17008_v8 = vld [vmem:[#allocation2 + $0x18] sm:$0xf]  ;;  %v14032_v34 = vld [vmem:[%s18345_s2 + $0x1c8] sm:$0xff]  ;;  %7508 = vmatpush.bf16.msra.mxu0 %v14024_v3 }
 0x2fa   : > { %v16993_v2 = vadd.f32 %v6290_v12, %v6145_v51  ;;  %v6999_v9 = vpack.c.b16 %v16997_v29, %v16995_v50  ;;  %v17016_v41 = vpack.c.b16 %v7240_v35, %v7239_v24  ;;  %v383_v53 = vld [vmem:[#allocation2 + $0xbc] sm:$0x1]  ;;  %v6385_v51 = vrot.slane %v6383_v20, 4  ;;  %7886 = vmatpush.bf16.msra.mxu1 %v14032_v34  ;;  %v14063_v50 = vld [vmem:[%s18345_s2 + $0x40] sm:$0xff] }
 0x2fb   : > { %v5758_v25 = vsel %vm15564_vm12, %v5642_v61, %v5757_v10  ;;  %v5561_v54 = vpack.c.bf16 %v5545_v47, %v5545_v47  ;;  %v5498_v26 = vadd.f32 %v5473_v13, %v5249_v27  ;;  %6518 = vmatmul.bf16.gmra.mxu0 %v16881_v21  ;;  %v14040_v21 = vld [vmem:[%s18345_s2 + $0x208] sm:$0xff]  ;;  %v17033_v11 = vsel %vm14369_vm4, %v12739_v57, %v6383_v20  ;;  %v17039_v36 = vld [vmem:[#allocation2 + $0x1c] sm:$0xf] }
 0x2fc   : > { %6712 = vmatmul.bf16.gmra.mxu1 %v13988_v15  ;;  %5759 = vst [vmem:[#allocation2 + $0x9c] sm:$0xf] %v5758_v25  ;;  %8136 = vmatpush.bf16.msra.mxu2 %v14040_v21  ;;  %v384_v12 = vsel %vm15438_vm10, 0, %v383_v53  ;;  %v6943_v24 = vor.u32 %v6942_v0, %v6939_v39  ;;  %v6953_v10 = vor.u32 %v6952_v43, %v17001_v19  ;;  %v7205_v27 = vrot.slane %v16972_v62, 5  ;;  %v7129_v21 = vld [vmem:[#allocation2 + $0x60] sm:$0xe] }
 0x2fd   : > { %7090 = vmatmul.bf16.gmra.mxu2 %v6998_v5  ;;  %v6386_v5 = vrot.slane %v14192_v31, 5  ;;  %v5514_v44 = vmul.f32 %v16603_v60, %v5498_v26  ;;  %v6956_v60 = vshll.u32 %v17006_v14, 16  ;;  %v5648_v35 = vshll.u32 %v5561_v54, 16  ;;  %385 = vst [vmem:[#allocation2 + $0xbc] sm:$0x1] %v384_v12  ;;  %8865 = vmatpush.bf16.msra.mxu3 %v14063_v50 }
 0x2fe   : > { %7340 = vmatmul.bf16.gmra.mxu3 %v16957_v38  ;;  %v5645_v38 = vshrl.u32 %v5561_v54, 16  ;;  %v5643_v15 = vrot.slane %v16990_v37, 4  ;;  %v7592_v43 = vshrl.u32 %v17008_v8, 16  ;;  %v7595_v25 = vshll.u32 %v17008_v8, 16 }
 0x2ff   : > { %v5530_v49 = vadd.f32 %v16628_v1, %v5514_v44  ;;  %v6944_v3 = vrot.slane %v6943_v24, 4  ;;  %v6958_v28 = vrot.slane %v6956_v60, 5  ;;  %v7601_v62 = vshll.u32 %v17039_v36, 16  ;;  %v17058_v60 = vld [vmem:[%s18346_s3] ss:$0 sm:$0xff] }
 0x300   : > { %v5647_v13 = vrot.slane %v5645_v38, 7  ;;  %v6148_v61 = vpop.f32.mrf.mxu2  ;;  %v5226_v39 = vpop.f32.mrf.mxu0  ;;  %v7605_v37 = vshrl.u32 %v17039_v36, 16  ;;  %v6954_v34 = vrot.slane %v6953_v10, 4  ;;  %v12923_v53 = vrot.slane %v7129_v21, 9 }
 0x301   : > { %v6293_v47 = vpop.f32.mrf.mxu3  ;;  %v5475_v0 = vpop.f32.mrf.mxu1  ;;  %v5546_v26 = vmax.f32 %v5530_v49, 0.0  ;;  %v5250_v57 = vadd.f32 %v5226_v39, %v16471_v23  ;;  %v7207_v12 = vrot.slane %v7205_v27, 4  ;;  %v7594_v23 = vrot.slane %v7592_v43, 4  ;;  %v17075_v43 = vld [vmem:[%s18347_s4] ss:$0 sm:$0xff] }
 0x302   : > { %v17044_v20 = vadd.f32 %v6293_v47, %v6148_v61  ;;  %v5650_v54 = vor.u32 %v5648_v35, %v5647_v13  ;;  %v5652_v1 = vrot.slane %v5647_v13, 4  ;;  %v336_v35 = vld [vmem:[#allocation2 + $0xc0] sm:$0x1]  ;;  %v17063_v49 = vsel %vm14369_vm4, %v6385_v51, %v6386_v5 }
 0x303   : > { %v5562_v44 = vpack.c.bf16 %v5546_v26, %v5546_v26  ;;  %v5499_v8 = vadd.f32 %v5475_v0, %v5250_v57  ;;  %v7597_v61 = vrot.slane %v7595_v25, 5  ;;  %v337_v10 = vsel %vm15403_vm8, 0, %v336_v35 }
 0x304   : > { %v5651_v31 = vsel %vm15606_vm14, %v5643_v15, %v5650_v54  ;;  %v5762_v38 = vsel %vm15403_vm8, %v5652_v1, %v5761_v7  ;;  %v7208_v47 = vrot.slane %v17006_v14, 5  ;;  %v17068_v15 = vrot.slane %v7601_v62, 5  ;;  %338 = vst [vmem:[#allocation2 + $0xc0] sm:$0x1] %v337_v10  ;;  %v17081_v54 = vld [vmem:[#allocation2 + $0x20] sm:$0x1] }
 0x305   : > { %5760 = vst [vmem:[#allocation2 + $0xa0] sm:$0xf] %v5651_v31  ;;  %v5654_v24 = vshrl.u32 %v5562_v44, 16  ;;  %v5515_v13 = vmul.f32 %v17058_v60, %v5499_v8  ;;  %v7607_v7 = vrot.slane %v7605_v37, 4  ;;  %v5657_v0 = vshll.u32 %v5562_v44, 16  ;;  %v13989_v44 = vld [vmem:[#allocation2 + $0x54] sm:$0xff] }
 0x306   : > { %5763 = vst [vmem:[#allocation2 + $0xa4] sm:$0x1] %v5762_v38  ;;  %v6949_v14 = vsel %vm14379_vm5, %v6944_v3, %v17001_v19  ;;  %v5764_v1 = vld [vmem:[#allocation2 + $0xa8] sm:$0xf]  ;;  %v6959_v62 = vsel %vm14379_vm5, %v6954_v34, %v6958_v28  ;;  %v17089_v37 = vsel %vm14369_vm4, %v12923_v53, %v7205_v27  ;;  %v17093_v31 = vsel %vm14369_vm4, %v7207_v12, %v7208_v47  ;;  %v7945_v34 = vld [vmem:[#allocation2 + $0x18] sm:$0xe] }
 0x307   : > { %v17070_v39 = vrot.slane %v5654_v24, 7  ;;  %v5531_v5 = vadd.f32 %v17075_v43, %v5515_v13  ;;  %v7598_v8 = vor.u32 %v7597_v61, %v7594_v23  ;;  %v6419_v24 = vunpack.c.l.b16 %v17033_v11  ;;  %v7570_v23 = vld [vmem:[#allocation2 + $0x24] sm:$0xf] }
 0x308   : > { %v6150_v51 = vpop.f32.mrf.mxu2  ;;  %v5229_v57 = vpop.f32.mrf.mxu0  ;;  %v7608_v13 = vor.u32 %v7607_v7, %v17068_v15  ;;  %v7611_v28 = vshll.u32 %v17081_v54, 16  ;;  %v7979_v27 = vrot.slane %v17039_v36, 5  ;;  %v17109_v61 = vunpack.c.l.b16 %v6949_v14  ;;  %v386_v7 = vld [vmem:[#allocation2 + $0xc8] sm:$0x1] }
 0x309   : > { %v6295_v25 = vpop.f32.mrf.mxu3  ;;  %v5478_v21 = vpop.f32.mrf.mxu1  ;;  %v5659_v19 = vor.u32 %v5657_v0, %v17070_v39  ;;  %v5547_v3 = vmax.f32 %v5531_v5, 0.0  ;;  %v5251_v38 = vadd.f32 %v5229_v57, %v16491_v16  ;;  %v6420_v16 = vunpack.c.l.b16 %v17063_v49  ;;  %v14023_v49 = vld [vmem:[%s18345_s2 + $0x180] sm:$0xff] }
 0x30a   : > { %v17083_v26 = vadd.f32 %v6295_v25, %v6150_v51  ;;  %v17111_v36 = vunpack.c.l.b16 %v6959_v62  ;;  %v7241_v10 = vunpack.c.l.b16 %v17089_v37  ;;  %v7242_v47 = vunpack.c.l.b16 %v17093_v31  ;;  %7509 = vmatpush.bf16.msra.mxu0 %v14023_v49 }
 0x30b   : > { %v5765_v53 = vsel %vm15564_vm12, %v5659_v19, %v5764_v1  ;;  %v5563_v12 = vpack.c.bf16 %v5547_v3, %v5547_v3  ;;  %v5500_v35 = vadd.f32 %v5478_v21, %v5251_v38  ;;  %6523 = vmatmul.bf16.gmra.mxu0 %v16974_v17  ;;  %v14039_v17 = vld [vmem:[%s18345_s2 + $0x200] sm:$0xff]  ;;  %v7599_v0 = vrot.slane %v7598_v8, 4  ;;  %v5768_v38 = vld [vmem:[#allocation2 + $0xb0] sm:$0x1] }
 0x30c   : > { %6717 = vmatmul.bf16.gmra.mxu1 %v13989_v44  ;;  %5766 = vst [vmem:[#allocation2 + $0xa8] sm:$0xf] %v5765_v53  ;;  %v13100_v5 = vrot.slane %v7945_v34, 9  ;;  %8137 = vmatpush.bf16.msra.mxu2 %v14039_v17  ;;  %v387_v51 = vsel %vm15438_vm10, 0, %v386_v7  ;;  %v7609_v25 = vrot.slane %v7608_v13, 4  ;;  %v7613_v14 = vrot.slane %v7611_v28, 5 }
 0x30d   : > { %7095 = vmatmul.bf16.gmra.mxu2 %v6999_v9  ;;  %v5662_v29 = vshrl.u32 %v5563_v12, 16  ;;  %v5516_v9 = vmul.f32 %v17058_v60, %v5500_v35  ;;  %v7981_v1 = vrot.slane %v7979_v27, 4  ;;  %v5665_v21 = vshll.u32 %v5563_v12, 16  ;;  %388 = vst [vmem:[#allocation2 + $0xc8] sm:$0x1] %v387_v51 }
 0x30e   : > { %7345 = vmatmul.bf16.gmra.mxu3 %v17016_v41  ;;  %v14031_v41 = vld [vmem:[%s18345_s2 + $0x1c0] sm:$0xff]  ;;  %v7982_v19 = vrot.slane %v17081_v54, 5  ;;  %v5660_v3 = vrot.slane %v17070_v39, 4  ;;  %v7616_v13 = vshrl.u32 %v7570_v23, 16  ;;  %v7619_v28 = vshll.u32 %v7570_v23, 16 }
 0x30f   : > { %v5664_v57 = vrot.slane %v5662_v29, 7  ;;  %v5532_v62 = vadd.f32 %v17075_v43, %v5516_v9  ;;  %7887 = vmatpush.bf16.msra.mxu1 %v14031_v41  ;;  %v7604_v17 = vsel %vm14379_vm5, %v7599_v0, %v17068_v15  ;;  %v7614_v54 = vsel %vm14379_vm5, %v7609_v25, %v7613_v14  ;;  %v8530_v25 = vld [vmem:[#allocation2 + $0x60] sm:$0xf] }
 0x310   : > { %v6153_v37 = vpop.f32.mrf.mxu2  ;;  %v5231_v22 = vpop.f32.mrf.mxu0  ;;  %v17143_v39 = vsel %vm14369_vm4, %v13100_v5, %v7979_v27  ;;  %v17147_v49 = vsel %vm14369_vm4, %v7981_v1, %v7982_v19  ;;  %v6428_v15 = vpack.c.b16 %v6420_v16, %v6419_v24  ;;  %v7000_v27 = vpack.c.b16 %v17111_v36, %v17109_v61  ;;  %v17166_v16 = vld [vmem:[#allocation2 + $0x64] sm:$0xf]  ;;  %v17168_v61 = vld [vmem:[#allocation2 + $0x28] sm:$0xf]  ;;  %v14102_v19 = vld [vmem:[%s18345_s2 + $0x138] sm:$0xff] }
 0x311   : > { %v6298_v31 = vpop.f32.mrf.mxu3  ;;  %v5480_v8 = vpop.f32.mrf.mxu1  ;;  %v5667_v34 = vor.u32 %v5665_v21, %v5664_v57  ;;  %v5669_v53 = vrot.slane %v5664_v57, 4  ;;  %v5548_v12 = vmax.f32 %v5532_v62, 0.0  ;;  %v5252_v35 = vadd.f32 %v5231_v22, %v16510_v55  ;;  %9798 = vmatpush.bf16.msrb.mxu3 %v14102_v19 }
 0x312   : > { %v17133_v44 = vadd.f32 %v6298_v31, %v6153_v37  ;;  %v17157_v9 = vrot.slane %v7616_v13, 4  ;;  %v7621_v41 = vrot.slane %v7619_v28, 5  ;;  %v7250_v5 = vpack.c.b16 %v7242_v47, %v7241_v10  ;;  %v14094_v37 = vld [vmem:[%s18345_s2 + $0xf8] sm:$0xff] }
 0x313   : > { %v5668_v23 = vsel %vm15606_vm14, %v5660_v3, %v5667_v34  ;;  %v5769_v55 = vsel %vm15403_vm8, %v5669_v53, %v5768_v38  ;;  %v5564_v50 = vpack.c.bf16 %v5548_v12, %v5548_v12  ;;  %v5501_v29 = vadd.f32 %v5480_v8, %v5252_v35  ;;  %v14062_v31 = vld [vmem:[%s18345_s2 + $0x38] sm:$0xff]  ;;  %v5771_v3 = vld [vmem:[#allocation2 + $0xb4] sm:$0xf]  ;;  %9421 = vmatpush.bf16.msrb.mxu2 %v14094_v37 }
 0x314   : > { %5767 = vst [vmem:[#allocation2 + $0xac] sm:$0xf] %v5668_v23  ;;  %v17160_v51 = vunpack.c.l.b16 %v7604_v17  ;;  %v17162_v1 = vunpack.c.l.b16 %v7614_v54  ;;  %v8050_v11 = vunpack.c.l.b16 %v17143_v39  ;;  %v8051_v24 = vunpack.c.l.b16 %v17147_v49  ;;  %v14078_v34 = vld [vmem:[%s18345_s2 + $0xb8] sm:$0xff]  ;;  %v13990_v54 = vld [vmem:[#allocation2 + $0x60] sm:$0xff]  ;;  %v17192_v39 = vld [vmem:[#allocation2 + $0x68] sm:$0x1]  ;;  %9003 = vmatpush.bf16.msrb.mxu0 %v14062_v31 }
 0x315   : > { %5770 = vst [vmem:[#allocation2 + $0xb0] sm:$0x1] %v5769_v55  ;;  %v5671_v7 = vshrl.u32 %v5564_v50, 16  ;;  %v5517_v0 = vmul.f32 %v17058_v60, %v5501_v29  ;;  %v5674_v14 = vshll.u32 %v5564_v50, 16  ;;  %v8571_v47 = vshrl.u32 %v8530_v25, 16  ;;  %9228 = vmatpush.bf16.msrb.mxu1 %v14078_v34  ;;  %v14061_v37 = vld [vmem:[%s18345_s2 + $0x30] sm:$0xff] }
 0x316   : > { %v8574_v62 = vshll.u32 %v8530_v25, 16  ;;  %v8580_v13 = vshll.u32 %v17166_v16, 16  ;;  %v8584_v28 = vshrl.u32 %v17166_v16, 16  ;;  %v7622_v53 = vor.u32 %v7621_v41, %v17157_v9  ;;  %v14101_v31 = vld [vmem:[%s18345_s2 + $0x130] sm:$0xff]  ;;  %v5775_v34 = vld [vmem:[#allocation2 + $0xbc] sm:$0x1] }
 0x317   : > { %v17170_v36 = vrot.slane %v5671_v7, 7  ;;  %v5533_v57 = vadd.f32 %v17075_v43, %v5517_v0  ;;  %v7625_v49 = vshll.u32 %v17168_v61, 16  ;;  %v8573_v23 = vrot.slane %v8571_v47, 4  ;;  %9799 = vmatpush.bf16.msrb.mxu3 %v14101_v31 }
 0x318   : > { %v6155_v21 = vpop.f32.mrf.mxu2  ;;  %v5234_v22 = vpop.f32.mrf.mxu0  ;;  %v8576_v55 = vrot.slane %v8574_v62, 5  ;;  %v17195_v50 = vrot.slane %v8580_v13, 5  ;;  %v8586_v29 = vrot.slane %v8584_v28, 4  ;;  %v8590_v25 = vshll.u32 %v17192_v39, 16  ;;  %v8533_v13 = vld [vmem:[#allocation2 + $0x70] sm:$0xf]  ;;  %9004 = vmatpush.bf16.msrb.mxu0 %v14061_v37 }
 0x319   : > { %v6300_v10 = vpop.f32.mrf.mxu3  ;;  %v5483_v8 = vpop.f32.mrf.mxu1  ;;  %v5676_v12 = vor.u32 %v5674_v14, %v17170_v36  ;;  %v5549_v35 = vmax.f32 %v5533_v57, 0.0  ;;  %v5253_v17 = vadd.f32 %v5234_v22, %v16556_v52  ;;  %v7629_v52 = vshrl.u32 %v17168_v61, 16 }
 0x31a   : > { %v17182_v38 = vadd.f32 %v6300_v10, %v6155_v21  ;;  %v8587_v0 = vor.u32 %v8586_v29, %v17195_v50  ;;  %v7816_v21 = vpack.c.b16 %v17162_v1, %v17160_v51  ;;  %v17205_v10 = vpack.c.b16 %v8051_v24, %v8050_v11  ;;  %v17274_v51 = vld [vmem:[#allocation2 + $0x34] sm:$0xf]  ;;  %v14092_v1 = vld [vmem:[%s18345_s2 + $0xe8] sm:$0xff] }
 0x31b   : > { %v5772_v9 = vsel %vm15564_vm12, %v5676_v12, %v5771_v3  ;;  %v5565_v41 = vpack.c.bf16 %v5549_v35, %v5549_v35  ;;  %v5502_v7 = vadd.f32 %v5483_v8, %v5253_v17  ;;  %6528 = vmatmul.bf16.gmra.mxu0 %v6428_v15  ;;  %v14093_v15 = vld [vmem:[%s18345_s2 + $0xf0] sm:$0xff]  ;;  %v8577_v47 = vor.u32 %v8576_v55, %v8573_v23 }
 0x31c   : > { %6722 = vmatmul.bf16.gmra.mxu1 %v13990_v54  ;;  %5773 = vst [vmem:[#allocation2 + $0xb4] sm:$0xf] %v5772_v9  ;;  %v8588_v62 = vrot.slane %v8587_v0, 4  ;;  %v7631_v8 = vrot.slane %v7629_v52, 4  ;;  %9422 = vmatpush.bf16.msrb.mxu2 %v14093_v15  ;;  %v5677_v28 = vrot.slane %v17170_v36, 4  ;;  %v8592_v17 = vrot.slane %v8590_v25, 5 }
 0x31d   : > { %7100 = vmatmul.bf16.gmra.mxu2 %v7000_v27  ;;  %v5679_v14 = vshrl.u32 %v5565_v41, 16  ;;  %v5518_v57 = vmul.f32 %v17058_v60, %v5502_v7  ;;  %v17210_v27 = vrot.slane %v7622_v53, 4  ;;  %v5682_v24 = vshll.u32 %v5565_v41, 16  ;;  %v7572_v9 = vld [vmem:[#allocation2 + $0x2c] sm:$0x1]  ;;  %v14077_v25 = vld [vmem:[%s18345_s2 + $0xb0] sm:$0xff] }
 0x31e   : > { %7350 = vmatmul.bf16.gmra.mxu3 %v7250_v5  ;;  %v17212_v5 = vrot.slane %v7625_v49, 5  ;;  %v7986_v54 = vrot.slane %v17168_v61, 5  ;;  %v8578_v41 = vrot.slane %v8577_v47, 4  ;;  %v8593_v36 = vsel %vm14379_vm5, %v8588_v62, %v8592_v17  ;;  %v8532_v7 = vld [vmem:[#allocation2 + $0x6c] sm:$0xf]  ;;  %9229 = vmatpush.bf16.msrb.mxu1 %v14077_v25  ;;  %v14015_v25 = vld [vmem:[#allocation2 + $0x18] sm:$0xff] }
 0x31f   : > { %v5681_v11 = vrot.slane %v5679_v14, 7  ;;  %v5534_v19 = vadd.f32 %v17075_v43, %v5518_v57  ;;  %v8604_v52 = vshll.u32 %v8533_v13, 16  ;;  %v8608_v0 = vshrl.u32 %v8533_v13, 16  ;;  %v14100_v61 = vld [vmem:[%s18345_s2 + $0x128] sm:$0xff] }
 0x320   : > { %v6158_v3 = vpop.f32.mrf.mxu2  ;;  %v5236_v12 = vpop.f32.mrf.mxu0  ;;  %v7628_v47 = vsel %vm14379_vm5, %v17210_v27, %v17212_v5  ;;  %v7632_v62 = vor.u32 %v7631_v8, %v17212_v5  ;;  %v7635_v37 = vshll.u32 %v7572_v9, 16  ;;  %v7988_v31 = vrot.slane %v7986_v54, 4  ;;  %9423 = vmatpush.bf16.msrb.mxu2 %v14092_v1  ;;  %9800 = vmatpush.bf16.msrb.mxu3 %v14100_v61 }
 0x321   : > { %v6303_v22 = vpop.f32.mrf.mxu3  ;;  %v5485_v35 = vpop.f32.mrf.mxu1  ;;  %v5684_v49 = vor.u32 %v5682_v24, %v5681_v11  ;;  %v5686_v23 = vrot.slane %v5681_v11, 4  ;;  %v5550_v55 = vmax.f32 %v5534_v19, 0.0  ;;  %v5254_v29 = vadd.f32 %v5236_v12, %v16583_v18 }
 0x322   : > { %v17222_v53 = vadd.f32 %v6303_v22, %v6158_v3  ;;  %v8583_v19 = vsel %vm14379_vm5, %v8578_v41, %v17195_v50  ;;  %v8595_v3 = vshrl.u32 %v8532_v7, 16  ;;  %v8779_v22 = vunpack.c.l.b16 %v8593_v36  ;;  %v7946_v36 = vld [vmem:[#allocation2 + $0x24] sm:$0xe] }
 0x323   : > { %v5685_v14 = vsel %vm15606_vm14, %v5677_v28, %v5684_v49  ;;  %v5776_v57 = vsel %vm15403_vm8, %v5686_v23, %v5775_v34  ;;  %v5566_v15 = vpack.c.bf16 %v5550_v55, %v5550_v55  ;;  %v5503_v18 = vadd.f32 %v5485_v35, %v5254_v29  ;;  %v5778_v49 = vld [vmem:[#allocation2 + $0xc0] sm:$0xf] }
 0x324   : > { %5774 = vst [vmem:[#allocation2 + $0xb8] sm:$0xf] %v5685_v14  ;;  %v8598_v13 = vshll.u32 %v8532_v7, 16  ;;  %v17246_v28 = vrot.slane %v8604_v52, 5  ;;  %v8610_v27 = vrot.slane %v8608_v0, 4  ;;  %v7989_v17 = vrot.slane %v7572_v9, 5 }
 0x325   : > { %5777 = vst [vmem:[#allocation2 + $0xbc] sm:$0x1] %v5776_v57  ;;  %v5688_v11 = vshrl.u32 %v5566_v15, 16  ;;  %v5519_v24 = vmul.f32 %v17058_v60, %v5503_v18  ;;  %v5691_v8 = vshll.u32 %v5566_v15, 16  ;;  %v8778_v50 = vunpack.c.l.b16 %v8583_v19  ;;  %v8563_v9 = vld [vmem:[#allocation2 + $0x74] sm:$0x1] }
 0x326   : > { %v7633_v29 = vrot.slane %v7632_v62, 4  ;;  %v7637_v41 = vrot.slane %v7635_v37, 5  ;;  %v8597_v57 = vrot.slane %v8595_v3, 4  ;;  %v8600_v15 = vrot.slane %v8598_v13, 5 }
 0x327   : > { %v17248_v5 = vrot.slane %v5688_v11, 7  ;;  %v5535_v34 = vadd.f32 %v17075_v43, %v5519_v24  ;;  %v17257_v43 = vsel %vm14369_vm4, %v7988_v31, %v7989_v17  ;;  %v8794_v14 = vpack.c.b16 %v8779_v22, %v8778_v50  ;;  %v7573_v24 = vld [vmem:[#allocation2 + $0x30] sm:$0xf] }
 0x328   : > { %v6160_v12 = vpop.f32.mrf.mxu2  ;;  %v6494_v23 = vpop.f32.mrf.mxu0  ;;  %v8611_v18 = vor.u32 %v8610_v27, %v17246_v28  ;;  %v7638_v31 = vsel %vm14379_vm5, %v7633_v29, %v7637_v41  ;;  %v8614_v19 = vshll.u32 %v8563_v9, 16  ;;  %v17268_v58 = vunpack.c.l.b16 %v7628_v47  ;;  %v14060_v47 = vld [vmem:[%s18345_s2 + $0x28] sm:$0xff] }
 0x329   : > { %v6305_v35 = vpop.f32.mrf.mxu3  ;;  %v6688_v55 = vpop.f32.mrf.mxu1  ;;  %v5693_v7 = vor.u32 %v5691_v8, %v17248_v5  ;;  %v5551_v52 = vmax.f32 %v5535_v34, 0.0  ;;  %v6534_v0 = vadd.f32 %v6494_v23, %v16631_v40  ;;  %v13101_v40 = vrot.slane %v7946_v36, 9  ;;  %v5782_v23 = vld [vmem:[#allocation2 + $0xc8] sm:$0x1]  ;;  %9005 = vmatpush.bf16.msrb.mxu0 %v14060_v47 }
 0x32a   : > { %v17251_v60 = vadd.f32 %v6305_v35, %v6160_v12  ;;  %v7640_v13 = vshrl.u32 %v7573_v24, 16  ;;  %v7643_v27 = vshll.u32 %v7573_v24, 16  ;;  %v17286_v35 = vunpack.c.l.b16 %v7638_v31 }
 0x32b   : > { %v5779_v62 = vsel %vm15564_vm12, %v5693_v7, %v5778_v49  ;;  %v5567_v37 = vpack.c.bf16 %v5551_v52, %v5551_v52  ;;  %v6728_v11 = vadd.f32 %v6688_v55, %v6534_v0  ;;  %7510 = vmatmul.bf16.vlgmr.msra.gmra.mxu0 %v14015_v25  ;;  %v7987_v22 = vsel %vm14369_vm4, %v13101_v40, %v7986_v54  ;;  %v8535_v49 = vld [vmem:[#allocation2 + $0x7c] sm:$0xf] }
 0x32c   : > { %7888 = vmatmul.bf16.vlgmr.msra.gmra.mxu1 %v7816_v21  ;;  %5780 = vst [vmem:[#allocation2 + $0xc0] sm:$0xf] %v5779_v62  ;;  %v8053_v21 = vunpack.c.l.b16 %v17257_v43  ;;  %v8612_v17 = vrot.slane %v8611_v18, 4  ;;  %v8616_v41 = vrot.slane %v8614_v19, 5  ;;  %v7649_v36 = vshll.u32 %v17274_v51, 16  ;;  %v14076_v62 = vld [vmem:[%s18345_s2 + $0xa8] sm:$0xff] }
 0x32d   : > { %8138 = vmatmul.bf16.vlgmr.msra.gmra.mxu2 %v17205_v10  ;;  %v5696_v3 = vshrl.u32 %v5567_v37, 16  ;;  %v8601_v10 = vor.u32 %v8600_v15, %v8597_v57  ;;  %v5699_v8 = vshll.u32 %v5567_v37, 16  ;;  %v7653_v7 = vshrl.u32 %v17274_v51, 16  ;;  %v8534_v57 = vld [vmem:[#allocation2 + $0x78] sm:$0xf]  ;;  %9230 = vmatpush.bf16.msrb.mxu1 %v14076_v62 }
 0x32e   : > { %8866 = vmatmul.bf16.vlgmr.msra.gmra.mxu3 %v8794_v14  ;;  %v5694_v52 = vrot.slane %v17248_v5, 4  ;;  %v8628_v15 = vshll.u32 %v8535_v49, 16  ;;  %v8632_v18 = vshrl.u32 %v8535_v49, 16  ;;  %v8052_v40 = vunpack.c.l.b16 %v7987_v22 }
 0x32f   : > { %v5698_v54 = vrot.slane %v5696_v3, 7  ;;  %v8602_v14 = vrot.slane %v8601_v10, 4  ;;  %v7642_v24 = vrot.slane %v7640_v13, 4  ;;  %v17303_v31 = vrot.slane %v7649_v36, 5 }
 0x330   : > { %v7066_v34 = vpop.f32.mrf.mxu2  ;;  %v6496_v50 = vpop.f32.mrf.mxu0  ;;  %v7655_v19 = vrot.slane %v7653_v7, 4  ;;  %v7645_v3 = vrot.slane %v7643_v27, 5  ;;  %v8619_v1 = vshrl.u32 %v8534_v57, 16  ;;  %v8622_v32 = vshll.u32 %v8534_v57, 16 }
 0x331   : > { %v7316_v12 = vpop.f32.mrf.mxu3  ;;  %v7106_v55 = vadd.f32 %v7066_v34, %v6728_v11  ;;  %v6690_v29 = vpop.f32.mrf.mxu1  ;;  %v5701_v0 = vor.u32 %v5699_v8, %v5698_v54  ;;  %v5703_v25 = vrot.slane %v5698_v54, 4  ;;  %v6535_v43 = vadd.f32 %v6496_v50, %v16660_v6  ;;  %v7575_v34 = vld [vmem:[#allocation2 + $0x38] sm:$0x1]  ;;  %v14016_v50 = vld [vmem:[#allocation2 + $0x24] sm:$0xff] }
 0x332   : > { %v8617_v6 = vsel %vm14379_vm5, %v8612_v17, %v8616_v41  ;;  %v8607_v30 = vsel %vm14379_vm5, %v8602_v14, %v17246_v28  ;;  %v17308_v47 = vrot.slane %v8628_v15, 5  ;;  %v8634_v61 = vrot.slane %v8632_v18, 4  ;;  %v8564_v41 = vld [vmem:[#allocation2 + $0x80] sm:$0x1]  ;;  %v7576_v15 = vld [vmem:[#allocation2 + $0x3c] sm:$0xf] }
 0x333   : > { %v17292_v9 = vadd.f32 %v7316_v12, %v7106_v55  ;;  %v5702_v37 = vsel %vm15606_vm14, %v5694_v52, %v5701_v0  ;;  %v5783_v5 = vsel %vm15403_vm8, %v5703_v25, %v5782_v23  ;;  %v6729_v11 = vadd.f32 %v6690_v29, %v6535_v43  ;;  %v17318_v0 = vld [vmem:[#allocation2 + $0x40] sm:$0xf]  ;;  %v7947_v43 = vld [vmem:[#allocation2 + $0x30] sm:$0xe] }
 0x334   : > { %5781 = vst [vmem:[#allocation2 + $0xc4] sm:$0xf] %v5702_v37  ;;  %v8781_v10 = vunpack.c.l.b16 %v8617_v6  ;;  %v7817_v22 = vpack.c.b16 %v17286_v35, %v17268_v58  ;;  %v8067_v13 = vpack.c.b16 %v8053_v21, %v8052_v40  ;;  %v8780_v23 = vunpack.c.l.b16 %v8607_v30  ;;  %v14059_v6 = vld [vmem:[%s18345_s2 + $0x20] sm:$0xff] }
 0x335   : > { %5784 = vst [vmem:[#allocation2 + $0xc8] sm:$0x1] %v5783_v5  ;;  %v7656_v28 = vor.u32 %v7655_v19, %v17303_v31  ;;  %v7993_v27 = vrot.slane %v17274_v51, 5  ;;  %v7646_v29 = vor.u32 %v7645_v3, %v7642_v24  ;;  %v8621_v36 = vrot.slane %v8619_v1, 4  ;;  %v14099_v30 = vld [vmem:[%s18345_s2 + $0x120] sm:$0xff]  ;;  %9006 = vmatpush.bf16.msrb.mxu0 %v14059_v6 }
 0x336   : > { %v8624_v7 = vrot.slane %v8622_v32, 5  ;;  %v8795_v58 = vpack.c.b16 %v8781_v10, %v8780_v23  ;;  %v7659_v21 = vshll.u32 %v7575_v34, 16  ;;  %v8635_v35 = vor.u32 %v8634_v61, %v17308_v47  ;;  %9801 = vmatpush.bf16.msrb.mxu3 %v14099_v30 }
 0x337   : > { %v7995_v14 = vrot.slane %v7993_v27, 4  ;;  %v8638_v57 = vshll.u32 %v8564_v41, 16  ;;  %v7647_v18 = vrot.slane %v7646_v29, 4  ;;  %v7673_v37 = vshll.u32 %v17318_v0, 16 }
 0x338   : > { %v7068_v54 = vpop.f32.mrf.mxu2  ;;  %v6499_v17 = vpop.f32.mrf.mxu0  ;;  %v8625_v62 = vor.u32 %v8624_v7, %v8621_v36  ;;  %v7677_v5 = vshrl.u32 %v17318_v0, 16  ;;  %v7661_v40 = vrot.slane %v7659_v21, 5  ;;  %v7996_v24 = vrot.slane %v7575_v34, 5  ;;  %v14075_v7 = vld [vmem:[%s18345_s2 + $0xa0] sm:$0xff] }
 0x339   : > { %v7318_v8 = vpop.f32.mrf.mxu3  ;;  %v7107_v12 = vadd.f32 %v7068_v54, %v6729_v11  ;;  %v6693_v49 = vpop.f32.mrf.mxu1  ;;  %v6536_v55 = vadd.f32 %v6499_v17, %v16711_v4  ;;  %v7657_v4 = vrot.slane %v7656_v28, 4  ;;  %v14091_v11 = vld [vmem:[%s18345_s2 + $0xe0] sm:$0xff]  ;;  %v8636_v19 = vrot.slane %v8635_v35, 4  ;;  %9231 = vmatpush.bf16.msrb.mxu1 %v14075_v7  ;;  %v7579_v7 = vld [vmem:[#allocation2 + $0x48] sm:$0xf] }
 0x33a   : > { %v7652_v32 = vsel %vm14379_vm5, %v7647_v18, %v17303_v31  ;;  %v13102_v10 = vrot.slane %v7947_v43, 9  ;;  %v7664_v61 = vshrl.u32 %v7576_v15, 16  ;;  %v7667_v54 = vshll.u32 %v7576_v15, 16  ;;  %9424 = vmatpush.bf16.msrb.mxu2 %v14091_v11  ;;  %v7578_v18 = vld [vmem:[#allocation2 + $0x44] sm:$0x1] }
 0x33b   : > { %v17315_v52 = vadd.f32 %v7318_v8, %v7107_v12  ;;  %v6730_v25 = vadd.f32 %v6693_v49, %v6536_v55  ;;  %7515 = vmatmul.bf16.gmra.mxu0 %v14016_v50  ;;  %v8537_v8 = vld [vmem:[#allocation2 + $0x88] sm:$0xf]  ;;  %v7662_v12 = vsel %vm14379_vm5, %v7657_v4, %v7661_v40  ;;  %v7997_v17 = vsel %vm14369_vm4, %v7995_v14, %v7996_v24 }
 0x33c   : > { %7893 = vmatmul.bf16.gmra.mxu1 %v7817_v22  ;;  %v8640_v49 = vrot.slane %v8638_v57, 5  ;;  %v8626_v31 = vrot.slane %v8625_v62, 4  ;;  %v17341_v28 = vrot.slane %v7673_v37, 5  ;;  %v7679_v55 = vrot.slane %v7677_v5, 4 }
 0x33d   : > { %8143 = vmatmul.bf16.gmra.mxu2 %v8067_v13  ;;  %v8652_v41 = vshll.u32 %v8537_v8, 16  ;;  %v8656_v36 = vshrl.u32 %v8537_v8, 16  ;;  %v7666_v21 = vrot.slane %v7664_v61, 4  ;;  %v7669_v35 = vrot.slane %v7667_v54, 5  ;;  %v14017_v54 = vld [vmem:[#allocation2 + $0x30] sm:$0xff] }
 0x33e   : > { %8871 = vmatmul.bf16.gmra.mxu3 %v8795_v58  ;;  %v8641_v29 = vsel %vm14379_vm5, %v8636_v19, %v8640_v49  ;;  %v7994_v43 = vsel %vm14369_vm4, %v13102_v10, %v7993_v27  ;;  %v8631_v4 = vsel %vm14379_vm5, %v8626_v31, %v17308_v47  ;;  %v7804_v14 = vunpack.c.l.b16 %v7652_v32 }
 0x33f   : > { %v8055_v57 = vunpack.c.l.b16 %v7997_v17  ;;  %v8783_v15 = vunpack.c.l.b16 %v8641_v29  ;;  %v7680_v62 = vor.u32 %v7679_v55, %v17341_v28  ;;  %v17358_v11 = vrot.slane %v8652_v41, 5 }
 0x340   : > { %v7071_v3 = vpop.f32.mrf.mxu2  ;;  %v6501_v13 = vpop.f32.mrf.mxu0  ;;  %v8658_v6 = vrot.slane %v8656_v36, 4  ;;  %v8054_v24 = vunpack.c.l.b16 %v7994_v43  ;;  %v8782_v27 = vunpack.c.l.b16 %v8631_v4  ;;  %v7670_v19 = vor.u32 %v7669_v35, %v7666_v21  ;;  %v17368_v35 = vld [vmem:[#allocation2 + $0x4c] sm:$0xf] }
 0x341   : > { %v7321_v1 = vpop.f32.mrf.mxu3  ;;  %v7108_v22 = vadd.f32 %v7071_v3, %v6730_v25  ;;  %v6695_v34 = vpop.f32.mrf.mxu1  ;;  %v6537_v23 = vadd.f32 %v6501_v13, %v16741_v33  ;;  %v8536_v25 = vld [vmem:[#allocation2 + $0x84] sm:$0xf]  ;;  %v7805_v33 = vunpack.c.l.b16 %v7662_v12  ;;  %v8000_v30 = vrot.slane %v17318_v0, 5  ;;  %v8565_v12 = vld [vmem:[#allocation2 + $0x8c] sm:$0x1] }
 0x342   : > { %v8643_v37 = vshrl.u32 %v8536_v25, 16  ;;  %v8646_v5 = vshll.u32 %v8536_v25, 16  ;;  %v7683_v10 = vshll.u32 %v7578_v18, 16  ;;  %v8068_v8 = vpack.c.b16 %v8055_v57, %v8054_v24  ;;  %v14090_v25 = vld [vmem:[%s18345_s2 + $0xd8] sm:$0xff] }
 0x343   : > { %v17343_v50 = vadd.f32 %v7321_v1, %v7108_v22  ;;  %v6731_v58 = vadd.f32 %v6695_v34, %v6537_v23  ;;  %v7818_v32 = vpack.c.b16 %v7805_v33, %v7804_v14  ;;  %v8796_v22 = vpack.c.b16 %v8783_v15, %v8782_v27  ;;  %v7948_v34 = vld [vmem:[#allocation2 + $0x3c] sm:$0xe]  ;;  %9425 = vmatpush.bf16.msrb.mxu2 %v14090_v25  ;;  %v9052_v25 = vld [vmem:[#allocation2 + $0x60] sm:$0xe] }
 0x344   : > { %v7681_v13 = vrot.slane %v7680_v62, 4  ;;  %v8645_v49 = vrot.slane %v8643_v37, 4  ;;  %v8648_v23 = vrot.slane %v8646_v5, 5  ;;  %v8659_v31 = vor.u32 %v8658_v6, %v17358_v11  ;;  %v14058_v33 = vld [vmem:[%s18345_s2 + $0x18] sm:$0xff] }
 0x345   : > { %v7671_v55 = vrot.slane %v7670_v19, 4  ;;  %v8002_v29 = vrot.slane %v8000_v30, 4  ;;  %v13103_v41 = vrot.slane %v7948_v34, 9  ;;  %v8662_v36 = vshll.u32 %v8565_v12, 16  ;;  %9007 = vmatpush.bf16.msrb.mxu0 %v14058_v33  ;;  %v17395_v12 = vld [vmem:[#allocation2 + $0x50] sm:$0x1] }
 0x346   : > { %v8003_v21 = vrot.slane %v7578_v18, 5  ;;  %v8649_v14 = vor.u32 %v8648_v23, %v8645_v49  ;;  %v8660_v57 = vrot.slane %v8659_v31, 4  ;;  %v7688_v37 = vshrl.u32 %v7579_v7, 16 }
 0x347   : > { %v8001_v4 = vsel %vm14369_vm4, %v13103_v41, %v8000_v30  ;;  %v7691_v5 = vshll.u32 %v7579_v7, 16  ;;  %v8664_v24 = vrot.slane %v8662_v36, 5  ;;  %v7697_v27 = vshll.u32 %v17368_v35, 16  ;;  %v8539_v30 = vld [vmem:[#allocation2 + $0x94] sm:$0xf] }
 0x348   : > { %v7073_v51 = vpop.f32.mrf.mxu2  ;;  %v6504_v3 = vpop.f32.mrf.mxu0  ;;  %v8004_v62 = vsel %vm14369_vm4, %v8002_v29, %v8003_v21  ;;  %v7701_v19 = vshrl.u32 %v17368_v35, 16  ;;  %v7690_v49 = vrot.slane %v7688_v37, 4  ;;  %v8680_v23 = vshrl.u32 %v8539_v30, 16 }
 0x349   : > { %v7323_v40 = vpop.f32.mrf.mxu3  ;;  %v7109_v47 = vadd.f32 %v7073_v51, %v6731_v58  ;;  %v6698_v1 = vpop.f32.mrf.mxu1  ;;  %v6538_v61 = vadd.f32 %v6504_v3, %v16802_v59  ;;  %v7685_v59 = vrot.slane %v7683_v10, 5  ;;  %v7676_v58 = vsel %vm14379_vm5, %v7671_v55, %v17341_v28  ;;  %v14098_v28 = vld [vmem:[%s18345_s2 + $0x118] sm:$0xff] }
 0x34a   : > { %9802 = vmatpush.bf16.msrb.mxu3 %v14098_v28  ;;  %v7806_v3 = vunpack.c.l.b16 %v7676_v58  ;;  %v17400_v55 = vrot.slane %v7697_v27, 5  ;;  %v7703_v29 = vrot.slane %v7701_v19, 4  ;;  %v7707_v58 = vshll.u32 %v17395_v12, 16 }
 0x34b   : > { %v17362_v17 = vadd.f32 %v7323_v40, %v7109_v47  ;;  %v6732_v0 = vadd.f32 %v6698_v1, %v6538_v61  ;;  %7520 = vmatmul.bf16.gmra.mxu0 %v14017_v54  ;;  %v7686_v43 = vsel %vm14379_vm5, %v7681_v13, %v7685_v59  ;;  %v8057_v61 = vunpack.c.l.b16 %v8004_v62  ;;  %v14074_v13 = vld [vmem:[%s18345_s2 + $0x98] sm:$0xff] }
 0x34c   : > { %7898 = vmatmul.bf16.gmra.mxu1 %v7818_v32  ;;  %v7807_v1 = vunpack.c.l.b16 %v7686_v43  ;;  %v8056_v32 = vunpack.c.l.b16 %v8001_v4  ;;  %v8650_v54 = vrot.slane %v8649_v14, 4  ;;  %v7704_v37 = vor.u32 %v7703_v29, %v17400_v55  ;;  %v14097_v29 = vld [vmem:[%s18345_s2 + $0x110] sm:$0xff] }
 0x34d   : > { %8148 = vmatmul.bf16.gmra.mxu2 %v8068_v8  ;;  %v8665_v8 = vsel %vm14379_vm5, %v8660_v57, %v8664_v24  ;;  %9232 = vmatpush.bf16.msrb.mxu1 %v14074_v13  ;;  %v8682_v57 = vrot.slane %v8680_v23, 4  ;;  %v13292_v19 = vrot.slane %v9052_v25, 9  ;;  %v7709_v13 = vrot.slane %v7707_v58, 5  ;;  %v14057_v23 = vld [vmem:[%s18345_s2 + $0x10] sm:$0xff] }
 0x34e   : > { %8876 = vmatmul.bf16.gmra.mxu3 %v8796_v22  ;;  %v8538_v22 = vld [vmem:[#allocation2 + $0x90] sm:$0xf]  ;;  %v8655_v31 = vsel %vm14379_vm5, %v8650_v54, %v17358_v11  ;;  %v8785_v59 = vunpack.c.l.b16 %v8665_v8  ;;  %v7819_v36 = vpack.c.b16 %v7807_v1, %v7806_v3  ;;  %v8069_v7 = vpack.c.b16 %v8057_v61, %v8056_v32  ;;  %v17415_v8 = vld [vmem:[#allocation2 + $0x58] sm:$0xf]  ;;  %9008 = vmatpush.bf16.msrb.mxu0 %v14057_v23 }
 0x34f   : > { %v8667_v41 = vshrl.u32 %v8538_v22, 16  ;;  %v8670_v21 = vshll.u32 %v8538_v22, 16  ;;  %v8784_v4 = vunpack.c.l.b16 %v8655_v31  ;;  %v9078_v11 = vrot.slane %v17166_v16, 5  ;;  %9803 = vmatpush.bf16.msrb.mxu3 %v14097_v29 }
 0x350   : > { %v7076_v15 = vpop.f32.mrf.mxu2  ;;  %v6506_v51 = vpop.f32.mrf.mxu0  ;;  %v9081_v1 = vrot.slane %v17192_v39, 5  ;;  %v7705_v31 = vrot.slane %v7704_v37, 4 }
 0x351   : > { %v7326_v18 = vpop.f32.mrf.mxu3  ;;  %v7110_v6 = vadd.f32 %v7076_v15, %v6732_v0  ;;  %v6700_v40 = vpop.f32.mrf.mxu1  ;;  %v6539_v47 = vadd.f32 %v6506_v51, %v16831_v56  ;;  %v8676_v56 = vshll.u32 %v8539_v30, 16  ;;  %v7693_v0 = vrot.slane %v7691_v5, 5  ;;  %v7949_v5 = vld [vmem:[#allocation2 + $0x48] sm:$0xe] }
 0x352   : > { %v8797_v24 = vpack.c.b16 %v8785_v59, %v8784_v4  ;;  %v8669_v27 = vrot.slane %v8667_v41, 4  ;;  %v8672_v3 = vrot.slane %v8670_v21, 5  ;;  %v9080_v16 = vrot.slane %v9078_v11, 4 }
 0x353   : > { %v17388_v10 = vadd.f32 %v7326_v18, %v7110_v6  ;;  %v6733_v34 = vadd.f32 %v6700_v40, %v6539_v47  ;;  %v17403_v14 = vrot.slane %v8676_v56, 5  ;;  %v7694_v62 = vor.u32 %v7693_v0, %v7690_v49  ;;  %v14018_v40 = vld [vmem:[#allocation2 + $0x3c] sm:$0xff]  ;;  %v8566_v47 = vld [vmem:[#allocation2 + $0x98] sm:$0x1]  ;;  %v14089_v56 = vld [vmem:[%s18345_s2 + $0xd0] sm:$0xff] }
 0x354   : > { %v8007_v6 = vrot.slane %v17368_v35, 5  ;;  %v13104_v61 = vrot.slane %v7949_v5, 9  ;;  %v7582_v35 = vld [vmem:[#allocation2 + $0x54] sm:$0xf]  ;;  %v9082_v22 = vsel %vm14369_vm4, %v9080_v16, %v9081_v1  ;;  %v8686_v49 = vshll.u32 %v8566_v47, 16  ;;  %9426 = vmatpush.bf16.msrb.mxu2 %v14089_v56 }
 0x355   : > { %v8683_v54 = vor.u32 %v8682_v57, %v17403_v14  ;;  %v8673_v0 = vor.u32 %v8672_v3, %v8669_v27  ;;  %v9149_v41 = vunpack.c.l.b16 %v9082_v22  ;;  %v7695_v58 = vrot.slane %v7694_v62, 4  ;;  %v14073_v27 = vld [vmem:[%s18345_s2 + $0x90] sm:$0xff]  ;;  %v8540_v47 = vld [vmem:[#allocation2 + $0x9c] sm:$0xf] }
 0x356   : > { %v17421_v39 = vsel %vm14369_vm4, %v13104_v61, %v8007_v6  ;;  %v8010_v21 = vrot.slane %v17395_v12, 5  ;;  %v8688_v62 = vrot.slane %v8686_v49, 5  ;;  %v7715_v5 = vshll.u32 %v7582_v35, 16  ;;  %9233 = vmatpush.bf16.msrb.mxu1 %v14073_v27 }
 0x357   : > { %v8684_v25 = vrot.slane %v8683_v54, 4  ;;  %v8058_v61 = vunpack.c.l.b16 %v17421_v39  ;;  %v8694_v49 = vshll.u32 %v8540_v47, 16 }
 0x358   : > { %v7078_v33 = vpop.f32.mrf.mxu2  ;;  %v6509_v15 = vpop.f32.mrf.mxu0 }
 0x359   : > { %v7328_v43 = vpop.f32.mrf.mxu3  ;;  %v7111_v28 = vadd.f32 %v7078_v33, %v6733_v34  ;;  %v6703_v18 = vpop.f32.mrf.mxu1  ;;  %v6540_v51 = vadd.f32 %v6509_v15, %v16884_v42  ;;  %v9079_v42 = vsel %vm14369_vm4, %v13292_v19, %v9078_v11  ;;  %v8009_v34 = vrot.slane %v8007_v6, 4  ;;  %v8541_v15 = vld [vmem:[#allocation2 + $0xa0] sm:$0xf] }
 0x35a   : > { %v9148_v59 = vunpack.c.l.b16 %v9079_v42  ;;  %v7712_v33 = vshrl.u32 %v7582_v35, 16  ;;  %v7721_v11 = vshll.u32 %v17415_v8, 16  ;;  %v8689_v19 = vsel %vm14379_vm5, %v8684_v25, %v8688_v62  ;;  %v14019_v25 = vld [vmem:[#allocation2 + $0x48] sm:$0xff]  ;;  %v7585_v62 = vld [vmem:[#allocation2 + $0x60] sm:$0xf] }
 0x35b   : > { %v17409_v30 = vadd.f32 %v7328_v43, %v7111_v28  ;;  %v6734_v32 = vadd.f32 %v6703_v18, %v6540_v51  ;;  %7525 = vmatmul.bf16.gmra.mxu0 %v14018_v40  ;;  %v7725_v28 = vshrl.u32 %v17415_v8, 16  ;;  %v8011_v12 = vsel %vm14369_vm4, %v8009_v34, %v8010_v21 }
 0x35c   : > { %7903 = vmatmul.bf16.gmra.mxu1 %v7819_v36  ;;  %v17435_v18 = vpack.c.b16 %v9149_v41, %v9148_v59  ;;  %v7700_v51 = vsel %vm14379_vm5, %v7695_v58, %v17400_v55  ;;  %v7710_v40 = vsel %vm14379_vm5, %v7705_v31, %v7709_v13  ;;  %v8700_v3 = vshll.u32 %v8541_v15, 16  ;;  %v7584_v13 = vld [vmem:[#allocation2 + $0x5c] sm:$0x1] }
 0x35d   : > { %8153 = vmatmul.bf16.gmra.mxu2 %v8069_v7  ;;  %v8704_v16 = vshrl.u32 %v8541_v15, 16  ;;  %v17452_v1 = vrot.slane %v7721_v11, 5  ;;  %v7809_v55 = vunpack.c.l.b16 %v7710_v40  ;;  %v8059_v54 = vunpack.c.l.b16 %v8011_v12  ;;  %v7950_v11 = vld [vmem:[#allocation2 + $0x54] sm:$0xe]  ;;  %v8567_v15 = vld [vmem:[#allocation2 + $0xa4] sm:$0x1] }
 0x35e   : > { %8881 = vmatmul.bf16.gmra.mxu3 %v8797_v24  ;;  %v8674_v24 = vrot.slane %v8673_v0, 4  ;;  %v7808_v35 = vunpack.c.l.b16 %v7700_v51  ;;  %v8787_v22 = vunpack.c.l.b16 %v8689_v19  ;;  %v8691_v34 = vshrl.u32 %v8540_v47, 16  ;;  %v17466_v40 = vld [vmem:[#allocation2 + $0x64] sm:$0xf] }
 0x35f   : > { %v7714_v31 = vrot.slane %v7712_v33, 4  ;;  %v7717_v0 = vrot.slane %v7715_v5, 5  ;;  %v17458_v29 = vrot.slane %v8700_v3, 5  ;;  %v8706_v59 = vrot.slane %v8704_v16, 4  ;;  %v14088_v16 = vld [vmem:[%s18345_s2 + $0xc8] sm:$0xff] }
 0x360   : > { %v7081_v36 = vpop.f32.mrf.mxu2  ;;  %v6511_v4 = vpop.f32.mrf.mxu0  ;;  %v8679_v42 = vsel %vm14379_vm5, %v8674_v24, %v17403_v14  ;;  %v8014_v14 = vrot.slane %v17415_v8, 5  ;;  %v8696_v12 = vrot.slane %v8694_v49, 5  ;;  %v13105_v24 = vrot.slane %v7950_v11, 9  ;;  %9427 = vmatpush.bf16.msrb.mxu2 %v14088_v16 }
 0x361   : > { %v7331_v7 = vpop.f32.mrf.mxu3  ;;  %v7112_v43 = vadd.f32 %v7081_v36, %v6734_v32  ;;  %v6705_v57 = vpop.f32.mrf.mxu1  ;;  %v6541_v37 = vadd.f32 %v6511_v4, %v16915_v63  ;;  %v7727_v32 = vrot.slane %v7725_v28, 4  ;;  %v8070_v4 = vpack.c.b16 %v8059_v54, %v8058_v61 }
 0x362   : > { %v7718_v51 = vor.u32 %v7717_v0, %v7714_v31  ;;  %v8707_v8 = vor.u32 %v8706_v59, %v17458_v29  ;;  %v8016_v27 = vrot.slane %v8014_v14, 4  ;;  %v8710_v19 = vshll.u32 %v8567_v15, 16  ;;  %v8542_v15 = vld [vmem:[#allocation2 + $0xa8] sm:$0xf] }
 0x363   : > { %v17440_v6 = vadd.f32 %v7331_v7, %v7112_v43  ;;  %v6735_v63 = vadd.f32 %v6705_v57, %v6541_v37  ;;  %v8786_v7 = vunpack.c.l.b16 %v8679_v42  ;;  %v7728_v58 = vor.u32 %v7727_v32, %v17452_v1  ;;  %v14056_v32 = vld [vmem:[%s18345_s2 + $0x8] sm:$0xff] }
 0x364   : > { %v7820_v43 = vpack.c.b16 %v7809_v55, %v7808_v35  ;;  %v7731_v57 = vshll.u32 %v7584_v13, 16  ;;  %v8693_v37 = vrot.slane %v8691_v34, 4  ;;  %v7736_v47 = vshrl.u32 %v7585_v62, 16  ;;  %v14096_v35 = vld [vmem:[%s18345_s2 + $0x108] sm:$0xff]  ;;  %9009 = vmatpush.bf16.msrb.mxu0 %v14056_v32 }
 0x365   : > { %v8798_v28 = vpack.c.b16 %v8787_v22, %v8786_v7  ;;  %v7739_v3 = vshll.u32 %v7585_v62, 16  ;;  %v8017_v55 = vrot.slane %v7584_v13, 5  ;;  %v7745_v54 = vshll.u32 %v17466_v40, 16  ;;  %9804 = vmatpush.bf16.msrb.mxu3 %v14096_v35 }
 0x366   : > { %v8697_v61 = vor.u32 %v8696_v12, %v8693_v37  ;;  %v7749_v42 = vshrl.u32 %v17466_v40, 16  ;;  %v7719_v49 = vrot.slane %v7718_v51, 4  ;;  %v8015_v59 = vsel %vm14369_vm4, %v13105_v24, %v8014_v14  ;;  %v14072_v14 = vld [vmem:[%s18345_s2 + $0x88] sm:$0xff] }
 0x367   : > { %v8712_v7 = vrot.slane %v8710_v19, 5  ;;  %9234 = vmatpush.bf16.msrb.mxu1 %v14072_v14  ;;  %v8718_v19 = vshll.u32 %v8542_v15, 16  ;;  %v14087_v14 = vld [vmem:[%s18345_s2 + $0xc0] sm:$0xff] }
 0x368   : > { %v7083_v56 = vpop.f32.mrf.mxu2  ;;  %v6514_v36 = vpop.f32.mrf.mxu0  ;;  %v7724_v12 = vsel %vm14379_vm5, %v7719_v49, %v17452_v1  ;;  %9428 = vmatpush.bf16.msrb.mxu2 %v14087_v14 }
 0x369   : > { %v7333_v23 = vpop.f32.mrf.mxu3  ;;  %v7113_v41 = vadd.f32 %v7083_v56, %v6735_v63  ;;  %v6708_v39 = vpop.f32.mrf.mxu1  ;;  %v6542_v21 = vadd.f32 %v6514_v36, %v16964_v46  ;;  %v7729_v46 = vrot.slane %v7728_v58, 4  ;;  %v7733_v63 = vrot.slane %v7731_v57, 5  ;;  %v8543_v36 = vld [vmem:[#allocation2 + $0xac] sm:$0xf] }
 0x36a   : > { %v8708_v56 = vrot.slane %v8707_v8, 4  ;;  %v7738_v58 = vrot.slane %v7736_v47, 4  ;;  %v7751_v57 = vrot.slane %v7749_v42, 4  ;;  %v8724_v37 = vshll.u32 %v8543_v36, 16 }
 0x36b   : > { %v17463_v33 = vadd.f32 %v7333_v23, %v7113_v41  ;;  %v6736_v5 = vadd.f32 %v6708_v39, %v6542_v21  ;;  %7530 = vmatmul.bf16.gmra.mxu0 %v14019_v25  ;;  %v7734_v13 = vsel %vm14379_vm5, %v7729_v46, %v7733_v63  ;;  %v8018_v41 = vsel %vm14369_vm4, %v8016_v27, %v8017_v55  ;;  %v17501_v27 = vld [vmem:[#allocation2 + $0x68] sm:$0x1] }
 0x36c   : > { %7908 = vmatmul.bf16.gmra.mxu1 %v7820_v43  ;;  %v7741_v21 = vrot.slane %v7739_v3, 5  ;;  %v8698_v43 = vrot.slane %v8697_v61, 4  ;;  %v8061_v62 = vunpack.c.l.b16 %v8018_v41  ;;  %v8060_v46 = vunpack.c.l.b16 %v8015_v59 }
 0x36d   : > { %8158 = vmatmul.bf16.gmra.mxu2 %v8070_v4  ;;  %v17488_v4 = vrot.slane %v7745_v54, 5  ;;  %v8715_v63 = vshrl.u32 %v8542_v15, 16  ;;  %v7810_v16 = vunpack.c.l.b16 %v7724_v12  ;;  %v17504_v1 = vrot.slane %v8724_v37, 5 }
 0x36e   : > { %8886 = vmatmul.bf16.gmra.mxu3 %v8798_v28  ;;  %v8713_v28 = vsel %vm14379_vm5, %v8708_v56, %v8712_v7  ;;  %v8703_v51 = vsel %vm14379_vm5, %v8698_v43, %v17458_v29  ;;  %v7742_v8 = vor.u32 %v7741_v21, %v7738_v58  ;;  %v8071_v35 = vpack.c.b16 %v8061_v62, %v8060_v46  ;;  %v7951_v43 = vld [vmem:[#allocation2 + $0x60] sm:$0xe] }
 0x36f   : > { %v8789_v24 = vunpack.c.l.b16 %v8713_v28  ;;  %v7752_v32 = vor.u32 %v7751_v57, %v17488_v4  ;;  %v8788_v29 = vunpack.c.l.b16 %v8703_v51  ;;  %v8717_v59 = vrot.slane %v8715_v63, 4  ;;  %v17518_v28 = vld [vmem:[#allocation2 + $0x70] sm:$0xf]  ;;  %v14055_v63 = vld [vmem:[%s18345_s2] sm:$0xff] }
 0x370   : > { %v7086_v22 = vpop.f32.mrf.mxu2  ;;  %v6516_v31 = vpop.f32.mrf.mxu0  ;;  %v7743_v56 = vrot.slane %v7742_v8, 4  ;;  %v8720_v41 = vrot.slane %v8718_v19, 5  ;;  %v8021_v7 = vrot.slane %v17466_v40, 5  ;;  %v13106_v8 = vrot.slane %v7951_v43, 9  ;;  %v14095_v19 = vld [vmem:[%s18345_s2 + $0x100] sm:$0xff]  ;;  %9010 = vmatpush.bf16.msrb.mxu0 %v14055_v63 }
 0x371   : > { %v7336_v34 = vpop.f32.mrf.mxu3  ;;  %v7114_v23 = vadd.f32 %v7086_v22, %v6736_v5  ;;  %v6710_v0 = vpop.f32.mrf.mxu1  ;;  %v6543_v39 = vadd.f32 %v6516_v31, %v16993_v2  ;;  %v8728_v2 = vshrl.u32 %v8543_v36, 16  ;;  %v7811_v5 = vunpack.c.l.b16 %v7734_v13  ;;  %v8568_v13 = vld [vmem:[#allocation2 + $0xb0] sm:$0x1]  ;;  %9805 = vmatpush.bf16.msrb.mxu3 %v14095_v19 }
 0x372   : > { %v8734_v57 = vshll.u32 %v8568_v13, 16  ;;  %v8024_v46 = vrot.slane %v17501_v27, 5 }
 0x373   : > { %v17486_v25 = vadd.f32 %v7336_v34, %v7114_v23  ;;  %v6737_v11 = vadd.f32 %v6710_v0, %v6543_v39  ;;  %v8730_v55 = vrot.slane %v8728_v2, 4  ;;  %v14020_v34 = vld [vmem:[#allocation2 + $0x54] sm:$0xff]  ;;  %v7821_v49 = vpack.c.b16 %v7811_v5, %v7810_v16  ;;  %v7588_v16 = vld [vmem:[#allocation2 + $0x6c] sm:$0xf] }
 0x374   : > { %v7755_v23 = vshll.u32 %v17501_v27, 16  ;;  %v8799_v0 = vpack.c.b16 %v8789_v24, %v8788_v29  ;;  %v7753_v39 = vrot.slane %v7752_v32, 4  ;;  %v8023_v2 = vrot.slane %v8021_v7, 4  ;;  %v8545_v24 = vld [vmem:[#allocation2 + $0xb8] sm:$0xf] }
 0x375   : > { %v8731_v58 = vor.u32 %v8730_v55, %v17504_v1  ;;  %v7769_v32 = vshll.u32 %v17518_v28, 16  ;;  %v7773_v55 = vshrl.u32 %v17518_v28, 16  ;;  %v8752_v13 = vshrl.u32 %v8545_v24, 16 }
 0x376   : > { %v7757_v21 = vrot.slane %v7755_v23, 5  ;;  %v7760_v23 = vshrl.u32 %v7588_v16, 16 }
 0x377   : > { %v8732_v12 = vrot.slane %v8731_v58, 4 }
 0x378   : > { %v7088_v47 = vpop.f32.mrf.mxu2  ;;  %v6519_v54 = vpop.f32.mrf.mxu0  ;;  %v7758_v37 = vsel %vm14379_vm5, %v7753_v39, %v7757_v21  ;;  %v8754_v21 = vrot.slane %v8752_v13, 4  ;;  %v9487_v13 = vld [vmem:[#allocation2 + $0x70] sm:$0xf] }
 0x379   : > { %v7338_v3 = vpop.f32.mrf.mxu3  ;;  %v7115_v61 = vadd.f32 %v7088_v47, %v6737_v11  ;;  %v6713_v42 = vpop.f32.mrf.mxu1  ;;  %v6544_v22 = vadd.f32 %v6519_v54, %v17044_v20  ;;  %v7748_v20 = vsel %vm14379_vm5, %v7743_v56, %v17488_v4  ;;  %v8721_v11 = vor.u32 %v8720_v41, %v8717_v59 }
 0x37a   : > { %v7812_v51 = vunpack.c.l.b16 %v7748_v20  ;;  %v7813_v27 = vunpack.c.l.b16 %v7758_v37  ;;  %v8022_v54 = vsel %vm14369_vm4, %v13106_v8, %v8021_v7  ;;  %v17546_v59 = vrot.slane %v7769_v32, 5  ;;  %v14021_v8 = vld [vmem:[#allocation2 + $0x60] sm:$0xff] }
 0x37b   : > { %v17508_v31 = vadd.f32 %v7338_v3, %v7115_v61  ;;  %v6738_v36 = vadd.f32 %v6713_v42, %v6544_v22  ;;  %7535 = vmatmul.bf16.gmra.mxu0 %v14020_v34  ;;  %v8736_v3 = vrot.slane %v8734_v57, 5  ;;  %v8722_v42 = vrot.slane %v8721_v11, 4 }
 0x37c   : > { %7913 = vmatmul.bf16.gmra.mxu1 %v7821_v49  ;;  %v8025_v22 = vsel %vm14369_vm4, %v8023_v2, %v8024_v46  ;;  %v8748_v49 = vshll.u32 %v8545_v24, 16  ;;  %v7775_v41 = vrot.slane %v7773_v55, 4  ;;  %v7822_v14 = vpack.c.b16 %v7813_v27, %v7812_v51  ;;  %v7590_v2 = vld [vmem:[#allocation2 + $0x74] sm:$0x1]  ;;  %v8569_v24 = vld [vmem:[#allocation2 + $0xbc] sm:$0x1] }
 0x37d   : > { %8163 = vmatmul.bf16.gmra.mxu2 %v8071_v35  ;;  %v8544_v35 = vld [vmem:[#allocation2 + $0xb4] sm:$0xf]  ;;  %v8737_v34 = vsel %vm14379_vm5, %v8732_v12, %v8736_v3  ;;  %v8727_v56 = vsel %vm14379_vm5, %v8722_v42, %v17504_v1  ;;  %v8063_v7 = vunpack.c.l.b16 %v8025_v22  ;;  %v8062_v11 = vunpack.c.l.b16 %v8022_v54  ;;  %v14142_v22 = vld [vmem:[%s18345_s2 + $0x238] sm:$0xff] }
 0x37e   : > { %8891 = vmatmul.bf16.gmra.mxu3 %v8799_v0  ;;  %v7763_v0 = vshll.u32 %v7588_v16, 16  ;;  %v8742_v39 = vshll.u32 %v8544_v35, 16  ;;  %v8791_v58 = vunpack.c.l.b16 %v8737_v34  ;;  %v17548_v20 = vrot.slane %v8748_v49, 5 }
 0x37f   : > { %v7762_v12 = vrot.slane %v7760_v23, 4  ;;  %v7776_v46 = vor.u32 %v7775_v41, %v17546_v59  ;;  %v8072_v51 = vpack.c.b16 %v8063_v7, %v8062_v11  ;;  %v7779_v55 = vshll.u32 %v7590_v2, 16  ;;  %10867 = vmatpush.bf16.msra.mxu3 %v14142_v22 }
 0x380   : > { %v7091_v15 = vpop.f32.mrf.mxu2  ;;  %v6521_v4 = vpop.f32.mrf.mxu0  ;;  %v8744_v19 = vrot.slane %v8742_v39, 5  ;;  %v8755_v16 = vor.u32 %v8754_v21, %v17548_v20  ;;  %v8758_v27 = vshll.u32 %v8569_v24, 16  ;;  %v8031_v34 = vrot.slane %v7590_v2, 5 }
 0x381   : > { %v7341_v40 = vpop.f32.mrf.mxu3  ;;  %v7116_v62 = vadd.f32 %v7091_v15, %v6738_v36  ;;  %v6715_v5 = vpop.f32.mrf.mxu1  ;;  %v6545_v47 = vadd.f32 %v6521_v4, %v17083_v26  ;;  %v14071_v26 = vld [vmem:[%s18345_s2 + $0x80] sm:$0xff]  ;;  %v8739_v36 = vshrl.u32 %v8544_v35, 16  ;;  %v8790_v15 = vunpack.c.l.b16 %v8727_v56 }
 0x382   : > { %9235 = vmatpush.bf16.msrb.mxu1 %v14071_v26  ;;  %v8028_v4 = vrot.slane %v17518_v28, 5  ;;  %v7952_v28 = vld [vmem:[#allocation2 + $0x6c] sm:$0xe]  ;;  %v7777_v42 = vrot.slane %v7776_v46, 4  ;;  %v14134_v26 = vld [vmem:[%s18345_s2 + $0x1f8] sm:$0xff]  ;;  %v8756_v49 = vrot.slane %v8755_v16, 4 }
 0x383   : > { %v17532_v61 = vadd.f32 %v7341_v40, %v7116_v62  ;;  %v6739_v29 = vadd.f32 %v6715_v5, %v6545_v47  ;;  %v7765_v62 = vrot.slane %v7763_v0, 5  ;;  %v8741_v63 = vrot.slane %v8739_v36, 4  ;;  %10618 = vmatpush.bf16.msra.mxu2 %v14134_v26 }
 0x384   : > { %v8800_v3 = vpack.c.b16 %v8791_v58, %v8790_v15  ;;  %v7781_v0 = vrot.slane %v7779_v55, 5  ;;  %v13107_v7 = vrot.slane %v7952_v28, 9  ;;  %v8760_v21 = vrot.slane %v8758_v27, 5 }
 0x385   : > { %v7766_v54 = vor.u32 %v7765_v62, %v7762_v12  ;;  %v8745_v35 = vor.u32 %v8744_v19, %v8741_v63  ;;  %v9486_v12 = vld [vmem:[#allocation2 + $0x6c] sm:$0xf] }
 0x386   : > { %v9511_v63 = vshrl.u32 %v9486_v12, 16  ;;  %v9514_v19 = vshll.u32 %v9486_v12, 16 }
 0x387   : > { %v8746_v11 = vrot.slane %v8745_v35, 4 }
 0x388   : > { %v7093_v43 = vpop.f32.mrf.mxu2  ;;  %v6524_v40 = vpop.f32.mrf.mxu0 }
 0x389   : > { %v7343_v57 = vpop.f32.mrf.mxu3  ;;  %v7117_v1 = vadd.f32 %v7093_v43, %v6739_v29  ;;  %v6718_v37 = vpop.f32.mrf.mxu1  ;;  %v6546_v5 = vadd.f32 %v6524_v40, %v17133_v44  ;;  %v8030_v44 = vrot.slane %v8028_v4, 4  ;;  %v14110_v29 = vld [vmem:[%s18345_s2 + $0x178] sm:$0xff]  ;;  %v9520_v40 = vshll.u32 %v9487_v13, 16 }
 0x38a   : > { %10047 = vmatpush.bf16.msra.mxu0 %v14110_v29  ;;  %v9488_v29 = vld [vmem:[#allocation2 + $0x74] sm:$0x1] }
 0x38b   : > { %v17553_v47 = vadd.f32 %v7343_v57, %v7117_v1  ;;  %v6740_v32 = vadd.f32 %v6718_v37, %v6546_v5  ;;  %7540 = vmatmul.bf16.gmra.mxu0 %v14021_v8  ;;  %v8032_v58 = vsel %vm14369_vm4, %v8030_v44, %v8031_v34  ;;  %v7767_v57 = vrot.slane %v7766_v54, 4 }
 0x38c   : > { %7918 = vmatmul.bf16.gmra.mxu1 %v7822_v14  ;;  %v7782_v14 = vsel %vm14379_vm5, %v7777_v42, %v7781_v0  ;;  %v8761_v1 = vsel %vm14379_vm5, %v8756_v49, %v8760_v21  ;;  %v9524_v37 = vshrl.u32 %v9487_v13, 16  ;;  %v8751_v5 = vsel %vm14379_vm5, %v8746_v11, %v17548_v20  ;;  %v14022_v20 = vld [vmem:[#allocation2 + $0x6c] sm:$0xff]  ;;  %v14126_v0 = vld [vmem:[%s18345_s2 + $0x1b8] sm:$0xff] }
 0x38d   : > { %8168 = vmatmul.bf16.gmra.mxu2 %v8072_v51  ;;  %v7772_v62 = vsel %vm14379_vm5, %v7767_v57, %v17546_v59  ;;  %v7815_v8 = vunpack.c.l.b16 %v7782_v14  ;;  %v8065_v46 = vunpack.c.l.b16 %v8032_v58  ;;  %v8793_v24 = vunpack.c.l.b16 %v8761_v1  ;;  %10241 = vmatpush.bf16.msra.mxu1 %v14126_v0 }
 0x38e   : > { %8896 = vmatmul.bf16.gmra.mxu3 %v8800_v3  ;;  %v17582_v51 = vrot.slane %v9520_v40, 5  ;;  %v9526_v3 = vrot.slane %v9524_v37, 4  ;;  %v7814_v55 = vunpack.c.l.b16 %v7772_v62  ;;  %v8792_v28 = vunpack.c.l.b16 %v8751_v5 }
 0x38f   : > { %v9513_v34 = vrot.slane %v9511_v63, 4  ;;  %v9516_v49 = vrot.slane %v9514_v19, 5  ;;  %v9490_v63 = vld [vmem:[#allocation2 + $0x7c] sm:$0xf]  ;;  %v14133_v19 = vld [vmem:[%s18345_s2 + $0x1f0] sm:$0xff] }
 0x390   : > { %v7096_v56 = vpop.f32.mrf.mxu2  ;;  %v6526_v36 = vpop.f32.mrf.mxu0  ;;  %v7823_v42 = vpack.c.b16 %v7815_v8, %v7814_v55  ;;  %v8801_v26 = vpack.c.b16 %v8793_v24, %v8792_v28  ;;  %v9489_v24 = vld [vmem:[#allocation2 + $0x78] sm:$0xf]  ;;  %10619 = vmatpush.bf16.msra.mxu2 %v14133_v19  ;;  %v14196_v19 = vld [vmem:[#allocation2 + $0x74] sm:$0x1] }
 0x391   : > { %v7346_v23 = vpop.f32.mrf.mxu3  ;;  %v7118_v41 = vadd.f32 %v7096_v56, %v6740_v32  ;;  %v6720_v39 = vpop.f32.mrf.mxu1  ;;  %v6547_v43 = vadd.f32 %v6526_v36, %v17182_v38  ;;  %v8029_v38 = vsel %vm14369_vm4, %v13107_v7, %v8028_v4  ;;  %v9527_v56 = vor.u32 %v9526_v3, %v17582_v51 }
 0x392   : > { %v8064_v59 = vunpack.c.l.b16 %v8029_v38  ;;  %v9535_v3 = vshrl.u32 %v9489_v24, 16 }
 0x393   : > { %v17570_v15 = vadd.f32 %v7346_v23, %v7118_v41  ;;  %v6741_v2 = vadd.f32 %v6720_v39, %v6547_v43  ;;  %v13156_v23 = vld [vmem:[%s14328_s9 + $0xc] sm:$0xf]  ;;  %v9517_v39 = vor.u32 %v9516_v49, %v9513_v34  ;;  %v9528_v7 = vrot.slane %v9527_v56, 4  ;;  %v13157_v43 = vld [vmem:[%s14328_s9 + $0x10] sm:$0xf] }
 0x394   : > { %v8073_v35 = vpack.c.b16 %v8065_v46, %v8064_v59  ;;  %v8220_v41 = vshrl.u32 %v13156_v23, 16  ;;  %v8223_v36 = vshll.u32 %v13156_v23, 16  ;;  %v8233_v12 = vshrl.u32 %v13157_v43, 16 }
 0x395   : > { %v9518_v38 = vrot.slane %v9517_v39, 4  ;;  %v8229_v8 = vshll.u32 %v13157_v43, 16  ;;  %v13159_v43 = vld [vmem:[%s14328_s9 + $0x18] sm:$0xf] }
 0x396   : > { %v8222_v37 = vrot.slane %v8220_v41, 4  ;;  %v8235_v28 = vrot.slane %v8233_v12, 4 }
 0x398   : > { %v7098_v16 = vpop.f32.mrf.mxu2  ;;  %v6529_v4 = vpop.f32.mrf.mxu0 }
 0x399   : > { %v7348_v32 = vpop.f32.mrf.mxu3  ;;  %v7119_v44 = vadd.f32 %v7098_v16, %v6741_v2  ;;  %v6723_v27 = vpop.f32.mrf.mxu1  ;;  %v6548_v54 = vadd.f32 %v6529_v4, %v17222_v53  ;;  %v9530_v53 = vshll.u32 %v9488_v29, 16  ;;  %v8225_v2 = vrot.slane %v8223_v36, 5  ;;  %v14109_v4 = vld [vmem:[%s18345_s2 + $0x170] sm:$0xff]  ;;  %v14047_v36 = vld [vmem:[#allocation2 + $0x60] sm:$0xff] }
 0x39a   : > { %v9538_v16 = vshll.u32 %v9489_v24, 16  ;;  %10048 = vmatpush.bf16.msra.mxu0 %v14109_v4 }
 0x39b   : > { %v17585_v22 = vadd.f32 %v7348_v32, %v7119_v44  ;;  %v6742_v13 = vadd.f32 %v6723_v27, %v6548_v54  ;;  %7545 = vmatmul.bf16.gmra.mxu0 %v14022_v20  ;;  %v9532_v1 = vrot.slane %v9530_v53, 5  ;;  %v9544_v32 = vshll.u32 %v9490_v63, 16  ;;  %v14141_v27 = vld [vmem:[%s18345_s2 + $0x230] sm:$0xff] }
 0x39c   : > { %7923 = vmatmul.bf16.gmra.mxu1 %v7823_v42  ;;  %v8226_v59 = vor.u32 %v8225_v2, %v8222_v37  ;;  %v9548_v44 = vshrl.u32 %v9490_v63, 16  ;;  %v17610_v54 = vrot.slane %v8229_v8, 5  ;;  %10868 = vmatpush.bf16.msra.mxu3 %v14141_v27  ;;  %v9537_v53 = vrot.slane %v9535_v3, 4  ;;  %v14125_v37 = vld [vmem:[%s18345_s2 + $0x1b0] sm:$0xff]  ;;  %v13160_v8 = vld [vmem:[%s14328_s9 + $0x1c] sm:$0xf] }
 0x39d   : > { %8173 = vmatmul.bf16.gmra.mxu2 %v8073_v35  ;;  %v9533_v5 = vsel %vm14379_vm5, %v9528_v7, %v9532_v1  ;;  %v13158_v35 = vld [vmem:[%s14328_s9 + $0x14] sm:$0x1]  ;;  %v17613_v34 = vrot.slane %v9544_v32, 5  ;;  %v9540_v41 = vrot.slane %v9538_v16, 5  ;;  %10242 = vmatpush.bf16.msra.mxu1 %v14125_v37  ;;  %v8253_v27 = vshll.u32 %v13160_v8, 16  ;;  %v14140_v37 = vld [vmem:[%s18345_s2 + $0x228] sm:$0xff] }
 0x39e   : > { %8901 = vmatmul.bf16.gmra.mxu3 %v8801_v26  ;;  %v9719_v55 = vunpack.c.l.b16 %v9533_v5  ;;  %v14195_v26 = vld [vmem:[#allocation2 + $0x70] sm:$0xf]  ;;  %v9550_v49 = vrot.slane %v9548_v44, 4  ;;  %v8227_v7 = vrot.slane %v8226_v59, 4  ;;  %v8239_v1 = vshll.u32 %v13158_v35, 16 }
 0x39f   : > { %v9085_v29 = vrot.slane %v14195_v26, 5  ;;  %v9541_v5 = vor.u32 %v9540_v41, %v9537_v53 }
 0x3a0   : > { %v7101_v58 = vpop.f32.mrf.mxu2  ;;  %v6531_v14 = vpop.f32.mrf.mxu0  ;;  %v8232_v24 = vsel %vm14379_vm5, %v8227_v7, %v17610_v54  ;;  %v8241_v16 = vrot.slane %v8239_v1, 5  ;;  %10869 = vmatpush.bf16.msra.mxu3 %v14140_v37 }
 0x3a1   : > { %v7351_v21 = vpop.f32.mrf.mxu3  ;;  %v7120_v57 = vadd.f32 %v7101_v58, %v6742_v13  ;;  %v6725_v11 = vpop.f32.mrf.mxu1  ;;  %v6549_v40 = vadd.f32 %v6531_v14, %v17251_v60  ;;  %v9523_v60 = vsel %vm14379_vm5, %v9518_v38, %v17582_v51  ;;  %v9491_v13 = vld [vmem:[#allocation2 + $0x80] sm:$0x1]  ;;  %v8236_v58 = vor.u32 %v8235_v28, %v17610_v54 }
 0x3a2   : > { %v9718_v42 = vunpack.c.l.b16 %v9523_v60  ;;  %v9087_v2 = vrot.slane %v9085_v29, 4  ;;  %v9554_v12 = vshll.u32 %v9491_v13, 16  ;;  %v9088_v60 = vrot.slane %v14196_v19, 5 }
 0x3a3   : > { %v17594_v62 = vadd.f32 %v7351_v21, %v7120_v57  ;;  %v6743_v46 = vadd.f32 %v6725_v11, %v6549_v40  ;;  %v9053_v21 = vld [vmem:[#allocation2 + $0x6c] sm:$0xe]  ;;  %v9551_v40 = vor.u32 %v9550_v49, %v17613_v34  ;;  %v17629_v63 = vrot.slane %v8236_v58, 4 }
 0x3a4   : > { %v9734_v39 = vpack.c.b16 %v9719_v55, %v9718_v42  ;;  %v14079_v11 = vld [vmem:[#allocation2 + $0x6c] sm:$0xff]  ;;  %v13293_v38 = vrot.slane %v9053_v21, 9  ;;  %v9089_v44 = vsel %vm14369_vm4, %v9087_v2, %v9088_v60  ;;  %v9556_v4 = vrot.slane %v9554_v12, 5  ;;  %v9492_v21 = vld [vmem:[#allocation2 + $0x84] sm:$0xf] }
 0x3a5   : > { %v9552_v55 = vrot.slane %v9551_v40, 4  ;;  %v8257_v54 = vshrl.u32 %v13160_v8, 16  ;;  %v9542_v26 = vrot.slane %v9541_v5, 4  ;;  %v9151_v7 = vunpack.c.l.b16 %v9089_v44  ;;  %v14108_v40 = vld [vmem:[%s18345_s2 + $0x168] sm:$0xff] }
 0x3a6   : > { %v9086_v32 = vsel %vm14369_vm4, %v13293_v38, %v9085_v29  ;;  %10049 = vmatpush.bf16.msra.mxu0 %v14108_v40 }
 0x3a7   : > { %v9547_v53 = vsel %vm14379_vm5, %v9542_v26, %v17613_v34  ;;  %v9557_v41 = vsel %vm14379_vm5, %v9552_v55, %v9556_v4  ;;  %v8259_v58 = vrot.slane %v8257_v54, 4 }
 0x3a8   : > { %v7103_v20 = vpop.f32.mrf.mxu2  ;;  %v7511_v23 = vpop.f32.mrf.mxu0  ;;  %v9720_v2 = vunpack.c.l.b16 %v9547_v53  ;;  %v9721_v12 = vunpack.c.l.b16 %v9557_v41  ;;  %v14124_v41 = vld [vmem:[%s18345_s2 + $0x1a8] sm:$0xff] }
 0x3a9   : > { %v7353_v51 = vpop.f32.mrf.mxu3  ;;  %v7121_v56 = vadd.f32 %v7103_v20, %v6743_v46  ;;  %v7889_v0 = vpop.f32.mrf.mxu1  ;;  %v7551_v14 = vadd.f32 %v7511_v23, %v17292_v9  ;;  %v8244_v46 = vshrl.u32 %v13159_v43, 16  ;;  %v8247_v9 = vshll.u32 %v13159_v43, 16  ;;  %v13161_v23 = vld [vmem:[%s14328_s9 + $0x20] sm:$0x1]  ;;  %v9493_v43 = vld [vmem:[#allocation2 + $0x88] sm:$0xf]  ;;  %10243 = vmatpush.bf16.msra.mxu1 %v14124_v41 }
 0x3aa   : > { %v8263_v1 = vshll.u32 %v13161_v23, 16  ;;  %v9568_v38 = vshll.u32 %v9493_v43, 16  ;;  %v9572_v5 = vshrl.u32 %v9493_v43, 16  ;;  %v14080_v23 = vld [vmem:[#allocation2 + $0x78] sm:$0xff] }
 0x3ab   : > { %v17617_v57 = vadd.f32 %v7353_v51, %v7121_v56  ;;  %9011 = vmatmul.bf16.vlgmr.msrb.gmra.mxu0 %v14047_v36  ;;  %v7929_v3 = vadd.f32 %v7889_v0, %v7551_v14  ;;  %v17645_v51 = vld [vmem:[%s18349_s6] ss:$0 sm:$0xff]  ;;  %v8246_v29 = vrot.slane %v8244_v46, 4  ;;  %v8249_v49 = vrot.slane %v8247_v9, 5 }
 0x3ac   : > { %9236 = vmatmul.bf16.vlgmr.msrb.gmra.mxu1 %v17435_v18  ;;  %v17634_v18 = vld [vmem:[%s18348_s5] ss:$0 sm:$0xff]  ;;  %v8465_v56 = vunpack.c.l.bf16 %v8232_v24  ;;  %v8242_v36 = vsel %vm14379_vm5, %v17629_v63, %v8241_v16  ;;  %v9559_v9 = vshrl.u32 %v9492_v21, 16  ;;  %v9562_v24 = vshll.u32 %v9492_v21, 16 }
 0x3ad   : > { %9429 = vmatmul.bf16.vlgmr.msrb.gmra.mxu2 %v14079_v11  ;;  %v8250_v34 = vor.u32 %v8249_v49, %v8246_v29  ;;  %v17663_v11 = vrot.slane %v8253_v27, 5  ;;  %v9574_v55 = vrot.slane %v9572_v5, 4  ;;  %v8466_v54 = vunpack.c.l.bf16 %v8242_v36  ;;  %v13162_v29 = vld [vmem:[%s14328_s9 + $0x24] sm:$0xf] }
 0x3ae   : > { %9806 = vmatmul.bf16.vlgmr.msrb.gmra.mxu3 %v9734_v39  ;;  %v9150_v39 = vunpack.c.l.b16 %v9086_v32  ;;  %v17679_v32 = vrot.slane %v9568_v38, 5  ;;  %v9564_v53 = vrot.slane %v9562_v24, 5  ;;  %v8268_v43 = vshrl.u32 %v13162_v29, 16 }
 0x3af   : > { %v8260_v60 = vor.u32 %v8259_v58, %v17663_v11  ;;  %v8251_v26 = vrot.slane %v8250_v34, 4 }
 0x3b0   : > { %v8139_v59 = vpop.f32.mrf.mxu2  ;;  %v7513_v42 = vpop.f32.mrf.mxu0  ;;  %v9575_v58 = vor.u32 %v9574_v55, %v17679_v32 }
 0x3b1   : > { %v17638_v28 = vpop.f32.mrf.mxu3  ;;  %v8179_v20 = vadd.f32 %v8139_v59, %v7929_v3  ;;  %v7891_v35 = vpop.f32.mrf.mxu1  ;;  %v7552_v13 = vadd.f32 %v7513_v42, %v17315_v52  ;;  %v14132_v52 = vld [vmem:[%s18345_s2 + $0x1e8] sm:$0xff]  ;;  %v14197_v3 = vld [vmem:[#allocation2 + $0x7c] sm:$0xf]  ;;  %v9165_v42 = vpack.c.b16 %v9151_v7, %v9150_v39  ;;  %v8261_v36 = vrot.slane %v8260_v60, 4 }
 0x3b2   : > { %10620 = vmatpush.bf16.msra.mxu2 %v14132_v52  ;;  %v9092_v16 = vrot.slane %v14197_v3, 5  ;;  %v8265_v39 = vrot.slane %v8263_v1, 5  ;;  %v8271_v52 = vshll.u32 %v13162_v29, 16  ;;  %v8256_v1 = vsel %vm14379_vm5, %v8251_v26, %v17663_v11 }
 0x3b3   : > { %v8430_v0 = vmul.f32 %v17634_v18, %v8179_v20  ;;  %v7930_v46 = vadd.f32 %v7891_v35, %v7552_v13  ;;  %v14048_v20 = vld [vmem:[#allocation2 + $0x6c] sm:$0xff]  ;;  %v9735_v35 = vpack.c.b16 %v9721_v12, %v9720_v2  ;;  %v9561_v13 = vrot.slane %v9559_v9, 4 }
 0x3b4   : > { %v9094_v7 = vrot.slane %v9092_v16, 4  ;;  %v9576_v24 = vrot.slane %v9575_v58, 4  ;;  %v8273_v11 = vrot.slane %v8271_v52, 5  ;;  %v14139_v52 = vld [vmem:[%s18345_s2 + $0x220] sm:$0xff] }
 0x3b5   : > { %v8449_v14 = vadd.f32 %v17645_v51, %v8430_v0  ;;  %v9494_v0 = vld [vmem:[#allocation2 + $0x8c] sm:$0x1]  ;;  %v9565_v12 = vor.u32 %v9564_v53, %v9561_v13  ;;  %10870 = vmatpush.bf16.msra.mxu3 %v14139_v52  ;;  %v13166_v52 = vld [vmem:[%s14328_s9 + $0x34] sm:$0xf] }
 0x3b6   : > { %v9578_v40 = vshll.u32 %v9494_v0, 16  ;;  %v9495_v0 = vld [vmem:[#allocation2 + $0x90] sm:$0xf] }
 0x3b7   : > { %v8481_v8 = vadd.f32 %v8465_v56, %v8449_v14  ;;  %v14198_v14 = vld [vmem:[#allocation2 + $0x80] sm:$0x1]  ;;  %v9566_v29 = vrot.slane %v9565_v12, 4  ;;  %v9583_v58 = vshrl.u32 %v9495_v0, 16 }
 0x3b8   : > { %v8141_v63 = vpop.f32.mrf.mxu2  ;;  %v7516_v4 = vpop.f32.mrf.mxu0  ;;  %v9095_v34 = vrot.slane %v14198_v14, 5 }
 0x3b9   : > { %v17676_v19 = vpop.f32.mrf.mxu3  ;;  %v8497_v59 = vmax.f32 %v8481_v8, 0.0  ;;  %v8180_v44 = vadd.f32 %v8141_v63, %v7930_v46  ;;  %v7894_v27 = vpop.f32.mrf.mxu1  ;;  %v7553_v56 = vadd.f32 %v7516_v4, %v17343_v50  ;;  %v9054_v50 = vld [vmem:[#allocation2 + $0x78] sm:$0xe]  ;;  %v8266_v8 = vsel %vm14379_vm5, %v8261_v36, %v8265_v39  ;;  %v13164_v36 = vld [vmem:[%s14328_s9 + $0x2c] sm:$0x1] }
 0x3ba   : > { %v13294_v46 = vrot.slane %v9054_v50, 9  ;;  %v9096_v9 = vsel %vm14369_vm4, %v9094_v7, %v9095_v34  ;;  %v8467_v4 = vunpack.c.l.bf16 %v8256_v1  ;;  %v9496_v39 = vld [vmem:[#allocation2 + $0x94] sm:$0xf] }
 0x3bb   : > { %8513 = vst [vmem:[%s17674_s22] sm:$0xff] %v8497_v59  ;;  %v8431_v49 = vmul.f32 %v17634_v18, %v8180_v44  ;;  %9016 = vmatmul.bf16.gmra.mxu0 %v14048_v20  ;;  %v7931_v2 = vadd.f32 %v7894_v27, %v7553_v56  ;;  %v13163_v59 = vld [vmem:[%s14328_s9 + $0x28] sm:$0xf]  ;;  %v8270_v44 = vrot.slane %v8268_v43, 4  ;;  %v9153_v26 = vunpack.c.l.b16 %v9096_v9  ;;  %v14107_v43 = vld [vmem:[%s18345_s2 + $0x160] sm:$0xff]  ;;  %v9497_v9 = vld [vmem:[#allocation2 + $0x98] sm:$0x1] }
 0x3bc   : > { %9241 = vmatmul.bf16.gmra.mxu1 %v9165_v42  ;;  %v9093_v27 = vsel %vm14369_vm4, %v13294_v46, %v9092_v16  ;;  %v8281_v20 = vshrl.u32 %v13163_v59, 16  ;;  %v14131_v16 = vld [vmem:[%s18345_s2 + $0x1e0] sm:$0xff]  ;;  %v9592_v50 = vshll.u32 %v9496_v39, 16  ;;  %10050 = vmatpush.bf16.msra.mxu0 %v14107_v43 }
 0x3bd   : > { %v8450_v21 = vadd.f32 %v17645_v51, %v8431_v49  ;;  %9434 = vmatmul.bf16.gmra.mxu2 %v14080_v23  ;;  %v17705_v49 = vunpack.c.l.bf16 %v8266_v8  ;;  %v8277_v23 = vshll.u32 %v13163_v59, 16  ;;  %v9152_v53 = vunpack.c.l.b16 %v9093_v27  ;;  %v14199_v8 = vld [vmem:[#allocation2 + $0x88] sm:$0xf] }
 0x3be   : > { %9811 = vmatmul.bf16.gmra.mxu3 %v9735_v35  ;;  %v8274_v41 = vor.u32 %v8273_v11, %v8270_v44  ;;  %v8283_v7 = vrot.slane %v8281_v20, 4  ;;  %10621 = vmatpush.bf16.msra.mxu2 %v14131_v16  ;;  %v9099_v46 = vrot.slane %v14199_v8, 5  ;;  %v9596_v59 = vshrl.u32 %v9496_v39, 16  ;;  %v13165_v44 = vld [vmem:[%s14328_s9 + $0x30] sm:$0xf]  ;;  %v14049_v11 = vld [vmem:[#allocation2 + $0x78] sm:$0xff] }
 0x3bf   : > { %v8482_v37 = vadd.f32 %v8466_v54, %v8450_v21  ;;  %v9580_v54 = vrot.slane %v9578_v40, 5  ;;  %v9586_v21 = vshll.u32 %v9495_v0, 16  ;;  %v9166_v40 = vpack.c.b16 %v9153_v26, %v9152_v53  ;;  %v14123_v0 = vld [vmem:[%s18345_s2 + $0x1a0] sm:$0xff] }
 0x3c0   : > { %v8144_v38 = vpop.f32.mrf.mxu2  ;;  %v7518_v3 = vpop.f32.mrf.mxu0  ;;  %v17725_v12 = vrot.slane %v8277_v23, 5  ;;  %v9585_v20 = vrot.slane %v9583_v58, 4  ;;  %v9598_v23 = vrot.slane %v9596_v59, 4  ;;  %v9602_v53 = vshll.u32 %v9497_v9, 16  ;;  %10244 = vmatpush.bf16.msra.mxu1 %v14123_v0 }
 0x3c1   : > { %v17693_v5 = vpop.f32.mrf.mxu3  ;;  %v8498_v63 = vmax.f32 %v8482_v37, 0.0  ;;  %v8181_v60 = vadd.f32 %v8144_v38, %v7931_v2  ;;  %v7896_v55 = vpop.f32.mrf.mxu1  ;;  %v7554_v35 = vadd.f32 %v7518_v3, %v17362_v17  ;;  %v9581_v56 = vsel %vm14379_vm5, %v9576_v24, %v9580_v54  ;;  %v9055_v54 = vld [vmem:[#allocation2 + $0x84] sm:$0xe] }
 0x3c2   : > { %v9571_v17 = vsel %vm14379_vm5, %v9566_v29, %v17679_v32  ;;  %v9723_v32 = vunpack.c.l.b16 %v9581_v56  ;;  %v8287_v38 = vshll.u32 %v13164_v36, 16  ;;  %v8284_v27 = vor.u32 %v8283_v7, %v17725_v12  ;;  %v14081_v29 = vld [vmem:[#allocation2 + $0x84] sm:$0xff] }
 0x3c3   : > { %8514 = vst [vmem:[%s17674_s22 + $0x8] sm:$0xff] %v8498_v63  ;;  %v8432_v42 = vmul.f32 %v17634_v18, %v8181_v60  ;;  %v7932_v34 = vadd.f32 %v7896_v55, %v7554_v35  ;;  %v9722_v1 = vunpack.c.l.b16 %v9571_v17  ;;  %v17727_v55 = vrot.slane %v9592_v50, 5 }
 0x3c4   : > { %v8289_v16 = vrot.slane %v8287_v38, 5  ;;  %v8292_v17 = vshrl.u32 %v13165_v44, 16  ;;  %v13295_v36 = vrot.slane %v9055_v54, 9  ;;  %v8295_v39 = vshll.u32 %v13165_v44, 16 }
 0x3c5   : > { %v8451_v13 = vadd.f32 %v17645_v51, %v8432_v42  ;;  %v9588_v42 = vrot.slane %v9586_v21, 5  ;;  %v9736_v56 = vpack.c.b16 %v9723_v32, %v9722_v1  ;;  %v8285_v58 = vrot.slane %v8284_v27, 4  ;;  %v14200_v21 = vld [vmem:[#allocation2 + $0x8c] sm:$0x1] }
 0x3c6   : > { %v9102_v50 = vrot.slane %v14200_v21, 5  ;;  %v9604_v38 = vrot.slane %v9602_v53, 5  ;;  %v8294_v8 = vrot.slane %v8292_v17, 4  ;;  %v8305_v9 = vshrl.u32 %v13166_v52, 16  ;;  %v13167_v17 = vld [vmem:[%s14328_s9 + $0x38] sm:$0x1] }
 0x3c7   : > { %v8483_v14 = vadd.f32 %v8467_v4, %v8451_v13  ;;  %v8275_v4 = vrot.slane %v8274_v41, 4  ;;  %v9101_v13 = vrot.slane %v9099_v46, 4  ;;  %v9589_v43 = vor.u32 %v9588_v42, %v9585_v20 }
 0x3c8   : > { %v8146_v37 = vpop.f32.mrf.mxu2  ;;  %v7521_v60 = vpop.f32.mrf.mxu0  ;;  %v8290_v54 = vsel %vm14379_vm5, %v8285_v58, %v8289_v16  ;;  %v17767_v16 = vld [vmem:[#allocation2 + $0x94] sm:$0xf] }
 0x3c9   : > { %v17723_v2 = vpop.f32.mrf.mxu3  ;;  %v8499_v24 = vmax.f32 %v8483_v14, 0.0  ;;  %v8182_v63 = vadd.f32 %v8146_v37, %v7932_v34  ;;  %v7899_v3 = vpop.f32.mrf.mxu1  ;;  %v7555_v26 = vadd.f32 %v7521_v60, %v17388_v10  ;;  %v9599_v10 = vor.u32 %v9598_v23, %v17727_v55 }
 0x3ca   : > { %v8280_v7 = vsel %vm14379_vm5, %v8275_v4, %v17725_v12  ;;  %v9103_v12 = vsel %vm14369_vm4, %v9101_v13, %v9102_v50  ;;  %v9590_v44 = vrot.slane %v9589_v43, 4  ;;  %v8470_v50 = vunpack.c.l.bf16 %v8290_v54  ;;  %v14082_v54 = vld [vmem:[#allocation2 + $0x90] sm:$0xff] }
 0x3cb   : > { %8515 = vst [vmem:[%s17674_s22 + $0x10] sm:$0xff] %v8499_v24  ;;  %v8433_v35 = vmul.f32 %v17634_v18, %v8182_v63  ;;  %9021 = vmatmul.bf16.gmra.mxu0 %v14049_v11  ;;  %v7933_v34 = vadd.f32 %v7899_v3, %v7555_v26  ;;  %v9600_v32 = vrot.slane %v9599_v10, 4  ;;  %v8301_v3 = vshll.u32 %v13166_v52, 16 }
 0x3cc   : > { %9246 = vmatmul.bf16.gmra.mxu1 %v9166_v40  ;;  %v9100_v40 = vsel %vm14369_vm4, %v13295_v36, %v9099_v46  ;;  %v8469_v4 = vunpack.c.l.bf16 %v8280_v7  ;;  %v9155_v42 = vunpack.c.l.b16 %v9103_v12  ;;  %v8307_v26 = vrot.slane %v8305_v9, 4  ;;  %v14138_v7 = vld [vmem:[%s18345_s2 + $0x218] sm:$0xff] }
 0x3cd   : > { %v8452_v41 = vadd.f32 %v17645_v51, %v8433_v35  ;;  %9439 = vmatmul.bf16.gmra.mxu2 %v14081_v29  ;;  %v9605_v46 = vsel %vm14379_vm5, %v9600_v32, %v9604_v38  ;;  %v9154_v20 = vunpack.c.l.b16 %v9100_v40  ;;  %v9595_v35 = vsel %vm14379_vm5, %v9590_v44, %v17727_v55  ;;  %v9498_v29 = vld [vmem:[#allocation2 + $0x9c] sm:$0xf]  ;;  %10871 = vmatpush.bf16.msra.mxu3 %v14138_v7 }
 0x3ce   : > { %9816 = vmatmul.bf16.gmra.mxu3 %v9736_v56  ;;  %v9499_v56 = vld [vmem:[#allocation2 + $0xa0] sm:$0xf]  ;;  %v9725_v0 = vunpack.c.l.b16 %v9605_v46  ;;  %v17761_v53 = vrot.slane %v8301_v3, 5  ;;  %v9607_v36 = vshrl.u32 %v9498_v29, 16  ;;  %v9610_v43 = vshll.u32 %v9498_v29, 16 }
 0x3cf   : > { %v8484_v14 = vadd.f32 %v17705_v49, %v8452_v41  ;;  %v8297_v49 = vrot.slane %v8295_v39, 5  ;;  %v9106_v41 = vrot.slane %v17767_v16, 5  ;;  %v9616_v55 = vshll.u32 %v9499_v56, 16  ;;  %v14106_v39 = vld [vmem:[%s18345_s2 + $0x158] sm:$0xff]  ;;  %v14129_v16 = vld [vmem:[%s18345_s2 + $0x1d0] sm:$0xff] }
 0x3d0   : > { %v8149_v37 = vpop.f32.mrf.mxu2  ;;  %v7523_v60 = vpop.f32.mrf.mxu0  ;;  %v9620_v10 = vshrl.u32 %v9499_v56, 16  ;;  %v9724_v40 = vunpack.c.l.b16 %v9595_v35  ;;  %v8308_v32 = vor.u32 %v8307_v26, %v17761_v53  ;;  %10051 = vmatpush.bf16.msra.mxu0 %v14106_v39  ;;  %v9609_v46 = vrot.slane %v9607_v36, 4  ;;  %v14122_v35 = vld [vmem:[%s18345_s2 + $0x198] sm:$0xff] }
 0x3d1   : > { %v17746_v1 = vpop.f32.mrf.mxu3  ;;  %v8500_v24 = vmax.f32 %v8484_v14, 0.0  ;;  %v8183_v63 = vadd.f32 %v8149_v37, %v7933_v34  ;;  %v7901_v59 = vpop.f32.mrf.mxu1  ;;  %v7556_v27 = vadd.f32 %v7523_v60, %v17409_v30  ;;  %v8298_v13 = vor.u32 %v8297_v49, %v8294_v8  ;;  %v14130_v30 = vld [vmem:[%s18345_s2 + $0x1d8] sm:$0xff]  ;;  %10245 = vmatpush.bf16.msra.mxu1 %v14122_v35  ;;  %v9502_v35 = vld [vmem:[#allocation2 + $0xac] sm:$0xf] }
 0x3d2   : > { %10622 = vmatpush.bf16.msra.mxu2 %v14130_v30  ;;  %v9167_v34 = vpack.c.b16 %v9155_v42, %v9154_v20  ;;  %v8311_v37 = vshll.u32 %v13167_v17, 16  ;;  %v9622_v60 = vrot.slane %v9620_v10, 4  ;;  %v9737_v49 = vpack.c.b16 %v9725_v0, %v9724_v40  ;;  %v14202_v56 = vld [vmem:[#allocation2 + $0x98] sm:$0x1] }
 0x3d3   : > { %8516 = vst [vmem:[%s17674_s22 + $0x18] sm:$0xff] %v8500_v24  ;;  %v8434_v11 = vmul.f32 %v17634_v18, %v8183_v63  ;;  %v7934_v21 = vadd.f32 %v7901_v59, %v7556_v27  ;;  %v9500_v24 = vld [vmem:[#allocation2 + $0xa4] sm:$0x1]  ;;  %v17779_v63 = vrot.slane %v9616_v55, 5  ;;  %v8299_v3 = vrot.slane %v8298_v13, 4 }
 0x3d4   : > { %v14050_v59 = vld [vmem:[#allocation2 + $0x84] sm:$0xff]  ;;  %v9108_v44 = vrot.slane %v9106_v41, 4  ;;  %v9612_v20 = vrot.slane %v9610_v43, 5  ;;  %v8309_v26 = vrot.slane %v8308_v32, 4  ;;  %v8313_v29 = vrot.slane %v8311_v37, 5 }
 0x3d5   : > { %v8453_v23 = vadd.f32 %v17645_v51, %v8434_v11  ;;  %v13168_v11 = vld [vmem:[%s14328_s9 + $0x3c] sm:$0xf]  ;;  %v9623_v42 = vor.u32 %v9622_v60, %v17779_v63  ;;  %v9626_v0 = vshll.u32 %v9500_v24, 16  ;;  %v8304_v36 = vsel %vm14379_vm5, %v8299_v3, %v17761_v53 }
 0x3d6   : > { %v8316_v17 = vshrl.u32 %v13168_v11, 16  ;;  %v8319_v30 = vshll.u32 %v13168_v11, 16  ;;  %v9613_v7 = vor.u32 %v9612_v20, %v9609_v46  ;;  %10623 = vmatpush.bf16.msra.mxu2 %v14129_v16 }
 0x3d7   : > { %v8485_v58 = vadd.f32 %v8469_v4, %v8453_v23  ;;  %v9109_v23 = vrot.slane %v14202_v56, 5  ;;  %v9628_v40 = vrot.slane %v9626_v0, 5  ;;  %v14105_v0 = vld [vmem:[%s18345_s2 + $0x150] sm:$0xff] }
 0x3d8   : > { %v8151_v52 = vpop.f32.mrf.mxu2  ;;  %v7526_v8 = vpop.f32.mrf.mxu0  ;;  %v8321_v24 = vrot.slane %v8319_v30, 5  ;;  %10052 = vmatpush.bf16.msra.mxu0 %v14105_v0 }
 0x3d9   : > { %v17776_v14 = vpop.f32.mrf.mxu3  ;;  %v8501_v12 = vmax.f32 %v8485_v58, 0.0  ;;  %v8184_v38 = vadd.f32 %v8151_v52, %v7934_v21  ;;  %v7904_v9 = vpop.f32.mrf.mxu1  ;;  %v7557_v27 = vadd.f32 %v7526_v8, %v17440_v6  ;;  %v9056_v6 = vld [vmem:[#allocation2 + $0x90] sm:$0xe]  ;;  %v9110_v55 = vsel %vm14369_vm4, %v9108_v44, %v9109_v23 }
 0x3da   : > { %v9624_v58 = vrot.slane %v9623_v42, 4  ;;  %v8314_v52 = vsel %vm14379_vm5, %v8309_v26, %v8313_v29  ;;  %v8318_v8 = vrot.slane %v8316_v17, 4  ;;  %v9157_v60 = vunpack.c.l.b16 %v9110_v55  ;;  %v13170_v42 = vld [vmem:[%s14328_s9 + $0x44] sm:$0x1] }
 0x3db   : > { %8517 = vst [vmem:[%s17674_s22 + $0x20] sm:$0xff] %v8501_v12  ;;  %v8435_v4 = vmul.f32 %v17634_v18, %v8184_v38  ;;  %9026 = vmatmul.bf16.gmra.mxu0 %v14050_v59  ;;  %v7935_v39 = vadd.f32 %v7904_v9, %v7557_v27  ;;  %v13169_v38 = vld [vmem:[%s14328_s9 + $0x40] sm:$0xf]  ;;  %v9614_v44 = vrot.slane %v9613_v7, 4  ;;  %v17811_v11 = vunpack.c.l.bf16 %v8314_v52  ;;  %v9501_v27 = vld [vmem:[#allocation2 + $0xa8] sm:$0xf] }
 0x3dc   : > { %9251 = vmatmul.bf16.gmra.mxu1 %v9167_v34  ;;  %v13296_v34 = vrot.slane %v9056_v6, 9  ;;  %v8329_v59 = vshrl.u32 %v13169_v38, 16  ;;  %v9629_v46 = vsel %vm14379_vm5, %v9624_v58, %v9628_v40  ;;  %v9631_v56 = vshrl.u32 %v9501_v27, 16  ;;  %v14203_v58 = vld [vmem:[#allocation2 + $0xa0] sm:$0xf] }
 0x3dd   : > { %v8454_v13 = vadd.f32 %v17645_v51, %v8435_v4  ;;  %9444 = vmatmul.bf16.gmra.mxu2 %v14082_v54  ;;  %v8325_v4 = vshll.u32 %v13169_v38, 16  ;;  %v9619_v20 = vsel %vm14379_vm5, %v9614_v44, %v17779_v63  ;;  %v9727_v26 = vunpack.c.l.b16 %v9629_v46  ;;  %v14051_v38 = vld [vmem:[#allocation2 + $0x90] sm:$0xff]  ;;  %v9057_v44 = vld [vmem:[#allocation2 + $0x9c] sm:$0xe] }
 0x3de   : > { %9821 = vmatmul.bf16.gmra.mxu3 %v9737_v49  ;;  %v9107_v9 = vsel %vm14369_vm4, %v13296_v34, %v9106_v41  ;;  %v8331_v29 = vrot.slane %v8329_v59, 4  ;;  %v9640_v23 = vshll.u32 %v9502_v35, 16  ;;  %v9634_v63 = vshll.u32 %v9501_v27, 16  ;;  %v13171_v59 = vld [vmem:[%s14328_s9 + $0x48] sm:$0xf]  ;;  %v14121_v27 = vld [vmem:[%s18345_s2 + $0x190] sm:$0xff] }
 0x3df   : > { %v8486_v10 = vadd.f32 %v8470_v50, %v8454_v13  ;;  %v8471_v50 = vunpack.c.l.bf16 %v8304_v36  ;;  %v9156_v54 = vunpack.c.l.b16 %v9107_v9  ;;  %v14137_v13 = vld [vmem:[%s18345_s2 + $0x210] sm:$0xff]  ;;  %v8335_v7 = vshll.u32 %v13170_v42, 16  ;;  %10246 = vmatpush.bf16.msra.mxu1 %v14121_v27 }
 0x3e0   : > { %v8154_v21 = vpop.f32.mrf.mxu2  ;;  %v7528_v37 = vpop.f32.mrf.mxu0  ;;  %10872 = vmatpush.bf16.msra.mxu3 %v14137_v13  ;;  %v9636_v46 = vrot.slane %v9634_v63, 5  ;;  %v8340_v42 = vshrl.u32 %v13171_v59, 16 }
 0x3e1   : > { %v17797_v43 = vpop.f32.mrf.mxu3  ;;  %v8502_v32 = vmax.f32 %v8486_v10, 0.0  ;;  %v8185_v53 = vadd.f32 %v8154_v21, %v7935_v39  ;;  %v7906_v12 = vpop.f32.mrf.mxu1  ;;  %v7558_v3 = vadd.f32 %v7528_v37, %v17463_v33  ;;  %v8322_v33 = vor.u32 %v8321_v24, %v8318_v8  ;;  %v14083_v8 = vld [vmem:[#allocation2 + $0x9c] sm:$0xff] }
 0x3e2   : > { %v9168_v30 = vpack.c.b16 %v9157_v60, %v9156_v54  ;;  %v9726_v10 = vunpack.c.l.b16 %v9619_v20  ;;  %v8327_v39 = vrot.slane %v8325_v4, 5  ;;  %v9113_v21 = vrot.slane %v14203_v58, 5 }
 0x3e3   : > { %8518 = vst [vmem:[%s17674_s22 + $0x28] sm:$0xff] %v8502_v32  ;;  %v8436_v49 = vmul.f32 %v17634_v18, %v8185_v53  ;;  %v7936_v17 = vadd.f32 %v7906_v12, %v7558_v3  ;;  %v9503_v53 = vld [vmem:[#allocation2 + $0xb0] sm:$0x1]  ;;  %v17829_v37 = vrot.slane %v9640_v23, 5  ;;  %v9644_v12 = vshrl.u32 %v9502_v35, 16 }
 0x3e4   : > { %v9738_v24 = vpack.c.b16 %v9727_v26, %v9726_v10  ;;  %v8332_v9 = vor.u32 %v8331_v29, %v8327_v39  ;;  %v9633_v60 = vrot.slane %v9631_v56, 4  ;;  %v8337_v16 = vrot.slane %v8335_v7, 5  ;;  %v14204_v56 = vld [vmem:[#allocation2 + $0xa4] sm:$0x1] }
 0x3e5   : > { %v8455_v41 = vadd.f32 %v17645_v51, %v8436_v49  ;;  %v9646_v4 = vrot.slane %v9644_v12, 4  ;;  %v9650_v54 = vshll.u32 %v9503_v53, 16  ;;  %v13297_v29 = vrot.slane %v9057_v44, 9 }
 0x3e6   : > { %v8333_v26 = vrot.slane %v8332_v9, 4  ;;  %v9116_v23 = vrot.slane %v14204_v56, 5 }
 0x3e7   : > { %v8487_v6 = vadd.f32 %v8471_v50, %v8455_v41  ;;  %v8323_v50 = vrot.slane %v8322_v33, 4  ;;  %v9115_v41 = vrot.slane %v9113_v21, 4  ;;  %v9647_v33 = vor.u32 %v9646_v4, %v17829_v37 }
 0x3e8   : > { %v8156_v36 = vpop.f32.mrf.mxu2  ;;  %v7531_v40 = vpop.f32.mrf.mxu0 }
 0x3e9   : > { %v17827_v55 = vpop.f32.mrf.mxu3  ;;  %v8503_v52 = vmax.f32 %v8487_v6, 0.0  ;;  %v8186_v34 = vadd.f32 %v8156_v36, %v7936_v17  ;;  %v7909_v32 = vpop.f32.mrf.mxu1  ;;  %v7559_v3 = vadd.f32 %v7531_v40, %v17486_v25  ;;  %v8343_v25 = vshll.u32 %v13171_v59, 16  ;;  %v13172_v40 = vld [vmem:[%s14328_s9 + $0x4c] sm:$0xf] }
 0x3ea   : > { %v8328_v35 = vsel %vm14379_vm5, %v8323_v50, %v8327_v39  ;;  %v9637_v6 = vor.u32 %v9636_v46, %v9633_v60  ;;  %v9648_v17 = vrot.slane %v9647_v33, 4  ;;  %v9114_v36 = vsel %vm14369_vm4, %v13297_v29, %v9113_v21 }
 0x3eb   : > { %8519 = vst [vmem:[%s17674_s22 + $0x30] sm:$0xff] %v8503_v52  ;;  %v8437_v49 = vmul.f32 %v17634_v18, %v8186_v34  ;;  %9031 = vmatmul.bf16.gmra.mxu0 %v14051_v38  ;;  %v7937_v13 = vadd.f32 %v7909_v32, %v7559_v3  ;;  %v9117_v10 = vsel %vm14369_vm4, %v9115_v41, %v9116_v23  ;;  %v9652_v39 = vrot.slane %v9650_v54, 5  ;;  %v9505_v3 = vld [vmem:[#allocation2 + $0xb8] sm:$0xf] }
 0x3ec   : > { %9256 = vmatmul.bf16.gmra.mxu1 %v9168_v30  ;;  %v8345_v32 = vrot.slane %v8343_v25, 5  ;;  %v8473_v53 = vunpack.c.l.bf16 %v8328_v35  ;;  %v9158_v50 = vunpack.c.l.b16 %v9114_v36  ;;  %v9159_v9 = vunpack.c.l.b16 %v9117_v10 }
 0x3ed   : > { %v8456_v20 = vadd.f32 %v17645_v51, %v8437_v49  ;;  %9449 = vmatmul.bf16.gmra.mxu2 %v14083_v8  ;;  %v9653_v12 = vsel %vm14379_vm5, %v9648_v17, %v9652_v39  ;;  %v8338_v8 = vsel %vm14379_vm5, %v8333_v26, %v8337_v16  ;;  %v8349_v60 = vshll.u32 %v13172_v40, 16  ;;  %v9504_v49 = vld [vmem:[#allocation2 + $0xb4] sm:$0xf]  ;;  %v17864_v16 = vld [vmem:[#allocation2 + $0xac] sm:$0xf] }
 0x3ee   : > { %9826 = vmatmul.bf16.gmra.mxu3 %v9738_v24  ;;  %v9638_v24 = vrot.slane %v9637_v6, 4  ;;  %v8353_v59 = vshrl.u32 %v13172_v40, 16  ;;  %v9729_v4 = vunpack.c.l.b16 %v9653_v12  ;;  %v9120_v41 = vrot.slane %v17864_v16, 5 }
 0x3ef   : > { %v8488_v0 = vadd.f32 %v17811_v11, %v8456_v20  ;;  %v8342_v11 = vrot.slane %v8340_v42, 4  ;;  %v9655_v54 = vshrl.u32 %v9504_v49, 16  ;;  %v9664_v20 = vshll.u32 %v9505_v3, 16  ;;  %v14104_v42 = vld [vmem:[%s18345_s2 + $0x148] sm:$0xff] }
 0x3f0   : > { %v8159_v30 = vpop.f32.mrf.mxu2  ;;  %v7533_v52 = vpop.f32.mrf.mxu0  ;;  %v9643_v46 = vsel %vm14379_vm5, %v9638_v24, %v17829_v37  ;;  %v9668_v33 = vshrl.u32 %v9505_v3, 16  ;;  %v14136_v37 = vld [vmem:[%s18345_s2 + $0x208] sm:$0xff]  ;;  %v8474_v26 = vunpack.c.l.bf16 %v8338_v8  ;;  %v9658_v29 = vshll.u32 %v9504_v49, 16  ;;  %10053 = vmatpush.bf16.msra.mxu0 %v14104_v42  ;;  %v14206_v3 = vld [vmem:[#allocation2 + $0xb0] sm:$0x1] }
 0x3f1   : > { %v17843_v63 = vpop.f32.mrf.mxu3  ;;  %v8504_v7 = vmax.f32 %v8488_v0, 0.0  ;;  %v8187_v58 = vadd.f32 %v8159_v30, %v7937_v13  ;;  %v7911_v34 = vpop.f32.mrf.mxu1  ;;  %v7560_v21 = vadd.f32 %v7533_v52, %v17508_v31  ;;  %v8346_v27 = vor.u32 %v8345_v32, %v8342_v11  ;;  %v14128_v31 = vld [vmem:[%s18345_s2 + $0x1c8] sm:$0xff]  ;;  %10873 = vmatpush.bf16.msra.mxu3 %v14136_v37 }
 0x3f2   : > { %10624 = vmatpush.bf16.msra.mxu2 %v14128_v31  ;;  %v9169_v0 = vpack.c.b16 %v9159_v9, %v9158_v50  ;;  %v9728_v13 = vunpack.c.l.b16 %v9643_v46  ;;  %v8351_v6 = vrot.slane %v8349_v60, 5  ;;  %v8355_v17 = vrot.slane %v8353_v59, 4  ;;  %v14084_v8 = vld [vmem:[#allocation2 + $0xa8] sm:$0xff]  ;;  %v13174_v9 = vld [vmem:[%s14328_s9 + $0x54] sm:$0xf] }
 0x3f3   : > { %8520 = vst [vmem:[%s17674_s22 + $0x38] sm:$0xff] %v8504_v7  ;;  %v8438_v38 = vmul.f32 %v17634_v18, %v8187_v58  ;;  %v7938_v35 = vadd.f32 %v7911_v34, %v7560_v21  ;;  %v13173_v7 = vld [vmem:[%s14328_s9 + $0x50] sm:$0x1]  ;;  %v17876_v58 = vrot.slane %v9664_v20, 5  ;;  %v9670_v52 = vrot.slane %v9668_v33, 4  ;;  %v14052_v34 = vld [vmem:[#allocation2 + $0x9c] sm:$0xff] }
 0x3f4   : > { %v9739_v40 = vpack.c.b16 %v9729_v4, %v9728_v13  ;;  %v8347_v11 = vrot.slane %v8346_v27, 4  ;;  %v9122_v32 = vrot.slane %v9120_v41, 4  ;;  %v9657_v12 = vrot.slane %v9655_v54, 4  ;;  %v14120_v60 = vld [vmem:[%s18345_s2 + $0x188] sm:$0xff] }
 0x3f5   : > { %v8457_v44 = vadd.f32 %v17645_v51, %v8438_v38  ;;  %v9660_v24 = vrot.slane %v9658_v29, 5  ;;  %v9671_v50 = vor.u32 %v9670_v52, %v17876_v58  ;;  %v8356_v59 = vor.u32 %v8355_v17, %v8351_v6  ;;  %10247 = vmatpush.bf16.msra.mxu1 %v14120_v60 }
 0x3f6   : > { %v8359_v49 = vshll.u32 %v13173_v7, 16  ;;  %v8352_v27 = vsel %vm14379_vm5, %v8347_v11, %v8351_v6  ;;  %v8364_v54 = vshrl.u32 %v13174_v9, 16  ;;  %v8367_v20 = vshll.u32 %v13174_v9, 16 }
 0x3f7   : > { %v8489_v25 = vadd.f32 %v8473_v53, %v8457_v44  ;;  %v9506_v53 = vld [vmem:[#allocation2 + $0xbc] sm:$0x1]  ;;  %v9123_v44 = vrot.slane %v14206_v3, 5  ;;  %v9661_v37 = vor.u32 %v9660_v24, %v9657_v12  ;;  %v13175_v12 = vld [vmem:[%s14328_s9 + $0x58] sm:$0xf] }
 0x3f8   : > { %v8161_v56 = vpop.f32.mrf.mxu2  ;;  %v7536_v10 = vpop.f32.mrf.mxu0  ;;  %v9674_v4 = vshll.u32 %v9506_v53, 16  ;;  %v8366_v52 = vrot.slane %v8364_v54, 4  ;;  %v8377_v16 = vshrl.u32 %v13175_v12, 16  ;;  %v9508_v24 = vld [vmem:[#allocation2 + $0xc4] sm:$0xf]  ;;  %v8373_v60 = vshll.u32 %v13175_v12, 16 }
 0x3f9   : > { %v17873_v23 = vpop.f32.mrf.mxu3  ;;  %v8505_v30 = vmax.f32 %v8489_v25, 0.0  ;;  %v8188_v36 = vadd.f32 %v8161_v56, %v7938_v35  ;;  %v7914_v39 = vpop.f32.mrf.mxu1  ;;  %v7561_v21 = vadd.f32 %v7536_v10, %v17532_v61  ;;  %v9058_v61 = vld [vmem:[#allocation2 + $0xa8] sm:$0xe]  ;;  %v9124_v31 = vsel %vm14369_vm4, %v9122_v32, %v9123_v44 }
 0x3fa   : > { %v9672_v25 = vrot.slane %v9671_v50, 4  ;;  %v8357_v56 = vrot.slane %v8356_v59, 4  ;;  %v13298_v13 = vrot.slane %v9058_v61, 9  ;;  %v9676_v7 = vrot.slane %v9674_v4, 5 }
 0x3fb   : > { %8521 = vst [vmem:[%s17674_s22 + $0x40] sm:$0xff] %v8505_v30  ;;  %v8439_v38 = vmul.f32 %v17634_v18, %v8188_v36  ;;  %9036 = vmatmul.bf16.gmra.mxu0 %v14052_v34  ;;  %v7939_v42 = vadd.f32 %v7914_v39, %v7561_v21  ;;  %v8475_v30 = vunpack.c.l.bf16 %v8352_v27  ;;  %v9161_v39 = vunpack.c.l.b16 %v9124_v31 }
 0x3fc   : > { %9261 = vmatmul.bf16.gmra.mxu1 %v9169_v0  ;;  %v8361_v0 = vrot.slane %v8359_v49, 5  ;;  %v8369_v34 = vrot.slane %v8367_v20, 5  ;;  %v9662_v32 = vrot.slane %v9661_v37, 4  ;;  %v9677_v53 = vsel %vm14379_vm5, %v9672_v25, %v9676_v7  ;;  %v14103_v49 = vld [vmem:[%s18345_s2 + $0x140] sm:$0xff] }
 0x3fd   : > { %v8458_v46 = vadd.f32 %v17645_v51, %v8439_v38  ;;  %9454 = vmatmul.bf16.gmra.mxu2 %v14084_v8  ;;  %v9731_v50 = vunpack.c.l.b16 %v9677_v53  ;;  %v9688_v59 = vshll.u32 %v9508_v24, 16  ;;  %v8379_v54 = vrot.slane %v8377_v16, 4  ;;  %10054 = vmatpush.bf16.msra.mxu0 %v14103_v49  ;;  %v14119_v53 = vld [vmem:[%s18345_s2 + $0x180] sm:$0xff] }
 0x3fe   : > { %9831 = vmatmul.bf16.gmra.mxu3 %v9739_v40  ;;  %v8362_v38 = vsel %vm14379_vm5, %v8357_v56, %v8361_v0  ;;  %v8370_v9 = vor.u32 %v8369_v34, %v8366_v52  ;;  %v9692_v0 = vshrl.u32 %v9508_v24, 16  ;;  %v14208_v34 = vld [vmem:[#allocation2 + $0xb8] sm:$0xf]  ;;  %v17941_v16 = vld [vmem:[%s18349_s6] ss:$0 sm:$0xff]  ;;  %10248 = vmatpush.bf16.msra.mxu1 %v14119_v53 }
 0x3ff   : > { %v8490_v33 = vadd.f32 %v8474_v26, %v8458_v46  ;;  %v9121_v26 = vsel %vm14369_vm4, %v13298_v13, %v9120_v41  ;;  %v14127_v41 = vld [vmem:[%s18345_s2 + $0x1c0] sm:$0xff]  ;;  %v8476_v46 = vunpack.c.l.bf16 %v8362_v38  ;;  %v17923_v56 = vrot.slane %v9688_v59, 5  ;;  %v17925_v13 = vld [vmem:[#allocation2 + $0x78] sm:$0xf]  ;;  %v9059_v59 = vld [vmem:[#allocation2 + $0xb4] sm:$0xe] }
 0x400   : > { %v8164_v35 = vpop.f32.mrf.mxu2  ;;  %v7538_v36 = vpop.f32.mrf.mxu0  ;;  %v9160_v8 = vunpack.c.l.b16 %v9121_v26  ;;  %10625 = vmatpush.bf16.msra.mxu2 %v14127_v41  ;;  %v17931_v26 = vld [vmem:[%s18348_s5] ss:$0 sm:$0xff]  ;;  %v10331_v24 = vshrl.u32 %v17925_v13, 16 }
 0x401   : > { %v17893_v29 = vpop.f32.mrf.mxu3  ;;  %v8506_v17 = vmax.f32 %v8490_v33, 0.0  ;;  %v8189_v6 = vadd.f32 %v8164_v35, %v7939_v42  ;;  %v7916_v10 = vpop.f32.mrf.mxu1  ;;  %v7562_v11 = vadd.f32 %v7538_v36, %v17553_v47  ;;  %v9667_v47 = vsel %vm14379_vm5, %v9662_v32, %v17876_v58  ;;  %v13176_v58 = vld [vmem:[%s14328_s9 + $0x5c] sm:$0x1] }
 0x402   : > { %v9170_v61 = vpack.c.b16 %v9161_v39, %v9160_v8  ;;  %v9730_v31 = vunpack.c.l.b16 %v9667_v47  ;;  %v8371_v36 = vrot.slane %v8370_v9, 4  ;;  %v8383_v7 = vshll.u32 %v13176_v58, 16  ;;  %v13177_v8 = vld [vmem:[%s14328_s9 + $0x60] sm:$0xf] }
 0x403   : > { %8522 = vst [vmem:[%s17674_s22 + $0x48] sm:$0xff] %v8506_v17  ;;  %v8440_v40 = vmul.f32 %v17634_v18, %v8189_v6  ;;  %v9507_v18 = vld [vmem:[#allocation2 + $0xc0] sm:$0xf]  ;;  %v7940_v44 = vadd.f32 %v7916_v10, %v7562_v11  ;;  %v14053_v17 = vld [vmem:[#allocation2 + $0xa8] sm:$0xff]  ;;  %v14085_v6 = vld [vmem:[#allocation2 + $0xb4] sm:$0xff]  ;;  %v8375_v10 = vrot.slane %v8373_v60, 5 }
 0x404   : > { %v9679_v20 = vshrl.u32 %v9507_v18, 16  ;;  %v9682_v33 = vshll.u32 %v9507_v18, 16  ;;  %v9509_v11 = vld [vmem:[#allocation2 + $0xc8] sm:$0x1]  ;;  %v9694_v32 = vrot.slane %v9692_v0, 4  ;;  %v8385_v47 = vrot.slane %v8383_v7, 5 }
 0x405   : > { %v8459_v21 = vadd.f32 %v17645_v51, %v8440_v40  ;;  %v14135_v51 = vld [vmem:[%s18345_s2 + $0x200] sm:$0xff]  ;;  %v9127_v40 = vrot.slane %v14208_v34, 5  ;;  %v8380_v41 = vor.u32 %v8379_v54, %v8375_v10  ;;  %v9698_v18 = vshll.u32 %v9509_v11, 16 }
 0x406   : > { %10874 = vmatpush.bf16.msra.mxu3 %v14135_v51  ;;  %v9681_v12 = vrot.slane %v9679_v20, 4  ;;  %v9684_v38 = vrot.slane %v9682_v33, 5  ;;  %v8376_v60 = vsel %vm14379_vm5, %v8371_v36, %v8375_v10  ;;  %v17949_v51 = vld [vmem:[#allocation2 + $0x7c] sm:$0xf]  ;;  %v13299_v0 = vrot.slane %v9059_v59, 9 }
 0x407   : > { %v8491_v3 = vadd.f32 %v8475_v30, %v8459_v21  ;;  %v9740_v30 = vpack.c.b16 %v9731_v50, %v9730_v31  ;;  %v9695_v21 = vor.u32 %v9694_v32, %v17923_v56  ;;  %v9129_v49 = vrot.slane %v9127_v40, 4 }
 0x408   : > { %v8166_v4 = vpop.f32.mrf.mxu2  ;;  %v7541_v25 = vpop.f32.mrf.mxu0  ;;  %v8391_v31 = vshll.u32 %v13177_v8, 16  ;;  %v10344_v7 = vshrl.u32 %v17949_v51, 16 }
 0x409   : > { %v17921_v27 = vpop.f32.mrf.mxu3  ;;  %v8507_v42 = vmax.f32 %v8491_v3, 0.0  ;;  %v8190_v37 = vadd.f32 %v8166_v4, %v7940_v44  ;;  %v7919_v35 = vpop.f32.mrf.mxu1  ;;  %v7563_v52 = vadd.f32 %v7541_v25, %v17570_v15  ;;  %v9696_v58 = vrot.slane %v9695_v21, 4 }
 0x40a   : > { %v8388_v4 = vshrl.u32 %v13177_v8, 16  ;;  %v8393_v11 = vrot.slane %v8391_v31, 5 }
 0x40b   : > { %8523 = vst [vmem:[%s17674_s22 + $0x50] sm:$0xff] %v8507_v42  ;;  %v8441_v39 = vmul.f32 %v17931_v26, %v8190_v37  ;;  %9041 = vmatmul.bf16.gmra.mxu0 %v14053_v17  ;;  %v7941_v9 = vadd.f32 %v7919_v35, %v7563_v52  ;;  %v8381_v42 = vrot.slane %v8380_v41, 4  ;;  %v14210_v37 = vld [vmem:[#allocation2 + $0xbc] sm:$0x1]  ;;  %v8477_v35 = vunpack.c.l.bf16 %v8376_v60 }
 0x40c   : > { %9266 = vmatmul.bf16.gmra.mxu1 %v9170_v61  ;;  %v9685_v61 = vor.u32 %v9684_v38, %v9681_v12  ;;  %v9130_v25 = vrot.slane %v14210_v37, 5  ;;  %v9700_v17 = vrot.slane %v9698_v18, 5  ;;  %v8390_v34 = vrot.slane %v8388_v4, 4 }
 0x40d   : > { %v8460_v15 = vadd.f32 %v17941_v16, %v8441_v39  ;;  %9459 = vmatmul.bf16.gmra.mxu2 %v14085_v6  ;;  %v10340_v6 = vshll.u32 %v17949_v51, 16  ;;  %v8386_v53 = vsel %vm14379_vm5, %v8381_v42, %v8385_v47  ;;  %v9128_v12 = vsel %vm14369_vm4, %v13299_v0, %v9127_v40 }
 0x40e   : > { %9836 = vmatmul.bf16.gmra.mxu3 %v9740_v30  ;;  %v9131_v10 = vsel %vm14369_vm4, %v9129_v49, %v9130_v25  ;;  %v9686_v39 = vrot.slane %v9685_v61, 4  ;;  %v9701_v52 = vsel %vm14379_vm5, %v9696_v58, %v9700_v17  ;;  %v10334_v38 = vshll.u32 %v17925_v13, 16  ;;  %v17976_v13 = vld [vmem:[#allocation2 + $0x70] sm:$0xf]  ;;  %v10308_v25 = vld [vmem:[#allocation2 + $0x80] sm:$0x1] }
 0x40f   : > { %v8492_v50 = vadd.f32 %v8476_v46, %v8460_v15  ;;  %v9163_v15 = vunpack.c.l.b16 %v9131_v10  ;;  %v17972_v8 = vrot.slane %v10340_v6, 5  ;;  %v10346_v60 = vrot.slane %v10344_v7, 4  ;;  %v14086_v6 = vld [vmem:[#allocation2 + $0xc0] sm:$0xff] }
 0x410   : > { %v8169_v3 = vpop.f32.mrf.mxu2  ;;  %v7543_v33 = vpop.f32.mrf.mxu0  ;;  %v9691_v41 = vsel %vm14379_vm5, %v9686_v39, %v17923_v56  ;;  %v9162_v49 = vunpack.c.l.b16 %v9128_v12  ;;  %v8394_v40 = vor.u32 %v8393_v11, %v8390_v34  ;;  %v9897_v61 = vrot.slane %v17976_v13, 5  ;;  %v9863_v34 = vld [vmem:[#allocation2 + $0x6c] sm:$0xe] }
 0x411   : > { %v17951_v44 = vpop.f32.mrf.mxu3  ;;  %v8508_v54 = vmax.f32 %v8492_v50, 0.0  ;;  %v8191_v20 = vadd.f32 %v8169_v3, %v7941_v9  ;;  %v7921_v46 = vpop.f32.mrf.mxu1  ;;  %v7564_v36 = vadd.f32 %v7543_v33, %v17585_v22  ;;  %v13178_v22 = vld [vmem:[%s14328_s9 + $0x64] sm:$0xf]  ;;  %v9733_v9 = vunpack.c.l.b16 %v9701_v52 }
 0x412   : > { %v8401_v21 = vshrl.u32 %v13178_v22, 16  ;;  %v8397_v3 = vshll.u32 %v13178_v22, 16  ;;  %v8478_v33 = vunpack.c.l.bf16 %v8386_v53  ;;  %v9171_v42 = vpack.c.b16 %v9163_v15, %v9162_v49  ;;  %v14212_v15 = vld [vmem:[#allocation2 + $0x74] sm:$0x1] }
 0x413   : > { %8524 = vst [vmem:[%s17674_s22 + $0x58] sm:$0xff] %v8508_v54  ;;  %v8442_v30 = vmul.f32 %v17931_v26, %v8191_v20  ;;  %v7942_v50 = vadd.f32 %v7921_v46, %v7564_v36  ;;  %v9732_v54 = vunpack.c.l.b16 %v9691_v41  ;;  %v10333_v20 = vrot.slane %v10331_v24, 4  ;;  %v14054_v46 = vld [vmem:[#allocation2 + $0xb4] sm:$0xff]  ;;  %v13179_v36 = vld [vmem:[%s14328_s9 + $0x68] sm:$0x1] }
 0x414   : > { %v8403_v37 = vrot.slane %v8401_v21, 4  ;;  %v10347_v10 = vor.u32 %v10346_v60, %v17972_v8  ;;  %v8395_v7 = vrot.slane %v8394_v40, 4  ;;  %v8399_v24 = vrot.slane %v8397_v3, 5 }
 0x415   : > { %v8461_v32 = vadd.f32 %v17941_v16, %v8442_v30  ;;  %v9741_v30 = vpack.c.b16 %v9733_v9, %v9732_v54  ;;  %v10717_v39 = vrot.slane %v17949_v51, 5  ;;  %v9899_v11 = vrot.slane %v9897_v61, 4 }
 0x416   : > { %v8407_v53 = vshll.u32 %v13179_v36, 16  ;;  %v9900_v41 = vrot.slane %v14212_v15, 5  ;;  %v10348_v21 = vrot.slane %v10347_v10, 4  ;;  %v8400_v51 = vsel %vm14379_vm5, %v8395_v7, %v8399_v24 }
 0x417   : > { %v8493_v18 = vadd.f32 %v8477_v35, %v8461_v32  ;;  %v10336_v35 = vrot.slane %v10334_v38, 5  ;;  %v8404_v32 = vor.u32 %v8403_v37, %v8399_v24  ;;  %v13476_v9 = vrot.slane %v9863_v34, 9 }
 0x418   : > { %v8171_v59 = vpop.f32.mrf.mxu2  ;;  %v7546_v4 = vpop.f32.mrf.mxu0  ;;  %v10719_v60 = vrot.slane %v10717_v39, 4  ;;  %v8479_v37 = vunpack.c.l.bf16 %v8400_v51 }
 0x419   : > { %v17974_v47 = vpop.f32.mrf.mxu3  ;;  %v8509_v58 = vmax.f32 %v8493_v18, 0.0  ;;  %v8192_v56 = vadd.f32 %v8171_v59, %v7942_v50  ;;  %v7924_v31 = vpop.f32.mrf.mxu1  ;;  %v7565_v17 = vadd.f32 %v7546_v4, %v17594_v62  ;;  %v10350_v62 = vshll.u32 %v10308_v25, 16  ;;  %v10683_v4 = vld [vmem:[#allocation2 + $0x78] sm:$0xe] }
 0x41a   : > { %v10337_v12 = vor.u32 %v10336_v35, %v10333_v20  ;;  %v8405_v54 = vrot.slane %v8404_v32, 4  ;;  %v8409_v20 = vrot.slane %v8407_v53, 5  ;;  %v9898_v7 = vsel %vm14369_vm4, %v13476_v9, %v9897_v61 }
 0x41b   : > { %8525 = vst [vmem:[%s17674_s22 + $0x60] sm:$0xff] %v8509_v58  ;;  %v8443_v0 = vmul.f32 %v17931_v26, %v8192_v56  ;;  %9046 = vmatmul.bf16.gmra.mxu0 %v14054_v46  ;;  %v7943_v38 = vadd.f32 %v7924_v31, %v7565_v17  ;;  %v9901_v58 = vsel %vm14369_vm4, %v9899_v11, %v9900_v41  ;;  %v10352_v56 = vrot.slane %v10350_v62, 5  ;;  %v17994_v31 = vld [vmem:[#allocation2 + $0x88] sm:$0xf]  ;;  %v14213_v62 = vld [vmem:[#allocation2 + $0x7c] sm:$0xf] }
 0x41c   : > { %9271 = vmatmul.bf16.gmra.mxu1 %v9171_v42  ;;  %v10720_v46 = vrot.slane %v10308_v25, 5  ;;  %v13660_v17 = vrot.slane %v10683_v4, 9  ;;  %v10364_v36 = vshll.u32 %v17994_v31, 16  ;;  %v10368_v10 = vshrl.u32 %v17994_v31, 16 }
 0x41d   : > { %v8462_v52 = vadd.f32 %v17941_v16, %v8443_v0  ;;  %9464 = vmatmul.bf16.gmra.mxu2 %v14086_v6  ;;  %v10353_v0 = vsel %vm14379_vm5, %v10348_v21, %v10352_v56  ;;  %v9904_v32 = vrot.slane %v14213_v62, 5  ;;  %v9967_v15 = vunpack.c.l.b16 %v9898_v7 }
 0x41e   : > { %9841 = vmatmul.bf16.gmra.mxu3 %v9741_v30  ;;  %v10721_v6 = vsel %vm14369_vm4, %v10719_v60, %v10720_v46  ;;  %v10309_v30 = vld [vmem:[#allocation2 + $0x84] sm:$0xf]  ;;  %v10539_v34 = vunpack.c.l.b16 %v10353_v0  ;;  %v10718_v11 = vsel %vm14369_vm4, %v13660_v17, %v10717_v39  ;;  %v10370_v21 = vrot.slane %v10368_v10, 4 }
 0x41f   : > { %v8494_v22 = vadd.f32 %v8478_v33, %v8462_v52  ;;  %v10338_v33 = vrot.slane %v10337_v12, 4  ;;  %v8410_v52 = vsel %vm14379_vm5, %v8405_v54, %v8409_v20  ;;  %v10788_v13 = vunpack.c.l.b16 %v10721_v6  ;;  %v14214_v6 = vld [vmem:[#allocation2 + $0x80] sm:$0x1] }
 0x420   : > { %v8174_v18 = vpop.f32.mrf.mxu2  ;;  %v7548_v40 = vpop.f32.mrf.mxu0  ;;  %v10358_v41 = vshll.u32 %v10309_v30, 16  ;;  %v9906_v56 = vrot.slane %v9904_v32, 4  ;;  %v10724_v17 = vrot.slane %v17994_v31, 5  ;;  %v18029_v31 = vld [vmem:[#allocation2 + $0x94] sm:$0xf] }
 0x421   : > { %v17990_v50 = vpop.f32.mrf.mxu3  ;;  %v8510_v59 = vmax.f32 %v8494_v22, 0.0  ;;  %v8193_v49 = vadd.f32 %v8174_v18, %v7943_v38  ;;  %v7926_v3 = vpop.f32.mrf.mxu1  ;;  %v7566_v35 = vadd.f32 %v7548_v40, %v17617_v57  ;;  %v9968_v57 = vunpack.c.l.b16 %v9901_v58  ;;  %v14111_v58 = vld [vmem:[#allocation2 + $0x78] sm:$0xff] }
 0x422   : > { %v10343_v24 = vsel %vm14379_vm5, %v10338_v33, %v17972_v8  ;;  %v10355_v22 = vshrl.u32 %v10309_v30, 16  ;;  %v18019_v8 = vrot.slane %v10364_v36, 5  ;;  %v10311_v33 = vld [vmem:[#allocation2 + $0x8c] sm:$0x1]  ;;  %v9907_v30 = vrot.slane %v14214_v6, 5 }
 0x423   : > { %8526 = vst [vmem:[%s17674_s22 + $0x68] sm:$0xff] %v8510_v59  ;;  %v8444_v42 = vmul.f32 %v17931_v26, %v8193_v49  ;;  %v7944_v12 = vadd.f32 %v7926_v3, %v7566_v35  ;;  %v10538_v39 = vunpack.c.l.b16 %v10343_v24  ;;  %v10787_v59 = vunpack.c.l.b16 %v10718_v11 }
 0x424   : > { %v8480_v49 = vunpack.c.l.bf16 %v8410_v52  ;;  %v9983_v3 = vpack.c.b16 %v9968_v57, %v9967_v15  ;;  %v10357_v46 = vrot.slane %v10355_v22, 4  ;;  %v10360_v35 = vrot.slane %v10358_v41, 5 }
 0x425   : > { %v8463_v25 = vadd.f32 %v17941_v16, %v8444_v42  ;;  %v10554_v54 = vpack.c.b16 %v10539_v34, %v10538_v39  ;;  %v10803_v20 = vpack.c.b16 %v10788_v13, %v10787_v59  ;;  %v10371_v0 = vor.u32 %v10370_v21, %v18019_v8  ;;  %v10684_v34 = vld [vmem:[#allocation2 + $0x84] sm:$0xe] }
 0x426   : > { %v10361_v24 = vor.u32 %v10360_v35, %v10357_v46  ;;  %v10726_v11 = vrot.slane %v10724_v17, 4  ;;  %v10727_v41 = vrot.slane %v10311_v33, 5 }
 0x427   : > { %v8495_v53 = vadd.f32 %v8479_v37, %v8463_v25  ;;  %v9864_v37 = vld [vmem:[#allocation2 + $0x78] sm:$0xe]  ;;  %v9908_v25 = vsel %vm14369_vm4, %v9906_v56, %v9907_v30  ;;  %v10372_v52 = vrot.slane %v10371_v0, 4 }
 0x428   : > { %v8176_v38 = vpop.f32.mrf.mxu2  ;;  %v9012_v9 = vpop.f32.mrf.mxu0  ;;  %v13477_v10 = vrot.slane %v9864_v37, 9  ;;  %v10362_v59 = vrot.slane %v10361_v24, 4 }
 0x429   : > { %v18017_v61 = vpop.f32.mrf.mxu3  ;;  %v8511_v18 = vmax.f32 %v8495_v53, 0.0  ;;  %v8194_v51 = vadd.f32 %v8176_v38, %v7944_v12  ;;  %v9237_v60 = vpop.f32.mrf.mxu1  ;;  %v9013_v40 = vadd.f32 %v9012_v9, %v17638_v28  ;;  %v9970_v38 = vunpack.c.l.b16 %v9908_v25 }
 0x42a   : > { %v9905_v13 = vsel %vm14369_vm4, %v13477_v10, %v9904_v32  ;;  %v10388_v9 = vshll.u32 %v18029_v31, 16  ;;  %v10314_v10 = vld [vmem:[#allocation2 + $0x98] sm:$0x1] }
 0x42b   : > { %8527 = vst [vmem:[%s17674_s22 + $0x70] sm:$0xff] %v8511_v18  ;;  %v8445_v4 = vmul.f32 %v17931_v26, %v8194_v51  ;;  %v9277_v42 = vadd.f32 %v9237_v60, %v9013_v40  ;;  %10055 = vmatmul.bf16.vlgmr.msra.gmra.mxu0 %v9983_v3  ;;  %v10374_v26 = vshll.u32 %v10311_v33, 16  ;;  %v13661_v18 = vrot.slane %v10684_v34, 9  ;;  %v10312_v51 = vld [vmem:[#allocation2 + $0x90] sm:$0xf] }
 0x42c   : > { %10249 = vmatmul.bf16.vlgmr.msra.gmra.mxu1 %v14111_v58  ;;  %v10392_v60 = vshrl.u32 %v18029_v31, 16  ;;  %v9969_v32 = vunpack.c.l.b16 %v9905_v13  ;;  %v10367_v40 = vsel %vm14379_vm5, %v10362_v59, %v18019_v8  ;;  %v10379_v58 = vshrl.u32 %v10312_v51, 16 }
 0x42d   : > { %v8464_v28 = vadd.f32 %v17941_v16, %v8445_v4  ;;  %10626 = vmatmul.bf16.vlgmr.msra.gmra.mxu2 %v10554_v54  ;;  %v10376_v15 = vrot.slane %v10374_v26, 5  ;;  %v10725_v3 = vsel %vm14369_vm4, %v13661_v18, %v10724_v17  ;;  %v10382_v56 = vshll.u32 %v10312_v51, 16  ;;  %v14215_v26 = vld [vmem:[#allocation2 + $0x88] sm:$0xf] }
 0x42e   : > { %10875 = vmatmul.bf16.vlgmr.msra.gmra.mxu3 %v10803_v20  ;;  %v18048_v20 = vrot.slane %v10388_v9, 5  ;;  %v10394_v33 = vrot.slane %v10392_v60, 4  ;;  %v9984_v37 = vpack.c.b16 %v9970_v38, %v9969_v32  ;;  %v10540_v6 = vunpack.c.l.b16 %v10367_v40  ;;  %v14112_v17 = vld [vmem:[#allocation2 + $0x84] sm:$0xff]  ;;  %v18055_v9 = vld [vmem:[#allocation2 + $0xa0] sm:$0xf] }
 0x42f   : > { %v8496_v36 = vadd.f32 %v8480_v49, %v8464_v28  ;;  %v10377_v49 = vsel %vm14379_vm5, %v10372_v52, %v10376_v15  ;;  %v10789_v30 = vunpack.c.l.b16 %v10725_v3  ;;  %v9911_v8 = vrot.slane %v14215_v26, 5 }
 0x430   : > { %v9430_v7 = vpop.f32.mrf.mxu2  ;;  %v9014_v53 = vpop.f32.mrf.mxu0  ;;  %v10541_v4 = vunpack.c.l.b16 %v10377_v49  ;;  %v10381_v25 = vrot.slane %v10379_v58, 4  ;;  %v10734_v51 = vrot.slane %v10314_v10, 5 }
 0x431   : > { %v9807_v57 = vpop.f32.mrf.mxu3  ;;  %v8512_v16 = vmax.f32 %v8496_v36, 0.0  ;;  %v9470_v62 = vadd.f32 %v9430_v7, %v9277_v42  ;;  %v9239_v12 = vpop.f32.mrf.mxu1  ;;  %v9015_v22 = vadd.f32 %v9014_v53, %v17676_v19  ;;  %v10728_v19 = vsel %vm14369_vm4, %v10726_v11, %v10727_v41 }
 0x432   : > { %v10790_v54 = vunpack.c.l.b16 %v10728_v19  ;;  %v10384_v7 = vrot.slane %v10382_v56, 5  ;;  %v10555_v52 = vpack.c.b16 %v10541_v4, %v10540_v6  ;;  %v10395_v11 = vor.u32 %v10394_v33, %v18048_v20  ;;  %v10315_v33 = vld [vmem:[#allocation2 + $0x9c] sm:$0xf] }
 0x433   : > { %8528 = vst [vmem:[%s17674_s22 + $0x78] sm:$0xff] %v8512_v16  ;;  %v18035_v21 = vadd.f32 %v9807_v57, %v9470_v62  ;;  %v9278_v39 = vadd.f32 %v9239_v12, %v9015_v22  ;;  %v10731_v57 = vrot.slane %v18029_v31, 5  ;;  %v9913_v62 = vrot.slane %v9911_v8, 4  ;;  %v14216_v22 = vld [vmem:[#allocation2 + $0x8c] sm:$0x1] }
 0x434   : > { %v10804_v34 = vpack.c.b16 %v10790_v54, %v10789_v30  ;;  %v10398_v53 = vshll.u32 %v10314_v10, 16  ;;  %v10385_v12 = vor.u32 %v10384_v7, %v10381_v25  ;;  %v9914_v38 = vrot.slane %v14216_v22, 5  ;;  %v10685_v31 = vld [vmem:[#allocation2 + $0x90] sm:$0xe] }
 0x435   : > { %v10733_v13 = vrot.slane %v10731_v57, 4  ;;  %v10396_v15 = vrot.slane %v10395_v11, 4  ;;  %v13662_v58 = vrot.slane %v10685_v31, 9  ;;  %v10403_v26 = vshrl.u32 %v10315_v33, 16 }
 0x436   : > { %v9915_v19 = vsel %vm14369_vm4, %v9913_v62, %v9914_v38  ;;  %v10400_v32 = vrot.slane %v10398_v53, 5  ;;  %v10386_v3 = vrot.slane %v10385_v12, 4  ;;  %v14113_v12 = vld [vmem:[#allocation2 + $0x90] sm:$0xff]  ;;  %v10317_v38 = vld [vmem:[#allocation2 + $0xa4] sm:$0x1] }
 0x437   : > { %v10735_v56 = vsel %vm14369_vm4, %v10733_v13, %v10734_v51  ;;  %v10738_v51 = vrot.slane %v18055_v9, 5 }
 0x438   : > { %v9432_v46 = vpop.f32.mrf.mxu2  ;;  %v9017_v0 = vpop.f32.mrf.mxu0  ;;  %v10401_v54 = vsel %vm14379_vm5, %v10396_v15, %v10400_v32  ;;  %v10792_v30 = vunpack.c.l.b16 %v10735_v56  ;;  %v10405_v15 = vrot.slane %v10403_v26, 4  ;;  %v10686_v32 = vld [vmem:[#allocation2 + $0x9c] sm:$0xe]  ;;  %v14218_v56 = vld [vmem:[#allocation2 + $0x98] sm:$0x1] }
 0x439   : > { %v9809_v42 = vpop.f32.mrf.mxu3  ;;  %v9471_v35 = vadd.f32 %v9432_v46, %v9278_v39  ;;  %v9242_v28 = vpop.f32.mrf.mxu1  ;;  %v9018_v36 = vadd.f32 %v9017_v0, %v17693_v5  ;;  %v9865_v5 = vld [vmem:[#allocation2 + $0x84] sm:$0xe]  ;;  %v10412_v46 = vshll.u32 %v18055_v9, 16  ;;  %v10391_v0 = vsel %vm14379_vm5, %v10386_v3, %v18048_v20  ;;  %v14217_v20 = vld [vmem:[#allocation2 + $0x94] sm:$0xf] }
 0x43a   : > { %v13478_v49 = vrot.slane %v9865_v5, 9  ;;  %v10543_v6 = vunpack.c.l.b16 %v10401_v54  ;;  %v9918_v5 = vrot.slane %v14217_v20, 5  ;;  %v9921_v54 = vrot.slane %v14218_v56, 5 }
 0x43b   : > { %v18052_v24 = vadd.f32 %v9809_v42, %v9471_v35  ;;  %v9279_v16 = vadd.f32 %v9242_v28, %v9018_v36  ;;  %10060 = vmatmul.bf16.gmra.mxu0 %v9984_v37  ;;  %v10416_v42 = vshrl.u32 %v18055_v9, 16  ;;  %v10732_v28 = vsel %vm14369_vm4, %v13662_v58, %v10731_v57 }
 0x43c   : > { %10254 = vmatmul.bf16.gmra.mxu1 %v14112_v17  ;;  %v9912_v35 = vsel %vm14369_vm4, %v13478_v49, %v9911_v8  ;;  %v10406_v17 = vshll.u32 %v10315_v33, 16  ;;  %v18075_v10 = vrot.slane %v10412_v46, 5  ;;  %v10791_v8 = vunpack.c.l.b16 %v10732_v28 }
 0x43d   : > { %10631 = vmatmul.bf16.gmra.mxu2 %v10555_v52  ;;  %v9971_v36 = vunpack.c.l.b16 %v9912_v35  ;;  %v10418_v25 = vrot.slane %v10416_v42, 4  ;;  %v18082_v35 = vld [vmem:[#allocation2 + $0xac] sm:$0xf] }
 0x43e   : > { %10880 = vmatmul.bf16.gmra.mxu3 %v10804_v34  ;;  %v10542_v34 = vunpack.c.l.b16 %v10391_v0  ;;  %v10805_v22 = vpack.c.b16 %v10792_v30, %v10791_v8 }
 0x440   : > { %v9435_v41 = vpop.f32.mrf.mxu2  ;;  %v9019_v39 = vpop.f32.mrf.mxu0  ;;  %v10556_v13 = vpack.c.b16 %v10543_v6, %v10542_v34  ;;  %v13663_v6 = vrot.slane %v10686_v32, 9  ;;  %v10440_v34 = vshrl.u32 %v18082_v35, 16 }
 0x441   : > { %v9812_v18 = vpop.f32.mrf.mxu3  ;;  %v9472_v60 = vadd.f32 %v9435_v41, %v9279_v16  ;;  %v9244_v59 = vpop.f32.mrf.mxu1  ;;  %v9020_v40 = vadd.f32 %v9019_v39, %v17723_v2  ;;  %v9972_v2 = vunpack.c.l.b16 %v9915_v19  ;;  %v10408_v41 = vrot.slane %v10406_v17, 5 }
 0x442   : > { %v10422_v39 = vshll.u32 %v10317_v38, 16 }
 0x443   : > { %v18062_v4 = vadd.f32 %v9812_v18, %v9472_v60  ;;  %v9280_v37 = vadd.f32 %v9244_v59, %v9020_v40  ;;  %v9985_v53 = vpack.c.b16 %v9972_v2, %v9971_v36  ;;  %v10419_v18 = vor.u32 %v10418_v25, %v18075_v10 }
 0x444   : > { %v9920_v59 = vrot.slane %v9918_v5, 4  ;;  %v10409_v49 = vor.u32 %v10408_v41, %v10405_v15  ;;  %v10740_v40 = vrot.slane %v10738_v51, 4  ;;  %v10424_v9 = vrot.slane %v10422_v39, 5 }
 0x445   : > { %v10420_v19 = vrot.slane %v10419_v18, 4  ;;  %v10442_v41 = vrot.slane %v10440_v34, 4  ;;  %v18109_v34 = vld [vmem:[#allocation2 + $0xb8] sm:$0xf] }
 0x446   : > { %v9922_v28 = vsel %vm14369_vm4, %v9920_v59, %v9921_v54  ;;  %v10410_v26 = vrot.slane %v10409_v49, 4  ;;  %v10745_v54 = vrot.slane %v18082_v35, 5 }
 0x447   : > { %v10425_v36 = vsel %vm14379_vm5, %v10420_v19, %v10424_v9  ;;  %v9974_v8 = vunpack.c.l.b16 %v9922_v28  ;;  %v14219_v19 = vld [vmem:[#allocation2 + $0xa0] sm:$0xf] }
 0x448   : > { %v9437_v7 = vpop.f32.mrf.mxu2  ;;  %v9022_v16 = vpop.f32.mrf.mxu0  ;;  %v9925_v32 = vrot.slane %v14219_v19, 5 }
 0x449   : > { %v9814_v52 = vpop.f32.mrf.mxu3  ;;  %v9473_v11 = vadd.f32 %v9437_v7, %v9280_v37  ;;  %v9247_v62 = vpop.f32.mrf.mxu1  ;;  %v9023_v57 = vadd.f32 %v9022_v16, %v17746_v1  ;;  %v9866_v1 = vld [vmem:[#allocation2 + $0x90] sm:$0xe]  ;;  %v10741_v37 = vrot.slane %v10317_v38, 5  ;;  %v10739_v16 = vsel %vm14369_vm4, %v13663_v6, %v10738_v51 }
 0x44a   : > { %v13479_v0 = vrot.slane %v9866_v1, 9  ;;  %v10793_v38 = vunpack.c.l.b16 %v10739_v16  ;;  %v14114_v1 = vld [vmem:[#allocation2 + $0x9c] sm:$0xff] }
 0x44b   : > { %v18078_v31 = vadd.f32 %v9814_v52, %v9473_v11  ;;  %v9281_v60 = vadd.f32 %v9247_v62, %v9023_v57  ;;  %10065 = vmatmul.bf16.gmra.mxu0 %v9985_v53  ;;  %v10742_v17 = vsel %vm14369_vm4, %v10740_v40, %v10741_v37  ;;  %v10318_v52 = vld [vmem:[#allocation2 + $0xa8] sm:$0xf]  ;;  %v10415_v11 = vsel %vm14379_vm5, %v10410_v26, %v18075_v10  ;;  %v14220_v26 = vld [vmem:[#allocation2 + $0xa4] sm:$0x1] }
 0x44c   : > { %10259 = vmatmul.bf16.gmra.mxu1 %v14113_v12  ;;  %v9919_v7 = vsel %vm14369_vm4, %v13479_v0, %v9918_v5  ;;  %v10545_v62 = vunpack.c.l.b16 %v10425_v36  ;;  %v10794_v53 = vunpack.c.l.b16 %v10742_v17  ;;  %v10427_v57 = vshrl.u32 %v10318_v52, 16 }
 0x44d   : > { %10636 = vmatmul.bf16.gmra.mxu2 %v10556_v13  ;;  %v9973_v20 = vunpack.c.l.b16 %v9919_v7  ;;  %v10430_v12 = vshll.u32 %v10318_v52, 16  ;;  %v9928_v36 = vrot.slane %v14220_v26, 5  ;;  %v10323_v26 = vld [vmem:[#allocation2 + $0xbc] sm:$0x1] }
 0x44e   : > { %10885 = vmatmul.bf16.gmra.mxu3 %v10805_v22  ;;  %v10544_v22 = vunpack.c.l.b16 %v10415_v11  ;;  %v10806_v49 = vpack.c.b16 %v10794_v53, %v10793_v38  ;;  %v10464_v38 = vshrl.u32 %v18109_v34, 16 }
 0x44f   : > { %v9986_v59 = vpack.c.b16 %v9974_v8, %v9973_v20  ;;  %v10432_v56 = vrot.slane %v10430_v12, 5 }
 0x450   : > { %v9440_v3 = vpop.f32.mrf.mxu2  ;;  %v9024_v46 = vpop.f32.mrf.mxu0  ;;  %v10557_v51 = vpack.c.b16 %v10545_v62, %v10544_v22 }
 0x451   : > { %v9817_v58 = vpop.f32.mrf.mxu3  ;;  %v9474_v33 = vadd.f32 %v9440_v3, %v9281_v60  ;;  %v9249_v42 = vpop.f32.mrf.mxu1  ;;  %v9025_v2 = vadd.f32 %v9024_v46, %v17776_v14  ;;  %v10436_v14 = vshll.u32 %v18082_v35, 16  ;;  %v10320_v3 = vld [vmem:[#allocation2 + $0xb0] sm:$0x1] }
 0x452   : > { %v10446_v9 = vshll.u32 %v10320_v3, 16 }
 0x453   : > { %v18087_v30 = vadd.f32 %v9817_v58, %v9474_v33  ;;  %v9282_v25 = vadd.f32 %v9249_v42, %v9025_v2  ;;  %v18102_v15 = vrot.slane %v10436_v14, 5  ;;  %v10429_v58 = vrot.slane %v10427_v57, 4 }
 0x454   : > { %v9927_v42 = vrot.slane %v9925_v32, 4  ;;  %v10747_v2 = vrot.slane %v10745_v54, 4  ;;  %v10748_v14 = vrot.slane %v10320_v3, 5  ;;  %v10448_v62 = vrot.slane %v10446_v9, 5  ;;  %v14115_v9 = vld [vmem:[#allocation2 + $0xa8] sm:$0xff] }
 0x455   : > { %v10443_v46 = vor.u32 %v10442_v41, %v18102_v15  ;;  %v10433_v37 = vor.u32 %v10432_v56, %v10429_v58  ;;  %v10466_v58 = vrot.slane %v10464_v38, 4  ;;  %v18136_v38 = vld [vmem:[#allocation2 + $0xc4] sm:$0xf] }
 0x456   : > { %v9929_v16 = vsel %vm14369_vm4, %v9927_v42, %v9928_v36  ;;  %v10749_v12 = vsel %vm14369_vm4, %v10747_v2, %v10748_v14 }
 0x457   : > { %v10444_v17 = vrot.slane %v10443_v46, 4  ;;  %v10434_v20 = vrot.slane %v10433_v37, 4  ;;  %v9976_v41 = vunpack.c.l.b16 %v9929_v16  ;;  %v14221_v37 = vld [vmem:[#allocation2 + $0xac] sm:$0xf] }
 0x458   : > { %v9442_v13 = vpop.f32.mrf.mxu2  ;;  %v9027_v60 = vpop.f32.mrf.mxu0  ;;  %v9932_v2 = vrot.slane %v14221_v37, 5 }
 0x459   : > { %v9819_v5 = vpop.f32.mrf.mxu3  ;;  %v9475_v18 = vadd.f32 %v9442_v13, %v9282_v25  ;;  %v9252_v39 = vpop.f32.mrf.mxu1  ;;  %v9028_v10 = vadd.f32 %v9027_v60, %v17797_v43  ;;  %v9867_v43 = vld [vmem:[#allocation2 + $0x9c] sm:$0xe]  ;;  %v10687_v25 = vld [vmem:[#allocation2 + $0xa8] sm:$0xe]  ;;  %v10321_v13 = vld [vmem:[#allocation2 + $0xb4] sm:$0xf]  ;;  %v10449_v22 = vsel %vm14379_vm5, %v10444_v17, %v10448_v62  ;;  %v10439_v60 = vsel %vm14379_vm5, %v10434_v20, %v18102_v15 }
 0x45a   : > { %v13480_v6 = vrot.slane %v9867_v43, 9  ;;  %v13664_v57 = vrot.slane %v10687_v25, 9  ;;  %v10752_v17 = vrot.slane %v18109_v34, 5  ;;  %v14222_v20 = vld [vmem:[#allocation2 + $0xb0] sm:$0x1] }
 0x45b   : > { %v18105_v40 = vadd.f32 %v9819_v5, %v9475_v18  ;;  %v9283_v33 = vadd.f32 %v9252_v39, %v9028_v10  ;;  %10070 = vmatmul.bf16.gmra.mxu0 %v9986_v59  ;;  %v10796_v39 = vunpack.c.l.b16 %v10749_v12  ;;  %v10451_v59 = vshrl.u32 %v10321_v13, 16 }
 0x45c   : > { %10264 = vmatmul.bf16.gmra.mxu1 %v14114_v1  ;;  %v9926_v11 = vsel %vm14369_vm4, %v13480_v6, %v9925_v32  ;;  %v10746_v18 = vsel %vm14369_vm4, %v13664_v57, %v10745_v54  ;;  %v10547_v1 = vunpack.c.l.b16 %v10449_v22  ;;  %v10546_v54 = vunpack.c.l.b16 %v10439_v60 }
 0x45d   : > { %10641 = vmatmul.bf16.gmra.mxu2 %v10557_v51  ;;  %v9975_v10 = vunpack.c.l.b16 %v9926_v11  ;;  %v10454_v51 = vshll.u32 %v10321_v13, 16  ;;  %v10795_v32 = vunpack.c.l.b16 %v10746_v18  ;;  %v9935_v57 = vrot.slane %v14222_v20, 5  ;;  %v10688_v13 = vld [vmem:[#allocation2 + $0xb4] sm:$0xe] }
 0x45e   : > { %10890 = vmatmul.bf16.gmra.mxu3 %v10806_v49  ;;  %v10558_v6 = vpack.c.b16 %v10547_v1, %v10546_v54  ;;  %v13665_v1 = vrot.slane %v10688_v13, 9  ;;  %v9869_v20 = vld [vmem:[#allocation2 + $0xb4] sm:$0xe] }
 0x45f   : > { %v9987_v43 = vpack.c.b16 %v9976_v41, %v9975_v10  ;;  %v10807_v15 = vpack.c.b16 %v10796_v39, %v10795_v32  ;;  %v10456_v36 = vrot.slane %v10454_v51, 5  ;;  %v10324_v32 = vld [vmem:[#allocation2 + $0xc0] sm:$0xf] }
 0x460   : > { %v9445_v0 = vpop.f32.mrf.mxu2  ;;  %v9029_v7 = vpop.f32.mrf.mxu0 }
 0x461   : > { %v9822_v28 = vpop.f32.mrf.mxu3  ;;  %v9476_v35 = vadd.f32 %v9445_v0, %v9283_v33  ;;  %v9254_v52 = vpop.f32.mrf.mxu1  ;;  %v9030_v8 = vadd.f32 %v9029_v7, %v17827_v55  ;;  %v10460_v55 = vshll.u32 %v18109_v34, 16  ;;  %v10453_v0 = vrot.slane %v10451_v59, 4 }
 0x462   : > { %v9934_v7 = vrot.slane %v9932_v2, 4 }
 0x463   : > { %v18116_v53 = vadd.f32 %v9822_v28, %v9476_v35  ;;  %v9284_v5 = vadd.f32 %v9254_v52, %v9030_v8  ;;  %v18129_v3 = vrot.slane %v10460_v55, 5  ;;  %v10470_v52 = vshll.u32 %v10323_v26, 16 }
 0x464   : > { %v10457_v14 = vor.u32 %v10456_v36, %v10453_v0  ;;  %v10754_v8 = vrot.slane %v10752_v17, 4  ;;  %v10755_v55 = vrot.slane %v10323_v26, 5  ;;  %v9936_v60 = vsel %vm14369_vm4, %v9934_v7, %v9935_v57 }
 0x465   : > { %v10467_v35 = vor.u32 %v10466_v58, %v18129_v3  ;;  %v10472_v39 = vrot.slane %v10470_v52, 5  ;;  %v10488_v58 = vshrl.u32 %v18136_v38, 16 }
 0x466   : > { %v10458_v10 = vrot.slane %v10457_v14, 4  ;;  %v10756_v51 = vsel %vm14369_vm4, %v10754_v8, %v10755_v55  ;;  %v14116_v14 = vld [vmem:[#allocation2 + $0xb4] sm:$0xff]  ;;  %v13482_v55 = vrot.slane %v9869_v20, 9 }
 0x467   : > { %v10468_v12 = vrot.slane %v10467_v35, 4 }
 0x468   : > { %v9447_v49 = vpop.f32.mrf.mxu2  ;;  %v9032_v33 = vpop.f32.mrf.mxu0 }
 0x469   : > { %v9824_v19 = vpop.f32.mrf.mxu3  ;;  %v9477_v56 = vadd.f32 %v9447_v49, %v9284_v5  ;;  %v9257_v46 = vpop.f32.mrf.mxu1  ;;  %v9033_v42 = vadd.f32 %v9032_v33, %v17843_v63  ;;  %v9868_v63 = vld [vmem:[#allocation2 + $0xa8] sm:$0xe]  ;;  %v9978_v33 = vunpack.c.l.b16 %v9936_v60  ;;  %v10327_v60 = vld [vmem:[#allocation2 + $0xcc] sm:$0xf] }
 0x46a   : > { %v13481_v62 = vrot.slane %v9868_v63, 9 }
 0x46b   : > { %v18132_v28 = vadd.f32 %v9824_v19, %v9477_v56  ;;  %v9285_v25 = vadd.f32 %v9257_v46, %v9033_v42  ;;  %10075 = vmatmul.bf16.gmra.mxu0 %v9987_v43  ;;  %v10473_v19 = vsel %vm14379_vm5, %v10468_v12, %v10472_v39  ;;  %v10753_v56 = vsel %vm14369_vm4, %v13665_v1, %v10752_v17 }
 0x46c   : > { %10269 = vmatmul.bf16.gmra.mxu1 %v14115_v9  ;;  %v9933_v18 = vsel %vm14369_vm4, %v13481_v62, %v9932_v2  ;;  %v10463_v46 = vsel %vm14379_vm5, %v10458_v10, %v18129_v3  ;;  %v10798_v43 = vunpack.c.l.b16 %v10756_v51  ;;  %v10549_v42 = vunpack.c.l.b16 %v10473_v19  ;;  %v18163_v10 = vld [vmem:[#allocation2 + $0xd0] sm:$0xf] }
 0x46d   : > { %10646 = vmatmul.bf16.gmra.mxu2 %v10558_v6  ;;  %v9977_v54 = vunpack.c.l.b16 %v9933_v18  ;;  %v10475_v9 = vshrl.u32 %v10324_v32, 16  ;;  %v10797_v0 = vunpack.c.l.b16 %v10753_v56  ;;  %v14223_v6 = vld [vmem:[#allocation2 + $0xb8] sm:$0xf]  ;;  %v10548_v7 = vunpack.c.l.b16 %v10463_v46 }
 0x46e   : > { %10895 = vmatmul.bf16.gmra.mxu3 %v10807_v15  ;;  %v10478_v15 = vshll.u32 %v10324_v32, 16  ;;  %v9939_v26 = vrot.slane %v14223_v6, 5 }
 0x46f   : > { %v9988_v3 = vpack.c.b16 %v9978_v33, %v9977_v54  ;;  %v10808_v8 = vpack.c.b16 %v10798_v43, %v10797_v0  ;;  %v10559_v62 = vpack.c.b16 %v10549_v42, %v10548_v7  ;;  %v10477_v57 = vrot.slane %v10475_v9, 4 }
 0x470   : > { %v9450_v11 = vpop.f32.mrf.mxu2  ;;  %v9034_v5 = vpop.f32.mrf.mxu0  ;;  %v10480_v12 = vrot.slane %v10478_v15, 5  ;;  %v10499_v54 = vshrl.u32 %v10327_v60, 16  ;;  %v10502_v9 = vshll.u32 %v10327_v60, 16  ;;  %v10508_v15 = vshll.u32 %v18163_v10, 16  ;;  %v14117_v60 = vld [vmem:[#allocation2 + $0xc0] sm:$0xff] }
 0x471   : > { %v9827_v16 = vpop.f32.mrf.mxu3  ;;  %v9478_v34 = vadd.f32 %v9450_v11, %v9285_v25  ;;  %v9259_v22 = vpop.f32.mrf.mxu1  ;;  %v9035_v41 = vadd.f32 %v9034_v5, %v17873_v23  ;;  %v10484_v23 = vshll.u32 %v18136_v38, 16  ;;  %v10490_v25 = vrot.slane %v10488_v58, 4  ;;  %v10326_v11 = vld [vmem:[#allocation2 + $0xc8] sm:$0x1] }
 0x472   : > { %v10481_v39 = vor.u32 %v10480_v12, %v10477_v57  ;;  %v10762_v43 = vrot.slane %v10326_v11, 5 }
 0x473   : > { %v18143_v59 = vadd.f32 %v9827_v16, %v9478_v34  ;;  %v9286_v49 = vadd.f32 %v9259_v22, %v9035_v41  ;;  %v18156_v36 = vrot.slane %v10484_v23, 5  ;;  %v9941_v34 = vrot.slane %v9939_v26, 4  ;;  %v14224_v41 = vld [vmem:[#allocation2 + $0xbc] sm:$0x1] }
 0x474   : > { %v10759_v22 = vrot.slane %v18136_v38, 5  ;;  %v9942_v18 = vrot.slane %v14224_v41, 5  ;;  %v10689_v38 = vld [vmem:[#allocation2 + $0xc0] sm:$0xe]  ;;  %v10482_v0 = vrot.slane %v10481_v39, 4 }
 0x475   : > { %v10491_v5 = vor.u32 %v10490_v25, %v18156_v36  ;;  %v13666_v6 = vrot.slane %v10689_v38, 9  ;;  %v14225_v38 = vld [vmem:[#allocation2 + $0xc4] sm:$0xf] }
 0x476   : > { %v9943_v19 = vsel %vm14369_vm4, %v9941_v34, %v9942_v18  ;;  %v10761_v23 = vrot.slane %v10759_v22, 4 }
 0x477   : > { %v10492_v32 = vrot.slane %v10491_v5, 4  ;;  %v9980_v25 = vunpack.c.l.b16 %v9943_v19  ;;  %v10760_v7 = vsel %vm14369_vm4, %v13666_v6, %v10759_v22 }
 0x478   : > { %v9452_v37 = vpop.f32.mrf.mxu2  ;;  %v9037_v17 = vpop.f32.mrf.mxu0  ;;  %v10799_v41 = vunpack.c.l.b16 %v10760_v7 }
 0x479   : > { %v9829_v2 = vpop.f32.mrf.mxu3  ;;  %v9479_v35 = vadd.f32 %v9452_v37, %v9286_v49  ;;  %v9262_v63 = vpop.f32.mrf.mxu1  ;;  %v9038_v52 = vadd.f32 %v9037_v17, %v17893_v29  ;;  %v10494_v29 = vshll.u32 %v10326_v11, 16  ;;  %v9940_v49 = vsel %vm14369_vm4, %v13482_v55, %v9939_v26 }
 0x47a   : > { %v10512_v37 = vshrl.u32 %v18163_v10, 16  ;;  %v10763_v17 = vsel %vm14369_vm4, %v10761_v23, %v10762_v43  ;;  %v9946_v23 = vrot.slane %v14225_v38, 5 }
 0x47b   : > { %v18159_v16 = vadd.f32 %v9829_v2, %v9479_v35  ;;  %v9287_v13 = vadd.f32 %v9262_v63, %v9038_v52  ;;  %10080 = vmatmul.bf16.gmra.mxu0 %v9988_v3  ;;  %v10496_v46 = vrot.slane %v10494_v29, 5  ;;  %v9979_v63 = vunpack.c.l.b16 %v9940_v49  ;;  %v10329_v52 = vld [vmem:[#allocation2 + $0xd4] sm:$0x1] }
 0x47c   : > { %10274 = vmatmul.bf16.gmra.mxu1 %v14116_v14  ;;  %v10501_v3 = vrot.slane %v10499_v54, 4  ;;  %v10504_v14 = vrot.slane %v10502_v9, 5  ;;  %v10514_v11 = vrot.slane %v10512_v37, 4  ;;  %v10800_v20 = vunpack.c.l.b16 %v10763_v17 }
 0x47d   : > { %10651 = vmatmul.bf16.gmra.mxu2 %v10559_v62  ;;  %v10497_v35 = vsel %vm14379_vm5, %v10492_v32, %v10496_v46  ;;  %v10518_v18 = vshll.u32 %v10329_v52, 16  ;;  %v9948_v9 = vrot.slane %v9946_v23, 4 }
 0x47e   : > { %10900 = vmatmul.bf16.gmra.mxu3 %v10808_v8  ;;  %v10510_v8 = vrot.slane %v10508_v15, 5  ;;  %v10551_v62 = vunpack.c.l.b16 %v10497_v35  ;;  %v10505_v22 = vor.u32 %v10504_v14, %v10501_v3  ;;  %v10809_v32 = vpack.c.b16 %v10800_v20, %v10799_v41 }
 0x47f   : > { %v10520_v54 = vrot.slane %v10518_v18, 5 }
 0x480   : > { %v9455_v1 = vpop.f32.mrf.mxu2  ;;  %v9039_v56 = vpop.f32.mrf.mxu0  ;;  %v10515_v39 = vor.u32 %v10514_v11, %v10510_v8  ;;  %v10506_v46 = vrot.slane %v10505_v22, 4 }
 0x481   : > { %v9832_v51 = vpop.f32.mrf.mxu3  ;;  %v9480_v58 = vadd.f32 %v9455_v1, %v9287_v13  ;;  %v9264_v33 = vpop.f32.mrf.mxu1  ;;  %v9040_v42 = vadd.f32 %v9039_v56, %v17921_v27  ;;  %v10487_v27 = vsel %vm14379_vm5, %v10482_v0, %v18156_v36  ;;  %v9989_v13 = vpack.c.b16 %v9980_v25, %v9979_v63  ;;  %v10690_v1 = vld [vmem:[#allocation2 + $0xcc] sm:$0xe]  ;;  %v14226_v25 = vld [vmem:[#allocation2 + $0xc8] sm:$0x1] }
 0x482   : > { %v10550_v55 = vunpack.c.l.b16 %v10487_v27  ;;  %v13667_v56 = vrot.slane %v10690_v1, 9  ;;  %v10516_v43 = vrot.slane %v10515_v39, 4  ;;  %v9949_v35 = vrot.slane %v14226_v25, 5 }
 0x483   : > { %v18172_v2 = vadd.f32 %v9832_v51, %v9480_v58  ;;  %v9288_v26 = vadd.f32 %v9264_v33, %v9040_v42  ;;  %v10766_v51 = vrot.slane %v18163_v10, 5  ;;  %v10769_v33 = vrot.slane %v10329_v52, 5 }
 0x484   : > { %v10560_v19 = vpack.c.b16 %v10551_v62, %v10550_v55  ;;  %v10511_v27 = vsel %vm14379_vm5, %v10506_v46, %v10510_v8  ;;  %v10521_v7 = vsel %vm14379_vm5, %v10516_v43, %v10520_v54  ;;  %v9950_v14 = vsel %vm14369_vm4, %v9948_v9, %v9949_v35 }
 0x485   : > { %v10768_v42 = vrot.slane %v10766_v51, 4  ;;  %v10767_v17 = vsel %vm14369_vm4, %v13667_v56, %v10766_v51  ;;  %v10552_v20 = vunpack.c.l.b16 %v10511_v27  ;;  %v9982_v8 = vunpack.c.l.b16 %v9950_v14  ;;  %v13716_v51 = vld [vmem:[%s14328_s9 + $0x6c] sm:$0xf]  ;;  %v13719_v14 = vld [vmem:[%s14328_s9 + $0x78] sm:$0xf] }
 0x486   : > { %v10957_v56 = vshrl.u32 %v13716_v51, 16 }
 0x487   : > { %v10770_v52 = vsel %vm14369_vm4, %v10768_v42, %v10769_v33  ;;  %v10960_v33 = vshll.u32 %v13716_v51, 16  ;;  %v13717_v42 = vld [vmem:[%s14328_s9 + $0x70] sm:$0xf] }
 0x488   : > { %v9457_v57 = vpop.f32.mrf.mxu2  ;;  %v9042_v5 = vpop.f32.mrf.mxu0  ;;  %v10959_v43 = vrot.slane %v10957_v56, 4  ;;  %v10970_v25 = vshrl.u32 %v13717_v42, 16 }
 0x489   : > { %v9834_v12 = vpop.f32.mrf.mxu3  ;;  %v9481_v34 = vadd.f32 %v9457_v57, %v9288_v26  ;;  %v9267_v29 = vpop.f32.mrf.mxu1  ;;  %v9043_v36 = vadd.f32 %v9042_v5, %v17951_v44  ;;  %v9870_v44 = vld [vmem:[#allocation2 + $0xc0] sm:$0xe]  ;;  %v10801_v57 = vunpack.c.l.b16 %v10767_v17  ;;  %v10962_v54 = vrot.slane %v10960_v33, 5 }
 0x48a   : > { %v13483_v26 = vrot.slane %v9870_v44, 9  ;;  %v10972_v27 = vrot.slane %v10970_v25, 4  ;;  %v13722_v25 = vld [vmem:[%s14328_s9 + $0x84] sm:$0xf] }
 0x48b   : > { %v18185_v49 = vadd.f32 %v9834_v12, %v9481_v34  ;;  %v9289_v58 = vadd.f32 %v9267_v29, %v9043_v36  ;;  %10085 = vmatmul.bf16.gmra.mxu0 %v9989_v13  ;;  %v10802_v12 = vunpack.c.l.b16 %v10770_v52  ;;  %v14118_v29 = vld [vmem:[#allocation2 + $0xcc] sm:$0xff]  ;;  %v13718_v52 = vld [vmem:[%s14328_s9 + $0x74] sm:$0x1] }
 0x48c   : > { %10279 = vmatmul.bf16.gmra.mxu1 %v14117_v60  ;;  %v9947_v62 = vsel %vm14369_vm4, %v13483_v26, %v9946_v23  ;;  %v10966_v26 = vshll.u32 %v13717_v42, 16 }
 0x48d   : > { %10656 = vmatmul.bf16.gmra.mxu2 %v10560_v19  ;;  %v9981_v5 = vunpack.c.l.b16 %v9947_v62  ;;  %v10810_v60 = vpack.c.b16 %v10802_v12, %v10801_v57 }
 0x48e   : > { %10905 = vmatmul.bf16.gmra.mxu3 %v10809_v32 }
 0x48f   : > { %v9990_v39 = vpack.c.b16 %v9982_v8, %v9981_v5  ;;  %v10984_v5 = vshll.u32 %v13719_v14, 16 }
 0x490   : > { %v9460_v10 = vpop.f32.mrf.mxu2  ;;  %v9044_v0 = vpop.f32.mrf.mxu0 }
 0x491   : > { %v9837_v15 = vpop.f32.mrf.mxu3  ;;  %v9482_v37 = vadd.f32 %v9460_v10, %v9289_v58  ;;  %v9269_v6 = vpop.f32.mrf.mxu1  ;;  %v9045_v63 = vadd.f32 %v9044_v0, %v17974_v47  ;;  %v10553_v47 = vunpack.c.l.b16 %v10521_v7 }
 0x493   : > { %v18196_v3 = vadd.f32 %v9837_v15, %v9482_v37  ;;  %v9290_v11 = vadd.f32 %v9269_v6, %v9045_v63  ;;  %v10561_v36 = vpack.c.b16 %v10553_v47, %v10552_v20  ;;  %v10963_v6 = vor.u32 %v10962_v54, %v10959_v43 }
 0x494   : > { %v10968_v63 = vrot.slane %v10966_v26, 5 }
 0x495   : > { %v10964_v17 = vrot.slane %v10963_v6, 4 }
 0x496   : > { %v10973_v8 = vor.u32 %v10972_v27, %v10968_v63 }
 0x497   : > { %v10969_v47 = vsel %vm14379_vm5, %v10964_v17, %v10968_v63  ;;  %v13721_v63 = vld [vmem:[%s14328_s9 + $0x80] sm:$0x1] }
 0x498   : > { %v9462_v13 = vpop.f32.mrf.mxu2  ;;  %v9047_v41 = vpop.f32.mrf.mxu0 }
 0x499   : > { %v9839_v34 = vpop.f32.mrf.mxu3  ;;  %v9483_v55 = vadd.f32 %v9462_v13, %v9290_v11  ;;  %v9272_v18 = vpop.f32.mrf.mxu1  ;;  %v9048_v22 = vadd.f32 %v9047_v41, %v17990_v50  ;;  %v10976_v13 = vshll.u32 %v13718_v52, 16 }
 0x49b   : > { %v18203_v45 = vadd.f32 %v9839_v34, %v9483_v55  ;;  %v9291_v1 = vadd.f32 %v9272_v18, %v9048_v22  ;;  %10090 = vmatmul.bf16.gmra.mxu0 %v9990_v39  ;;  %v10981_v34 = vshrl.u32 %v13719_v14, 16  ;;  %v18221_v55 = vld [vmem:[%s18348_s5] ss:$0 sm:$0xff]  ;;  %v11196_v18 = vunpack.c.l.bf16 %v10969_v47 }
 0x49c   : > { %10284 = vmatmul.bf16.gmra.mxu1 %v14118_v29  ;;  %v10986_v39 = vrot.slane %v10984_v5, 5 }
 0x49d   : > { %10661 = vmatmul.bf16.gmra.mxu2 %v10561_v36  ;;  %v10974_v36 = vrot.slane %v10973_v8, 4  ;;  %v10983_v22 = vrot.slane %v10981_v34, 4 }
 0x49e   : > { %10910 = vmatmul.bf16.gmra.mxu3 %v10810_v60  ;;  %v10978_v60 = vrot.slane %v10976_v13, 5 }
 0x4a0   : > { %v9465_v19 = vpop.f32.mrf.mxu2  ;;  %v9049_v23 = vpop.f32.mrf.mxu0 }
 0x4a1   : > { %v9842_v32 = vpop.f32.mrf.mxu3  ;;  %v9484_v38 = vadd.f32 %v9465_v19, %v9291_v1  ;;  %v9274_v58 = vpop.f32.mrf.mxu1  ;;  %v9050_v44 = vadd.f32 %v9049_v23, %v18017_v61  ;;  %v18227_v1 = vld [vmem:[%s18349_s6] ss:$0 sm:$0xff]  ;;  %v13720_v19 = vld [vmem:[%s14328_s9 + $0x7c] sm:$0xf] }
 0x4a2   : > { %v10990_v43 = vshll.u32 %v13720_v19, 16  ;;  %v10994_v54 = vshrl.u32 %v13720_v19, 16 }
 0x4a3   : > { %v18207_v50 = vadd.f32 %v9842_v32, %v9484_v38  ;;  %v9292_v46 = vadd.f32 %v9274_v58, %v9050_v44  ;;  %v10979_v44 = vsel %vm14379_vm5, %v10974_v36, %v10978_v60  ;;  %v13723_v60 = vld [vmem:[%s14328_s9 + $0x88] sm:$0xf] }
 0x4a4   : > { %v10992_v6 = vrot.slane %v10990_v43, 5  ;;  %v10996_v26 = vrot.slane %v10994_v54, 4 }
 0x4a8   : > { %v9467_v9 = vpop.f32.mrf.mxu2  ;;  %v10056_v37 = vpop.f32.mrf.mxu0 }
 0x4a9   : > { %v9844_v10 = vpop.f32.mrf.mxu3  ;;  %v9485_v15 = vadd.f32 %v9467_v9, %v9292_v46  ;;  %v10250_v0 = vpop.f32.mrf.mxu1  ;;  %v10096_v61 = vadd.f32 %v10056_v37, %v18035_v21  ;;  %v10987_v46 = vor.u32 %v10986_v39, %v10983_v22  ;;  %v11197_v37 = vunpack.c.l.bf16 %v10979_v44 }
 0x4ab   : > { %v18210_v35 = vadd.f32 %v9844_v10, %v9485_v15  ;;  %v10290_v7 = vadd.f32 %v10250_v0, %v10096_v61  ;;  %v10988_v0 = vrot.slane %v10987_v46, 4 }
 0x4ad   : > { %v10993_v47 = vsel %vm14379_vm5, %v10988_v0, %v10992_v6 }
 0x4b0   : > { %v10627_v11 = vpop.f32.mrf.mxu2  ;;  %v10058_v57 = vpop.f32.mrf.mxu0 }
 0x4b1   : > { %v10876_v62 = vpop.f32.mrf.mxu3  ;;  %v10667_v20 = vadd.f32 %v10627_v11, %v10290_v7  ;;  %v10252_v12 = vpop.f32.mrf.mxu1  ;;  %v10097_v29 = vadd.f32 %v10058_v57, %v18052_v24  ;;  %v10997_v57 = vor.u32 %v10996_v26, %v10992_v6  ;;  %v13724_v6 = vld [vmem:[%s14328_s9 + $0x8c] sm:$0x1]  ;;  %v13725_v26 = vld [vmem:[%s14328_s9 + $0x90] sm:$0xf] }
 0x4b3   : > { %v10916_v21 = vadd.f32 %v10876_v62, %v10667_v20  ;;  %v10291_v24 = vadd.f32 %v10252_v12, %v10097_v29  ;;  %v11008_v20 = vshll.u32 %v13722_v25, 16  ;;  %v11000_v12 = vshll.u32 %v13721_v63, 16 }
 0x4b5   : > { %v11164_v41 = vmul.f32 %v18221_v55, %v10916_v21  ;;  %v11198_v21 = vunpack.c.l.bf16 %v10993_v47  ;;  %v11002_v36 = vrot.slane %v11000_v12, 5 }
 0x4b7   : > { %v11180_v51 = vadd.f32 %v18227_v1, %v11164_v41  ;;  %v11010_v41 = vrot.slane %v11008_v20, 5 }
 0x4b8   : > { %v10629_v32 = vpop.f32.mrf.mxu2  ;;  %v10061_v56 = vpop.f32.mrf.mxu0 }
 0x4b9   : > { %v10878_v38 = vpop.f32.mrf.mxu3  ;;  %v11212_v23 = vadd.f32 %v11196_v18, %v11180_v51  ;;  %v10668_v58 = vadd.f32 %v10629_v32, %v10291_v24  ;;  %v10255_v33 = vpop.f32.mrf.mxu1  ;;  %v10098_v10 = vadd.f32 %v10061_v56, %v18062_v4  ;;  %v11005_v4 = vshrl.u32 %v13722_v25, 16 }
 0x4ba   : > { %v10998_v18 = vrot.slane %v10997_v57, 4 }
 0x4bb   : > { %v11228_v42 = vmax.f32 %v11212_v23, 0.0  ;;  %v10917_v9 = vadd.f32 %v10878_v38, %v10668_v58  ;;  %v10292_v17 = vadd.f32 %v10255_v33, %v10098_v10  ;;  %v11007_v29 = vrot.slane %v11005_v4, 4 }
 0x4bc   : > { %v11014_v58 = vshll.u32 %v13723_v60, 16  ;;  %v11003_v56 = vsel %vm14379_vm5, %v10998_v18, %v11002_v36  ;;  %v11018_v33 = vshrl.u32 %v13723_v60, 16 }
 0x4bd   : > { %13740 = vst [vmem:[%s17674_s22 + $0x80] sm:$0xff] %v11228_v42  ;;  %v11165_v15 = vmul.f32 %v18221_v55, %v10917_v9  ;;  %v11199_v42 = vunpack.c.l.bf16 %v11003_v56 }
 0x4be   : > { %v11016_v10 = vrot.slane %v11014_v58, 5 }
 0x4bf   : > { %v11181_v61 = vadd.f32 %v18227_v1, %v11165_v15  ;;  %v11020_v15 = vrot.slane %v11018_v33, 4 }
 0x4c0   : > { %v10632_v27 = vpop.f32.mrf.mxu2  ;;  %v10063_v11 = vpop.f32.mrf.mxu0 }
 0x4c1   : > { %v10881_v7 = vpop.f32.mrf.mxu3  ;;  %v11213_v52 = vadd.f32 %v11197_v37, %v11181_v61  ;;  %v10669_v14 = vadd.f32 %v10632_v27, %v10292_v17  ;;  %v10257_v62 = vpop.f32.mrf.mxu1  ;;  %v10099_v34 = vadd.f32 %v10063_v11, %v18078_v31  ;;  %v11011_v31 = vor.u32 %v11010_v41, %v11007_v29  ;;  %v13726_v41 = vld [vmem:[%s14328_s9 + $0x94] sm:$0xf] }
 0x4c2   : > { %v11029_v11 = vshrl.u32 %v13725_v26, 16 }
 0x4c3   : > { %v11229_v8 = vmax.f32 %v11213_v52, 0.0  ;;  %v10918_v13 = vadd.f32 %v10881_v7, %v10669_v14  ;;  %v10293_v39 = vadd.f32 %v10257_v62, %v10099_v34  ;;  %v11012_v9 = vrot.slane %v11011_v31, 4 }
 0x4c4   : > { %v11021_v52 = vor.u32 %v11020_v15, %v11016_v10  ;;  %v11024_v14 = vshll.u32 %v13724_v6, 16  ;;  %v11032_v62 = vshll.u32 %v13725_v26, 16  ;;  %v11031_v34 = vrot.slane %v11029_v11, 4 }
 0x4c5   : > { %13741 = vst [vmem:[%s17674_s22 + $0x88] sm:$0xff] %v11229_v8  ;;  %v11166_v5 = vmul.f32 %v18221_v55, %v10918_v13 }
 0x4c6   : > { %v11022_v8 = vrot.slane %v11021_v52, 4  ;;  %v11026_v13 = vrot.slane %v11024_v14, 5 }
 0x4c7   : > { %v11182_v22 = vadd.f32 %v18227_v1, %v11166_v5  ;;  %v11034_v5 = vrot.slane %v11032_v62, 5 }
 0x4c8   : > { %v10634_v51 = vpop.f32.mrf.mxu2  ;;  %v10066_v38 = vpop.f32.mrf.mxu0 }
 0x4c9   : > { %v10883_v24 = vpop.f32.mrf.mxu3  ;;  %v11214_v19 = vadd.f32 %v11198_v21, %v11182_v22  ;;  %v10670_v32 = vadd.f32 %v10634_v51, %v10293_v39  ;;  %v10260_v23 = vpop.f32.mrf.mxu1  ;;  %v10100_v43 = vadd.f32 %v10066_v38, %v18087_v30  ;;  %v11017_v30 = vsel %vm14379_vm5, %v11012_v9, %v11016_v10  ;;  %v13727_v9 = vld [vmem:[%s14328_s9 + $0x98] sm:$0x1] }
 0x4ca   : > { %v11200_v12 = vunpack.c.l.bf16 %v11017_v30  ;;  %v11027_v51 = vsel %vm14379_vm5, %v11022_v8, %v11026_v13 }
 0x4cb   : > { %v11230_v44 = vmax.f32 %v11214_v19, 0.0  ;;  %v10919_v46 = vadd.f32 %v10883_v24, %v10670_v32  ;;  %v10294_v0 = vadd.f32 %v10260_v23, %v10100_v43  ;;  %v11035_v24 = vor.u32 %v11034_v5, %v11031_v34  ;;  %v13728_v43 = vld [vmem:[%s14328_s9 + $0x9c] sm:$0xf] }
 0x4cc   : > { %v11038_v19 = vshll.u32 %v13726_v41, 16  ;;  %v11042_v32 = vshrl.u32 %v13726_v41, 16  ;;  %v11201_v56 = vunpack.c.l.bf16 %v11027_v51 }
 0x4cd   : > { %13742 = vst [vmem:[%s17674_s22 + $0x90] sm:$0xff] %v11230_v44  ;;  %v11167_v54 = vmul.f32 %v18221_v55, %v10919_v46  ;;  %v11036_v33 = vrot.slane %v11035_v24, 4 }
 0x4ce   : > { %v11040_v44 = vrot.slane %v11038_v19, 5  ;;  %v11044_v46 = vrot.slane %v11042_v32, 4 }
 0x4cf   : > { %v11183_v37 = vadd.f32 %v18227_v1, %v11167_v54 }
 0x4d0   : > { %v10637_v25 = vpop.f32.mrf.mxu2  ;;  %v10068_v27 = vpop.f32.mrf.mxu0 }
 0x4d1   : > { %v10886_v61 = vpop.f32.mrf.mxu3  ;;  %v11215_v17 = vadd.f32 %v11199_v42, %v11183_v37  ;;  %v10671_v63 = vadd.f32 %v10637_v25, %v10294_v0  ;;  %v10262_v7 = vpop.f32.mrf.mxu1  ;;  %v10101_v47 = vadd.f32 %v10068_v27, %v18105_v40  ;;  %v11056_v25 = vshll.u32 %v13728_v43, 16 }
 0x4d3   : > { %v11231_v4 = vmax.f32 %v11215_v17, 0.0  ;;  %v10920_v20 = vadd.f32 %v10886_v61, %v10671_v63  ;;  %v10295_v29 = vadd.f32 %v10262_v7, %v10101_v47  ;;  %v11041_v61 = vsel %vm14379_vm5, %v11036_v33, %v11040_v44  ;;  %v13729_v47 = vld [vmem:[%s14328_s9 + $0xa0] sm:$0xf] }
 0x4d4   : > { %v11045_v17 = vor.u32 %v11044_v46, %v11040_v44  ;;  %v11048_v63 = vshll.u32 %v13727_v9, 16  ;;  %v11202_v14 = vunpack.c.l.bf16 %v11041_v61  ;;  %v11058_v62 = vrot.slane %v11056_v25, 5 }
 0x4d5   : > { %13743 = vst [vmem:[%s17674_s22 + $0x98] sm:$0xff] %v11231_v4  ;;  %v11168_v57 = vmul.f32 %v18221_v55, %v10920_v20  ;;  %v11062_v41 = vshll.u32 %v13729_v47, 16 }
 0x4d6   : > { %v11046_v4 = vrot.slane %v11045_v17, 4  ;;  %v11050_v20 = vrot.slane %v11048_v63, 5 }
 0x4d7   : > { %v11184_v21 = vadd.f32 %v18227_v1, %v11168_v57  ;;  %v11064_v19 = vrot.slane %v11062_v41, 5 }
 0x4d8   : > { %v10639_v18 = vpop.f32.mrf.mxu2  ;;  %v10071_v39 = vpop.f32.mrf.mxu0 }
 0x4d9   : > { %v10888_v36 = vpop.f32.mrf.mxu3  ;;  %v11216_v60 = vadd.f32 %v11200_v12, %v11184_v21  ;;  %v10672_v22 = vadd.f32 %v10639_v18, %v10295_v29  ;;  %v10265_v40 = vpop.f32.mrf.mxu1  ;;  %v10102_v31 = vadd.f32 %v10071_v39, %v18116_v53  ;;  %v11053_v53 = vshrl.u32 %v13728_v43, 16 }
 0x4da   : > { %v11051_v18 = vsel %vm14379_vm5, %v11046_v4, %v11050_v20 }
 0x4db   : > { %v11232_v38 = vmax.f32 %v11216_v60, 0.0  ;;  %v10921_v23 = vadd.f32 %v10888_v36, %v10672_v22  ;;  %v10296_v42 = vadd.f32 %v10265_v40, %v10102_v31  ;;  %v11055_v11 = vrot.slane %v11053_v53, 4  ;;  %v13730_v31 = vld [vmem:[%s14328_s9 + $0xa4] sm:$0x1] }
 0x4dc   : > { %v11066_v36 = vshrl.u32 %v13729_v47, 16  ;;  %v11203_v51 = vunpack.c.l.bf16 %v11051_v18  ;;  %v11072_v9 = vshll.u32 %v13730_v31, 16  ;;  %v13734_v18 = vld [vmem:[%s14328_s9 + $0xb4] sm:$0xf] }
 0x4dd   : > { %13744 = vst [vmem:[%s17674_s22 + $0xa0] sm:$0xff] %v11232_v38  ;;  %v11169_v58 = vmul.f32 %v18221_v55, %v10921_v23 }
 0x4de   : > { %v11068_v32 = vrot.slane %v11066_v36, 4  ;;  %v11074_v61 = vrot.slane %v11072_v9, 5 }
 0x4df   : > { %v11185_v54 = vadd.f32 %v18227_v1, %v11169_v58  ;;  %v13731_v58 = vld [vmem:[%s14328_s9 + $0xa8] sm:$0xf] }
 0x4e0   : > { %v10642_v10 = vpop.f32.mrf.mxu2  ;;  %v10073_v6 = vpop.f32.mrf.mxu0 }
 0x4e1   : > { %v10891_v15 = vpop.f32.mrf.mxu3  ;;  %v11217_v37 = vadd.f32 %v11201_v56, %v11185_v54  ;;  %v10673_v0 = vadd.f32 %v10642_v10, %v10296_v42  ;;  %v10267_v26 = vpop.f32.mrf.mxu1  ;;  %v10103_v7 = vadd.f32 %v10073_v6, %v18132_v28  ;;  %v11059_v28 = vor.u32 %v11058_v62, %v11055_v11 }
 0x4e2   : > { %v11069_v42 = vor.u32 %v11068_v32, %v11064_v19  ;;  %v11077_v10 = vshrl.u32 %v13731_v58, 16 }
 0x4e3   : > { %v11233_v30 = vmax.f32 %v11217_v37, 0.0  ;;  %v10922_v27 = vadd.f32 %v10891_v15, %v10673_v0  ;;  %v10297_v12 = vadd.f32 %v10267_v26, %v10103_v7  ;;  %v11060_v24 = vrot.slane %v11059_v28, 4  ;;  %v13732_v7 = vld [vmem:[%s14328_s9 + $0xac] sm:$0xf] }
 0x4e4   : > { %v11080_v15 = vshll.u32 %v13731_v58, 16  ;;  %v11070_v25 = vrot.slane %v11069_v42, 4  ;;  %v11079_v17 = vrot.slane %v11077_v10, 4  ;;  %v13735_v10 = vld [vmem:[%s14328_s9 + $0xb8] sm:$0xf] }
 0x4e5   : > { %13745 = vst [vmem:[%s17674_s22 + $0xa8] sm:$0xff] %v11233_v30  ;;  %v11170_v52 = vmul.f32 %v18221_v55, %v10922_v27 }
 0x4e6   : > { %v11082_v63 = vrot.slane %v11080_v15, 5  ;;  %v11075_v20 = vsel %vm14379_vm5, %v11070_v25, %v11074_v61 }
 0x4e7   : > { %v11186_v57 = vadd.f32 %v18227_v1, %v11170_v52 }
 0x4e8   : > { %v10644_v8 = vpop.f32.mrf.mxu2  ;;  %v10076_v21 = vpop.f32.mrf.mxu0  ;;  %v11083_v47 = vor.u32 %v11082_v63, %v11079_v17  ;;  %v11110_v17 = vshll.u32 %v13735_v10, 16 }
 0x4e9   : > { %v10893_v13 = vpop.f32.mrf.mxu3  ;;  %v11218_v34 = vadd.f32 %v11202_v14, %v11186_v57  ;;  %v10674_v5 = vadd.f32 %v10644_v8, %v10297_v12  ;;  %v10270_v29 = vpop.f32.mrf.mxu1  ;;  %v10104_v39 = vadd.f32 %v10076_v21, %v18143_v59  ;;  %v11065_v59 = vsel %vm14379_vm5, %v11060_v24, %v11064_v19 }
 0x4ea   : > { %v11204_v53 = vunpack.c.l.bf16 %v11065_v59  ;;  %v11086_v57 = vshll.u32 %v13732_v7, 16  ;;  %v11090_v12 = vshrl.u32 %v13732_v7, 16  ;;  %v11205_v21 = vunpack.c.l.bf16 %v11075_v20 }
 0x4eb   : > { %v11234_v60 = vmax.f32 %v11218_v34, 0.0  ;;  %v10923_v22 = vadd.f32 %v10893_v13, %v10674_v5  ;;  %v10298_v23 = vadd.f32 %v10270_v29, %v10104_v39  ;;  %v11084_v29 = vrot.slane %v11083_v47, 4 }
 0x4ec   : > { %v11088_v28 = vrot.slane %v11086_v57, 5  ;;  %v11092_v41 = vrot.slane %v11090_v12, 4  ;;  %v13736_v57 = vld [vmem:[%s14328_s9 + $0xbc] sm:$0x1]  ;;  %v13737_v12 = vld [vmem:[%s14328_s9 + $0xc0] sm:$0xf] }
 0x4ed   : > { %13746 = vst [vmem:[%s17674_s22 + $0xb0] sm:$0xff] %v11234_v60  ;;  %v11171_v40 = vmul.f32 %v18221_v55, %v10923_v22  ;;  %v13733_v22 = vld [vmem:[%s14328_s9 + $0xb0] sm:$0x1] }
 0x4ee   : > { %v11093_v31 = vor.u32 %v11092_v41, %v11088_v28  ;;  %v11096_v58 = vshll.u32 %v13733_v22, 16  ;;  %v11120_v41 = vshll.u32 %v13736_v57, 16 }
 0x4ef   : > { %v11187_v38 = vadd.f32 %v18227_v1, %v11171_v40 }
 0x4f0   : > { %v10647_v56 = vpop.f32.mrf.mxu2  ;;  %v10078_v43 = vpop.f32.mrf.mxu0  ;;  %v11094_v42 = vrot.slane %v11093_v31, 4  ;;  %v11098_v9 = vrot.slane %v11096_v58, 5  ;;  %v13738_v31 = vld [vmem:[%s14328_s9 + $0xc4] sm:$0xf] }
 0x4f1   : > { %v10896_v33 = vpop.f32.mrf.mxu3  ;;  %v11219_v44 = vadd.f32 %v11203_v51, %v11187_v38  ;;  %v10675_v46 = vadd.f32 %v10647_v56, %v10298_v23  ;;  %v10272_v54 = vpop.f32.mrf.mxu1  ;;  %v10105_v6 = vadd.f32 %v10078_v43, %v18159_v16  ;;  %v11104_v38 = vshll.u32 %v13734_v18, 16 }
 0x4f2   : > { %v11089_v23 = vsel %vm14379_vm5, %v11084_v29, %v11088_v28  ;;  %v11099_v63 = vsel %vm14379_vm5, %v11094_v42, %v11098_v9 }
 0x4f3   : > { %v11235_v37 = vmax.f32 %v11219_v44, 0.0  ;;  %v10924_v0 = vadd.f32 %v10896_v33, %v10675_v46  ;;  %v10299_v27 = vadd.f32 %v10272_v54, %v10105_v6  ;;  %v11206_v59 = vunpack.c.l.bf16 %v11089_v23 }
 0x4f4   : > { %v11106_v54 = vrot.slane %v11104_v38, 5 }
 0x4f5   : > { %13747 = vst [vmem:[%s17674_s22 + $0xb8] sm:$0xff] %v11235_v37  ;;  %v11172_v26 = vmul.f32 %v18221_v55, %v10924_v0 }
 0x4f7   : > { %v11188_v30 = vadd.f32 %v18227_v1, %v11172_v26 }
 0x4f8   : > { %v10649_v52 = vpop.f32.mrf.mxu2  ;;  %v10081_v4 = vpop.f32.mrf.mxu0 }
 0x4f9   : > { %v10898_v14 = vpop.f32.mrf.mxu3  ;;  %v11220_v11 = vadd.f32 %v11204_v53, %v11188_v30  ;;  %v10676_v62 = vadd.f32 %v10649_v52, %v10299_v27  ;;  %v10275_v16 = vpop.f32.mrf.mxu1  ;;  %v10106_v34 = vadd.f32 %v10081_v4, %v18172_v2  ;;  %v11101_v2 = vshrl.u32 %v13734_v18, 16 }
 0x4fa   : > { %v11114_v30 = vshrl.u32 %v13735_v10, 16  ;;  %v11112_v4 = vrot.slane %v11110_v17, 5  ;;  %v11125_v18 = vshrl.u32 %v13737_v12, 16 }
 0x4fb   : > { %v11236_v8 = vmax.f32 %v11220_v11, 0.0  ;;  %v10925_v13 = vadd.f32 %v10898_v14, %v10676_v62  ;;  %v10300_v60 = vadd.f32 %v10275_v16, %v10106_v34  ;;  %v11103_v43 = vrot.slane %v11101_v2, 4 }
 0x4fc   : > { %v11207_v11 = vunpack.c.l.bf16 %v11099_v63  ;;  %v11116_v16 = vrot.slane %v11114_v30, 4 }
 0x4fd   : > { %13748 = vst [vmem:[%s17674_s22 + $0xc0] sm:$0xff] %v11236_v8  ;;  %v11173_v5 = vmul.f32 %v18221_v55, %v10925_v13 }
 0x4fe   : > { %v11117_v28 = vor.u32 %v11116_v16, %v11112_v4 }
 0x4ff   : > { %v11189_v36 = vadd.f32 %v18227_v1, %v11173_v5 }
 0x500   : > { %v10652_v39 = vpop.f32.mrf.mxu2  ;;  %v10083_v19 = vpop.f32.mrf.mxu0 }
 0x501   : > { %v10901_v40 = vpop.f32.mrf.mxu3  ;;  %v11221_v51 = vadd.f32 %v11205_v21, %v11189_v36  ;;  %v10677_v24 = vadd.f32 %v10652_v39, %v10300_v60  ;;  %v10277_v32 = vpop.f32.mrf.mxu1  ;;  %v10107_v44 = vadd.f32 %v10083_v19, %v18185_v49  ;;  %v11107_v49 = vor.u32 %v11106_v54, %v11103_v43 }
 0x502   : > { %v11128_v36 = vshll.u32 %v13737_v12, 16  ;;  %v11122_v19 = vrot.slane %v11120_v41, 5  ;;  %v11134_v43 = vshll.u32 %v13738_v31, 16  ;;  %v11138_v54 = vshrl.u32 %v13738_v31, 16 }
 0x503   : > { %v11237_v56 = vmax.f32 %v11221_v51, 0.0  ;;  %v10926_v33 = vadd.f32 %v10901_v40, %v10677_v24  ;;  %v10301_v37 = vadd.f32 %v10277_v32, %v10107_v44  ;;  %v11108_v62 = vrot.slane %v11107_v49, 4  ;;  %v13739_v49 = vld [vmem:[%s14328_s9 + $0xc8] sm:$0x1] }
 0x504   : > { %v11118_v24 = vrot.slane %v11117_v28, 4  ;;  %v11127_v32 = vrot.slane %v11125_v18, 4  ;;  %v11130_v2 = vrot.slane %v11128_v36, 5 }
 0x505   : > { %13749 = vst [vmem:[%s17674_s22 + $0xc8] sm:$0xff] %v11237_v56  ;;  %v11174_v46 = vmul.f32 %v18221_v55, %v10926_v33 }
 0x507   : > { %v11190_v15 = vadd.f32 %v18227_v1, %v11174_v46 }
 0x508   : > { %v10654_v0 = vpop.f32.mrf.mxu2  ;;  %v10086_v25 = vpop.f32.mrf.mxu0 }
 0x509   : > { %v10903_v6 = vpop.f32.mrf.mxu3  ;;  %v11222_v26 = vadd.f32 %v11206_v59, %v11190_v15  ;;  %v10678_v53 = vadd.f32 %v10654_v0, %v10301_v37  ;;  %v10280_v61 = vpop.f32.mrf.mxu1  ;;  %v10108_v52 = vadd.f32 %v10086_v25, %v18196_v3  ;;  %v11113_v3 = vsel %vm14379_vm5, %v11108_v62, %v11112_v4 }
 0x50a   : > { %v11208_v51 = vunpack.c.l.bf16 %v11113_v3  ;;  %v11131_v59 = vor.u32 %v11130_v2, %v11127_v32 }
 0x50b   : > { %v11238_v27 = vmax.f32 %v11222_v26, 0.0  ;;  %v10927_v7 = vadd.f32 %v10903_v6, %v10678_v53  ;;  %v10302_v47 = vadd.f32 %v10280_v61, %v10108_v52  ;;  %v11136_v26 = vrot.slane %v11134_v43, 5 }
 0x50c   : > { %v11132_v6 = vrot.slane %v11131_v59, 4  ;;  %v11140_v53 = vrot.slane %v11138_v54, 4 }
 0x50d   : > { %13750 = vst [vmem:[%s17674_s22 + $0xd0] sm:$0xff] %v11238_v27  ;;  %v11175_v14 = vmul.f32 %v18221_v55, %v10927_v7 }
 0x50e   : > { %v11141_v52 = vor.u32 %v11140_v53, %v11136_v26 }
 0x50f   : > { %v11191_v20 = vadd.f32 %v18227_v1, %v11175_v14  ;;  %v11144_v14 = vshll.u32 %v13739_v49, 16 }
 0x510   : > { %v10657_v8 = vpop.f32.mrf.mxu2  ;;  %v10088_v21 = vpop.f32.mrf.mxu0  ;;  %v11142_v57 = vrot.slane %v11141_v52, 4 }
 0x511   : > { %v10906_v13 = vpop.f32.mrf.mxu3  ;;  %v11223_v34 = vadd.f32 %v11207_v11, %v11191_v20  ;;  %v10679_v5 = vadd.f32 %v10657_v8, %v10302_v47  ;;  %v10282_v29 = vpop.f32.mrf.mxu1  ;;  %v10109_v39 = vadd.f32 %v10088_v21, %v18203_v45  ;;  %v11123_v45 = vsel %vm14379_vm5, %v11118_v24, %v11122_v19 }
 0x512   : > { %v11209_v0 = vunpack.c.l.bf16 %v11123_v45  ;;  %v11146_v12 = vrot.slane %v11144_v14, 5 }
 0x513   : > { %v11239_v60 = vmax.f32 %v11223_v34, 0.0  ;;  %v10928_v22 = vadd.f32 %v10906_v13, %v10679_v5  ;;  %v10303_v23 = vadd.f32 %v10282_v29, %v10109_v39 }
 0x514   : > { %v11147_v29 = vsel %vm14379_vm5, %v11142_v57, %v11146_v12 }
 0x515   : > { %13751 = vst [vmem:[%s17674_s22 + $0xd8] sm:$0xff] %v11239_v60  ;;  %v11176_v40 = vmul.f32 %v18221_v55, %v10928_v22  ;;  %v11211_v18 = vunpack.c.l.bf16 %v11147_v29 }
 0x517   : > { %v11192_v38 = vadd.f32 %v18227_v1, %v11176_v40 }
 0x518   : > { %v10659_v58 = vpop.f32.mrf.mxu2  ;;  %v10091_v46 = vpop.f32.mrf.mxu0 }
 0x519   : > { %v10908_v56 = vpop.f32.mrf.mxu3  ;;  %v11224_v33 = vadd.f32 %v11208_v51, %v11192_v38  ;;  %v10680_v44 = vadd.f32 %v10659_v58, %v10303_v23  ;;  %v10110_v10 = vadd.f32 %v10091_v46, %v18207_v50  ;;  %v10285_v15 = vpop.f32.mrf.mxu1  ;;  %v11137_v50 = vsel %vm14379_vm5, %v11132_v6, %v11136_v26 }
 0x51a   : > { %v11210_v20 = vunpack.c.l.bf16 %v11137_v50 }
 0x51b   : > { %v11240_v42 = vmax.f32 %v11224_v33, 0.0  ;;  %v10929_v9 = vadd.f32 %v10908_v56, %v10680_v44  ;;  %v10304_v61 = vadd.f32 %v10285_v15, %v10110_v10 }
 0x51d   : > { %13752 = vst [vmem:[%s17674_s22 + $0xe0] sm:$0xff] %v11240_v42  ;;  %v11177_v37 = vmul.f32 %v18221_v55, %v10929_v9 }
 0x51f   : > { %v11193_v25 = vadd.f32 %v18227_v1, %v11177_v37 }
 0x520   : > { %v10662_v17 = vpop.f32.mrf.mxu2  ;;  %v10093_v7 = vpop.f32.mrf.mxu0 }
 0x521   : > { %v10911_v63 = vpop.f32.mrf.mxu3  ;;  %v11225_v30 = vadd.f32 %v11209_v0, %v11193_v25  ;;  %v10681_v27 = vadd.f32 %v10662_v17, %v10304_v61  ;;  %v10111_v4 = vadd.f32 %v10093_v7, %v18210_v35  ;;  %v10287_v47 = vpop.f32.mrf.mxu1 }
 0x523   : > { %v11241_v11 = vmax.f32 %v11225_v30, 0.0  ;;  %v10930_v62 = vadd.f32 %v10911_v63, %v10681_v27  ;;  %v10305_v13 = vadd.f32 %v10287_v47, %v10111_v4 }
 0x525   : > { %13753 = vst [vmem:[%s17674_s22 + $0xe8] sm:$0xff] %v11241_v11  ;;  %v11178_v16 = vmul.f32 %v18221_v55, %v10930_v62 }
 0x527   : > { %v11194_v8 = vadd.f32 %v18227_v1, %v11178_v16 }
 0x528   : > { %v10664_v34 = vpop.f32.mrf.mxu2 }
 0x529   : > { %v11226_v5 = vadd.f32 %v11210_v20, %v11194_v8  ;;  %v10682_v3 = vadd.f32 %v10664_v34, %v10305_v13  ;;  %v10913_v21 = vpop.f32.mrf.mxu3 }
 0x52b   : > { %v11242_v35 = vmax.f32 %v11226_v5, 0.0  ;;  %v10931_v28 = vadd.f32 %v10913_v21, %v10682_v3 }
 0x52d   : > { %13754 = vst [vmem:[%s17674_s22 + $0xf0] sm:$0xff] %v11242_v35  ;;  %v11179_v41 = vmul.f32 %v18221_v55, %v10931_v28 }
 0x52f   : > { %v11195_v36 = vadd.f32 %v18227_v1, %v11179_v41 }
 0x531   : > { %v11227_v60 = vadd.f32 %v11211_v18, %v11195_v36 }
 0x533   : > { %v11243_v22 = vmax.f32 %v11227_v60, 0.0 }
 0x535   : > { %13755 = vst [vmem:[%s17674_s22 + $0xf8] sm:$0xff] %v11243_v22 }
 0x536 PF: > { %s17_s24 = sadd.s32 1, %s14235_s24  }
 0x537   : > { %p14_p4 = scmp.ge.s32.totalorder %s17_s24, 4  }
 0x539   :  { %16 = sbr.rel (!%p14_p4) target bundleno = 1 (0x1), region = 106 }

</bundles_post_ra>
